<compile_context>
chip_gen: v7x
topology: tpu7x:2x2x1
jax: 0.10.0
libtpu: 0.0.40
codegen_flags: <defaults>
</compile_context>

<pallas_src>
import functools

import jax
import jax.numpy as jnp
from jax.experimental import pallas as pl
from jax.experimental.pallas import tpu as pltpu

# ------------------------- configuration (small) -----------------------------
VOCAB_C = 32                      # len(vocab_c)  (V)
CHAR_EMB_DIM = 16                 # E
CHAR_CONV_FILTERS = ((1, 32), (2, 32), (3, 64))   # (kernel_size, out_channels)
NUM_HIGHWAYS = 2
OUTPUT_DIM = 64
PAD_IDX = 0

BATCH = 4
SEQ_LEN = 64
TOKEN_LEN = 16                    # L

NUM_FILTERS = sum(c for _, c in CHAR_CONV_FILTERS)   # D = 128
K_MAX = max(k for k, _ in CHAR_CONV_FILTERS)         # 3
HIGHEST = jax.lax.Precision.HIGHEST
NEG_INF = jnp.float32(-1e30)


# ------------------------------- kernel --------------------------------------
def conv_token_kernel(ids_ref, m_ref, cb_ref, mask_ref, *refs,
                      num_highways, L, k_max, V, D):
    """refs = [(hw_w, hw_b)*num_highways, proj_w, proj_b, out_ref]."""
    hw_refs = refs[:2 * num_highways]
    pw_ref = refs[2 * num_highways]
    pb_ref = refs[2 * num_highways + 1]
    out_ref = refs[-1]

    tn = ids_ref.shape[0]
    KV = k_max * V
    ids = ids_ref[...]                                          # (tn, L_pad) i32

    # ---- hoisted loop invariants --------------------------------------------
    m_packed = m_ref[...]                                       # (KV, D) bf16, resident
    iota_kv = jax.lax.broadcasted_iota(jnp.int32, (tn, KV), 1)  # (tn, KV)
    # Per-tap offset ids: tap j can only match lanes in group [j*V, (j+1)*V).
    ids_off = [ids + j * V for j in range(k_max)]

    # ---- fused gather + packed conv + masked max-over-time + relu -----------
    #   packed one-hot (tn, KV) @ m_packed (KV, D) == sum_j onehot(ids[:,p+j]) @ M_j
    # One MXU matmul per window (K = k_max*V = 96) instead of k_max matmuls.
    # Two partial max accumulators (even/odd windows) break the serial max chain.
    acc = [None, None]
    for p in range(L):
        oh = ids_off[0][:, p:p + 1] == iota_kv                  # (tn, KV) bool
        for j in range(1, k_max):
            oh = oh | (ids_off[j][:, p + j:p + j + 1] == iota_kv)
        h = jnp.dot(oh.astype(jnp.bfloat16), m_packed,
                    preferred_element_type=jnp.float32)         # (tn, D) f32
        if p > L - k_max:   # only the last k_max-1 windows contain invalid taps
            h = h + mask_ref[p:p + 1, :]                        # -1e30 on too-wide filters
        s = p & 1
        acc[s] = h if acc[s] is None else jnp.maximum(acc[s], h)
    mx = acc[0] if acc[1] is None else jnp.maximum(acc[0], acc[1])
    x = jnp.maximum(mx + cb_ref[...], 0.0)                      # conv bias + relu, (tn, D)

    # ------------------------------- Highway ---------------------------------
    for hi in range(num_highways):
        wh = hw_refs[2 * hi][...]            # (D, 2D) bf16
        bh = hw_refs[2 * hi + 1][...]        # (1, 2D) f32
        proj = jnp.dot(x.astype(jnp.bfloat16), wh,
                       preferred_element_type=jnp.float32) + bh
        hidden = jnp.maximum(proj[:, :D], 0.0)
        # sigmoid(z) = 1 / (1 + exp(-z)); exp + approx reciprocal ride the EUP slot.
        gate = pl.reciprocal(1.0 + jnp.exp(-proj[:, D:]), approx=True)
        # 3-op blend, algebraically identical to gate*x + (1-gate)*hidden.
        x = hidden + gate * (x - hidden)

    # --------------------------- projection (padded to 128 lanes) ------------
    out = jnp.dot(x.astype(jnp.bfloat16), pw_ref[...],
                  preferred_element_type=jnp.float32) + pb_ref[...]
    out_ref[...] = out.astype(out_ref.dtype)


# --------------------------- parameter packing --------------------------------
def pack_kernel_params(emb_table, raw_params, *, filters, k_max, L, out_dim):
    V, E = emb_table.shape
    D = sum(c for _, c in filters)
    out_pad = pl.cdiv(out_dim, 128) * 128

    # Per-tap lane-dense conv weights fused with the embedding table, packed
    # along the contraction dim:  m_packed[j*V + v, :] = (emb_table @ W_tap_j)[v, :]
    m_taps = []
    for j in range(k_max):
        cols = []
        for (k, c), (w, _b) in zip(filters, raw_params["convs"]):
            cols.append(w[j] if j < k else jnp.zeros((E, c), jnp.float32))
        w_tap = jnp.concatenate(cols, axis=1)                            # (E, D)
        m_taps.append(jnp.dot(emb_table, w_tap, precision=HIGHEST))      # (V, D)
    m_packed = jnp.concatenate(m_taps, axis=0).astype(jnp.bfloat16)      # (k_max*V, D)

    conv_b = jnp.concatenate([b for (_w, b) in raw_params["convs"]], axis=1)  # (1, D)

    # Additive position mask: -1e30 where window p is invalid for a filter.
    pos = jnp.arange(L)
    mask_cols = []
    for (k, c) in filters:
        col = jnp.where(pos > (L - k), NEG_INF, 0.0)[:, None]            # (L, 1)
        mask_cols.append(jnp.broadcast_to(col, (L, c)))
    mask = jnp.concatenate(mask_cols, axis=1).astype(jnp.float32)        # (L, D)

    highways = [(w.astype(jnp.bfloat16), b) for (w, b) in raw_params["highways"]]

    pw_pad = (jnp.zeros((D, out_pad), jnp.float32)
              .at[:, :out_dim].set(raw_params["proj_w"]).astype(jnp.bfloat16))
    pb_pad = jnp.zeros((1, out_pad), jnp.float32).at[:, :out_dim].set(
        raw_params["proj_b"])

    return m_packed, conv_b, mask, highways, pw_pad, pb_pad, out_pad


# ------------------------------- TN heuristic ---------------------------------
def _pick_tn(n_tokens):
    """256 on single-TensorCore chips (v5e/v6e) to fill the MXU M dim and halve
    grid-step overhead; 128 otherwise so v7x's two TCs both get a grid step at
    small N.  Falls back to the known-good 128 if the chip query fails."""
    tn = 128
    try:
        info = pltpu.get_tpu_info()
        ver = str(getattr(info, "chip_version", None)
                  or getattr(info, "version", None) or "").lower()
        single_tc = any(tag in ver for tag in ("v5e", "5lite", "5_lite", "lite", "v6", "6e"))
        if single_tc and n_tokens >= 256:
            tn = 256
    except Exception:
        pass
    return tn


# ------------------------------- wrapper --------------------------------------
def conv_token_embedder(char_ids, emb_table, raw_params, *, filters,
                        num_highways, out_dim, tn=None):
    B, S, L = char_ids.shape
    N = B * S
    k_max = max(k for k, _ in filters)
    D = sum(c for _, c in filters)
    V, _E = emb_table.shape

    if tn is None:
        tn = _pick_tn(N)
    assert tn % 8 == 0
    n_pad = pl.cdiv(N, tn) * tn                 # pad token count to a TN multiple

    ids = jnp.clip(char_ids.reshape(N, L).astype(jnp.int32), 0, V - 1)
    if n_pad != N:
        ids = jnp.pad(ids, ((0, n_pad - N), (0, 0)), constant_values=PAD_IDX)
    L_pad = L + k_max - 1
    ids_pad = jnp.pad(ids, ((0, 0), (0, k_max - 1)), constant_values=PAD_IDX)

    (m_packed, conv_b, mask, highways, pw_pad, pb_pad,
     out_pad) = pack_kernel_params(emb_table, raw_params, filters=filters,
                                   k_max=k_max, L=L, out_dim=out_dim)

    in_arrays = [ids_pad, m_packed, conv_b, mask]
    in_specs = [
        pl.BlockSpec((tn, L_pad), lambda i: (i, 0)),
        pl.BlockSpec(m_packed.shape, lambda i: (0, 0)),
        pl.BlockSpec(conv_b.shape, lambda i: (0, 0)),
        pl.BlockSpec(mask.shape, lambda i: (0, 0)),
    ]
    for (w, b) in highways:
        in_arrays += [w, b]
        in_specs += [pl.BlockSpec(w.shape, lambda i: (0, 0)),
                     pl.BlockSpec(b.shape, lambda i: (0, 0))]
    in_arrays += [pw_pad, pb_pad]
    in_specs += [pl.BlockSpec(pw_pad.shape, lambda i: (0, 0)),
                 pl.BlockSpec(pb_pad.shape, lambda i: (0, 0))]

    kernel = functools.partial(conv_token_kernel, num_highways=num_highways,
                               L=L, k_max=k_max, V=V, D=D)
    out = pl.pallas_call(
        kernel,
        out_shape=jax.ShapeDtypeStruct((n_pad, out_pad), jnp.float32),
        grid=(n_pad // tn,),
        in_specs=in_specs,
        out_specs=pl.BlockSpec((tn, out_pad), lambda i: (i, 0)),
        compiler_params=pltpu.CompilerParams(
            dimension_semantics=("parallel",)),
    )(*in_arrays)
    return out[:N, :out_dim].reshape(B, S, out_dim)


# -------------------------- deterministic params ------------------------------
def init_params(key):
    keys = jax.random.split(key, 16)
    emb_table = jax.random.uniform(keys[0], (VOCAB_C, CHAR_EMB_DIM),
                                   jnp.float32, -0.25, 0.25)
    emb_table = emb_table.at[PAD_IDX].set(0.0)       # padding_idx row = 0

    convs = []
    ki = 1
    for (k, c) in CHAR_CONV_FILTERS:
        w = jax.random.normal(keys[ki], (k, CHAR_EMB_DIM, c), jnp.float32) * 0.1
        b = jax.random.normal(keys[ki + 1], (1, c), jnp.float32) * 0.1
        convs.append((w, b))
        ki += 2

    highways = []
    for _ in range(NUM_HIGHWAYS):
        w = jax.random.normal(keys[ki], (NUM_FILTERS, 2 * NUM_FILTERS),
                              jnp.float32) / jnp.sqrt(float(NUM_FILTERS))
        # mirrors `layer.bias[input_dim].data.fill_(1)` in the reference
        b = jnp.zeros((1, 2 * NUM_FILTERS), jnp.float32).at[0, NUM_FILTERS].set(1.0)
        highways.append((w, b))
        ki += 2

    proj_w = jax.random.normal(keys[ki], (NUM_FILTERS, OUTPUT_DIM),
                               jnp.float32) / jnp.sqrt(float(NUM_FILTERS))
    proj_b = jax.random.normal(keys[ki + 1], (1, OUTPUT_DIM), jnp.float32) * 0.1

    return emb_table, {"convs": convs, "highways": highways,
                       "proj_w": proj_w, "proj_b": proj_b}


# ------------------------------ JAX reference (f32 / HIGHEST) ------------------
def reference(char_ids, emb_table, params):
    B, S, L = char_ids.shape
    ids = char_ids.reshape(B * S, L)
    emb = emb_table[ids]                               # (N, L, E)
    feats = []
    for (k, _c), (w, b) in zip(CHAR_CONV_FILTERS, params["convs"]):
        hs = []
        for p in range(L - k + 1):
            window = emb[:, p:p + k, :]                # (N, k, E)
            hs.append(jnp.einsum("nke,kec->nc", window, w, precision=HIGHEST))
        h = jnp.max(jnp.stack(hs, axis=1), axis=1) + b
        feats.append(jnp.maximum(h, 0.0))
    x = jnp.concatenate(feats, -1)
    for (w, b) in params["highways"]:
        proj = jnp.dot(x, w, precision=HIGHEST) + b
        hidden = jnp.maximum(proj[:, :NUM_FILTERS], 0.0)
        gate = jax.nn.sigmoid(proj[:, NUM_FILTERS:])
        x = gate * x + (1.0 - gate) * hidden
    out = jnp.dot(x, params["proj_w"], precision=HIGHEST) + params["proj_b"]
    return out.reshape(B, S, -1)


# --------------------------------- main ----------------------------------------
if __name__ == "__main__":
    key = jax.random.PRNGKey(0)
    k_params, k_ids = jax.random.split(key)
    emb_table, params = init_params(k_params)

    # character ids: (batch, seq_len, token_len)
    char_ids = jax.random.randint(k_ids, (BATCH, SEQ_LEN, TOKEN_LEN), 0, VOCAB_C)

    out = conv_token_embedder(
        char_ids, emb_table, params, filters=CHAR_CONV_FILTERS,
        num_highways=NUM_HIGHWAYS, out_dim=OUTPUT_DIM)
    out = jax.block_until_ready(out)

    ref = jax.block_until_ready(reference(char_ids, emb_table, params))
    assert out.shape == (BATCH, SEQ_LEN, OUTPUT_DIM)
    # bf16-operand / f32-accumulate matmuls + approx-reciprocal sigmoid vs the
    # f32 HIGHEST reference.
    assert jnp.allclose(out, ref, atol=3e-2, rtol=3e-2), "mismatch vs JAX reference"

    print("KERNEL_OK")
</pallas_src>

<mosaic_0001>
module attributes {stable_mosaic.version = 11 : i64} {
  func.func @conv_token_kernel(%arg0: i32, %arg1: memref<128x18xi32, #tpu.memory_space<vmem>>, %arg2: memref<96x128xbf16, #tpu.memory_space<vmem>>, %arg3: memref<1x128xf32, #tpu.memory_space<vmem>>, %arg4: memref<16x128xf32, #tpu.memory_space<vmem>>, %arg5: memref<128x256xbf16, #tpu.memory_space<vmem>>, %arg6: memref<1x256xf32, #tpu.memory_space<vmem>>, %arg7: memref<128x256xbf16, #tpu.memory_space<vmem>>, %arg8: memref<1x256xf32, #tpu.memory_space<vmem>>, %arg9: memref<128x128xbf16, #tpu.memory_space<vmem>>, %arg10: memref<1x128xf32, #tpu.memory_space<vmem>>, %arg11: memref<128x128xf32, #tpu.memory_space<vmem>>) attributes {dimension_semantics = [#tpu.dimension_semantics<parallel>], iteration_bounds = array<i64: 2>, scalar_prefetch = 0 : i64, scratch_operands = 0 : i64, tpu.core_type = #tpu.core_type<tc>, window_params = [{transform_indices = @transform_0, window_bounds = array<i64: 128, 18>}, {pipeline_mode = #tpu.pipeline_mode<synchronous>, transform_indices = @transform_1, window_bounds = array<i64: 96, 128>}, {pipeline_mode = #tpu.pipeline_mode<synchronous>, transform_indices = @transform_2, window_bounds = array<i64: 1, 128>}, {pipeline_mode = #tpu.pipeline_mode<synchronous>, transform_indices = @transform_3, window_bounds = array<i64: 16, 128>}, {pipeline_mode = #tpu.pipeline_mode<synchronous>, transform_indices = @transform_4, window_bounds = array<i64: 128, 256>}, {pipeline_mode = #tpu.pipeline_mode<synchronous>, transform_indices = @transform_5, window_bounds = array<i64: 1, 256>}, {pipeline_mode = #tpu.pipeline_mode<synchronous>, transform_indices = @transform_6, window_bounds = array<i64: 128, 256>}, {pipeline_mode = #tpu.pipeline_mode<synchronous>, transform_indices = @transform_7, window_bounds = array<i64: 1, 256>}, {pipeline_mode = #tpu.pipeline_mode<synchronous>, transform_indices = @transform_8, window_bounds = array<i64: 128, 128>}, {pipeline_mode = #tpu.pipeline_mode<synchronous>, transform_indices = @transform_9, window_bounds = array<i64: 1, 128>}, {transform_indices = @transform_10, window_bounds = array<i64: 128, 128>}]} {
    %c0 = arith.constant 0 : index
    %c0_0 = arith.constant 0 : index
    %0 = vector.load %arg1[%c0, %c0_0] : memref<128x18xi32, #tpu.memory_space<vmem>>, vector<128x18xi32>
    %c0_1 = arith.constant 0 : index
    %c0_2 = arith.constant 0 : index
    %1 = vector.load %arg2[%c0_1, %c0_2] : memref<96x128xbf16, #tpu.memory_space<vmem>>, vector<96x128xbf16>
    %2 = tpu.iota {dimensions = array<i32: 1>} : vector<128x96xi32>
    %c0_i32 = arith.constant 0 : i32
    %3 = vector.broadcast %c0_i32 : i32 to vector<128x18xi32>
    %4 = arith.addi %0, %3 : vector<128x18xi32>
    %c32_i32 = arith.constant 32 : i32
    %5 = vector.broadcast %c32_i32 : i32 to vector<128x18xi32>
    %6 = arith.addi %0, %5 : vector<128x18xi32>
    %c64_i32 = arith.constant 64 : i32
    %7 = vector.broadcast %c64_i32 : i32 to vector<128x18xi32>
    %8 = arith.addi %0, %7 : vector<128x18xi32>
    %9 = vector.extract_strided_slice %4 {offsets = [0, 0], sizes = [128, 1], strides = [1, 1]} : vector<128x18xi32> to vector<128x1xi32>
    %10 = vector.broadcast %9 : vector<128x1xi32> to vector<128x96xi32>
    %11 = arith.cmpi eq, %10, %2 : vector<128x96xi32>
    %12 = vector.extract_strided_slice %6 {offsets = [0, 1], sizes = [128, 1], strides = [1, 1]} : vector<128x18xi32> to vector<128x1xi32>
    %13 = vector.broadcast %12 : vector<128x1xi32> to vector<128x96xi32>
    %14 = arith.cmpi eq, %13, %2 : vector<128x96xi32>
    %15 = arith.ori %11, %14 : vector<128x96xi1>
    %16 = vector.extract_strided_slice %8 {offsets = [0, 2], sizes = [128, 1], strides = [1, 1]} : vector<128x18xi32> to vector<128x1xi32>
    %17 = vector.broadcast %16 : vector<128x1xi32> to vector<128x96xi32>
    %18 = arith.cmpi eq, %17, %2 : vector<128x96xi32>
    %19 = arith.ori %15, %18 : vector<128x96xi1>
    %20 = arith.extui %19 : vector<128x96xi1> to vector<128x96xi32>
    %21 = arith.sitofp %20 : vector<128x96xi32> to vector<128x96xf32>
    %22 = arith.truncf %21 : vector<128x96xf32> to vector<128x96xbf16>
    %cst = arith.constant dense<0.000000e+00> : vector<128x128xf32>
    %23 = tpu.matmul %22, %1, %cst {dimension_numbers = #tpu.dot_dimension_numbers<[1], [0], [0], [1], [0, 0, 1, 1], [], []>} : vector<128x96xbf16>, vector<96x128xbf16>, vector<128x128xf32> -> vector<128x128xf32>
    %24 = vector.extract_strided_slice %4 {offsets = [0, 1], sizes = [128, 1], strides = [1, 1]} : vector<128x18xi32> to vector<128x1xi32>
    %25 = vector.broadcast %24 : vector<128x1xi32> to vector<128x96xi32>
    %26 = arith.cmpi eq, %25, %2 : vector<128x96xi32>
    %27 = vector.extract_strided_slice %6 {offsets = [0, 2], sizes = [128, 1], strides = [1, 1]} : vector<128x18xi32> to vector<128x1xi32>
    %28 = vector.broadcast %27 : vector<128x1xi32> to vector<128x96xi32>
    %29 = arith.cmpi eq, %28, %2 : vector<128x96xi32>
    %30 = arith.ori %26, %29 : vector<128x96xi1>
    %31 = vector.extract_strided_slice %8 {offsets = [0, 3], sizes = [128, 1], strides = [1, 1]} : vector<128x18xi32> to vector<128x1xi32>
    %32 = vector.broadcast %31 : vector<128x1xi32> to vector<128x96xi32>
    %33 = arith.cmpi eq, %32, %2 : vector<128x96xi32>
    %34 = arith.ori %30, %33 : vector<128x96xi1>
    %35 = arith.extui %34 : vector<128x96xi1> to vector<128x96xi32>
    %36 = arith.sitofp %35 : vector<128x96xi32> to vector<128x96xf32>
    %37 = arith.truncf %36 : vector<128x96xf32> to vector<128x96xbf16>
    %cst_3 = arith.constant dense<0.000000e+00> : vector<128x128xf32>
    %38 = tpu.matmul %37, %1, %cst_3 {dimension_numbers = #tpu.dot_dimension_numbers<[1], [0], [0], [1], [0, 0, 1, 1], [], []>} : vector<128x96xbf16>, vector<96x128xbf16>, vector<128x128xf32> -> vector<128x128xf32>
    %39 = vector.extract_strided_slice %4 {offsets = [0, 2], sizes = [128, 1], strides = [1, 1]} : vector<128x18xi32> to vector<128x1xi32>
    %40 = vector.broadcast %39 : vector<128x1xi32> to vector<128x96xi32>
    %41 = arith.cmpi eq, %40, %2 : vector<128x96xi32>
    %42 = vector.extract_strided_slice %6 {offsets = [0, 3], sizes = [128, 1], strides = [1, 1]} : vector<128x18xi32> to vector<128x1xi32>
    %43 = vector.broadcast %42 : vector<128x1xi32> to vector<128x96xi32>
    %44 = arith.cmpi eq, %43, %2 : vector<128x96xi32>
    %45 = arith.ori %41, %44 : vector<128x96xi1>
    %46 = vector.extract_strided_slice %8 {offsets = [0, 4], sizes = [128, 1], strides = [1, 1]} : vector<128x18xi32> to vector<128x1xi32>
    %47 = vector.broadcast %46 : vector<128x1xi32> to vector<128x96xi32>
    %48 = arith.cmpi eq, %47, %2 : vector<128x96xi32>
    %49 = arith.ori %45, %48 : vector<128x96xi1>
    %50 = arith.extui %49 : vector<128x96xi1> to vector<128x96xi32>
    %51 = arith.sitofp %50 : vector<128x96xi32> to vector<128x96xf32>
    %52 = arith.truncf %51 : vector<128x96xf32> to vector<128x96xbf16>
    %cst_4 = arith.constant dense<0.000000e+00> : vector<128x128xf32>
    %53 = tpu.matmul %52, %1, %cst_4 {dimension_numbers = #tpu.dot_dimension_numbers<[1], [0], [0], [1], [0, 0, 1, 1], [], []>} : vector<128x96xbf16>, vector<96x128xbf16>, vector<128x128xf32> -> vector<128x128xf32>
    %54 = arith.maximumf %23, %53 : vector<128x128xf32>
    %55 = vector.extract_strided_slice %4 {offsets = [0, 3], sizes = [128, 1], strides = [1, 1]} : vector<128x18xi32> to vector<128x1xi32>
    %56 = vector.broadcast %55 : vector<128x1xi32> to vector<128x96xi32>
    %57 = arith.cmpi eq, %56, %2 : vector<128x96xi32>
    %58 = vector.extract_strided_slice %6 {offsets = [0, 4], sizes = [128, 1], strides = [1, 1]} : vector<128x18xi32> to vector<128x1xi32>
    %59 = vector.broadcast %58 : vector<128x1xi32> to vector<128x96xi32>
    %60 = arith.cmpi eq, %59, %2 : vector<128x96xi32>
    %61 = arith.ori %57, %60 : vector<128x96xi1>
    %62 = vector.extract_strided_slice %8 {offsets = [0, 5], sizes = [128, 1], strides = [1, 1]} : vector<128x18xi32> to vector<128x1xi32>
    %63 = vector.broadcast %62 : vector<128x1xi32> to vector<128x96xi32>
    %64 = arith.cmpi eq, %63, %2 : vector<128x96xi32>
    %65 = arith.ori %61, %64 : vector<128x96xi1>
    %66 = arith.extui %65 : vector<128x96xi1> to vector<128x96xi32>
    %67 = arith.sitofp %66 : vector<128x96xi32> to vector<128x96xf32>
    %68 = arith.truncf %67 : vector<128x96xf32> to vector<128x96xbf16>
    %cst_5 = arith.constant dense<0.000000e+00> : vector<128x128xf32>
    %69 = tpu.matmul %68, %1, %cst_5 {dimension_numbers = #tpu.dot_dimension_numbers<[1], [0], [0], [1], [0, 0, 1, 1], [], []>} : vector<128x96xbf16>, vector<96x128xbf16>, vector<128x128xf32> -> vector<128x128xf32>
    %70 = arith.maximumf %38, %69 : vector<128x128xf32>
    %71 = vector.extract_strided_slice %4 {offsets = [0, 4], sizes = [128, 1], strides = [1, 1]} : vector<128x18xi32> to vector<128x1xi32>
    %72 = vector.broadcast %71 : vector<128x1xi32> to vector<128x96xi32>
    %73 = arith.cmpi eq, %72, %2 : vector<128x96xi32>
    %74 = vector.extract_strided_slice %6 {offsets = [0, 5], sizes = [128, 1], strides = [1, 1]} : vector<128x18xi32> to vector<128x1xi32>
    %75 = vector.broadcast %74 : vector<128x1xi32> to vector<128x96xi32>
    %76 = arith.cmpi eq, %75, %2 : vector<128x96xi32>
    %77 = arith.ori %73, %76 : vector<128x96xi1>
    %78 = vector.extract_strided_slice %8 {offsets = [0, 6], sizes = [128, 1], strides = [1, 1]} : vector<128x18xi32> to vector<128x1xi32>
    %79 = vector.broadcast %78 : vector<128x1xi32> to vector<128x96xi32>
    %80 = arith.cmpi eq, %79, %2 : vector<128x96xi32>
    %81 = arith.ori %77, %80 : vector<128x96xi1>
    %82 = arith.extui %81 : vector<128x96xi1> to vector<128x96xi32>
    %83 = arith.sitofp %82 : vector<128x96xi32> to vector<128x96xf32>
    %84 = arith.truncf %83 : vector<128x96xf32> to vector<128x96xbf16>
    %cst_6 = arith.constant dense<0.000000e+00> : vector<128x128xf32>
    %85 = tpu.matmul %84, %1, %cst_6 {dimension_numbers = #tpu.dot_dimension_numbers<[1], [0], [0], [1], [0, 0, 1, 1], [], []>} : vector<128x96xbf16>, vector<96x128xbf16>, vector<128x128xf32> -> vector<128x128xf32>
    %86 = arith.maximumf %54, %85 : vector<128x128xf32>
    %87 = vector.extract_strided_slice %4 {offsets = [0, 5], sizes = [128, 1], strides = [1, 1]} : vector<128x18xi32> to vector<128x1xi32>
    %88 = vector.broadcast %87 : vector<128x1xi32> to vector<128x96xi32>
    %89 = arith.cmpi eq, %88, %2 : vector<128x96xi32>
    %90 = vector.extract_strided_slice %6 {offsets = [0, 6], sizes = [128, 1], strides = [1, 1]} : vector<128x18xi32> to vector<128x1xi32>
    %91 = vector.broadcast %90 : vector<128x1xi32> to vector<128x96xi32>
    %92 = arith.cmpi eq, %91, %2 : vector<128x96xi32>
    %93 = arith.ori %89, %92 : vector<128x96xi1>
    %94 = vector.extract_strided_slice %8 {offsets = [0, 7], sizes = [128, 1], strides = [1, 1]} : vector<128x18xi32> to vector<128x1xi32>
    %95 = vector.broadcast %94 : vector<128x1xi32> to vector<128x96xi32>
    %96 = arith.cmpi eq, %95, %2 : vector<128x96xi32>
    %97 = arith.ori %93, %96 : vector<128x96xi1>
    %98 = arith.extui %97 : vector<128x96xi1> to vector<128x96xi32>
    %99 = arith.sitofp %98 : vector<128x96xi32> to vector<128x96xf32>
    %100 = arith.truncf %99 : vector<128x96xf32> to vector<128x96xbf16>
    %cst_7 = arith.constant dense<0.000000e+00> : vector<128x128xf32>
    %101 = tpu.matmul %100, %1, %cst_7 {dimension_numbers = #tpu.dot_dimension_numbers<[1], [0], [0], [1], [0, 0, 1, 1], [], []>} : vector<128x96xbf16>, vector<96x128xbf16>, vector<128x128xf32> -> vector<128x128xf32>
    %102 = arith.maximumf %70, %101 : vector<128x128xf32>
    %103 = vector.extract_strided_slice %4 {offsets = [0, 6], sizes = [128, 1], strides = [1, 1]} : vector<128x18xi32> to vector<128x1xi32>
    %104 = vector.broadcast %103 : vector<128x1xi32> to vector<128x96xi32>
    %105 = arith.cmpi eq, %104, %2 : vector<128x96xi32>
    %106 = vector.extract_strided_slice %6 {offsets = [0, 7], sizes = [128, 1], strides = [1, 1]} : vector<128x18xi32> to vector<128x1xi32>
    %107 = vector.broadcast %106 : vector<128x1xi32> to vector<128x96xi32>
    %108 = arith.cmpi eq, %107, %2 : vector<128x96xi32>
    %109 = arith.ori %105, %108 : vector<128x96xi1>
    %110 = vector.extract_strided_slice %8 {offsets = [0, 8], sizes = [128, 1], strides = [1, 1]} : vector<128x18xi32> to vector<128x1xi32>
    %111 = vector.broadcast %110 : vector<128x1xi32> to vector<128x96xi32>
    %112 = arith.cmpi eq, %111, %2 : vector<128x96xi32>
    %113 = arith.ori %109, %112 : vector<128x96xi1>
    %114 = arith.extui %113 : vector<128x96xi1> to vector<128x96xi32>
    %115 = arith.sitofp %114 : vector<128x96xi32> to vector<128x96xf32>
    %116 = arith.truncf %115 : vector<128x96xf32> to vector<128x96xbf16>
    %cst_8 = arith.constant dense<0.000000e+00> : vector<128x128xf32>
    %117 = tpu.matmul %116, %1, %cst_8 {dimension_numbers = #tpu.dot_dimension_numbers<[1], [0], [0], [1], [0, 0, 1, 1], [], []>} : vector<128x96xbf16>, vector<96x128xbf16>, vector<128x128xf32> -> vector<128x128xf32>
    %118 = arith.maximumf %86, %117 : vector<128x128xf32>
    %119 = vector.extract_strided_slice %4 {offsets = [0, 7], sizes = [128, 1], strides = [1, 1]} : vector<128x18xi32> to vector<128x1xi32>
    %120 = vector.broadcast %119 : vector<128x1xi32> to vector<128x96xi32>
    %121 = arith.cmpi eq, %120, %2 : vector<128x96xi32>
    %122 = vector.extract_strided_slice %6 {offsets = [0, 8], sizes = [128, 1], strides = [1, 1]} : vector<128x18xi32> to vector<128x1xi32>
    %123 = vector.broadcast %122 : vector<128x1xi32> to vector<128x96xi32>
    %124 = arith.cmpi eq, %123, %2 : vector<128x96xi32>
    %125 = arith.ori %121, %124 : vector<128x96xi1>
    %126 = vector.extract_strided_slice %8 {offsets = [0, 9], sizes = [128, 1], strides = [1, 1]} : vector<128x18xi32> to vector<128x1xi32>
    %127 = vector.broadcast %126 : vector<128x1xi32> to vector<128x96xi32>
    %128 = arith.cmpi eq, %127, %2 : vector<128x96xi32>
    %129 = arith.ori %125, %128 : vector<128x96xi1>
    %130 = arith.extui %129 : vector<128x96xi1> to vector<128x96xi32>
    %131 = arith.sitofp %130 : vector<128x96xi32> to vector<128x96xf32>
    %132 = arith.truncf %131 : vector<128x96xf32> to vector<128x96xbf16>
    %cst_9 = arith.constant dense<0.000000e+00> : vector<128x128xf32>
    %133 = tpu.matmul %132, %1, %cst_9 {dimension_numbers = #tpu.dot_dimension_numbers<[1], [0], [0], [1], [0, 0, 1, 1], [], []>} : vector<128x96xbf16>, vector<96x128xbf16>, vector<128x128xf32> -> vector<128x128xf32>
    %134 = arith.maximumf %102, %133 : vector<128x128xf32>
    %135 = vector.extract_strided_slice %4 {offsets = [0, 8], sizes = [128, 1], strides = [1, 1]} : vector<128x18xi32> to vector<128x1xi32>
    %136 = vector.broadcast %135 : vector<128x1xi32> to vector<128x96xi32>
    %137 = arith.cmpi eq, %136, %2 : vector<128x96xi32>
    %138 = vector.extract_strided_slice %6 {offsets = [0, 9], sizes = [128, 1], strides = [1, 1]} : vector<128x18xi32> to vector<128x1xi32>
    %139 = vector.broadcast %138 : vector<128x1xi32> to vector<128x96xi32>
    %140 = arith.cmpi eq, %139, %2 : vector<128x96xi32>
    %141 = arith.ori %137, %140 : vector<128x96xi1>
    %142 = vector.extract_strided_slice %8 {offsets = [0, 10], sizes = [128, 1], strides = [1, 1]} : vector<128x18xi32> to vector<128x1xi32>
    %143 = vector.broadcast %142 : vector<128x1xi32> to vector<128x96xi32>
    %144 = arith.cmpi eq, %143, %2 : vector<128x96xi32>
    %145 = arith.ori %141, %144 : vector<128x96xi1>
    %146 = arith.extui %145 : vector<128x96xi1> to vector<128x96xi32>
    %147 = arith.sitofp %146 : vector<128x96xi32> to vector<128x96xf32>
    %148 = arith.truncf %147 : vector<128x96xf32> to vector<128x96xbf16>
    %cst_10 = arith.constant dense<0.000000e+00> : vector<128x128xf32>
    %149 = tpu.matmul %148, %1, %cst_10 {dimension_numbers = #tpu.dot_dimension_numbers<[1], [0], [0], [1], [0, 0, 1, 1], [], []>} : vector<128x96xbf16>, vector<96x128xbf16>, vector<128x128xf32> -> vector<128x128xf32>
    %150 = arith.maximumf %118, %149 : vector<128x128xf32>
    %151 = vector.extract_strided_slice %4 {offsets = [0, 9], sizes = [128, 1], strides = [1, 1]} : vector<128x18xi32> to vector<128x1xi32>
    %152 = vector.broadcast %151 : vector<128x1xi32> to vector<128x96xi32>
    %153 = arith.cmpi eq, %152, %2 : vector<128x96xi32>
    %154 = vector.extract_strided_slice %6 {offsets = [0, 10], sizes = [128, 1], strides = [1, 1]} : vector<128x18xi32> to vector<128x1xi32>
    %155 = vector.broadcast %154 : vector<128x1xi32> to vector<128x96xi32>
    %156 = arith.cmpi eq, %155, %2 : vector<128x96xi32>
    %157 = arith.ori %153, %156 : vector<128x96xi1>
    %158 = vector.extract_strided_slice %8 {offsets = [0, 11], sizes = [128, 1], strides = [1, 1]} : vector<128x18xi32> to vector<128x1xi32>
    %159 = vector.broadcast %158 : vector<128x1xi32> to vector<128x96xi32>
    %160 = arith.cmpi eq, %159, %2 : vector<128x96xi32>
    %161 = arith.ori %157, %160 : vector<128x96xi1>
    %162 = arith.extui %161 : vector<128x96xi1> to vector<128x96xi32>
    %163 = arith.sitofp %162 : vector<128x96xi32> to vector<128x96xf32>
    %164 = arith.truncf %163 : vector<128x96xf32> to vector<128x96xbf16>
    %cst_11 = arith.constant dense<0.000000e+00> : vector<128x128xf32>
    %165 = tpu.matmul %164, %1, %cst_11 {dimension_numbers = #tpu.dot_dimension_numbers<[1], [0], [0], [1], [0, 0, 1, 1], [], []>} : vector<128x96xbf16>, vector<96x128xbf16>, vector<128x128xf32> -> vector<128x128xf32>
    %166 = arith.maximumf %134, %165 : vector<128x128xf32>
    %167 = vector.extract_strided_slice %4 {offsets = [0, 10], sizes = [128, 1], strides = [1, 1]} : vector<128x18xi32> to vector<128x1xi32>
    %168 = vector.broadcast %167 : vector<128x1xi32> to vector<128x96xi32>
    %169 = arith.cmpi eq, %168, %2 : vector<128x96xi32>
    %170 = vector.extract_strided_slice %6 {offsets = [0, 11], sizes = [128, 1], strides = [1, 1]} : vector<128x18xi32> to vector<128x1xi32>
    %171 = vector.broadcast %170 : vector<128x1xi32> to vector<128x96xi32>
    %172 = arith.cmpi eq, %171, %2 : vector<128x96xi32>
    %173 = arith.ori %169, %172 : vector<128x96xi1>
    %174 = vector.extract_strided_slice %8 {offsets = [0, 12], sizes = [128, 1], strides = [1, 1]} : vector<128x18xi32> to vector<128x1xi32>
    %175 = vector.broadcast %174 : vector<128x1xi32> to vector<128x96xi32>
    %176 = arith.cmpi eq, %175, %2 : vector<128x96xi32>
    %177 = arith.ori %173, %176 : vector<128x96xi1>
    %178 = arith.extui %177 : vector<128x96xi1> to vector<128x96xi32>
    %179 = arith.sitofp %178 : vector<128x96xi32> to vector<128x96xf32>
    %180 = arith.truncf %179 : vector<128x96xf32> to vector<128x96xbf16>
    %cst_12 = arith.constant dense<0.000000e+00> : vector<128x128xf32>
    %181 = tpu.matmul %180, %1, %cst_12 {dimension_numbers = #tpu.dot_dimension_numbers<[1], [0], [0], [1], [0, 0, 1, 1], [], []>} : vector<128x96xbf16>, vector<96x128xbf16>, vector<128x128xf32> -> vector<128x128xf32>
    %182 = arith.maximumf %150, %181 : vector<128x128xf32>
    %183 = vector.extract_strided_slice %4 {offsets = [0, 11], sizes = [128, 1], strides = [1, 1]} : vector<128x18xi32> to vector<128x1xi32>
    %184 = vector.broadcast %183 : vector<128x1xi32> to vector<128x96xi32>
    %185 = arith.cmpi eq, %184, %2 : vector<128x96xi32>
    %186 = vector.extract_strided_slice %6 {offsets = [0, 12], sizes = [128, 1], strides = [1, 1]} : vector<128x18xi32> to vector<128x1xi32>
    %187 = vector.broadcast %186 : vector<128x1xi32> to vector<128x96xi32>
    %188 = arith.cmpi eq, %187, %2 : vector<128x96xi32>
    %189 = arith.ori %185, %188 : vector<128x96xi1>
    %190 = vector.extract_strided_slice %8 {offsets = [0, 13], sizes = [128, 1], strides = [1, 1]} : vector<128x18xi32> to vector<128x1xi32>
    %191 = vector.broadcast %190 : vector<128x1xi32> to vector<128x96xi32>
    %192 = arith.cmpi eq, %191, %2 : vector<128x96xi32>
    %193 = arith.ori %189, %192 : vector<128x96xi1>
    %194 = arith.extui %193 : vector<128x96xi1> to vector<128x96xi32>
    %195 = arith.sitofp %194 : vector<128x96xi32> to vector<128x96xf32>
    %196 = arith.truncf %195 : vector<128x96xf32> to vector<128x96xbf16>
    %cst_13 = arith.constant dense<0.000000e+00> : vector<128x128xf32>
    %197 = tpu.matmul %196, %1, %cst_13 {dimension_numbers = #tpu.dot_dimension_numbers<[1], [0], [0], [1], [0, 0, 1, 1], [], []>} : vector<128x96xbf16>, vector<96x128xbf16>, vector<128x128xf32> -> vector<128x128xf32>
    %198 = arith.maximumf %166, %197 : vector<128x128xf32>
    %199 = vector.extract_strided_slice %4 {offsets = [0, 12], sizes = [128, 1], strides = [1, 1]} : vector<128x18xi32> to vector<128x1xi32>
    %200 = vector.broadcast %199 : vector<128x1xi32> to vector<128x96xi32>
    %201 = arith.cmpi eq, %200, %2 : vector<128x96xi32>
    %202 = vector.extract_strided_slice %6 {offsets = [0, 13], sizes = [128, 1], strides = [1, 1]} : vector<128x18xi32> to vector<128x1xi32>
    %203 = vector.broadcast %202 : vector<128x1xi32> to vector<128x96xi32>
    %204 = arith.cmpi eq, %203, %2 : vector<128x96xi32>
    %205 = arith.ori %201, %204 : vector<128x96xi1>
    %206 = vector.extract_strided_slice %8 {offsets = [0, 14], sizes = [128, 1], strides = [1, 1]} : vector<128x18xi32> to vector<128x1xi32>
    %207 = vector.broadcast %206 : vector<128x1xi32> to vector<128x96xi32>
    %208 = arith.cmpi eq, %207, %2 : vector<128x96xi32>
    %209 = arith.ori %205, %208 : vector<128x96xi1>
    %210 = arith.extui %209 : vector<128x96xi1> to vector<128x96xi32>
    %211 = arith.sitofp %210 : vector<128x96xi32> to vector<128x96xf32>
    %212 = arith.truncf %211 : vector<128x96xf32> to vector<128x96xbf16>
    %cst_14 = arith.constant dense<0.000000e+00> : vector<128x128xf32>
    %213 = tpu.matmul %212, %1, %cst_14 {dimension_numbers = #tpu.dot_dimension_numbers<[1], [0], [0], [1], [0, 0, 1, 1], [], []>} : vector<128x96xbf16>, vector<96x128xbf16>, vector<128x128xf32> -> vector<128x128xf32>
    %214 = arith.maximumf %182, %213 : vector<128x128xf32>
    %215 = vector.extract_strided_slice %4 {offsets = [0, 13], sizes = [128, 1], strides = [1, 1]} : vector<128x18xi32> to vector<128x1xi32>
    %216 = vector.broadcast %215 : vector<128x1xi32> to vector<128x96xi32>
    %217 = arith.cmpi eq, %216, %2 : vector<128x96xi32>
    %218 = vector.extract_strided_slice %6 {offsets = [0, 14], sizes = [128, 1], strides = [1, 1]} : vector<128x18xi32> to vector<128x1xi32>
    %219 = vector.broadcast %218 : vector<128x1xi32> to vector<128x96xi32>
    %220 = arith.cmpi eq, %219, %2 : vector<128x96xi32>
    %221 = arith.ori %217, %220 : vector<128x96xi1>
    %222 = vector.extract_strided_slice %8 {offsets = [0, 15], sizes = [128, 1], strides = [1, 1]} : vector<128x18xi32> to vector<128x1xi32>
    %223 = vector.broadcast %222 : vector<128x1xi32> to vector<128x96xi32>
    %224 = arith.cmpi eq, %223, %2 : vector<128x96xi32>
    %225 = arith.ori %221, %224 : vector<128x96xi1>
    %226 = arith.extui %225 : vector<128x96xi1> to vector<128x96xi32>
    %227 = arith.sitofp %226 : vector<128x96xi32> to vector<128x96xf32>
    %228 = arith.truncf %227 : vector<128x96xf32> to vector<128x96xbf16>
    %cst_15 = arith.constant dense<0.000000e+00> : vector<128x128xf32>
    %229 = tpu.matmul %228, %1, %cst_15 {dimension_numbers = #tpu.dot_dimension_numbers<[1], [0], [0], [1], [0, 0, 1, 1], [], []>} : vector<128x96xbf16>, vector<96x128xbf16>, vector<128x128xf32> -> vector<128x128xf32>
    %230 = arith.maximumf %198, %229 : vector<128x128xf32>
    %231 = vector.extract_strided_slice %4 {offsets = [0, 14], sizes = [128, 1], strides = [1, 1]} : vector<128x18xi32> to vector<128x1xi32>
    %232 = vector.broadcast %231 : vector<128x1xi32> to vector<128x96xi32>
    %233 = arith.cmpi eq, %232, %2 : vector<128x96xi32>
    %234 = vector.extract_strided_slice %6 {offsets = [0, 15], sizes = [128, 1], strides = [1, 1]} : vector<128x18xi32> to vector<128x1xi32>
    %235 = vector.broadcast %234 : vector<128x1xi32> to vector<128x96xi32>
    %236 = arith.cmpi eq, %235, %2 : vector<128x96xi32>
    %237 = arith.ori %233, %236 : vector<128x96xi1>
    %238 = vector.extract_strided_slice %8 {offsets = [0, 16], sizes = [128, 1], strides = [1, 1]} : vector<128x18xi32> to vector<128x1xi32>
    %239 = vector.broadcast %238 : vector<128x1xi32> to vector<128x96xi32>
    %240 = arith.cmpi eq, %239, %2 : vector<128x96xi32>
    %241 = arith.ori %237, %240 : vector<128x96xi1>
    %242 = arith.extui %241 : vector<128x96xi1> to vector<128x96xi32>
    %243 = arith.sitofp %242 : vector<128x96xi32> to vector<128x96xf32>
    %244 = arith.truncf %243 : vector<128x96xf32> to vector<128x96xbf16>
    %cst_16 = arith.constant dense<0.000000e+00> : vector<128x128xf32>
    %245 = tpu.matmul %244, %1, %cst_16 {dimension_numbers = #tpu.dot_dimension_numbers<[1], [0], [0], [1], [0, 0, 1, 1], [], []>} : vector<128x96xbf16>, vector<96x128xbf16>, vector<128x128xf32> -> vector<128x128xf32>
    %c14 = arith.constant 14 : index
    %c0_17 = arith.constant 0 : index
    %246 = vector.load %arg4[%c14, %c0_17] : memref<16x128xf32, #tpu.memory_space<vmem>>, vector<1x128xf32>
    %247 = vector.broadcast %246 : vector<1x128xf32> to vector<128x128xf32>
    %248 = arith.addf %245, %247 : vector<128x128xf32>
    %249 = arith.maximumf %214, %248 : vector<128x128xf32>
    %250 = vector.extract_strided_slice %4 {offsets = [0, 15], sizes = [128, 1], strides = [1, 1]} : vector<128x18xi32> to vector<128x1xi32>
    %251 = vector.broadcast %250 : vector<128x1xi32> to vector<128x96xi32>
    %252 = arith.cmpi eq, %251, %2 : vector<128x96xi32>
    %253 = vector.extract_strided_slice %6 {offsets = [0, 16], sizes = [128, 1], strides = [1, 1]} : vector<128x18xi32> to vector<128x1xi32>
    %254 = vector.broadcast %253 : vector<128x1xi32> to vector<128x96xi32>
    %255 = arith.cmpi eq, %254, %2 : vector<128x96xi32>
    %256 = arith.ori %252, %255 : vector<128x96xi1>
    %257 = vector.extract_strided_slice %8 {offsets = [0, 17], sizes = [128, 1], strides = [1, 1]} : vector<128x18xi32> to vector<128x1xi32>
    %258 = vector.broadcast %257 : vector<128x1xi32> to vector<128x96xi32>
    %259 = arith.cmpi eq, %258, %2 : vector<128x96xi32>
    %260 = arith.ori %256, %259 : vector<128x96xi1>
    %261 = arith.extui %260 : vector<128x96xi1> to vector<128x96xi32>
    %262 = arith.sitofp %261 : vector<128x96xi32> to vector<128x96xf32>
    %263 = arith.truncf %262 : vector<128x96xf32> to vector<128x96xbf16>
    %cst_18 = arith.constant dense<0.000000e+00> : vector<128x128xf32>
    %264 = tpu.matmul %263, %1, %cst_18 {dimension_numbers = #tpu.dot_dimension_numbers<[1], [0], [0], [1], [0, 0, 1, 1], [], []>} : vector<128x96xbf16>, vector<96x128xbf16>, vector<128x128xf32> -> vector<128x128xf32>
    %c15 = arith.constant 15 : index
    %c0_19 = arith.constant 0 : index
    %265 = vector.load %arg4[%c15, %c0_19] : memref<16x128xf32, #tpu.memory_space<vmem>>, vector<1x128xf32>
    %266 = vector.broadcast %265 : vector<1x128xf32> to vector<128x128xf32>
    %267 = arith.addf %264, %266 : vector<128x128xf32>
    %268 = arith.maximumf %230, %267 : vector<128x128xf32>
    %269 = arith.maximumf %249, %268 : vector<128x128xf32>
    %c0_20 = arith.constant 0 : index
    %c0_21 = arith.constant 0 : index
    %270 = vector.load %arg3[%c0_20, %c0_21] : memref<1x128xf32, #tpu.memory_space<vmem>>, vector<1x128xf32>
    %271 = vector.broadcast %270 : vector<1x128xf32> to vector<128x128xf32>
    %272 = arith.addf %269, %271 : vector<128x128xf32>
    %cst_22 = arith.constant 0.000000e+00 : f32
    %273 = vector.broadcast %cst_22 : f32 to vector<128x128xf32>
    %274 = arith.maximumf %272, %273 : vector<128x128xf32>
    %c0_23 = arith.constant 0 : index
    %c0_24 = arith.constant 0 : index
    %275 = vector.load %arg5[%c0_23, %c0_24] : memref<128x256xbf16, #tpu.memory_space<vmem>>, vector<128x256xbf16>
    %c0_25 = arith.constant 0 : index
    %c0_26 = arith.constant 0 : index
    %276 = vector.load %arg6[%c0_25, %c0_26] : memref<1x256xf32, #tpu.memory_space<vmem>>, vector<1x256xf32>
    %277 = arith.truncf %274 : vector<128x128xf32> to vector<128x128xbf16>
    %cst_27 = arith.constant dense<0.000000e+00> : vector<128x256xf32>
    %278 = tpu.matmul %277, %275, %cst_27 {dimension_numbers = #tpu.dot_dimension_numbers<[1], [0], [0], [1], [0, 0, 1, 1], [], []>} : vector<128x128xbf16>, vector<128x256xbf16>, vector<128x256xf32> -> vector<128x256xf32>
    %279 = vector.broadcast %276 : vector<1x256xf32> to vector<128x256xf32>
    %280 = arith.addf %278, %279 : vector<128x256xf32>
    %281 = vector.extract_strided_slice %280 {offsets = [0, 0], sizes = [128, 128], strides = [1, 1]} : vector<128x256xf32> to vector<128x128xf32>
    %cst_28 = arith.constant 0.000000e+00 : f32
    %282 = vector.broadcast %cst_28 : f32 to vector<128x128xf32>
    %283 = arith.maximumf %281, %282 : vector<128x128xf32>
    %284 = vector.extract_strided_slice %280 {offsets = [0, 128], sizes = [128, 128], strides = [1, 1]} : vector<128x256xf32> to vector<128x128xf32>
    %cst_29 = arith.constant 0.000000e+00 : f32
    %285 = vector.broadcast %cst_29 : f32 to vector<128x128xf32>
    %286 = arith.subf %285, %284 : vector<128x128xf32>
    %287 = math.exp %286 : vector<128x128xf32>
    %cst_30 = arith.constant 1.000000e+00 : f32
    %288 = vector.broadcast %cst_30 : f32 to vector<128x128xf32>
    %289 = arith.addf %288, %287 : vector<128x128xf32>
    %290 = tpu.reciprocal %289 {approx = true} : vector<128x128xf32> -> vector<128x128xf32>
    %291 = arith.subf %274, %283 : vector<128x128xf32>
    %292 = arith.mulf %290, %291 : vector<128x128xf32>
    %293 = arith.addf %283, %292 : vector<128x128xf32>
    %c0_31 = arith.constant 0 : index
    %c0_32 = arith.constant 0 : index
    %294 = vector.load %arg7[%c0_31, %c0_32] : memref<128x256xbf16, #tpu.memory_space<vmem>>, vector<128x256xbf16>
    %c0_33 = arith.constant 0 : index
    %c0_34 = arith.constant 0 : index
    %295 = vector.load %arg8[%c0_33, %c0_34] : memref<1x256xf32, #tpu.memory_space<vmem>>, vector<1x256xf32>
    %296 = arith.truncf %293 : vector<128x128xf32> to vector<128x128xbf16>
    %cst_35 = arith.constant dense<0.000000e+00> : vector<128x256xf32>
    %297 = tpu.matmul %296, %294, %cst_35 {dimension_numbers = #tpu.dot_dimension_numbers<[1], [0], [0], [1], [0, 0, 1, 1], [], []>} : vector<128x128xbf16>, vector<128x256xbf16>, vector<128x256xf32> -> vector<128x256xf32>
    %298 = vector.broadcast %295 : vector<1x256xf32> to vector<128x256xf32>
    %299 = arith.addf %297, %298 : vector<128x256xf32>
    %300 = vector.extract_strided_slice %299 {offsets = [0, 0], sizes = [128, 128], strides = [1, 1]} : vector<128x256xf32> to vector<128x128xf32>
    %cst_36 = arith.constant 0.000000e+00 : f32
    %301 = vector.broadcast %cst_36 : f32 to vector<128x128xf32>
    %302 = arith.maximumf %300, %301 : vector<128x128xf32>
    %303 = vector.extract_strided_slice %299 {offsets = [0, 128], sizes = [128, 128], strides = [1, 1]} : vector<128x256xf32> to vector<128x128xf32>
    %cst_37 = arith.constant 0.000000e+00 : f32
    %304 = vector.broadcast %cst_37 : f32 to vector<128x128xf32>
    %305 = arith.subf %304, %303 : vector<128x128xf32>
    %306 = math.exp %305 : vector<128x128xf32>
    %cst_38 = arith.constant 1.000000e+00 : f32
    %307 = vector.broadcast %cst_38 : f32 to vector<128x128xf32>
    %308 = arith.addf %307, %306 : vector<128x128xf32>
    %309 = tpu.reciprocal %308 {approx = true} : vector<128x128xf32> -> vector<128x128xf32>
    %310 = arith.subf %293, %302 : vector<128x128xf32>
    %311 = arith.mulf %309, %310 : vector<128x128xf32>
    %312 = arith.addf %302, %311 : vector<128x128xf32>
    %313 = arith.truncf %312 : vector<128x128xf32> to vector<128x128xbf16>
    %c0_39 = arith.constant 0 : index
    %c0_40 = arith.constant 0 : index
    %314 = vector.load %arg9[%c0_39, %c0_40] : memref<128x128xbf16, #tpu.memory_space<vmem>>, vector<128x128xbf16>
    %cst_41 = arith.constant dense<0.000000e+00> : vector<128x128xf32>
    %315 = tpu.matmul %313, %314, %cst_41 {dimension_numbers = #tpu.dot_dimension_numbers<[1], [0], [0], [1], [0, 0, 1, 1], [], []>} : vector<128x128xbf16>, vector<128x128xbf16>, vector<128x128xf32> -> vector<128x128xf32>
    %c0_42 = arith.constant 0 : index
    %c0_43 = arith.constant 0 : index
    %316 = vector.load %arg10[%c0_42, %c0_43] : memref<1x128xf32, #tpu.memory_space<vmem>>, vector<1x128xf32>
    %317 = vector.broadcast %316 : vector<1x128xf32> to vector<128x128xf32>
    %318 = arith.addf %315, %317 : vector<128x128xf32>
    %c0_44 = arith.constant 0 : index
    %c0_45 = arith.constant 0 : index
    %319 = vector.load %arg11[%c0_44, %c0_45] : memref<128x128xf32, #tpu.memory_space<vmem>>, vector<128x128xf32>
    tpu.vector_store %arg11[%c0_44, %c0_45], %318 {strides = array<i32>} : memref<128x128xf32, #tpu.memory_space<vmem>>, vector<128x128xf32>,
    return
  }
  func.func @transform_0(%arg0: i32) -> (i32, i32) {
    %c0_i32 = arith.constant 0 : i32
    %c0_i32_0 = arith.constant 0 : i32
    return %arg0, %c0_i32 : i32, i32
  }
  func.func @transform_1(%arg0: i32) -> (i32, i32) {
    %c0_i32 = arith.constant 0 : i32
    %c0_i32_0 = arith.constant 0 : i32
    %c0_i32_1 = arith.constant 0 : i32
    return %c0_i32, %c0_i32_0 : i32, i32
  }
  func.func @transform_2(%arg0: i32) -> (i32, i32) {
    %c0_i32 = arith.constant 0 : i32
    %c0_i32_0 = arith.constant 0 : i32
    %c0_i32_1 = arith.constant 0 : i32
    return %c0_i32, %c0_i32_0 : i32, i32
  }
  func.func @transform_3(%arg0: i32) -> (i32, i32) {
    %c0_i32 = arith.constant 0 : i32
    %c0_i32_0 = arith.constant 0 : i32
    %c0_i32_1 = arith.constant 0 : i32
    return %c0_i32, %c0_i32_0 : i32, i32
  }
  func.func @transform_4(%arg0: i32) -> (i32, i32) {
    %c0_i32 = arith.constant 0 : i32
    %c0_i32_0 = arith.constant 0 : i32
    %c0_i32_1 = arith.constant 0 : i32
    return %c0_i32, %c0_i32_0 : i32, i32
  }
  func.func @transform_5(%arg0: i32) -> (i32, i32) {
    %c0_i32 = arith.constant 0 : i32
    %c0_i32_0 = arith.constant 0 : i32
    %c0_i32_1 = arith.constant 0 : i32
    return %c0_i32, %c0_i32_0 : i32, i32
  }
  func.func @transform_6(%arg0: i32) -> (i32, i32) {
    %c0_i32 = arith.constant 0 : i32
    %c0_i32_0 = arith.constant 0 : i32
    %c0_i32_1 = arith.constant 0 : i32
    return %c0_i32, %c0_i32_0 : i32, i32
  }
  func.func @transform_7(%arg0: i32) -> (i32, i32) {
    %c0_i32 = arith.constant 0 : i32
    %c0_i32_0 = arith.constant 0 : i32
    %c0_i32_1 = arith.constant 0 : i32
    return %c0_i32, %c0_i32_0 : i32, i32
  }
  func.func @transform_8(%arg0: i32) -> (i32, i32) {
    %c0_i32 = arith.constant 0 : i32
    %c0_i32_0 = arith.constant 0 : i32
    %c0_i32_1 = arith.constant 0 : i32
    return %c0_i32, %c0_i32_0 : i32, i32
  }
  func.func @transform_9(%arg0: i32) -> (i32, i32) {
    %c0_i32 = arith.constant 0 : i32
    %c0_i32_0 = arith.constant 0 : i32
    %c0_i32_1 = arith.constant 0 : i32
    return %c0_i32, %c0_i32_0 : i32, i32
  }
  func.func @transform_10(%arg0: i32) -> (i32, i32) {
    %c0_i32 = arith.constant 0 : i32
    %c0_i32_0 = arith.constant 0 : i32
    return %arg0, %c0_i32 : i32, i32
  }
}

</mosaic_0001>

<bundles_post_ra>
// kernel: tpu_custom_call.1
= control target key start
LH: loop header
LB: loop body
LE: loop exit
PB: predicated region body
PF: predicated region fallthrough
CT: control target
= control target key end

     0   :  { %s17070_s0 = inlined_call_operand.vmem [shape: s32[256,18], index: 0, kind: input, shape index: {}]   ;;  %s17071_s1 = inlined_call_operand.hbm [shape: bf16[96,128], index: 1, kind: input, shape index: {}]   ;;  %s17072_s2 = inlined_call_operand.hbm [shape: f32[1,128], index: 2, kind: input, shape index: {}]   ;;  %s17073_s3 = inlined_call_operand.hbm [shape: f32[16,128], index: 3, kind: input, shape index: {}]   ;;  %s17074_s4 = inlined_call_operand.vmem [shape: bf16[128,256], index: 4, kind: input, shape index: {}]   ;;  %s17075_s5 = inlined_call_operand.vmem [shape: f32[1,256], index: 5, kind: input, shape index: {}]   ;;  %s17076_s6 = inlined_call_operand.vmem [shape: bf16[128,256], index: 6, kind: input, shape index: {}]   ;;  %s17077_s7 = inlined_call_operand.vmem [shape: f32[1,256], index: 7, kind: input, shape index: {}]   ;;  %s17078_s8 = inlined_call_operand.vmem [shape: bf16[128,128], index: 8, kind: input, shape index: {}]   ;;  %s17079_s9 = inlined_call_operand.vmem [shape: f32[1,128], index: 9, kind: input, shape index: {}]   ;;  %s17080_s10 = inlined_call_operand.hbm [shape: f32[256,128], index: 10, kind: output, shape index: {}]  }
   0x1   :  { %17472 = sst [smem:[#allocation99_spill]] %s17072_s2 }
   0x2   :  { %15 = vsyncpa [#allocation3], 0 }
   0x3   :  { %16 = vsyncpa [#allocation6], 0 }
   0x4   :  { %17 = vsyncpa [#allocation4], 0 }
   0x5   :  { %19 = vsyncpa [#allocation4 + $0x1], 0  ;;  %s10018_s13 = smov 0   ;;  %s10020_s14 = smov 0  }
   0x6   :  { %s10022_s15 = smov 0   ;;  %s10024_s16 = smov 0  }
   0x7 LB: > { %17473 = sst [smem:[#allocation12_spill]] %s9928_s15  ;;  %s10039_s17 = sadd.s32 4294967295, %s9932_s16   ;;  %s9932_s16 = sphi %s10024_s16, %s18557_s16   ;;  %s9928_s15 = sphi %s10022_s15, %s18559_s15   ;;  %s9924_s14 = sphi %s10020_s14, %s18561_s14   ;;  %s9920_s13 = sphi %s10018_s13, %s18560_s13  }
   0x8   : > { %s7997_s18 = sadd.s32 4294967294, %s9932_s16   ;;  %s10043_s19 = sadd.s32 1, %s9932_s16  }
   0x9   : > { %17474 = sst [smem:[#allocation13_spill]] %s10043_s19  ;;  %s247_s20 = sadd.s32 1, %s9928_s15 }
   0xa   : > { %s244_s21 = ssub.s32 %s9932_s16, %s10043_s19  ;;  %p257_p0 = scmp.ne.s32.totalorder %s9928_s15, %s9924_s14 }
   0xb   : > { %p245_p1 = scmp.eq.s32.totalorder %s244_s21, 0  ;;  %p258_p2 = scmp.eq.s32.totalorder %s10039_s17, 1 }
   0xc   : > { %p263_p3 = scmp.ne.s32.totalorder %s9924_s14, %s9920_s13  ;;  %p264_p4 = scmp.eq.s32.totalorder %s7997_s18, 1 }
   0xd   : > { %s10054_s22 = scalar_select %p245_p1, %s9928_s15, %s247_s20  }
   0xe   : > { %p10056_p5 = por %p258_p2, %p257_p0  ;;  %p10060_p6 = por %p264_p4, %p263_p3 }
   0xf   : > { %17475 = sst [smem:[#allocation14_spill]] %s10054_s22  ;;  %p7998_p7 = scmp.ge.s32.totalorder %s9932_s16, 1 }
  0x10   : > { %s17476_s23 = scalar_select %p10056_p5, 1, 0 }
  0x11   : > { %s17477_s24 = scalar_select %p10060_p6, 1, 0 }
  0x12   : > { %p271_p8 = scmp.lt.s32.totalorder %s9932_s16, 3  ;;  %p17082_p9 = scmp.eq.s32.totalorder %s10039_s17, 0 }
  0x13   : > { %17478 = sst [smem:[#allocation15_spill]] %s17477_s24  ;;  %s9934_s26 = smov [#allocation5]  }
  0x14   : > { %p10067_p10 = pnand %p7998_p7, %p271_p8  ;;  %s297_s27 = sshll.u32 %s9934_s26, 4  ;;  %s298_s27 = int_to_ptr.vmem [resolvable:$true] %s297_s27 }
  0x15   : > { %s9935_s28 = smov [#allocation2]   ;;  %s9936_s11 = smov [#allocation7]  }
  0x16   : > { %s17479_s25 = scalar_select %p10067_p10, 1, 0 }
  0x17   : > { %p9200_p11 = pneg %p10067_p10  ;;  %s283_s29 = sshll.u32 %s9935_s28, 4  ;;  %s10079_s29 = int_to_ptr.vmem [resolvable:$true] %s283_s29 }
  0x18   : > { %s10081_s12 = sshll.u32 %s9936_s11, 4  ;;  %s17481_s2 = sld [smem:[#allocation99_spill]]  ;;  %s308_s12 = int_to_ptr.vmem [resolvable:$true] %s10081_s12 }
  0x19   : > { %p10075_p12 = pnand %p17082_p9, %p9200_p11 }
  0x1b   : > { %p10091_p0 = pneg %p10075_p12 }
  0x1e   : > { %s9778_s21 = scalar_lea.hbm %s17481_s2, 16 }
  0x1f   : > { %p9779_p13 = scmp.ne.s32.totalorder %s17481_s2, %s9778_s21  ;;  %p9785_p3 = scmp.lt.u32.totalorder %s9778_s21, %s17481_s2 }
  0x21   : > { %p9781_p1 = pnand %p10091_p0, %p9779_p13 }
  0x23   : > { %p9782_p2 = pneg %p9781_p1 }
  0x25   : > { %p9787_p4 = pnand %p9785_p3, %p9782_p2 }
  0x27   : > { %9790 = shalt.err (!%p9787_p4)
}
  0x28   : > { %s9791_s18 = scalar_lea.vmem %s298_s27, 16  ;;  %s9798_s22 = scalar_lea.vmem %s298_s27, 32 }
  0x29   : > { %p9792_p7 = scmp.ne.s32.totalorder %s298_s27, %s9791_s18  ;;  %p9799_p9 = scmp.lt.s32.totalorder %s298_s27, %s298_s27 }
  0x2a   : > { %p9800_p6 = scmp.lt.s32.totalorder %s9798_s22, %s9791_s18 }
  0x2b   : > { %p9794_p8 = pnand %p9792_p7, %p10091_p0 }
  0x2c   : > { %p9801_p5 = por %p9800_p6, %p9799_p9 }
  0x2d   : > { %p9795_p11 = pneg %p9794_p8 }
  0x2f   : > { %p9802_p10 = pnand %p9801_p5, %p9795_p11 }
  0x31   : > { %9805 = shalt.err (!%p9802_p10)
}
  0x32   : > { %9206 = dma.hbm_to_vmem [thread:$0]  (!%p10075_p12), %s17481_s2, 16, %s298_s27, [#allocation6]  }
  0x33   : > { %s9806_s11 = scalar_lea.hbm %s17071_s1, 768 }
  0x34   : > { %p9807_p13 = scmp.ne.s32.totalorder %s17071_s1, %s9806_s11  ;;  %p9813_p5 = scmp.lt.u32.totalorder %s9806_s11, %s17071_s1 }
  0x36   : > { %p9809_p1 = pnand %p9807_p13, %p10091_p0 }
  0x38   : > { %p9810_p6 = pneg %p9809_p1 }
  0x3a   : > { %p9815_p9 = pnand %p9813_p5, %p9810_p6 }
  0x3c   : > { %9818 = shalt.err (!%p9815_p9)
}
  0x3d   : > { %s9819_s27 = scalar_lea.vmem %s10079_s29, 768  ;;  %p9827_p4 = scmp.lt.s32.totalorder %s10079_s29, %s10079_s29 }
  0x3e   : > { %p9820_p10 = scmp.ne.s32.totalorder %s10079_s29, %s9819_s27  ;;  %p9828_p7 = scmp.lt.s32.totalorder %s9819_s27, %s9819_s27 }
  0x40   : > { %p9822_p2 = pnand %p9820_p10, %p10091_p0  ;;  %p9829_p8 = por %p9828_p7, %p9827_p4 }
  0x42   : > { %p9823_p3 = pneg %p9822_p2 }
  0x44   : > { %p9830_p11 = pnand %p9829_p8, %p9823_p3 }
  0x46   : > { %9833 = shalt.err (!%p9830_p11)
}
  0x47   : > { %s9937_s19 = smov 64   ;;  %s9938_s24 = smov 4  }
  0x48   : > { %9203 = dma.hbm_to_vmem [thread:$0]  (!%p10075_p12), %s17071_s1, 768, %s10079_s29, [#allocation3], %s9937_s19, %s9937_s19, %s9938_s24  }
  0x49   : > { %s9834_s11 = scalar_lea.hbm %s17073_s3, 256 }
  0x4a   : > { %p9835_p13 = scmp.ne.s32.totalorder %s17073_s3, %s9834_s11  ;;  %p9841_p5 = scmp.lt.u32.totalorder %s9834_s11, %s17073_s3 }
  0x4c   : > { %p9837_p1 = pnand %p9835_p13, %p10091_p0 }
  0x4e   : > { %p9838_p6 = pneg %p9837_p1 }
  0x50   : > { %p9843_p9 = pnand %p9841_p5, %p9838_p6 }
  0x52   : > { %9846 = shalt.err (!%p9843_p9)
}
  0x53   : > { %s9847_s20 = scalar_lea.vmem %s308_s12, 256  ;;  %p9855_p4 = scmp.lt.s32.totalorder %s308_s12, %s308_s12 }
  0x54   : > { %p9848_p10 = scmp.ne.s32.totalorder %s308_s12, %s9847_s20  ;;  %p9856_p7 = scmp.lt.s32.totalorder %s9847_s20, %s9847_s20 }
  0x56   : > { %p9850_p2 = pnand %p9848_p10, %p10091_p0  ;;  %p9857_p8 = por %p9856_p7, %p9855_p4 }
  0x58   : > { %p9851_p3 = pneg %p9850_p2 }
  0x5a   : > { %p9858_p11 = pnand %p9857_p8, %p9851_p3 }
  0x5c   : > { %9861 = shalt.err (!%p9858_p11)
}
  0x5d   : > { %s9939_s29 = smov 128   ;;  %s9940_s19 = smov 8  }
  0x5e   : > { %9209 = dma.hbm_to_vmem [thread:$0]  (!%p10075_p12), %s17073_s3, 256, %s308_s12, [#allocation6], %s9939_s29, %s9939_s29, %s9940_s19  }
  0x5f   : > { %p17483_p13 = scmp.ne.s32.totalorder %s17479_s25, 0 }
  0x61   : > { %350 = sbr.rel (%p17483_p13) target bundleno = 3146 (0xc4a), region = 60 }
  0x68   : > { %p17484_p1 = scmp.eq.s32.totalorder %s10039_s17, 0 }
  0x6a   : > { %9907 = dma.done.wait (%p17484_p1), [#allocation3], 768   ;;  %p17485_p0 = pmov %p17484_p1 }
  0x6c   : > { %9909 = vsyncadd (%p17485_p0), [#allocation3], 4294966528  ;;  %p17486_p6 = pmov %p17485_p0 }
  0x6d   : > { %p17487_p5 = pmov %p17485_p0 }
  0x6e   : > { %9911 = dma.done.wait (%p17486_p6), [#allocation6], 272  }
  0x6f   : > { %9913 = vsyncadd (%p17487_p5), [#allocation6], 4294967024  ;;  %s8008_s30 = sshll.u32 %s10039_s17, 4  ;;  %v17088_v0 = vmov 0   ;;  %v9942_v19 = vmov 1   ;;  %v17092_v35 = vmov 2  }
  0x70   : > { %9282 = vset.pattern.permute.xlu1 %v17088_v0  ;;  %9281 = vset.pattern.permute.xlu0 %v17088_v0  ;;  %p397_p12 = scmp.lt.s32.totalorder %s8008_s30, 31  ;;  %v10321_v40 = vld [vmem:[#allocation2] sm:$0xff]   ;;  %v10330_v42 = vld [vmem:[#allocation2 + $0x8] sm:$0xff]   ;;  %v10341_v44 = vld [vmem:[#allocation2 + $0x10] sm:$0xff]   ;;  %s393_s22 = sand.u32 1, %s9924_s14  }
  0x71   : > { %8690 = vmatprep.subr.bf16.mxu0 %v10321_v40  ;;  %8718 = vmatprep.subr.bf16.mxu1 %v10321_v40  ;;  %v10352_v46 = vld [vmem:[#allocation2 + $0x18] sm:$0xff]   ;;  %v10366_v49 = vld [vmem:[#allocation2 + $0x20] sm:$0xff]   ;;  %v10378_v51 = vld [vmem:[#allocation2 + $0x28] sm:$0xff]   ;;  %s8007_s27 = sshll.u32 %s393_s22, 7  ;;  %s8449_s24 = sshll.u32 %s10039_s17, 11 }
  0x72   : > { %s18563_s30 = smov (!%p397_p12, %s8008_s30), 31  ;;  %8691 = vmatpush3.bf16.msra.mxu0 %v10321_v40  ;;  %8719 = vmatpush3.bf16.msra.mxu1 %v10321_v40  ;;  %17512 = vst [vmem:[#allocation40_spill] sm:$0xff] %v10352_v46  ;;  %17515 = vst [vmem:[#allocation43_spill] sm:$0xff] %v10366_v49  ;;  %s16984_s19 = scalar_lea.vmem [#allocation8], %s8007_s27 }
  0x73   : > { %s8009_s25 = sshll.u32 %s18563_s30, 3  ;;  %8692 = vmatprep.subr.bf16.mxu0 %v10330_v42  ;;  %8720 = vmatprep.subr.bf16.mxu1 %v10330_v42  ;;  %17517 = vst [vmem:[#allocation45_spill] sm:$0xff] %v10378_v51  ;;  %s7904_s2 = sshll.u32 %s16984_s19, 4  ;;  %s17021_s2 = int_to_ptr.vmem [resolvable:$true] %s7904_s2 }
  0x74   : > { %s10165_s26 = scalar_lea.vmem %s17070_s0, %s8009_s25  ;;  %s17019_s12 = scalar_lea.hbm %s17080_s10, %s8449_s24 }
  0x75   : > { %v10168_v1 = vld [vmem:[%s10165_s26 + $0x10] sm:$0xff]  ;;  %v10171_v2 = vld [vmem:[%s10165_s26] sm:$0xff]  ;;  %v10176_v3 = vld [vmem:[%s10165_s26 + $0x18] sm:$0xff]  ;;  %s17029_s17 = scalar_lea.sflag [#allocation4], %s393_s22  ;;  %s9862_s28 = scalar_lea.vmem %s17021_s2, 2048 }
  0x76   : > { %473 = vperm.xlu1 %9282, %v10168_v1   ;;  %467 = vperm.xlu0 %9281, %v10171_v2   ;;  %v10179_v4 = vld [vmem:[%s10165_s26 + $0x8] sm:$0xff]  ;;  %v10187_v6 = vld [vmem:[%s10165_s26 + $0x20] sm:$0xff]  ;;  %v10192_v7 = vld [vmem:[%s10165_s26 + $0x38] sm:$0xff]  ;;  %v10235_v18 = vadd.s32 32, %v10171_v2  ;;  %v10242_v20 = vadd.s32 32, %v10168_v1  ;;  %v10245_v21 = vadd.s32 32, %v10176_v3  ;;  %p9863_p9 = scmp.ne.s32.totalorder %s17021_s2, %s9862_s28 }
  0x77   : > { %v10184_v5 = vld [vmem:[%s10165_s26 + $0x28] sm:$0xff]  ;;  %v10195_v8 = vld [vmem:[%s10165_s26 + $0x30] sm:$0xff]  ;;  %v10201_v10 = vld [vmem:[%s10165_s26 + $0x40] sm:$0xff]  ;;  %v10232_v17 = vadd.s32 32, %v10179_v4  ;;  %v10250_v22 = vadd.s32 32, %v10187_v6  ;;  %v10261_v25 = vadd.s32 32, %v10192_v7  ;;  %8693 = vmatpush3.bf16.msra.mxu0 %v10330_v42  ;;  %8721 = vmatpush3.bf16.msra.mxu1 %v10330_v42 }
  0x78   : > { %v10198_v9 = vld [vmem:[%s10165_s26 + $0x48] sm:$0xff]  ;;  %v10206_v11 = vld [vmem:[%s10165_s26 + $0x58] sm:$0xff]  ;;  %v10209_v12 = vld [vmem:[%s10165_s26 + $0x50] sm:$0xff]  ;;  %17489 = vst [vmem:[#allocation17_spill] sm:$0xff] %v10235_v18  ;;  %v10253_v23 = vadd.s32 32, %v10184_v5  ;;  %v10258_v24 = vadd.s32 32, %v10195_v8  ;;  %8694 = vmatprep.subr.bf16.mxu0 %v10341_v44  ;;  %8722 = vmatprep.subr.bf16.mxu1 %v10341_v44 }
  0x79   : > { %v10214_v13 = vld [vmem:[%s10165_s26 + $0x68] sm:$0xff]  ;;  %v10217_v14 = vld [vmem:[%s10165_s26 + $0x60] sm:$0xff]  ;;  %v10222_v15 = vld [vmem:[%s10165_s26 + $0x78] sm:$0xff]  ;;  %17488 = vst [vmem:[#allocation16_spill] sm:$0xff] %v10232_v17  ;;  %v10266_v26 = vadd.s32 32, %v10201_v10  ;;  %v10269_v27 = vadd.s32 32, %v10198_v9 }
  0x7a   : > { %476 = vperm.xlu1 %9282, %v10176_v3   ;;  %470 = vperm.xlu0 %9281, %v10179_v4   ;;  %v10225_v16 = vld [vmem:[%s10165_s26 + $0x70] sm:$0xff]  ;;  %17490 = vst [vmem:[#allocation18_spill] sm:$0xff] %v10242_v20  ;;  %17491 = vst [vmem:[#allocation19_spill] sm:$0xff] %v10245_v21  ;;  %v10274_v28 = vadd.s32 32, %v10209_v12  ;;  %v10277_v29 = vadd.s32 32, %v10206_v11  ;;  %v10282_v30 = vadd.s32 32, %v10217_v14 }
  0x7b   : > { %17492 = vst [vmem:[#allocation20_spill] sm:$0xff] %v10250_v22  ;;  %17493 = vst [vmem:[#allocation21_spill] sm:$0xff] %v10253_v23  ;;  %v10285_v31 = vadd.s32 32, %v10214_v13  ;;  %v10290_v32 = vadd.s32 32, %v10225_v16  ;;  %v10293_v33 = vadd.s32 32, %v10222_v15  ;;  %v10298_v34 = vadd.s32 64, %v10171_v2  ;;  %8695 = vmatpush3.bf16.msra.mxu0 %v10341_v44  ;;  %8723 = vmatpush3.bf16.msra.mxu1 %v10341_v44 }
  0x7c   : > { %17494 = vst [vmem:[#allocation22_spill] sm:$0xff] %v10258_v24  ;;  %17495 = vst [vmem:[#allocation23_spill] sm:$0xff] %v10261_v25  ;;  %v10304_v36 = vadd.s32 64, %v10168_v1  ;;  %v10309_v37 = vadd.s32 64, %v10176_v3  ;;  %v10314_v38 = vadd.s32 64, %v10184_v5  ;;  %v10319_v39 = vadd.s32 64, %v10192_v7  ;;  %8696 = vmatprep.subr.bf16.mxu0 %v10352_v46  ;;  %8724 = vmatprep.subr.bf16.mxu1 %v10352_v46 }
  0x7d   : > { %17496 = vst [vmem:[#allocation24_spill] sm:$0xff] %v10266_v26  ;;  %17497 = vst [vmem:[#allocation25_spill] sm:$0xff] %v10269_v27  ;;  %v10327_v41 = vadd.s32 64, %v10198_v9  ;;  %v10338_v43 = vadd.s32 64, %v10206_v11  ;;  %v10349_v45 = vadd.s32 64, %v10214_v13  ;;  %v10360_v47 = vadd.s32 64, %v10222_v15 }
  0x7e   : > { %482 = vperm.xlu1 %9282, %v10184_v5   ;;  %479 = vperm.xlu0 %9281, %v10187_v6   ;;  %17498 = vst [vmem:[#allocation26_spill] sm:$0xff] %v10274_v28  ;;  %17499 = vst [vmem:[#allocation27_spill] sm:$0xff] %v10277_v29  ;;  %v10363_v48 = vadd.s32 64, %v10179_v4  ;;  %v10375_v50 = vadd.s32 64, %v10187_v6  ;;  %v10387_v52 = vadd.s32 64, %v10195_v8  ;;  %v10396_v53 = vadd.s32 64, %v10201_v10 }
  0x7f   : > { %17500 = vst [vmem:[#allocation28_spill] sm:$0xff] %v10282_v30  ;;  %17501 = vst [vmem:[#allocation29_spill] sm:$0xff] %v10285_v31  ;;  %8697 = vmatpush3.bf16.msra.mxu0 %v10352_v46  ;;  %8725 = vmatpush3.bf16.msra.mxu1 %v10352_v46  ;;  %v10401_v54 = vadd.s32 64, %v10209_v12  ;;  %v10406_v55 = vadd.s32 64, %v10217_v14  ;;  %v10411_v56 = vadd.s32 64, %v10225_v16  ;;  %v17121_v46 = vmov 3  }
  0x80   : > { %17502 = vst [vmem:[#allocation30_spill] sm:$0xff] %v10290_v32  ;;  %17503 = vst [vmem:[#allocation31_spill] sm:$0xff] %v10293_v33  ;;  %8698 = vmatprep.subr.bf16.mxu0 %v10366_v49  ;;  %8726 = vmatprep.subr.bf16.mxu1 %v10366_v49  ;;  %p18554_p10 = scmp.ne.s32.totalorder %s17476_s23, 0 }
  0x81   : > { %17504 = vst [vmem:[#allocation32_spill] sm:$0xff] %v10298_v34  ;;  %17505 = vst [vmem:[#allocation33_spill] sm:$0xff] %v10304_v36 }
  0x82   : > { %488 = vperm.xlu1 %9282, %v10192_v7   ;;  %485 = vperm.xlu0 %9281, %v10195_v8   ;;  %17506 = vst [vmem:[#allocation34_spill] sm:$0xff] %v10309_v37  ;;  %17507 = vst [vmem:[#allocation35_spill] sm:$0xff] %v10314_v38  ;;  %p9864_p2 = pnand %p9863_p9, %p18554_p10 }
  0x83   : > { %17508 = vst [vmem:[#allocation36_spill] sm:$0xff] %v10319_v39  ;;  %17509 = vst [vmem:[#allocation37_spill] sm:$0xff] %v10327_v41  ;;  %8699 = vmatpush3.bf16.msra.mxu0 %v10366_v49  ;;  %8727 = vmatpush3.bf16.msra.mxu1 %v10366_v49 }
  0x84   : > { %17510 = vst [vmem:[#allocation38_spill] sm:$0xff] %v10338_v43  ;;  %17511 = vst [vmem:[#allocation39_spill] sm:$0xff] %v10349_v45  ;;  %8700 = vmatprep.subr.bf16.mxu0 %v10378_v51  ;;  %8728 = vmatprep.subr.bf16.mxu1 %v10378_v51  ;;  %p9865_p3 = pneg %p9864_p2 }
  0x85   : > { %17513 = vst [vmem:[#allocation41_spill] sm:$0xff] %v10360_v47  ;;  %17514 = vst [vmem:[#allocation42_spill] sm:$0xff] %v10363_v48 }
  0x86   : > { %494 = vperm.xlu1 %9282, %v10198_v9   ;;  %491 = vperm.xlu0 %9281, %v10201_v10   ;;  %17516 = vst [vmem:[#allocation44_spill] sm:$0xff] %v10375_v50  ;;  %17518 = vst [vmem:[#allocation46_spill] sm:$0xff] %v10387_v52 }
  0x87   : > { %8701 = vmatpush3.bf16.msra.mxu0 %v10378_v51  ;;  %8729 = vmatpush3.bf16.msra.mxu1 %v10378_v51  ;;  %17519 = vst [vmem:[#allocation47_spill] sm:$0xff] %v10396_v53  ;;  %17520 = vst [vmem:[#allocation48_spill] sm:$0xff] %v10401_v54 }
  0x88   : > { %8746 = vmatprep.subr.bf16.mxu0 %v10321_v40  ;;  %8774 = vmatprep.subr.bf16.mxu1 %v10321_v40  ;;  %17521 = vst [vmem:[#allocation49_spill] sm:$0xff] %v10406_v55  ;;  %17522 = vst [vmem:[#allocation50_spill] sm:$0xff] %v10411_v56 }
  0x8a   : > { %500 = vperm.xlu1 %9282, %v10206_v11   ;;  %497 = vperm.xlu0 %9281, %v10209_v12  }
  0x8e   : > { %506 = vperm.xlu1 %9282, %v10214_v13   ;;  %503 = vperm.xlu0 %9281, %v10217_v14  }
  0x92   : > { %512 = vperm.xlu1 %9282, %v10222_v15   ;;  %509 = vperm.xlu0 %9281, %v10225_v16  }
  0x96   : > { %9284 = vset.pattern.permute.xlu1 %v9942_v19  ;;  %9283 = vset.pattern.permute.xlu0 %v9942_v19 }
  0x97   : > { %534 = vperm.xlu1 %9284, %v10232_v17   ;;  %531 = vperm.xlu0 %9283, %v10235_v18  }
  0x9b   : > { %537 = vperm.xlu1 %9284, %v10242_v20   ;;  %540 = vperm.xlu0 %9283, %v10245_v21  }
  0x9f   : > { %543 = vperm.xlu1 %9284, %v10250_v22   ;;  %546 = vperm.xlu0 %9283, %v10253_v23  }
  0xa3   : > { %549 = vperm.xlu1 %9284, %v10258_v24   ;;  %552 = vperm.xlu0 %9283, %v10261_v25  }
  0xa7   : > { %555 = vperm.xlu1 %9284, %v10266_v26   ;;  %558 = vperm.xlu0 %9283, %v10269_v27  }
  0xab   : > { %561 = vperm.xlu1 %9284, %v10274_v28   ;;  %564 = vperm.xlu0 %9283, %v10277_v29  }
  0xaf   : > { %567 = vperm.xlu1 %9284, %v10282_v30   ;;  %570 = vperm.xlu0 %9283, %v10285_v31  }
  0xb3   : > { %573 = vperm.xlu1 %9284, %v10290_v32   ;;  %576 = vperm.xlu0 %9283, %v10293_v33  }
  0xb7   : > { %9285 = vset.pattern.permute.xlu1 %v17092_v35  ;;  %889 = vperm.xlu0 %9283, %v10171_v2  }
  0xb8   : > { %611 = vperm.xlu1 %9285, %v10298_v34  }
  0xbb   : > { %898 = vperm.xlu0 %9283, %v10176_v3  }
  0xbc   : > { %617 = vperm.xlu1 %9285, %v10304_v36  }
  0xbf   : > { %904 = vperm.xlu0 %9283, %v10184_v5  }
  0xc0   : > { %620 = vperm.xlu1 %9285, %v10309_v37  }
  0xc3   : > { %910 = vperm.xlu0 %9283, %v10192_v7  }
  0xc4   : > { %626 = vperm.xlu1 %9285, %v10314_v38  }
  0xc7   : > { %916 = vperm.xlu0 %9283, %v10198_v9  }
  0xc8   : > { %632 = vperm.xlu1 %9285, %v10319_v39  }
  0xcb   : > { %922 = vperm.xlu0 %9283, %v10206_v11  }
  0xcc   : > { %638 = vperm.xlu1 %9285, %v10327_v41  }
  0xcf   : > { %928 = vperm.xlu0 %9283, %v10214_v13  }
  0xd0   : > { %644 = vperm.xlu1 %9285, %v10338_v43  }
  0xd3   : > { %934 = vperm.xlu0 %9283, %v10222_v15  }
  0xd4   : > { %650 = vperm.xlu1 %9285, %v10349_v45  }
  0xd7   : > { %9287 = vset.pattern.permute.xlu0 %v17092_v35 }
  0xd8   : > { %656 = vperm.xlu1 %9285, %v10360_v47   ;;  %614 = vperm.xlu0 %9287, %v10363_v48  }
  0xdc   : > { %9286 = vset.pattern.permute.xlu1 %v9942_v19  ;;  %623 = vperm.xlu0 %9287, %v10375_v50  }
  0xdd   : > { %892 = vperm.xlu1 %9286, %v10179_v4  }
  0xe0   : > { %629 = vperm.xlu0 %9287, %v10387_v52  }
  0xe1   : > { %895 = vperm.xlu1 %9286, %v10168_v1  }
  0xe4   : > { %635 = vperm.xlu0 %9287, %v10396_v53  }
  0xe5   : > { %901 = vperm.xlu1 %9286, %v10187_v6  }
  0xe8   : > { %641 = vperm.xlu0 %9287, %v10401_v54  }
  0xe9   : > { %907 = vperm.xlu1 %9286, %v10195_v8  }
  0xec   : > { %647 = vperm.xlu0 %9287, %v10406_v55  }
  0xed   : > { %913 = vperm.xlu1 %9286, %v10201_v10  }
  0xf0   : > { %653 = vperm.xlu0 %9287, %v10411_v56  }
  0xf1   : > { %919 = vperm.xlu1 %9286, %v10209_v12  }
  0xf4   : > { %956 = vperm.xlu0 %9287, %v10232_v17  }
  0xf5   : > { %v10417_v57 = vpop.permute.xlu1 %473  ;;  %925 = vperm.xlu1 %9286, %v10217_v14   ;;  %v10420_v58 = vpop.permute.xlu0 %467 }
  0xf8   : > { %965 = vperm.xlu0 %9287, %v10250_v22  }
  0xf9   : > { %v10423_v59 = vpop.permute.xlu1 %476  ;;  %931 = vperm.xlu1 %9286, %v10225_v16   ;;  %v10426_v60 = vpop.permute.xlu0 %470 }
  0xfc   : > { %971 = vperm.xlu0 %9287, %v10258_v24  }
  0xfd   : > { %v10429_v61 = vpop.permute.xlu1 %482  ;;  %9288 = vset.pattern.permute.xlu1 %v17092_v35  ;;  %v10432_v62 = vpop.permute.xlu0 %479 }
  0xfe   : > { %953 = vperm.xlu1 %9288, %v10235_v18  }
 0x100   : > { %977 = vperm.xlu0 %9287, %v10266_v26  }
 0x101   : > { %v10436_v63 = vpop.permute.xlu1 %488  ;;  %v10438_v19 = vpop.permute.xlu0 %485 }
 0x102   : > { %959 = vperm.xlu1 %9288, %v10242_v20  }
 0x104   : > { %983 = vperm.xlu0 %9287, %v10274_v28  }
 0x105   : > { %v10442_v0 = vpop.permute.xlu1 %494  ;;  %v10444_v24 = vpop.permute.xlu0 %491 }
 0x106   : > { %962 = vperm.xlu1 %9288, %v10245_v21  }
 0x108   : > { %989 = vperm.xlu0 %9287, %v10282_v30  }
 0x109   : > { %v10448_v35 = vpop.permute.xlu1 %500  ;;  %v10450_v51 = vpop.permute.xlu0 %497 }
 0x10a   : > { %968 = vperm.xlu1 %9288, %v10253_v23  }
 0x10c   : > { %995 = vperm.xlu0 %9287, %v10290_v32  }
 0x10d   : > { %v10454_v26 = vpop.permute.xlu1 %506  ;;  %v10456_v22 = vpop.permute.xlu0 %503 }
 0x10e   : > { %974 = vperm.xlu1 %9288, %v10261_v25  }
 0x110   : > { %1277 = vperm.xlu0 %9287, %v10179_v4  }
 0x111   : > { %v10460_v28 = vpop.permute.xlu1 %512  ;;  %v10462_v49 = vpop.permute.xlu0 %509 }
 0x112   : > { %17523 = vst [vmem:[#allocation51_spill] sm:$0xff] %v10460_v28  ;;  %17524 = vst [vmem:[#allocation52_spill] sm:$0xff] %v10462_v49  ;;  %980 = vperm.xlu1 %9288, %v10269_v27  }
 0x114   : > { %1286 = vperm.xlu0 %9287, %v10187_v6  }
 0x116   : > { %v10466_v30 = vpop.permute.xlu1 %534  ;;  %986 = vperm.xlu1 %9288, %v10277_v29   ;;  %v10469_v32 = vpop.permute.xlu0 %531 }
 0x118   : > { %1292 = vperm.xlu0 %9287, %v10195_v8  }
 0x11a   : > { %v10472_v20 = vpop.permute.xlu1 %537  ;;  %992 = vperm.xlu1 %9288, %v10285_v31   ;;  %v10475_v4 = vpop.permute.xlu0 %540 }
 0x11c   : > { %1298 = vperm.xlu0 %9287, %v10201_v10  }
 0x11e   : > { %v10478_v49 = vpop.permute.xlu1 %543  ;;  %998 = vperm.xlu1 %9288, %v10293_v33   ;;  %v10481_v6 = vpop.permute.xlu0 %546 }
 0x120   : > { %1304 = vperm.xlu0 %9287, %v10209_v12  }
 0x122   : > { %v10484_v28 = vpop.permute.xlu1 %549  ;;  %9289 = vset.pattern.permute.xlu1 %v17121_v46  ;;  %v10487_v8 = vpop.permute.xlu0 %552 }
 0x123   : > { %1036 = vperm.xlu1 %9289, %v10363_v48  }
 0x124   : > { %1310 = vperm.xlu0 %9287, %v10217_v14  }
 0x126   : > { %v10491_v10 = vpop.permute.xlu1 %555  ;;  %v10493_v17 = vpop.permute.xlu0 %558 }
 0x127   : > { %1039 = vperm.xlu1 %9289, %v10304_v36  }
 0x128   : > { %1316 = vperm.xlu0 %9287, %v10225_v16  }
 0x12a   : > { %v10497_v12 = vpop.permute.xlu1 %561  ;;  %v10499_v33 = vpop.permute.xlu0 %564 }
 0x12b   : > { %1045 = vperm.xlu1 %9289, %v10375_v50  }
 0x12c   : > { %9291 = vset.pattern.permute.xlu0 %v17121_v46 }
 0x12d   : > { %1033 = vperm.xlu0 %9291, %v10298_v34  }
 0x12e   : > { %v10504_v48 = vpop.permute.xlu1 %567  ;;  %v10506_v14 = vpop.permute.xlu0 %570 }
 0x12f   : > { %1051 = vperm.xlu1 %9289, %v10387_v52  }
 0x131   : > { %1042 = vperm.xlu0 %9291, %v10309_v37  }
 0x132   : > { %v10510_v36 = vpop.permute.xlu1 %573  ;;  %v10512_v16 = vpop.permute.xlu0 %576 }
 0x133   : > { %17525 = vst [vmem:[#allocation53_spill] sm:$0xff] %v10510_v36  ;;  %1057 = vperm.xlu1 %9289, %v10396_v53  }
 0x135   : > { %1048 = vperm.xlu0 %9291, %v10314_v38  }
 0x136   : > { %v10516_v50 = vpop.permute.xlu0 %889 }
 0x137   : > { %17526 = vst [vmem:[#allocation54_spill] sm:$0xff] %v10516_v50  ;;  %v612_v46 = vpop.permute.xlu1 %611  ;;  %1063 = vperm.xlu1 %9289, %v10401_v54   ;;  %v17530_v54 = vmov 2  }
 0x139   : > { %1054 = vperm.xlu0 %9291, %v10319_v39  }
 0x13a   : > { %v10520_v34 = vpop.permute.xlu0 %898 }
 0x13b   : > { %17527 = vst [vmem:[#allocation55_spill] sm:$0xff] %v10520_v34  ;;  %v618_v52 = vpop.permute.xlu1 %617  ;;  %1069 = vperm.xlu1 %9289, %v10406_v55  }
 0x13d   : > { %1060 = vperm.xlu0 %9291, %v10327_v41  }
 0x13e   : > { %v10524_v37 = vpop.permute.xlu0 %904 }
 0x13f   : > { %17528 = vst [vmem:[#allocation56_spill] sm:$0xff] %v10524_v37  ;;  %v621_v36 = vpop.permute.xlu1 %620  ;;  %1075 = vperm.xlu1 %9289, %v10411_v56   ;;  %v17142_v37 = vlaneseq }
 0x141   : > { %1066 = vperm.xlu0 %9291, %v10338_v43  }
 0x142   : > { %v10528_v50 = vpop.permute.xlu0 %910 }
 0x143   : > { %17529 = vst [vmem:[#allocation57_spill] sm:$0xff] %v10528_v50  ;;  %v627_v53 = vpop.permute.xlu1 %626  ;;  %9290 = vset.pattern.permute.xlu1 %v17530_v54  ;;  %v10545_v54 = vand.u32 127, %v17142_v37 }
 0x144   : > { %1274 = vperm.xlu1 %9290, %v10171_v2  }
 0x145   : > { %1072 = vperm.xlu0 %9291, %v10349_v45   ;;  %vm515_vm0 = vcmp.eq.s32.totalorder %v10426_v60, %v10545_v54  ;;  %vm579_vm1 = vcmp.eq.s32.totalorder %v10466_v30, %v10545_v54  ;;  %vm514_vm2 = vcmp.eq.s32.totalorder %v10420_v58, %v10545_v54  ;;  %vm578_vm3 = vcmp.eq.s32.totalorder %v10469_v32, %v10545_v54 }
 0x146   : > { %v10533_v34 = vpop.permute.xlu0 %916  ;;  %vm580_vm4 = vcmp.eq.s32.totalorder %v10472_v20, %v10545_v54  ;;  %vm10564_vm5 = vmor %vm515_vm0, %vm579_vm1  ;;  %vm581_vm6 = vcmp.eq.s32.totalorder %v10475_v4, %v10545_v54  ;;  %vm516_vm7 = vcmp.eq.s32.totalorder %v10417_v57, %v10545_v54  ;;  %vm583_vm9 = vcmp.eq.s32.totalorder %v10481_v6, %v10545_v54 }
 0x147   : > { %v10535_v55 = vpop.permute.xlu1 %632  ;;  %vm10574_vm8 = vmor %vm514_vm2, %vm578_vm3  ;;  %vm517_vm10 = vcmp.eq.s32.totalorder %v10423_v59, %v10545_v54  ;;  %vm661_vm12 = vcmp.eq.s32.totalorder %v621_v36, %v10545_v54  ;;  %vm519_vm13 = vcmp.eq.s32.totalorder %v10429_v61, %v10545_v54  ;;  %vm658_vm15 = vcmp.eq.s32.totalorder %v612_v46, %v10545_v54 }
 0x148   : > { %1280 = vperm.xlu1 %9290, %v10168_v1   ;;  %vm10584_vm11 = vmor %vm516_vm7, %vm580_vm4  ;;  %vm660_vm1 = vcmp.eq.s32.totalorder %v618_v52, %v10545_v54  ;;  %vm663_vm4 = vcmp.eq.s32.totalorder %v627_v53, %v10545_v54  ;;  %vm518_vm7 = vcmp.eq.s32.totalorder %v10432_v62, %v10545_v54  ;;  %v17143_v46 = vmov 0.0  }
 0x149   : > { %1078 = vperm.xlu0 %9291, %v10360_v47   ;;  %vm597_vm14 = vmor %vm517_vm10, %vm581_vm6  ;;  %v17547_v53 = vmov 3  }
 0x14a   : > { %v10539_v56 = vpop.permute.xlu0 %922  ;;  %vm10594_vm0 = vmor %vm519_vm13, %vm583_vm9  ;;  %vm582_vm9 = vcmp.eq.s32.totalorder %v10478_v49, %v10545_v54 }
 0x14b   : > { %v10541_v43 = vpop.permute.xlu1 %638  ;;  %vm677_vm2 = vmor %vm597_vm14, %vm661_vm12  ;;  %vm585_vm12 = vcmp.eq.s32.totalorder %v10487_v8, %v10545_v54 }
 0x14c   : > { %1283 = vperm.xlu1 %9290, %v10176_v3   ;;  %vm674_vm3 = vmor %vm10574_vm8, %vm658_vm15  ;;  %v8013_v52 = vsel %vm677_vm2, 1.0, %v17143_v46  ;;  %vm584_vm2 = vcmp.eq.s32.totalorder %v10484_v28, %v10545_v54  ;;  %v17557_v28 = vld [vmem:[#allocation43_spill] sm:$0xff] }
 0x14d   : > { %1338 = vperm.xlu0 %9291, %v10235_v18   ;;  %vm676_vm10 = vmor %vm10584_vm11, %vm660_vm1  ;;  %v8010_v61 = vsel %vm674_vm3, 1.0, %v17143_v46  ;;  %vm766_vm11 = vcmask 785408   ;;  %vm520_vm1 = vcmp.eq.s32.totalorder %v10438_v19, %v10545_v54 }
 0x14e   : > { %v10548_v50 = vpop.permute.xlu0 %928  ;;  %vm10620_vm13 = vmor %vm10594_vm0, %vm663_vm4  ;;  %v8012_v4 = vsel %vm676_vm10, 1.0, %v17143_v46  ;;  %vm521_vm0 = vcmp.eq.s32.totalorder %v10436_v63, %v10545_v54  ;;  %vm667_vm10 = vcmp.eq.s32.totalorder %v10541_v43, %v10545_v54 }
 0x14f   : > { %v10554_v1 = vpop.permute.xlu1 %644  ;;  %vm598_vm14 = vmor %vm518_vm7, %vm582_vm9  ;;  %v723_v32 = vpack.c.bf16 %v8013_v52, %v8012_v4  ;;  %v8015_v58 = vsel %vm10620_vm13, 1.0, %v17143_v46  ;;  %vm522_vm13 = vcmp.eq.s32.totalorder %v10444_v24, %v10545_v54  ;;  %v17559_v24 = vld [vmem:[#allocation45_spill] sm:$0xff] }
 0x150   : > { %1289 = vperm.xlu1 %9290, %v10184_v5   ;;  %vm601_vm4 = vmor %vm521_vm0, %vm585_vm12  ;;  %vm523_vm12 = vcmp.eq.s32.totalorder %v10442_v0, %v10545_v54  ;;  %vm589_vm0 = vcmp.eq.s32.totalorder %v10499_v33, %v10545_v54 }
 0x151   : > { %1347 = vperm.xlu0 %9291, %v10245_v21   ;;  %vm600_vm9 = vmor %vm520_vm1, %vm584_vm2 }
 0x152   : > { %v10570_v30 = vpop.permute.xlu0 %934 }
 0x153   : > { %v10580_v20 = vpop.permute.xlu1 %650 }
 0x154   : > { %1295 = vperm.xlu1 %9290, %v10192_v7  }
 0x155   : > { %1353 = vperm.xlu0 %9291, %v10253_v23  }
 0x157   : > { %v10599_v59 = vpop.permute.xlu1 %656  ;;  %v615_v36 = vpop.permute.xlu0 %614 }
 0x158   : > { %vm659_vm6 = vcmp.eq.s32.totalorder %v615_v36, %v10545_v54  ;;  %1301 = vperm.xlu1 %9290, %v10198_v9  }
 0x159   : > { %1359 = vperm.xlu0 %9291, %v10261_v25   ;;  %vm675_vm8 = vmor %vm10564_vm5, %vm659_vm6  ;;  %vm665_vm5 = vcmp.eq.s32.totalorder %v10535_v55, %v10545_v54  ;;  %vm587_vm6 = vcmp.eq.s32.totalorder %v10493_v17, %v10545_v54 }
 0x15a   : > { %v8011_v62 = vsel %vm675_vm8, 1.0, %v17143_v46  ;;  %vm10653_vm7 = vmor %vm601_vm4, %vm665_vm5 }
 0x15b   : > { %v624_v49 = vpop.permute.xlu0 %623  ;;  %v722_v60 = vpack.c.bf16 %v8011_v62, %v8010_v61  ;;  %v8017_v55 = vsel %vm10653_vm7, 1.0, %v17143_v46  ;;  %vm524_vm7 = vcmp.eq.s32.totalorder %v10450_v51, %v10545_v54 }
 0x15c   : > { %vm662_vm15 = vcmp.eq.s32.totalorder %v624_v49, %v10545_v54  ;;  %v10630_v6 = vpop.permute.xlu1 %892  ;;  %1307 = vperm.xlu1 %9290, %v10206_v11   ;;  %v17549_v49 = vld [vmem:[#allocation31_spill] sm:$0xff] }
 0x15d   : > { %vm678_vm3 = vmor %vm598_vm14, %vm662_vm15  ;;  %1365 = vperm.xlu0 %9291, %v10269_v27   ;;  %8702 = vmatprep.mubr.msk.bf16.mxu0 %vm766_vm11, %v722_v60  ;;  %vm586_vm14 = vcmp.eq.s32.totalorder %v10491_v10, %v10545_v54  ;;  %v17553_v60 = vld [vmem:[#allocation51_spill] sm:$0xff] }
 0x15e   : > { %v8014_v63 = vsel %vm678_vm3, 1.0, %v17143_v46  ;;  %8703 = vmatmul.mubr.msk.bf16.vlgmr.msra.gmra.mrb[0].mxu0 %vm766_vm11, %v723_v32  ;;  %vm603_vm15 = vmor %vm523_vm12, %vm587_vm6  ;;  %vm669_vm3 = vcmp.eq.s32.totalorder %v10554_v1, %v10545_v54  ;;  %vm525_vm6 = vcmp.eq.s32.totalorder %v10448_v35, %v10545_v54  ;;  %vm591_vm12 = vcmp.eq.s32.totalorder %v10506_v14, %v10545_v54  ;;  %v17548_v1 = vld [vmem:[#allocation16_spill] sm:$0xff]  ;;  %v17555_v32 = vld [vmem:[#allocation53_spill] sm:$0xff] }
 0x15f   : > { %v724_v19 = vpack.c.bf16 %v8015_v58, %v8014_v63  ;;  %v630_v8 = vpop.permute.xlu0 %629  ;;  %8747 = vmatpush3.bf16.msra.mxu0 %v10321_v40  ;;  %vm10686_vm1 = vmor %vm603_vm15, %vm667_vm10  ;;  %v17556_v58 = vld [vmem:[#allocation18_spill] sm:$0xff] }
 0x160   : > { %vm664_vm8 = vcmp.eq.s32.totalorder %v630_v8, %v10545_v54  ;;  %v10661_v57 = vpop.permute.xlu1 %895  ;;  %1313 = vperm.xlu1 %9290, %v10214_v13   ;;  %8748 = vmatprep.subr.bf16.mxu0 %v10330_v42  ;;  %vm602_vm2 = vmor %vm522_vm13, %vm586_vm14  ;;  %v8019_v43 = vsel %vm10686_vm1, 1.0, %v17143_v46  ;;  %vm526_vm1 = vcmp.eq.s32.totalorder %v10456_v22, %v10545_v54  ;;  %v17550_v22 = vld [vmem:[#allocation40_spill] sm:$0xff] }
 0x161   : > { %vm680_vm5 = vmor %vm600_vm9, %vm664_vm8  ;;  %1371 = vperm.xlu0 %9291, %v10277_v29   ;;  %8706 = vmatprep.mubr.msk.bf16.mxu0 %vm766_vm11, %v724_v19  ;;  %vm588_vm9 = vcmp.eq.s32.totalorder %v10497_v12, %v10545_v54 }
 0x162   : > { %v8016_v0 = vsel %vm680_vm5, 1.0, %v17143_v46  ;;  %vm605_vm8 = vmor %vm525_vm6, %vm589_vm0  ;;  %vm671_vm5 = vcmp.eq.s32.totalorder %v10580_v20, %v10545_v54  ;;  %vm527_vm0 = vcmp.eq.s32.totalorder %v10454_v26, %v10545_v54  ;;  %vm593_vm6 = vcmp.eq.s32.totalorder %v10512_v16, %v10545_v54  ;;  %v17554_v20 = vld [vmem:[#allocation52_spill] sm:$0xff] }
 0x163   : > { %v725_v17 = vpack.c.bf16 %v8017_v55, %v8016_v0  ;;  %v636_v10 = vpop.permute.xlu0 %635  ;;  %8749 = vmatpush3.bf16.msra.mxu0 %v10330_v42  ;;  %vm10717_vm13 = vmor %vm605_vm8, %vm669_vm3  ;;  %v17558_v16 = vld [vmem:[#allocation20_spill] sm:$0xff] }
 0x164   : > { %vm666_vm4 = vcmp.eq.s32.totalorder %v636_v10, %v10545_v54  ;;  %v10693_v36 = vpop.permute.xlu1 %901  ;;  %1319 = vperm.xlu1 %9290, %v10222_v15   ;;  %8750 = vmatprep.subr.bf16.mxu0 %v10341_v44  ;;  %vm604_vm14 = vmor %vm524_vm7, %vm588_vm9  ;;  %v8021_v61 = vsel %vm10717_vm13, 1.0, %v17143_v46  ;;  %vm528_vm13 = vcmp.eq.s32.totalorder %v17554_v20, %v10545_v54 }
 0x165   : > { %vm682_vm10 = vmor %vm602_vm2, %vm666_vm4  ;;  %1377 = vperm.xlu0 %9291, %v10285_v31   ;;  %vm590_vm2 = vcmp.eq.s32.totalorder %v10504_v48, %v10545_v54  ;;  %v17563_v48 = vld [vmem:[#allocation28_spill] sm:$0xff]  ;;  %v17578_v31 = vld [vmem:[#allocation38_spill] sm:$0xff] }
 0x166   : > { %v8018_v35 = vsel %vm682_vm10, 1.0, %v17143_v46  ;;  %8707 = vmatmul.mubr.msk.bf16.gmra.mrb[4].mxu0 %vm766_vm11, %v725_v17  ;;  %vm607_vm4 = vmor %vm527_vm0, %vm591_vm12  ;;  %vm673_vm10 = vcmp.eq.s32.totalorder %v10599_v59, %v10545_v54  ;;  %vm529_vm12 = vcmp.eq.s32.totalorder %v17553_v60, %v10545_v54  ;;  %v17564_v60 = vld [vmem:[#allocation30_spill] sm:$0xff] }
 0x167   : > { %v726_v12 = vpack.c.bf16 %v8019_v43, %v8018_v35  ;;  %v642_v33 = vpop.permute.xlu0 %641  ;;  %8751 = vmatpush3.bf16.msra.mxu0 %v10341_v44  ;;  %vm10751_vm7 = vmor %vm607_vm4, %vm671_vm5  ;;  %v17560_v35 = vld [vmem:[#allocation22_spill] sm:$0xff] }
 0x168   : > { %vm668_vm15 = vcmp.eq.s32.totalorder %v642_v33, %v10545_v54  ;;  %v10725_v52 = vpop.permute.xlu1 %907  ;;  %9292 = vset.pattern.permute.xlu1 %v17547_v53  ;;  %8752 = vmatprep.subr.bf16.mxu0 %v17550_v22  ;;  %vm606_vm9 = vmor %vm526_vm1, %vm590_vm2  ;;  %v8023_v59 = vsel %vm10751_vm7, 1.0, %v17143_v46 }
 0x169   : > { %vm684_vm3 = vmor %vm604_vm14, %vm668_vm15  ;;  %1341 = vperm.xlu1 %9292, %v17548_v1   ;;  %1383 = vperm.xlu0 %9291, %v17549_v49   ;;  %vm592_vm14 = vcmp.eq.s32.totalorder %v17555_v32, %v10545_v54  ;;  %v17145_v32 = vmov 4  }
 0x16a   : > { %v8020_v26 = vsel %vm684_vm3, 1.0, %v17143_v46  ;;  %8710 = vmatprep.mubr.msk.bf16.mxu0 %vm766_vm11, %v726_v12  ;;  %vm609_vm15 = vmor %vm529_vm12, %vm593_vm6  ;;  %v17561_v12 = vld [vmem:[#allocation24_spill] sm:$0xff] }
 0x16b   : > { %v727_v14 = vpack.c.bf16 %v8021_v61, %v8020_v26  ;;  %v648_v62 = vpop.permute.xlu0 %647  ;;  %8753 = vmatpush3.bf16.msra.mxu0 %v17550_v22  ;;  %vm689_vm0 = vmor %vm609_vm15, %vm673_vm10  ;;  %v17562_v61 = vld [vmem:[#allocation26_spill] sm:$0xff] }
 0x16c   : > { %vm670_vm8 = vcmp.eq.s32.totalorder %v648_v62, %v10545_v54  ;;  %v10758_v4 = vpop.permute.xlu1 %913  ;;  %8754 = vmatprep.subr.bf16.mxu0 %v17557_v28  ;;  %vm608_vm1 = vmor %vm528_vm13, %vm592_vm14  ;;  %v8025_v55 = vsel %vm689_vm0, 1.0, %v17143_v46 }
 0x16d   : > { %vm686_vm5 = vmor %vm606_vm9, %vm670_vm8  ;;  %1344 = vperm.xlu1 %9292, %v17556_v58   ;;  %1675 = vperm.xlu0 %9291, %v10171_v2   ;;  %vm937_vm9 = vcmp.eq.s32.totalorder %v10630_v6, %v10545_v54  ;;  %v17585_v6 = vld [vmem:[#allocation55_spill] sm:$0xff] }
 0x16e   : > { %v8022_v63 = vsel %vm686_vm5, 1.0, %v17143_v46  ;;  %8711 = vmatmul.mubr.msk.bf16.gmra.mrb[8].mxu0 %vm766_vm11, %v727_v14  ;;  %vm939_vm0 = vcmp.eq.s32.totalorder %v17585_v6, %v10545_v54 }
 0x16f   : > { %v728_v19 = vpack.c.bf16 %v8023_v59, %v8022_v63  ;;  %v654_v8 = vpop.permute.xlu0 %653  ;;  %8755 = vmatpush3.bf16.msra.mxu0 %v17557_v28  ;;  %v17565_v59 = vld [vmem:[#allocation32_spill] sm:$0xff] }
 0x170   : > { %vm672_vm2 = vcmp.eq.s32.totalorder %v654_v8, %v10545_v54  ;;  %v10779_v2 = vpop.permute.xlu1 %919  ;;  %8756 = vmatprep.subr.bf16.mxu0 %v17559_v24 }
 0x171   : > { %vm688_vm3 = vmor %vm608_vm1, %vm672_vm2  ;;  %1350 = vperm.xlu1 %9292, %v17558_v16   ;;  %1684 = vperm.xlu0 %9291, %v10176_v3   ;;  %vm938_vm1 = vcmp.eq.s32.totalorder %v10661_v57, %v10545_v54 }
 0x172   : > { %v8024_v0 = vsel %vm688_vm3, 1.0, %v17143_v46  ;;  %8714 = vmatprep.mubr.msk.bf16.mxu0 %vm766_vm11, %v728_v19  ;;  %v17566_v19 = vld [vmem:[#allocation33_spill] sm:$0xff]  ;;  %v17572_v46 = vld [vmem:[#allocation46_spill] sm:$0xff] }
 0x173   : > { %v729_v17 = vpack.c.bf16 %v8025_v55, %v8024_v0  ;;  %v10788_v10 = vpop.permute.xlu0 %956  ;;  %8757 = vmatpush3.bf16.msra.mxu0 %v17559_v24  ;;  %v17569_v0 = vld [vmem:[#allocation34_spill] sm:$0xff] }
 0x174   : > { %v10790_v43 = vpop.permute.xlu1 %925  ;;  %8802 = vmatprep.subr.bf16.mxu0 %v10321_v40  ;;  %vm1001_vm4 = vcmp.eq.s32.totalorder %v10788_v10, %v10545_v54 }
 0x175   : > { %1356 = vperm.xlu1 %9292, %v17560_v35   ;;  %1690 = vperm.xlu0 %9291, %v10184_v5   ;;  %vm1017_vm8 = vmor %vm937_vm9, %vm1001_vm4 }
 0x176   : > { %8715 = vmatmul.mubr.msk.bf16.gmra.mrb[12].mxu0 %vm766_vm11, %v729_v17  ;;  %v17570_v17 = vld [vmem:[#allocation44_spill] sm:$0xff] }
 0x177   : > { %v10797_v3 = vpop.permute.xlu0 %965 }
 0x178   : > { %v10799_v51 = vpop.permute.xlu1 %931 }
 0x179   : > { %1362 = vperm.xlu1 %9292, %v17561_v12   ;;  %1696 = vperm.xlu0 %9291, %v10192_v7  }
 0x17b   : > { %v10803_v33 = vpop.permute.xlu0 %971 }
 0x17d   : > { %1368 = vperm.xlu1 %9292, %v17562_v61   ;;  %v954_v26 = vpop.permute.xlu1 %953  ;;  %1702 = vperm.xlu0 %9291, %v10198_v9  }
 0x17e   : > { %vm1000_vm10 = vcmp.eq.s32.totalorder %v954_v26, %v10545_v54 }
 0x17f   : > { %v10807_v5 = vpop.permute.xlu0 %977 }
 0x181   : > { %1374 = vperm.xlu1 %9292, %v17563_v48   ;;  %v10810_v14 = vpop.permute.xlu1 %959  ;;  %1708 = vperm.xlu0 %9291, %v10206_v11  }
 0x182   : > { %vm1002_vm12 = vcmp.eq.s32.totalorder %v10810_v14, %v10545_v54  ;;  %v10894_v14 = vld [vmem:[%s10165_s26 + $0x8] sm:$0xff] }
 0x183   : > { %v10813_v62 = vpop.permute.xlu0 %983  ;;  %vm1018_vm4 = vmor %vm938_vm1, %vm1002_vm12 }
 0x185   : > { %1380 = vperm.xlu1 %9292, %v17564_v60   ;;  %v10816_v7 = vpop.permute.xlu1 %962  ;;  %1714 = vperm.xlu0 %9291, %v10214_v13   ;;  %v17567_v13 = vld [vmem:[#allocation42_spill] sm:$0xff] }
 0x186   : > { %vm1003_vm2 = vcmp.eq.s32.totalorder %v10816_v7, %v10545_v54 }
 0x187   : > { %v10819_v20 = vpop.permute.xlu0 %989  ;;  %vm1019_vm9 = vmor %vm939_vm0, %vm1003_vm2  ;;  %vm1006_vm0 = vcmp.eq.s32.totalorder %v10803_v33, %v10545_v54 }
 0x189   : > { %9293 = vset.pattern.permute.xlu1 %v17145_v32  ;;  %v10822_v9 = vpop.permute.xlu1 %968  ;;  %1720 = vperm.xlu0 %9291, %v10222_v15  }
 0x18a   : > { %1418 = vperm.xlu1 %9293, %v17565_v59  }
 0x18b   : > { %v10826_v11 = vpop.permute.xlu0 %995 }
 0x18d   : > { %v10828_v63 = vpop.permute.xlu1 %974  ;;  %9295 = vset.pattern.permute.xlu0 %v17145_v32 }
 0x18e   : > { %1424 = vperm.xlu1 %9293, %v17566_v19   ;;  %1421 = vperm.xlu0 %9295, %v17567_v13  }
 0x18f   : > { %v10833_v8 = vpop.permute.xlu0 %1277 }
 0x190   : > { %17568 = vst [vmem:[#allocation40_spill] sm:$0xff] %v10833_v8  ;;  %v17574_v8 = vld [vmem:[#allocation47_spill] sm:$0xff] }
 0x191   : > { %v10835_v55 = vpop.permute.xlu1 %980 }
 0x192   : > { %1427 = vperm.xlu1 %9293, %v17569_v0   ;;  %1430 = vperm.xlu0 %9295, %v17570_v17  }
 0x193   : > { %v10839_v15 = vpop.permute.xlu0 %1286 }
 0x194   : > { %17571 = vst [vmem:[#allocation51_spill] sm:$0xff] %v10839_v15  ;;  %v17576_v15 = vld [vmem:[#allocation48_spill] sm:$0xff] }
 0x195   : > { %v10841_v37 = vpop.permute.xlu1 %986 }
 0x196   : > { %1433 = vperm.xlu1 %9293, %v10314_v38   ;;  %1436 = vperm.xlu0 %9295, %v17572_v46  }
 0x197   : > { %v10845_v32 = vpop.permute.xlu0 %1292 }
 0x198   : > { %17573 = vst [vmem:[#allocation52_spill] sm:$0xff] %v10845_v32  ;;  %v17579_v32 = vld [vmem:[#allocation49_spill] sm:$0xff] }
 0x199   : > { %v10847_v19 = vpop.permute.xlu1 %992 }
 0x19a   : > { %1439 = vperm.xlu1 %9293, %v10319_v39   ;;  %1442 = vperm.xlu0 %9295, %v17574_v8   ;;  %v17581_v39 = vld [vmem:[#allocation50_spill] sm:$0xff] }
 0x19b   : > { %v10851_v13 = vpop.permute.xlu0 %1298 }
 0x19c   : > { %17575 = vst [vmem:[#allocation53_spill] sm:$0xff] %v10851_v13 }
 0x19d   : > { %v10853_v49 = vpop.permute.xlu1 %998 }
 0x19e   : > { %1445 = vperm.xlu1 %9293, %v10327_v41   ;;  %1448 = vperm.xlu0 %9295, %v17576_v15  }
 0x19f   : > { %v10857_v17 = vpop.permute.xlu0 %1304 }
 0x1a0   : > { %17577 = vst [vmem:[#allocation43_spill] sm:$0xff] %v10857_v17  ;;  %v17582_v17 = vld [vmem:[#allocation54_spill] sm:$0xff] }
 0x1a1   : > { %vm936_vm7 = vcmp.eq.s32.totalorder %v17582_v17, %v10545_v54  ;;  %17586 = vst [vmem:[#allocation54_spill] sm:$0xff] %v10894_v14  ;;  %v17587_v17 = vmov 0.0  }
 0x1a2   : > { %1451 = vperm.xlu1 %9293, %v17578_v31   ;;  %v1037_v46 = vpop.permute.xlu1 %1036  ;;  %1454 = vperm.xlu0 %9295, %v17579_v32   ;;  %vm1016_vm14 = vmor %vm936_vm7, %vm1000_vm10 }
 0x1a3   : > { %v10861_v38 = vpop.permute.xlu0 %1310  ;;  %vm1081_vm6 = vcmp.eq.s32.totalorder %v1037_v46, %v10545_v54  ;;  %v17588_v46 = vld [vmem:[#allocation56_spill] sm:$0xff] }
 0x1a4   : > { %17580 = vst [vmem:[#allocation45_spill] sm:$0xff] %v10861_v38  ;;  %vm10879_vm13 = vmor %vm1017_vm8, %vm1081_vm6  ;;  %vm1004_vm6 = vcmp.eq.s32.totalorder %v10797_v3, %v10545_v54  ;;  %vm941_vm12 = vcmp.eq.s32.totalorder %v17588_v46, %v10545_v54 }
 0x1a5   : > { %v8041_v57 = vsel %vm10879_vm13, 1.0, %v17587_v17  ;;  %vm940_vm13 = vcmp.eq.s32.totalorder %v10693_v36, %v10545_v54 }
 0x1a6   : > { %1457 = vperm.xlu1 %9293, %v10349_v45   ;;  %v1040_v8 = vpop.permute.xlu1 %1039  ;;  %1460 = vperm.xlu0 %9295, %v17581_v39  }
 0x1a7   : > { %v10865_v13 = vpop.permute.xlu0 %1316  ;;  %vm1082_vm5 = vcmp.eq.s32.totalorder %v1040_v8, %v10545_v54 }
 0x1a8   : > { %vm1098_vm7 = vmor %vm1018_vm4, %vm1082_vm5 }
 0x1a9   : > { %v8042_v8 = vsel %vm1098_vm7, 1.0, %v17587_v17  ;;  %vm942_vm7 = vcmp.eq.s32.totalorder %v10725_v52, %v10545_v54  ;;  %v11105_v52 = vld [vmem:[#allocation2] sm:$0xff]  }
 0x1aa   : > { %1463 = vperm.xlu1 %9293, %v10360_v47   ;;  %v1046_v38 = vpop.permute.xlu1 %1045  ;;  %1742 = vperm.xlu0 %9295, %v17548_v1  }
 0x1ab   : > { %vm1084_vm10 = vcmp.eq.s32.totalorder %v1046_v38, %v10545_v54 }
 0x1ac   : > { %v1034_v10 = vpop.permute.xlu0 %1033 }
 0x1ad   : > { %vm1080_vm15 = vcmp.eq.s32.totalorder %v1034_v10, %v10545_v54 }
 0x1ae   : > { %vm1096_vm3 = vmor %vm1016_vm14, %vm1080_vm15  ;;  %9294 = vset.pattern.permute.xlu1 %v17547_v53  ;;  %v1052_v26 = vpop.permute.xlu1 %1051  ;;  %1751 = vperm.xlu0 %9295, %v17558_v16   ;;  %vm1005_vm14 = vcmp.eq.s32.totalorder %v10822_v9, %v10545_v54 }
 0x1af   : > { %1678 = vperm.xlu1 %9294, %v10894_v14   ;;  %v8040_v10 = vsel %vm1096_vm3, 1.0, %v17587_v17  ;;  %vm1020_vm15 = vmor %vm940_vm13, %vm1004_vm6  ;;  %vm1086_vm3 = vcmp.eq.s32.totalorder %v1052_v26, %v10545_v54 }
 0x1b0   : > { %v1043_v53 = vpop.permute.xlu0 %1042  ;;  %v1144_v7 = vpack.c.bf16 %v8041_v57, %v8040_v10  ;;  %v10921_v10 = vld [vmem:[%s10165_s26 + $0x10] sm:$0xff]  ;;  %vm1100_vm1 = vmor %vm1020_vm15, %vm1084_vm10 }
 0x1b1   : > { %vm1083_vm8 = vcmp.eq.s32.totalorder %v1043_v53, %v10545_v54  ;;  %vm1021_vm2 = vmor %vm941_vm12, %vm1005_vm14  ;;  %v17589_v57 = vld [vmem:[#allocation57_spill] sm:$0xff]  ;;  %v8044_v33 = vsel %vm1100_vm1, 1.0, %v17587_v17  ;;  %vm1008_vm12 = vcmp.eq.s32.totalorder %v10807_v5, %v10545_v54  ;;  %vm944_vm1 = vcmp.eq.s32.totalorder %v10758_v4, %v10545_v54 }
 0x1b2   : > { %vm1099_vm5 = vmor %vm1019_vm9, %vm1083_vm8  ;;  %v1058_v3 = vpop.permute.xlu1 %1057  ;;  %1757 = vperm.xlu0 %9295, %v17560_v35   ;;  %8730 = vmatprep.mubr.msk.bf16.mxu1 %vm766_vm11, %v1144_v7  ;;  %vm943_vm6 = vcmp.eq.s32.totalorder %v17589_v57, %v10545_v54  ;;  %vm1007_vm9 = vcmp.eq.s32.totalorder %v10828_v63, %v10545_v54  ;;  %v10944_v7 = vld [vmem:[%s10165_s26 + $0x20] sm:$0xff]  ;;  %v10981_v4 = vld [vmem:[%s10165_s26 + $0x30] sm:$0xff] }
 0x1b3   : > { %v8043_v6 = vsel %vm1099_vm5, 1.0, %v17587_v17  ;;  %1681 = vperm.xlu1 %9294, %v10921_v10   ;;  %vm1022_vm8 = vmor %vm942_vm7, %vm1006_vm0  ;;  %17590 = vst [vmem:[#allocation55_spill] sm:$0xff] %v10944_v7  ;;  %vm1088_vm5 = vcmp.eq.s32.totalorder %v1058_v3, %v10545_v54  ;;  %vm945_vm0 = vcmp.eq.s32.totalorder %v10533_v34, %v10545_v54 }
 0x1b4   : > { %v1145_v36 = vpack.c.bf16 %v8043_v6, %v8042_v8  ;;  %v1049_v9 = vpop.permute.xlu0 %1048  ;;  %vm10952_vm13 = vmor %vm1022_vm8, %vm1086_vm3  ;;  %17593 = vst [vmem:[#allocation56_spill] sm:$0xff] %v10981_v4 }
 0x1b5   : > { %vm1085_vm4 = vcmp.eq.s32.totalorder %v1049_v9, %v10545_v54  ;;  %vm1023_vm14 = vmor %vm943_vm6, %vm1007_vm9  ;;  %v8046_v63 = vsel %vm10952_vm13, 1.0, %v17587_v17  ;;  %vm1010_vm6 = vcmp.eq.s32.totalorder %v10813_v62, %v10545_v54  ;;  %vm946_vm13 = vcmp.eq.s32.totalorder %v10779_v2, %v10545_v54  ;;  %v11018_v2 = vld [vmem:[%s10165_s26 + $0x40] sm:$0xff] }
 0x1b6   : > { %vm1101_vm10 = vmor %vm1021_vm2, %vm1085_vm4  ;;  %v1064_v38 = vpop.permute.xlu1 %1063  ;;  %1763 = vperm.xlu0 %9295, %v17561_v12   ;;  %8731 = vmatmul.mubr.msk.bf16.vlgmr.msra.gmra.mrb[0].mxu1 %vm766_vm11, %v1145_v36  ;;  %vm1009_vm2 = vcmp.eq.s32.totalorder %v10835_v55, %v10545_v54  ;;  %17596 = vst [vmem:[#allocation57_spill] sm:$0xff] %v11018_v2 }
 0x1b7   : > { %v8045_v53 = vsel %vm1101_vm10, 1.0, %v17587_v17  ;;  %1687 = vperm.xlu1 %9294, %v10944_v7   ;;  %8775 = vmatpush3.bf16.msra.mxu1 %v10321_v40  ;;  %vm1024_vm4 = vmor %vm944_vm1, %vm1008_vm12  ;;  %vm1090_vm10 = vcmp.eq.s32.totalorder %v1064_v38, %v10545_v54  ;;  %vm947_vm12 = vcmp.eq.s32.totalorder %v10539_v56, %v10545_v54  ;;  %v11046_v56 = vld [vmem:[%s10165_s26 + $0x50] sm:$0xff] }
 0x1b8   : > { %v1146_v46 = vpack.c.bf16 %v8045_v53, %v8044_v33  ;;  %v1055_v8 = vpop.permute.xlu0 %1054  ;;  %8776 = vmatprep.subr.bf16.mxu1 %v10330_v42  ;;  %vm10989_vm7 = vmor %vm1024_vm4, %vm1088_vm5  ;;  %17597 = vst [vmem:[#allocation58_spill] sm:$0xff] %v11046_v56  ;;  %v11097_v33 = vld [vmem:[%s10165_s26 + $0x70] sm:$0xff] }
 0x1b9   : > { %vm1087_vm15 = vcmp.eq.s32.totalorder %v1055_v8, %v10545_v54  ;;  %vm1025_vm9 = vmor %vm945_vm0, %vm1009_vm2  ;;  %v8048_v34 = vsel %vm10989_vm7, 1.0, %v17587_v17  ;;  %vm1012_vm0 = vcmp.eq.s32.totalorder %v10819_v20, %v10545_v54  ;;  %vm948_vm7 = vcmp.eq.s32.totalorder %v10790_v43, %v10545_v54  ;;  %17599 = vst [vmem:[#allocation60_spill] sm:$0xff] %v11097_v33 }
 0x1ba   : > { %vm1103_vm3 = vmor %vm1023_vm14, %vm1087_vm15  ;;  %v1070_v40 = vpop.permute.xlu1 %1069  ;;  %1769 = vperm.xlu0 %9295, %v17562_v61   ;;  %8734 = vmatprep.mubr.msk.bf16.mxu1 %vm766_vm11, %v1146_v46  ;;  %vm1011_vm14 = vcmp.eq.s32.totalorder %v10841_v37, %v10545_v54  ;;  %v17600_v46 = vmov 4  }
 0x1bb   : > { %v8047_v26 = vsel %vm1103_vm3, 1.0, %v17587_v17  ;;  %1693 = vperm.xlu1 %9294, %v10981_v4   ;;  %8777 = vmatpush3.bf16.msra.mxu1 %v10330_v42  ;;  %vm1026_vm15 = vmor %vm946_vm13, %vm1010_vm6  ;;  %vm1092_vm3 = vcmp.eq.s32.totalorder %v1070_v40, %v10545_v54  ;;  %vm949_vm6 = vcmp.eq.s32.totalorder %v10548_v50, %v10545_v54 }
 0x1bc   : > { %v1147_v6 = vpack.c.bf16 %v8047_v26, %v8046_v63  ;;  %v1061_v36 = vpop.permute.xlu0 %1060  ;;  %8778 = vmatprep.subr.bf16.mxu1 %v10341_v44  ;;  %vm1106_vm1 = vmor %vm1026_vm15, %vm1090_vm10 }
 0x1bd   : > { %vm1089_vm8 = vcmp.eq.s32.totalorder %v1061_v36, %v10545_v54  ;;  %vm1027_vm2 = vmor %vm947_vm12, %vm1011_vm14  ;;  %v8050_v37 = vsel %vm1106_vm1, 1.0, %v17587_v17  ;;  %vm1014_vm12 = vcmp.eq.s32.totalorder %v10826_v11, %v10545_v54  ;;  %vm950_vm1 = vcmp.eq.s32.totalorder %v10799_v51, %v10545_v54  ;;  %v11076_v11 = vld [vmem:[%s10165_s26 + $0x60] sm:$0xff] }
 0x1be   : > { %vm1105_vm5 = vmor %vm1025_vm9, %vm1089_vm8  ;;  %v1076_v42 = vpop.permute.xlu1 %1075  ;;  %1775 = vperm.xlu0 %9295, %v17563_v48   ;;  %8735 = vmatmul.mubr.msk.bf16.gmra.mrb[4].mxu1 %vm766_vm11, %v1147_v6  ;;  %vm1013_vm9 = vcmp.eq.s32.totalorder %v10847_v19, %v10545_v54  ;;  %17598 = vst [vmem:[#allocation59_spill] sm:$0xff] %v11076_v11 }
 0x1bf   : > { %v8049_v55 = vsel %vm1105_vm5, 1.0, %v17587_v17  ;;  %1699 = vperm.xlu1 %9294, %v11018_v2   ;;  %8779 = vmatpush3.bf16.msra.mxu1 %v10341_v44  ;;  %vm1028_vm8 = vmor %vm948_vm7, %vm1012_vm0  ;;  %vm1094_vm5 = vcmp.eq.s32.totalorder %v1076_v42, %v10545_v54  ;;  %vm951_vm0 = vcmp.eq.s32.totalorder %v10570_v30, %v10545_v54 }
 0x1c0   : > { %v1148_v62 = vpack.c.bf16 %v8049_v55, %v8048_v34  ;;  %v1067_v3 = vpop.permute.xlu0 %1066  ;;  %8780 = vmatprep.subr.bf16.mxu1 %v17550_v22  ;;  %vm1108_vm13 = vmor %vm1028_vm8, %vm1092_vm3  ;;  %v17167_v55 = vmov 5  }
 0x1c1   : > { %vm1091_vm4 = vcmp.eq.s32.totalorder %v1067_v3, %v10545_v54  ;;  %vm1029_vm14 = vmor %vm949_vm6, %vm1013_vm9  ;;  %v8052_v50 = vsel %vm1108_vm13, 1.0, %v17587_v17 }
 0x1c2   : > { %vm1107_vm10 = vmor %vm1027_vm2, %vm1091_vm4  ;;  %1781 = vperm.xlu0 %9295, %v17564_v60   ;;  %8738 = vmatprep.mubr.msk.bf16.mxu1 %vm766_vm11, %v1148_v62  ;;  %vm1015_vm2 = vcmp.eq.s32.totalorder %v10853_v49, %v10545_v54 }
 0x1c3   : > { %v8051_v44 = vsel %vm1107_vm10, 1.0, %v17587_v17  ;;  %1705 = vperm.xlu1 %9294, %v11046_v56   ;;  %v11049_v20 = vpop.permute.xlu1 %1274  ;;  %8781 = vmatpush3.bf16.msra.mxu1 %v17550_v22  ;;  %vm1030_vm4 = vmor %vm950_vm1, %vm1014_vm12 }
 0x1c4   : > { %v1149_v43 = vpack.c.bf16 %v8051_v44, %v8050_v37  ;;  %v1073_v9 = vpop.permute.xlu0 %1072  ;;  %8782 = vmatprep.subr.bf16.mxu1 %v17557_v28  ;;  %vm1110_vm6 = vmor %vm1030_vm4, %vm1094_vm5 }
 0x1c5   : > { %vm1093_vm15 = vcmp.eq.s32.totalorder %v1073_v9, %v10545_v54  ;;  %vm1031_vm7 = vmor %vm951_vm0, %vm1015_vm2  ;;  %v17602_v9 = vld [vmem:[#allocation29_spill] sm:$0xff] }
 0x1c6   : > { %vm1109_vm3 = vmor %vm1029_vm14, %vm1093_vm15  ;;  %2079 = vperm.xlu0 %9295, %v10894_v14   ;;  %8739 = vmatmul.mubr.msk.bf16.gmra.mrb[8].mxu1 %vm766_vm11, %v1149_v43  ;;  %v17601_v43 = vld [vmem:[#allocation35_spill] sm:$0xff]  ;;  %vm1321_vm14 = vcmp.eq.s32.totalorder %v11049_v20, %v10545_v54 }
 0x1c7   : > { %v8053_v22 = vsel %vm1109_vm3, 1.0, %v17587_v17  ;;  %1711 = vperm.xlu1 %9294, %v11076_v11   ;;  %v11079_v19 = vpop.permute.xlu1 %1280  ;;  %8783 = vmatpush3.bf16.msra.mxu1 %v17557_v28  ;;  %v8054_v28 = vsel %vm1110_vm6, 1.0, %v17587_v17 }
 0x1c8   : > { %v1150_v51 = vpack.c.bf16 %v8053_v22, %v8052_v50  ;;  %v1079_v57 = vpop.permute.xlu0 %1078  ;;  %8784 = vmatprep.subr.bf16.mxu1 %v17559_v24  ;;  %vm1323_vm2 = vcmp.eq.s32.totalorder %v11079_v19, %v10545_v54 }
 0x1c9   : > { %vm1095_vm9 = vcmp.eq.s32.totalorder %v1079_v57, %v10545_v54  ;;  %v17604_v57 = vld [vmem:[#allocation31_spill] sm:$0xff] }
 0x1ca   : > { %vm1111_vm10 = vmor %vm1031_vm7, %vm1095_vm9  ;;  %2088 = vperm.xlu0 %9295, %v10944_v7   ;;  %8742 = vmatprep.mubr.msk.bf16.mxu1 %vm766_vm11, %v1150_v51  ;;  %v17603_v51 = vld [vmem:[#allocation36_spill] sm:$0xff] }
 0x1cb   : > { %v8055_v38 = vsel %vm1111_vm10, 1.0, %v17587_v17  ;;  %1717 = vperm.xlu1 %9294, %v11097_v33   ;;  %v11100_v49 = vpop.permute.xlu1 %1283  ;;  %8785 = vmatpush3.bf16.msra.mxu1 %v17559_v24 }
 0x1cc   : > { %v1151_v30 = vpack.c.bf16 %v8055_v38, %v8054_v28  ;;  %v11103_v53 = vpop.permute.xlu0 %1338  ;;  %8830 = vmatprep.subr.bf16.mxu1 %v11105_v52 }
 0x1cd   : > { %vm1385_vm8 = vcmp.eq.s32.totalorder %v11103_v53, %v10545_v54 }
 0x1ce   : > { %2094 = vperm.xlu0 %9295, %v10981_v4   ;;  %8743 = vmatmul.mubr.msk.bf16.gmra.mrb[12].mxu1 %vm766_vm11, %v1151_v30  ;;  %v17609_v4 = vld [vmem:[#allocation33_spill] sm:$0xff]  ;;  %vm1401_vm15 = vmor %vm1321_vm14, %vm1385_vm8 }
 0x1cf   : > { %9296 = vset.pattern.permute.xlu1 %v17600_v46  ;;  %v11111_v8 = vpop.permute.xlu1 %1289 }
 0x1d0   : > { %1739 = vperm.xlu1 %9296, %v10235_v18   ;;  %v11114_v40 = vpop.permute.xlu0 %1347 }
 0x1d1   : > { %vm1388_vm7 = vcmp.eq.s32.totalorder %v11114_v40, %v10545_v54 }
 0x1d2   : > { %2100 = vperm.xlu0 %9295, %v11018_v2  }
 0x1d3   : > { %v11117_v24 = vpop.permute.xlu1 %1295 }
 0x1d4   : > { %1745 = vperm.xlu1 %9296, %v17556_v58   ;;  %v11120_v63 = vpop.permute.xlu0 %1353 }
 0x1d6   : > { %2106 = vperm.xlu0 %9295, %v11046_v56  }
 0x1d7   : > { %v11123_v26 = vpop.permute.xlu1 %1301 }
 0x1d8   : > { %1748 = vperm.xlu1 %9296, %v10245_v21   ;;  %v11126_v5 = vpop.permute.xlu0 %1359 }
 0x1da   : > { %2112 = vperm.xlu0 %9295, %v11076_v11   ;;  %v17607_v11 = vld [vmem:[#allocation42_spill] sm:$0xff] }
 0x1db   : > { %v11129_v6 = vpop.permute.xlu1 %1307 }
 0x1dc   : > { %1754 = vperm.xlu1 %9296, %v10253_v23   ;;  %v11132_v36 = vpop.permute.xlu0 %1365 }
 0x1de   : > { %2118 = vperm.xlu0 %9295, %v11097_v33  }
 0x1df   : > { %v11135_v42 = vpop.permute.xlu1 %1313 }
 0x1e0   : > { %1760 = vperm.xlu1 %9296, %v10261_v25   ;;  %v11138_v34 = vpop.permute.xlu0 %1371 }
 0x1e2   : > { %9299 = vset.pattern.permute.xlu0 %v17167_v55 }
 0x1e3   : > { %v11141_v62 = vpop.permute.xlu1 %1319  ;;  %1819 = vperm.xlu0 %9299, %v17565_v59  }
 0x1e4   : > { %1766 = vperm.xlu1 %9296, %v10269_v27   ;;  %v11145_v3 = vpop.permute.xlu0 %1377 }
 0x1e7   : > { %1828 = vperm.xlu0 %9299, %v17569_v0  }
 0x1e8   : > { %1772 = vperm.xlu1 %9296, %v10277_v29   ;;  %v1342_v37 = vpop.permute.xlu1 %1341  ;;  %v11149_v44 = vpop.permute.xlu0 %1383 }
 0x1e9   : > { %vm1386_vm13 = vcmp.eq.s32.totalorder %v1342_v37, %v10545_v54 }
 0x1eb   : > { %1834 = vperm.xlu0 %9299, %v17601_v43  }
 0x1ec   : > { %1778 = vperm.xlu1 %9296, %v17602_v9   ;;  %v1345_v50 = vpop.permute.xlu1 %1344  ;;  %v11153_v22 = vpop.permute.xlu0 %1675 }
 0x1ed   : > { %vm1387_vm0 = vcmp.eq.s32.totalorder %v1345_v50, %v10545_v54 }
 0x1ee   : > { %vm1403_vm9 = vmor %vm1323_vm2, %vm1387_vm0 }
 0x1ef   : > { %1840 = vperm.xlu0 %9299, %v17603_v51  }
 0x1f0   : > { %1784 = vperm.xlu1 %9296, %v17604_v57   ;;  %v11157_v28 = vpop.permute.xlu1 %1350  ;;  %v11159_v38 = vpop.permute.xlu0 %1684 }
 0x1f1   : > { %17605 = vst [vmem:[#allocation61_spill] sm:$0xff] %v11159_v38 }
 0x1f3   : > { %1846 = vperm.xlu0 %9299, %v10327_v41  }
 0x1f4   : > { %9297 = vset.pattern.permute.xlu1 %v17167_v55  ;;  %v11163_v30 = vpop.permute.xlu1 %1356  ;;  %v11165_v33 = vpop.permute.xlu0 %1690  ;;  %v17611_v55 = vld [vmem:[#allocation44_spill] sm:$0xff] }
 0x1f5   : > { %17606 = vst [vmem:[#allocation62_spill] sm:$0xff] %v11165_v33  ;;  %1822 = vperm.xlu1 %9297, %v17607_v11  }
 0x1f7   : > { %1852 = vperm.xlu0 %9299, %v17578_v31   ;;  %v17613_v31 = vld [vmem:[#allocation46_spill] sm:$0xff] }
 0x1f8   : > { %v11169_v56 = vpop.permute.xlu1 %1362  ;;  %v11171_v2 = vpop.permute.xlu0 %1696 }
 0x1f9   : > { %17608 = vst [vmem:[#allocation63_spill] sm:$0xff] %v11171_v2  ;;  %1825 = vperm.xlu1 %9297, %v17609_v4  }
 0x1fb   : > { %1858 = vperm.xlu0 %9299, %v10349_v45   ;;  %v17614_v45 = vld [vmem:[#allocation47_spill] sm:$0xff] }
 0x1fc   : > { %v11175_v7 = vpop.permute.xlu1 %1368  ;;  %v11177_v14 = vpop.permute.xlu0 %1702 }
 0x1fd   : > { %17610 = vst [vmem:[#allocation64_spill] sm:$0xff] %v11177_v14  ;;  %1831 = vperm.xlu1 %9297, %v17611_v55  }
 0x1ff   : > { %1864 = vperm.xlu0 %9299, %v10360_v47   ;;  %v17615_v47 = vld [vmem:[#allocation40_spill] sm:$0xff] }
 0x200   : > { %v11181_v33 = vpop.permute.xlu1 %1374  ;;  %v11183_v38 = vpop.permute.xlu0 %1708  ;;  %vm1322_vm12 = vcmp.eq.s32.totalorder %v17615_v47, %v10545_v54  ;;  %v17616_v47 = vld [vmem:[#allocation51_spill] sm:$0xff] }
 0x201   : > { %17612 = vst [vmem:[#allocation65_spill] sm:$0xff] %v11183_v38  ;;  %1837 = vperm.xlu1 %9297, %v17613_v31   ;;  %vm1402_vm1 = vmor %vm1322_vm12, %vm1386_vm13  ;;  %vm1325_vm10 = vcmp.eq.s32.totalorder %v17616_v47, %v10545_v54  ;;  %vm1324_vm12 = vcmp.eq.s32.totalorder %v11100_v49, %v10545_v54  ;;  %vm1389_vm13 = vcmp.eq.s32.totalorder %v11157_v28, %v10545_v54  ;;  %v17617_v28 = vld [vmem:[#allocation52_spill] sm:$0xff] }
 0x203   : > { %2140 = vperm.xlu0 %9299, %v10235_v18  }
 0x204   : > { %v11187_v2 = vpop.permute.xlu1 %1380  ;;  %v11189_v41 = vpop.permute.xlu0 %1714 }
 0x205   : > { %1843 = vperm.xlu1 %9297, %v17614_v45  }
 0x207   : > { %2149 = vperm.xlu0 %9299, %v10245_v21  }
 0x208   : > { %v11193_v14 = vpop.permute.xlu0 %1720 }
 0x209   : > { %1849 = vperm.xlu1 %9297, %v17576_v15   ;;  %v1419_v38 = vpop.permute.xlu1 %1418 }
 0x20a   : > { %vm1465_vm5 = vcmp.eq.s32.totalorder %v1419_v38, %v10545_v54 }
 0x20b   : > { %2155 = vperm.xlu0 %9299, %v10253_v23   ;;  %vm1481_vm3 = vmor %vm1401_vm15, %vm1465_vm5 }
 0x20c   : > { %v8064_v20 = vsel %vm1481_vm3, 1.0, %v17587_v17  ;;  %vm1404_vm5 = vmor %vm1324_vm12, %vm1388_vm7  ;;  %vm1391_vm7 = vcmp.eq.s32.totalorder %v11163_v30, %v10545_v54 }
 0x20d   : > { %1855 = vperm.xlu1 %9297, %v17579_v32   ;;  %v1425_v53 = vpop.permute.xlu1 %1424  ;;  %v1422_v21 = vpop.permute.xlu0 %1421  ;;  %vm1405_vm3 = vmor %vm1325_vm10, %vm1389_vm13  ;;  %vm1392_vm13 = vcmp.eq.s32.totalorder %v11126_v5, %v10545_v54  ;;  %v17620_v5 = vld [vmem:[#allocation43_spill] sm:$0xff] }
 0x20e   : > { %vm1467_vm4 = vcmp.eq.s32.totalorder %v1425_v53, %v10545_v54  ;;  %vm1466_vm6 = vcmp.eq.s32.totalorder %v1422_v21, %v10545_v54 }
 0x20f   : > { %2161 = vperm.xlu0 %9299, %v10261_v25   ;;  %vm1482_vm8 = vmor %vm1402_vm1, %vm1466_vm6  ;;  %vm1390_vm1 = vcmp.eq.s32.totalorder %v11120_v63, %v10545_v54  ;;  %vm1326_vm6 = vcmp.eq.s32.totalorder %v11111_v8, %v10545_v54  ;;  %v17619_v63 = vld [vmem:[#allocation53_spill] sm:$0xff] }
 0x210   : > { %vm1483_vm14 = vmor %vm1403_vm9, %vm1467_vm4  ;;  %v8065_v21 = vsel %vm1482_vm8, 1.0, %v17587_v17  ;;  %vm1327_vm4 = vcmp.eq.s32.totalorder %v17617_v28, %v10545_v54  ;;  %v11303_v28 = vld [vmem:[#allocation2 + $0x10] sm:$0xff]  }
 0x211   : > { %1861 = vperm.xlu1 %9297, %v17581_v39   ;;  %v1428_v19 = vpop.permute.xlu1 %1427  ;;  %v1431_v40 = vpop.permute.xlu0 %1430  ;;  %v1529_v37 = vpack.c.bf16 %v8065_v21, %v8064_v20  ;;  %v8066_v49 = vsel %vm1483_vm14, 1.0, %v17587_v17  ;;  %vm1406_vm10 = vmor %vm1326_vm6, %vm1390_vm1  ;;  %v11247_v20 = vld [vmem:[%s10165_s26] sm:$0xff]  ;;  %vm1393_vm1 = vcmp.eq.s32.totalorder %v11169_v56, %v10545_v54 }
 0x212   : > { %vm1468_vm15 = vcmp.eq.s32.totalorder %v1428_v19, %v10545_v54  ;;  %vm1469_vm0 = vcmp.eq.s32.totalorder %v1431_v40, %v10545_v54  ;;  %17618 = vst [vmem:[#allocation40_spill] sm:$0xff] %v11247_v20  ;;  %v11271_v40 = vld [vmem:[#allocation2 + $0x8] sm:$0xff]  }
 0x213   : > { %vm1484_vm2 = vmor %vm1404_vm5, %vm1468_vm15  ;;  %2167 = vperm.xlu0 %9299, %v10269_v27   ;;  %8758 = vmatprep.mubr.msk.bf16.mxu0 %vm766_vm11, %v1529_v37  ;;  %vm1329_vm15 = vcmp.eq.s32.totalorder %v17619_v63, %v10545_v54  ;;  %v11342_v63 = vld [vmem:[#allocation2 + $0x18] sm:$0xff]  }
 0x214   : > { %v8067_v50 = vsel %vm1484_vm2, 1.0, %v17587_v17  ;;  %vm1485_vm9 = vmor %vm1405_vm3, %vm1469_vm0  ;;  %vm1328_vm0 = vcmp.eq.s32.totalorder %v11117_v24, %v10545_v54 }
 0x215   : > { %v1530_v38 = vpack.c.bf16 %v8067_v50, %v8066_v49  ;;  %9298 = vset.pattern.permute.xlu1 %v17600_v46  ;;  %v1434_v53 = vpop.permute.xlu1 %1433  ;;  %v1437_v47 = vpop.permute.xlu0 %1436  ;;  %vm1407_vm5 = vmor %vm1327_vm4, %vm1391_vm7  ;;  %v8068_v46 = vsel %vm1485_vm9, 1.0, %v17587_v17  ;;  %vm1394_vm7 = vcmp.eq.s32.totalorder %v11132_v36, %v10545_v54 }
 0x216   : > { %vm1470_vm8 = vcmp.eq.s32.totalorder %v1434_v53, %v10545_v54  ;;  %vm1471_vm12 = vcmp.eq.s32.totalorder %v1437_v47, %v10545_v54  ;;  %2076 = vperm.xlu1 %9298, %v11247_v20   ;;  %vm1408_vm3 = vmor %vm1328_vm0, %vm1392_vm13  ;;  %vm1395_vm13 = vcmp.eq.s32.totalorder %v11175_v7, %v10545_v54  ;;  %v17624_v53 = vld [vmem:[#allocation45_spill] sm:$0xff] }
 0x217   : > { %vm1486_vm14 = vmor %vm1406_vm10, %vm1470_vm8  ;;  %2173 = vperm.xlu0 %9299, %v10277_v29   ;;  %8759 = vmatmul.mubr.msk.bf16.vlgmr.msra.gmra.mrb[16].mxu0 %vm766_vm11, %v1530_v38  ;;  %vm1331_vm8 = vcmp.eq.s32.totalorder %v17620_v5, %v10545_v54 }
 0x218   : > { %v8069_v8 = vsel %vm1486_vm14, 1.0, %v17587_v17  ;;  %8803 = vmatpush3.bf16.msra.mxu0 %v11105_v52  ;;  %vm1487_vm2 = vmor %vm1407_vm5, %vm1471_vm12  ;;  %vm1330_vm12 = vcmp.eq.s32.totalorder %v11123_v26, %v10545_v54  ;;  %v11312_v26 = vld [vmem:[%s10165_s26 + $0x18] sm:$0xff] }
 0x219   : > { %v1531_v30 = vpack.c.bf16 %v8069_v8, %v8068_v46  ;;  %v1440_v21 = vpop.permute.xlu1 %1439  ;;  %v1443_v19 = vpop.permute.xlu0 %1442  ;;  %8804 = vmatprep.subr.bf16.mxu0 %v11271_v40  ;;  %vm1409_vm10 = vmor %vm1329_vm15, %vm1393_vm1  ;;  %v8070_v24 = vsel %vm1487_vm2, 1.0, %v17587_v17  ;;  %17623 = vst [vmem:[#allocation51_spill] sm:$0xff] %v11312_v26  ;;  %vm1396_vm1 = vcmp.eq.s32.totalorder %v11138_v34, %v10545_v54 }
 0x21a   : > { %vm1472_vm4 = vcmp.eq.s32.totalorder %v1440_v21, %v10545_v54  ;;  %vm1473_vm6 = vcmp.eq.s32.totalorder %v1443_v19, %v10545_v54  ;;  %2082 = vperm.xlu1 %9298, %v10921_v10   ;;  %vm1410_vm5 = vmor %vm1330_vm12, %vm1394_vm7  ;;  %vm1397_vm7 = vcmp.eq.s32.totalorder %v11181_v33, %v10545_v54 }
 0x21b   : > { %vm1488_vm9 = vmor %vm1408_vm3, %vm1472_vm4  ;;  %2179 = vperm.xlu0 %9299, %v17602_v9   ;;  %8762 = vmatprep.mubr.msk.bf16.mxu0 %vm766_vm11, %v1531_v30  ;;  %vm1333_vm4 = vcmp.eq.s32.totalorder %v17624_v53, %v10545_v54 }
 0x21c   : > { %v8071_v10 = vsel %vm1488_vm9, 1.0, %v17587_v17  ;;  %8805 = vmatpush3.bf16.msra.mxu0 %v11271_v40  ;;  %vm11299_vm14 = vmor %vm1409_vm10, %vm1473_vm6  ;;  %vm1332_vm6 = vcmp.eq.s32.totalorder %v11129_v6, %v10545_v54  ;;  %v11351_v6 = vld [vmem:[%s10165_s26 + $0x28] sm:$0xff] }
 0x21d   : > { %v1532_v56 = vpack.c.bf16 %v8071_v10, %v8070_v24  ;;  %v1446_v49 = vpop.permute.xlu1 %1445  ;;  %v1449_v50 = vpop.permute.xlu0 %1448  ;;  %8806 = vmatprep.subr.bf16.mxu0 %v11303_v28  ;;  %vm1411_vm3 = vmor %vm1331_vm8, %vm1395_vm13  ;;  %v8072_v36 = vsel %vm11299_vm14, 1.0, %v17587_v17  ;;  %17627 = vst [vmem:[#allocation52_spill] sm:$0xff] %v11351_v6  ;;  %vm1398_vm13 = vcmp.eq.s32.totalorder %v11145_v3, %v10545_v54  ;;  %v11381_v10 = vld [vmem:[#allocation2 + $0x20] sm:$0xff]  }
 0x21e   : > { %vm1474_vm15 = vcmp.eq.s32.totalorder %v1446_v49, %v10545_v54  ;;  %vm1475_vm0 = vcmp.eq.s32.totalorder %v1449_v50, %v10545_v54  ;;  %2085 = vperm.xlu1 %9298, %v11312_v26   ;;  %vm1412_vm10 = vmor %vm1332_vm6, %vm1396_vm1  ;;  %vm1399_vm1 = vcmp.eq.s32.totalorder %v11187_v2, %v10545_v54  ;;  %v11412_v2 = vld [vmem:[#allocation2 + $0x28] sm:$0xff]  }
 0x21f   : > { %vm1490_vm2 = vmor %vm1410_vm5, %vm1474_vm15  ;;  %2185 = vperm.xlu0 %9299, %v17604_v57   ;;  %8763 = vmatmul.mubr.msk.bf16.gmra.mrb[20].mxu0 %vm766_vm11, %v1532_v56  ;;  %vm1335_vm15 = vcmp.eq.s32.totalorder %v10865_v13, %v10545_v54  ;;  %v11420_v13 = vld [vmem:[%s10165_s26 + $0x48] sm:$0xff] }
 0x220   : > { %v8073_v38 = vsel %vm1490_vm2, 1.0, %v17587_v17  ;;  %8807 = vmatpush3.bf16.msra.mxu0 %v11303_v28  ;;  %vm11338_vm9 = vmor %vm1411_vm3, %vm1475_vm0  ;;  %vm1334_vm0 = vcmp.eq.s32.totalorder %v11135_v42, %v10545_v54  ;;  %v11390_v42 = vld [vmem:[%s10165_s26 + $0x38] sm:$0xff]  ;;  %17631 = vst [vmem:[#allocation43_spill] sm:$0xff] %v11420_v13 }
 0x221   : > { %v1533_v7 = vpack.c.bf16 %v8073_v38, %v8072_v36  ;;  %v1452_v46 = vpop.permute.xlu1 %1451  ;;  %v1455_v8 = vpop.permute.xlu0 %1454  ;;  %8808 = vmatprep.subr.bf16.mxu0 %v11342_v63  ;;  %vm1413_vm5 = vmor %vm1333_vm4, %vm1397_vm7  ;;  %v8074_v34 = vsel %vm11338_vm9, 1.0, %v17587_v17  ;;  %17630 = vst [vmem:[#allocation53_spill] sm:$0xff] %v11390_v42  ;;  %vm1400_vm7 = vcmp.eq.s32.totalorder %v11149_v44, %v10545_v54  ;;  %v11432_v38 = vld [vmem:[%s10165_s26 + $0x58] sm:$0xff] }
 0x222   : > { %vm1476_vm8 = vcmp.eq.s32.totalorder %v1452_v46, %v10545_v54  ;;  %vm1477_vm12 = vcmp.eq.s32.totalorder %v1455_v8, %v10545_v54  ;;  %2091 = vperm.xlu1 %9298, %v11351_v6   ;;  %vm1414_vm3 = vmor %vm1334_vm0, %vm1398_vm13  ;;  %17632 = vst [vmem:[#allocation45_spill] sm:$0xff] %v11432_v38  ;;  %v11444_v46 = vld [vmem:[%s10165_s26 + $0x68] sm:$0xff] }
 0x223   : > { %vm1492_vm14 = vmor %vm1412_vm10, %vm1476_vm8  ;;  %2477 = vperm.xlu0 %9299, %v11247_v20   ;;  %8766 = vmatprep.mubr.msk.bf16.mxu0 %vm766_vm11, %v1533_v7  ;;  %vm1336_vm8 = vcmp.eq.s32.totalorder %v11141_v62, %v10545_v54  ;;  %17633 = vst [vmem:[#allocation66_spill] sm:$0xff] %v11444_v46 }
 0x224   : > { %v8075_v30 = vsel %vm1492_vm14, 1.0, %v17587_v17  ;;  %8809 = vmatpush3.bf16.msra.mxu0 %v11342_v63  ;;  %vm11377_vm2 = vmor %vm1413_vm5, %vm1477_vm12 }
 0x225   : > { %v1534_v33 = vpack.c.bf16 %v8075_v30, %v8074_v34  ;;  %v1458_v19 = vpop.permute.xlu1 %1457  ;;  %v1461_v24 = vpop.permute.xlu0 %1460  ;;  %8810 = vmatprep.subr.bf16.mxu0 %v11381_v10  ;;  %vm1415_vm10 = vmor %vm1335_vm15, %vm1399_vm1  ;;  %v8076_v3 = vsel %vm11377_vm2, 1.0, %v17587_v17  ;;  %vm1722_vm15 = vcmp.eq.s32.totalorder %v11153_v22, %v10545_v54 }
 0x226   : > { %vm1478_vm4 = vcmp.eq.s32.totalorder %v1458_v19, %v10545_v54  ;;  %vm1479_vm6 = vcmp.eq.s32.totalorder %v1461_v24, %v10545_v54  ;;  %2097 = vperm.xlu1 %9298, %v11390_v42   ;;  %vm1416_vm13 = vmor %vm1336_vm8, %vm1400_vm7  ;;  %v11459_v19 = vld [vmem:[%s10165_s26 + $0x78] sm:$0xff] }
 0x227   : > { %vm1494_vm9 = vmor %vm1414_vm3, %vm1478_vm4  ;;  %2486 = vperm.xlu0 %9299, %v11312_v26   ;;  %8767 = vmatmul.mubr.msk.bf16.gmra.mrb[24].mxu0 %vm766_vm11, %v1534_v33  ;;  %17634 = vst [vmem:[#allocation67_spill] sm:$0xff] %v11459_v19 }
 0x228   : > { %v8077_v5 = vsel %vm1494_vm9, 1.0, %v17587_v17  ;;  %8811 = vmatpush3.bf16.msra.mxu0 %v11381_v10  ;;  %vm1495_vm12 = vmor %vm1415_vm10, %vm1479_vm6 }
 0x229   : > { %v1535_v56 = vpack.c.bf16 %v8077_v5, %v8076_v3  ;;  %v1464_v37 = vpop.permute.xlu1 %1463  ;;  %v11410_v49 = vpop.permute.xlu0 %1742  ;;  %8812 = vmatprep.subr.bf16.mxu0 %v11412_v2  ;;  %v8078_v62 = vsel %vm1495_vm12, 1.0, %v17587_v17 }
 0x22a   : > { %vm1480_vm14 = vcmp.eq.s32.totalorder %v1464_v37, %v10545_v54  ;;  %2103 = vperm.xlu1 %9298, %v11420_v13   ;;  %vm1787_vm2 = vcmp.eq.s32.totalorder %v11410_v49, %v10545_v54 }
 0x22b   : > { %vm1496_vm5 = vmor %vm1416_vm13, %vm1480_vm14  ;;  %2492 = vperm.xlu0 %9299, %v11351_v6   ;;  %8770 = vmatprep.mubr.msk.bf16.mxu0 %vm766_vm11, %v1535_v56  ;;  %v17635_v56 = vmov 5  }
 0x22c   : > { %v8079_v50 = vsel %vm1496_vm5, 1.0, %v17587_v17  ;;  %8813 = vmatpush3.bf16.msra.mxu0 %v11412_v2 }
 0x22d   : > { %v1536_v44 = vpack.c.bf16 %v8079_v50, %v8078_v62  ;;  %v11428_v36 = vpop.permute.xlu0 %1751  ;;  %8858 = vmatprep.subr.bf16.mxu0 %v11105_v52 }
 0x22e   : > { %2109 = vperm.xlu1 %9298, %v11432_v38   ;;  %v11435_v53 = vpop.permute.xlu1 %1678 }
 0x22f   : > { %2498 = vperm.xlu0 %9299, %v11390_v42   ;;  %8771 = vmatmul.mubr.msk.bf16.gmra.mrb[28].mxu0 %vm766_vm11, %v1536_v44  ;;  %vm1723_vm3 = vcmp.eq.s32.totalorder %v11435_v53, %v10545_v54  ;;  %v17652_v53 = vld [vmem:[#allocation39_spill] sm:$0xff] }
 0x230   : > { %vm1803_vm10 = vmor %vm1723_vm3, %vm1787_vm2 }
 0x231   : > { %v11439_v7 = vpop.permute.xlu0 %1757  ;;  %v11441_v47 = vpop.f32.mrb[0].mxu0 }
 0x232   : > { %2115 = vperm.xlu1 %9298, %v11444_v46   ;;  %v11447_v8 = vpop.permute.xlu1 %1681  ;;  %v11449_v34 = vpop.f32.mrb[1].mxu0 }
 0x233   : > { %2504 = vperm.xlu0 %9299, %v11420_v13   ;;  %v11452_v30 = vpop.f32.mrb[2].mxu0 }
 0x234   : > { %v11454_v33 = vpop.f32.mrb[3].mxu0 }
 0x235   : > { %v11456_v21 = vpop.permute.xlu0 %1763 }
 0x236   : > { %2121 = vperm.xlu1 %9298, %v11459_v19   ;;  %v11462_v24 = vpop.permute.xlu1 %1687 }
 0x237   : > { %2510 = vperm.xlu0 %9299, %v11432_v38  }
 0x239   : > { %v11465_v3 = vpop.permute.xlu0 %1769  ;;  %v11467_v5 = vpop.f32.mrb[4].mxu0 }
 0x23a   : > { %9300 = vset.pattern.permute.xlu1 %v17635_v56  ;;  %v11470_v37 = vpop.permute.xlu1 %1693  ;;  %v11472_v62 = vpop.f32.mrb[5].mxu0 }
 0x23b   : > { %2143 = vperm.xlu1 %9300, %v17548_v1   ;;  %2516 = vperm.xlu0 %9299, %v11444_v46   ;;  %v11476_v50 = vpop.f32.mrb[6].mxu0  ;;  %v17200_v46 = vmov 6  }
 0x23c   : > { %v11478_v44 = vpop.f32.mrb[7].mxu0 }
 0x23d   : > { %v11480_v13 = vpop.permute.xlu0 %1775 }
 0x23e   : > { %v11482_v38 = vpop.permute.xlu1 %1699 }
 0x23f   : > { %2146 = vperm.xlu1 %9300, %v17556_v58   ;;  %2522 = vperm.xlu0 %9299, %v11459_v19  }
 0x241   : > { %v11486_v42 = vpop.permute.xlu0 %1781  ;;  %v11488_v6 = vpop.f32.mrb[8].mxu0 }
 0x242   : > { %v11490_v26 = vpop.permute.xlu1 %1705  ;;  %v11492_v20 = vpop.f32.mrb[9].mxu0 }
 0x243   : > { %2152 = vperm.xlu1 %9300, %v17558_v16   ;;  %9303 = vset.pattern.permute.xlu0 %v17200_v46  ;;  %v11496_v57 = vpop.f32.mrb[10].mxu0 }
 0x244   : > { %2223 = vperm.xlu0 %9303, %v17607_v11   ;;  %v11499_v9 = vpop.f32.mrb[11].mxu0 }
 0x245   : > { %v11501_v19 = vpop.permute.xlu0 %2079 }
 0x246   : > { %17636 = vst [vmem:[#allocation68_spill] sm:$0xff] %v11501_v19  ;;  %v11503_v29 = vpop.permute.xlu1 %1711 }
 0x247   : > { %2158 = vperm.xlu1 %9300, %v17560_v35  }
 0x248   : > { %2232 = vperm.xlu0 %9303, %v17611_v55  }
 0x249   : > { %v11507_v27 = vpop.permute.xlu0 %2088  ;;  %v11509_v25 = vpop.f32.mrb[12].mxu0 }
 0x24a   : > { %17637 = vst [vmem:[#allocation69_spill] sm:$0xff] %v11507_v27  ;;  %17638 = vst [vmem:[#allocation70_spill] sm:$0xff] %v11509_v25  ;;  %v11511_v23 = vpop.permute.xlu1 %1717  ;;  %v11513_v46 = vpop.f32.mrb[13].mxu0  ;;  %v17706_v25 = vld [vmem:[#allocation46_spill] sm:$0xff] }
 0x24b   : > { %17639 = vst [vmem:[#allocation71_spill] sm:$0xff] %v11513_v46  ;;  %2164 = vperm.xlu1 %9300, %v17561_v12   ;;  %v11516_v11 = vpop.f32.mrb[14].mxu0 }
 0x24c   : > { %17640 = vst [vmem:[#allocation72_spill] sm:$0xff] %v11516_v11  ;;  %2238 = vperm.xlu0 %9303, %v17613_v31   ;;  %v11519_v19 = vpop.f32.mrb[15].mxu0 }
 0x24d   : > { %17641 = vst [vmem:[#allocation73_spill] sm:$0xff] %v11519_v19  ;;  %v11521_v58 = vpop.permute.xlu0 %2094  ;;  %v17646_v19 = vmov 6  }
 0x24e   : > { %17642 = vst [vmem:[#allocation74_spill] sm:$0xff] %v11521_v58 }
 0x24f   : > { %2170 = vperm.xlu1 %9300, %v17562_v61   ;;  %v1740_v55 = vpop.permute.xlu1 %1739 }
 0x250   : > { %2244 = vperm.xlu0 %9303, %v17614_v45   ;;  %vm1786_vm0 = vcmp.eq.s32.totalorder %v1740_v55, %v10545_v54  ;;  %v17650_v55 = vld [vmem:[#allocation38_spill] sm:$0xff] }
 0x251   : > { %v11525_v27 = vpop.permute.xlu0 %2100  ;;  %vm1802_vm4 = vmor %vm1722_vm15, %vm1786_vm0  ;;  %vm1724_vm0 = vcmp.eq.s32.totalorder %v11447_v8, %v10545_v54 }
 0x252   : > { %17643 = vst [vmem:[#allocation75_spill] sm:$0xff] %v11525_v27 }
 0x253   : > { %2176 = vperm.xlu1 %9300, %v17563_v48   ;;  %v1746_v46 = vpop.permute.xlu1 %1745 }
 0x254   : > { %2250 = vperm.xlu0 %9303, %v17576_v15   ;;  %vm1788_vm13 = vcmp.eq.s32.totalorder %v1746_v46, %v10545_v54 }
 0x255   : > { %v11529_v18 = vpop.permute.xlu0 %2106  ;;  %vm1804_vm3 = vmor %vm1724_vm0, %vm1788_vm13 }
 0x256   : > { %17644 = vst [vmem:[#allocation76_spill] sm:$0xff] %v11529_v18 }
 0x257   : > { %2182 = vperm.xlu1 %9300, %v17564_v60   ;;  %v1749_v31 = vpop.permute.xlu1 %1748 }
 0x258   : > { %2256 = vperm.xlu0 %9303, %v17579_v32   ;;  %vm1789_vm7 = vcmp.eq.s32.totalorder %v1749_v31, %v10545_v54 }
 0x259   : > { %v11533_v58 = vpop.permute.xlu0 %2112 }
 0x25a   : > { %17645 = vst [vmem:[#allocation77_spill] sm:$0xff] %v11533_v58 }
 0x25b   : > { %9301 = vset.pattern.permute.xlu1 %v17646_v19  ;;  %v1755_v11 = vpop.permute.xlu1 %1754 }
 0x25c   : > { %2220 = vperm.xlu1 %9301, %v17565_v59   ;;  %2262 = vperm.xlu0 %9303, %v17581_v39  }
 0x25d   : > { %v11538_v27 = vpop.permute.xlu0 %2118 }
 0x25e   : > { %17647 = vst [vmem:[#allocation78_spill] sm:$0xff] %v11538_v27 }
 0x25f   : > { %v11540_v45 = vpop.permute.xlu1 %1760 }
 0x260   : > { %2226 = vperm.xlu1 %9301, %v17609_v4   ;;  %2544 = vperm.xlu0 %9303, %v17548_v1   ;;  %vm1793_vm13 = vcmp.eq.s32.totalorder %v11540_v45, %v10545_v54 }
 0x262   : > { %v1820_v18 = vpop.permute.xlu0 %1819 }
 0x263   : > { %v11544_v15 = vpop.permute.xlu1 %1766  ;;  %vm1866_vm1 = vcmp.eq.s32.totalorder %v1820_v18, %v10545_v54 }
 0x264   : > { %2229 = vperm.xlu1 %9301, %v17569_v0   ;;  %2553 = vperm.xlu0 %9303, %v17558_v16   ;;  %v17648_v16 = vld [vmem:[#allocation37_spill] sm:$0xff]  ;;  %vm1882_vm9 = vmor %vm1802_vm4, %vm1866_vm1  ;;  %vm1791_vm1 = vcmp.eq.s32.totalorder %v1755_v11, %v10545_v54 }
 0x265   : > { %v8088_v31 = vsel %vm1882_vm9, 1.0, %v17587_v17  ;;  %vm1726_vm9 = vcmp.eq.s32.totalorder %v11462_v24, %v10545_v54 }
 0x266   : > { %v1829_v58 = vpop.permute.xlu0 %1828 }
 0x267   : > { %v11548_v32 = vpop.permute.xlu1 %1772  ;;  %vm1869_vm8 = vcmp.eq.s32.totalorder %v1829_v58, %v10545_v54 }
 0x268   : > { %2235 = vperm.xlu1 %9301, %v17601_v43   ;;  %2559 = vperm.xlu0 %9303, %v17560_v35   ;;  %v17649_v35 = vld [vmem:[#allocation61_spill] sm:$0xff] }
 0x269   : > { %vm1725_vm6 = vcmp.eq.s32.totalorder %v17649_v35, %v10545_v54  ;;  %v17651_v35 = vld [vmem:[#allocation62_spill] sm:$0xff] }
 0x26a   : > { %v1835_v27 = vpop.permute.xlu0 %1834  ;;  %vm1727_vm5 = vcmp.eq.s32.totalorder %v17651_v35, %v10545_v54  ;;  %vm1805_vm15 = vmor %vm1725_vm6, %vm1789_vm7  ;;  %vm1790_vm7 = vcmp.eq.s32.totalorder %v11428_v36, %v10545_v54  ;;  %v17656_v35 = vld [vmem:[#allocation64_spill] sm:$0xff] }
 0x26b   : > { %v11552_v39 = vpop.permute.xlu1 %1778  ;;  %vm1885_vm2 = vmor %vm1805_vm15, %vm1869_vm8  ;;  %vm1871_vm4 = vcmp.eq.s32.totalorder %v1835_v27, %v10545_v54 }
 0x26c   : > { %2241 = vperm.xlu1 %9301, %v17603_v51   ;;  %2565 = vperm.xlu0 %9303, %v17561_v12   ;;  %vm1807_vm8 = vmor %vm1727_vm5, %vm1791_vm1  ;;  %v8091_v8 = vsel %vm1885_vm2, 1.0, %v17587_v17  ;;  %vm1792_vm1 = vcmp.eq.s32.totalorder %v11439_v7, %v10545_v54  ;;  %vm1728_vm2 = vcmp.eq.s32.totalorder %v11470_v37, %v10545_v54 }
 0x26d   : > { %vm1806_vm5 = vmor %vm1726_vm9, %vm1790_vm7  ;;  %vm1795_vm7 = vcmp.eq.s32.totalorder %v11544_v15, %v10545_v54 }
 0x26e   : > { %v11556_v1 = vpop.permute.xlu0 %1840 }
 0x26f   : > { %v11558_v4 = vpop.permute.xlu1 %1784  ;;  %vm1873_vm15 = vcmp.eq.s32.totalorder %v11556_v1, %v10545_v54 }
 0x270   : > { %2247 = vperm.xlu1 %9301, %v17648_v16   ;;  %2571 = vperm.xlu0 %9303, %v17562_v61  }
 0x272   : > { %v11570_v12 = vpop.permute.xlu0 %1846 }
 0x274   : > { %2253 = vperm.xlu1 %9301, %v17650_v55   ;;  %v1823_v22 = vpop.permute.xlu1 %1822  ;;  %2577 = vperm.xlu0 %9303, %v17563_v48  }
 0x275   : > { %vm1867_vm12 = vcmp.eq.s32.totalorder %v1823_v22, %v10545_v54  ;;  %v17653_v22 = vld [vmem:[#allocation63_spill] sm:$0xff] }
 0x276   : > { %vm1883_vm14 = vmor %vm1803_vm10, %vm1867_vm12  ;;  %v11580_v18 = vpop.permute.xlu0 %1852  ;;  %vm1729_vm12 = vcmp.eq.s32.totalorder %v17653_v22, %v10545_v54  ;;  %v17659_v22 = vld [vmem:[#allocation55_spill] sm:$0xff] }
 0x277   : > { %v8089_v49 = vsel %vm1883_vm14, 1.0, %v17587_v17  ;;  %vm1887_vm14 = vmor %vm1807_vm8, %vm1871_vm4  ;;  %vm1875_vm8 = vcmp.eq.s32.totalorder %v11570_v12, %v10545_v54  ;;  %v11695_v12 = vld [vmem:[%s10165_s26 + $0x10] sm:$0xff] }
 0x278   : > { %v1930_v58 = vpack.c.bf16 %v8089_v49, %v8088_v31  ;;  %2259 = vperm.xlu1 %9301, %v17652_v53   ;;  %v1826_v46 = vpop.permute.xlu1 %1825  ;;  %2583 = vperm.xlu0 %9303, %v17564_v60   ;;  %v17654_v31 = vld [vmem:[#allocation41_spill] sm:$0xff]  ;;  %vm1809_vm4 = vmor %vm1729_vm12, %vm1793_vm13  ;;  %v8093_v1 = vsel %vm1887_vm14, 1.0, %v17587_v17  ;;  %vm1794_vm13 = vcmp.eq.s32.totalorder %v11456_v21, %v10545_v54  ;;  %vm1730_vm14 = vcmp.eq.s32.totalorder %v11482_v38, %v10545_v54 }
 0x279   : > { %vm1868_vm6 = vcmp.eq.s32.totalorder %v1826_v46, %v10545_v54  ;;  %vm11634_vm9 = vmor %vm1809_vm4, %vm1873_vm15  ;;  %vm1877_vm4 = vcmp.eq.s32.totalorder %v11580_v18, %v10545_v54 }
 0x27a   : > { %vm1884_vm10 = vmor %vm1804_vm3, %vm1868_vm6  ;;  %8786 = vmatprep.mubr.msk.bf16.mxu1 %vm766_vm11, %v1930_v58  ;;  %v11598_v11 = vpop.permute.xlu0 %1858  ;;  %v17655_v58 = vld [vmem:[#allocation54_spill] sm:$0xff]  ;;  %vm1731_vm6 = vcmp.eq.s32.totalorder %v17656_v35, %v10545_v54 }
 0x27b   : > { %v8090_v27 = vsel %vm1884_vm10, 1.0, %v17587_v17  ;;  %vm1808_vm10 = vmor %vm1728_vm2, %vm1792_vm1  ;;  %vm1797_vm1 = vcmp.eq.s32.totalorder %v11548_v32, %v10545_v54 }
 0x27c   : > { %v1931_v24 = vpack.c.bf16 %v8091_v8, %v8090_v27  ;;  %2265 = vperm.xlu1 %9301, %v17654_v31   ;;  %v1832_v49 = vpop.permute.xlu1 %1831  ;;  %2881 = vperm.xlu0 %9303, %v17655_v58   ;;  %vm1811_vm15 = vmor %vm1731_vm6, %vm1795_vm7  ;;  %vm1796_vm7 = vcmp.eq.s32.totalorder %v11465_v3, %v10545_v54 }
 0x27d   : > { %vm1870_vm0 = vcmp.eq.s32.totalorder %v1832_v49, %v10545_v54  ;;  %v17661_v49 = vld [vmem:[#allocation65_spill] sm:$0xff]  ;;  %vm11679_vm2 = vmor %vm1811_vm15, %vm1875_vm8  ;;  %vm1879_vm15 = vcmp.eq.s32.totalorder %v11598_v11, %v10545_v54 }
 0x27e   : > { %vm1886_vm3 = vmor %vm1806_vm5, %vm1870_vm0  ;;  %8787 = vmatmul.mubr.msk.bf16.vlgmr.msra.gmra.mrb[16].mxu1 %vm766_vm11, %v1931_v24  ;;  %v11622_v45 = vpop.permute.xlu0 %1864  ;;  %v11650_v24 = vld [vmem:[%s10165_s26 + $0x8] sm:$0xff]  ;;  %vm1733_vm0 = vcmp.eq.s32.totalorder %v17661_v49, %v10545_v54  ;;  %v8097_v38 = vsel %vm11679_vm2, 1.0, %v17587_v17  ;;  %vm1734_vm2 = vcmp.eq.s32.totalorder %v11503_v29, %v10545_v54  ;;  %v11799_v11 = vld [vmem:[%s10165_s26 + $0x30] sm:$0xff] }
 0x27f   : > { %v8092_v36 = vsel %vm1886_vm3, 1.0, %v17587_v17  ;;  %8831 = vmatpush3.bf16.msra.mxu1 %v11105_v52  ;;  %17660 = vst [vmem:[#allocation61_spill] sm:$0xff] %v11650_v24  ;;  %vm1810_vm3 = vmor %vm1730_vm14, %vm1794_vm13  ;;  %vm1799_vm13 = vcmp.eq.s32.totalorder %v11552_v39, %v10545_v54 }
 0x280   : > { %v1932_v8 = vpack.c.bf16 %v8093_v1, %v8092_v36  ;;  %9302 = vset.pattern.permute.xlu1 %v17635_v56  ;;  %v1838_v27 = vpop.permute.xlu1 %1837  ;;  %2890 = vperm.xlu0 %9303, %v17659_v22   ;;  %v8095_v56 = vsel %vm11634_vm9, 1.0, %v17587_v17  ;;  %v17664_v36 = vld [vmem:[#allocation56_spill] sm:$0xff]  ;;  %vm1732_vm9 = vcmp.eq.s32.totalorder %v11490_v26, %v10545_v54  ;;  %vm1813_vm8 = vmor %vm1733_vm0, %vm1797_vm1  ;;  %vm1798_vm1 = vcmp.eq.s32.totalorder %v11480_v13, %v10545_v54 }
 0x281   : > { %vm1872_vm12 = vcmp.eq.s32.totalorder %v1838_v27, %v10545_v54  ;;  %2480 = vperm.xlu1 %9302, %v11650_v24   ;;  %8832 = vmatprep.subr.bf16.mxu1 %v11271_v40  ;;  %vm11723_vm14 = vmor %vm1813_vm8, %vm1877_vm4  ;;  %vm1737_vm4 = vcmp.eq.s32.totalorder %v11193_v14, %v10545_v54  ;;  %vm1881_vm8 = vcmp.eq.s32.totalorder %v11622_v45, %v10545_v54  ;;  %v11824_v14 = vld [vmem:[%s10165_s26 + $0x40] sm:$0xff]  ;;  %v17687_v24 = vld [vmem:[#allocation18_spill] sm:$0xff] }
 0x282   : > { %vm1888_vm5 = vmor %vm1808_vm10, %vm1872_vm12  ;;  %8790 = vmatprep.mubr.msk.bf16.mxu1 %vm766_vm11, %v1932_v8  ;;  %v11659_v7 = vpop.permute.xlu0 %2140  ;;  %vm1735_vm12 = vcmp.eq.s32.totalorder %v11189_v41, %v10545_v54  ;;  %v17667_v8 = vld [vmem:[#allocation57_spill] sm:$0xff]  ;;  %v8099_v22 = vsel %vm11723_vm14, 1.0, %v17587_v17  ;;  %17672 = vst [vmem:[#allocation63_spill] sm:$0xff] %v11799_v11  ;;  %vm1736_vm14 = vcmp.eq.s32.totalorder %v11511_v23, %v10545_v54 }
 0x283   : > { %v8094_v37 = vsel %vm1888_vm5, 1.0, %v17587_v17  ;;  %8833 = vmatpush3.bf16.msra.mxu1 %v11271_v40  ;;  %vm1812_vm5 = vmor %vm1732_vm9, %vm1796_vm7  ;;  %vm1801_vm7 = vcmp.eq.s32.totalorder %v11558_v4, %v10545_v54  ;;  %17674 = vst [vmem:[#allocation54_spill] sm:$0xff] %v11824_v14 }
 0x284   : > { %v1933_v58 = vpack.c.bf16 %v8095_v56, %v8094_v37  ;;  %v1844_v1 = vpop.permute.xlu1 %1843  ;;  %2896 = vperm.xlu0 %9303, %v17664_v36   ;;  %8834 = vmatprep.subr.bf16.mxu1 %v11303_v28  ;;  %v17671_v36 = vld [vmem:[#allocation58_spill] sm:$0xff] }
 0x285   : > { %vm1874_vm6 = vcmp.eq.s32.totalorder %v1844_v1, %v10545_v54  ;;  %2483 = vperm.xlu1 %9302, %v11695_v12  }
 0x286   : > { %vm1890_vm10 = vmor %vm1810_vm3, %vm1874_vm6  ;;  %8791 = vmatmul.mubr.msk.bf16.gmra.mrb[20].mxu1 %vm766_vm11, %v1933_v58  ;;  %v11703_v40 = vpop.permute.xlu0 %2149 }
 0x287   : > { %v8096_v21 = vsel %vm1890_vm10, 1.0, %v17587_v17  ;;  %8835 = vmatpush3.bf16.msra.mxu1 %v11303_v28  ;;  %v11739_v28 = vld [vmem:[%s10165_s26 + $0x20] sm:$0xff]  ;;  %vm1815_vm6 = vmor %vm1735_vm12, %vm1799_vm13  ;;  %vm1800_vm13 = vcmp.eq.s32.totalorder %v11486_v42, %v10545_v54 }
 0x288   : > { %v1934_v35 = vpack.c.bf16 %v8097_v38, %v8096_v21  ;;  %v1850_v46 = vpop.permute.xlu1 %1849  ;;  %2902 = vperm.xlu0 %9303, %v17667_v8   ;;  %8836 = vmatprep.subr.bf16.mxu1 %v11342_v63  ;;  %17668 = vst [vmem:[#allocation62_spill] sm:$0xff] %v11739_v28  ;;  %vm11777_vm9 = vmor %vm1815_vm6, %vm1879_vm15  ;;  %v17673_v38 = vld [vmem:[#allocation59_spill] sm:$0xff] }
 0x289   : > { %vm1876_vm0 = vcmp.eq.s32.totalorder %v1850_v46, %v10545_v54  ;;  %2489 = vperm.xlu1 %9302, %v11739_v28   ;;  %v11742_v18 = vpop.f32.mrb[0].mxu1  ;;  %vm1814_vm10 = vmor %vm1734_vm2, %vm1798_vm1  ;;  %v8101_v42 = vsel %vm11777_vm9, 1.0, %v17587_v17  ;;  %vm2187_vm9 = vcmp.eq.s32.totalorder %v11659_v7, %v10545_v54 }
 0x28a   : > { %vm1892_vm3 = vmor %vm1812_vm5, %vm1876_vm0  ;;  %v11750_v3 = vpop.f32.mrb[1].mxu1  ;;  %8794 = vmatprep.mubr.msk.bf16.mxu1 %vm766_vm11, %v1934_v35  ;;  %v11753_v27 = vpop.permute.xlu0 %2155 }
 0x28b   : > { %v8098_v56 = vsel %vm1892_vm3, 1.0, %v17587_v17  ;;  %v11769_v49 = vpop.f32.mrb[2].mxu1  ;;  %8837 = vmatpush3.bf16.msra.mxu1 %v11342_v63  ;;  %vm1817_vm15 = vmor %vm1737_vm4, %vm1801_vm7 }
 0x28c   : > { %v1935_v41 = vpack.c.bf16 %v8099_v22, %v8098_v56  ;;  %v1856_v58 = vpop.permute.xlu1 %1855  ;;  %v11783_v1 = vpop.f32.mrb[3].mxu1  ;;  %2908 = vperm.xlu0 %9303, %v17671_v36   ;;  %8838 = vmatprep.subr.bf16.mxu1 %v11381_v10  ;;  %vm1897_vm0 = vmor %vm1817_vm15, %vm1881_vm8 }
 0x28d   : > { %vm1878_vm12 = vcmp.eq.s32.totalorder %v1856_v58, %v10545_v54  ;;  %2495 = vperm.xlu1 %9302, %v11799_v11   ;;  %vm1816_vm1 = vmor %vm1736_vm14, %vm1800_vm13  ;;  %v8103_v35 = vsel %vm1897_vm0, 1.0, %v17587_v17  ;;  %v17675_v58 = vld [vmem:[#allocation60_spill] sm:$0xff] }
 0x28e   : > { %vm1894_vm5 = vmor %vm1814_vm10, %vm1878_vm12  ;;  %8795 = vmatmul.mubr.msk.bf16.gmra.mrb[24].mxu1 %vm766_vm11, %v1935_v41  ;;  %v11807_v29 = vpop.permute.xlu0 %2161 }
 0x28f   : > { %v8100_v13 = vsel %vm1894_vm5, 1.0, %v17587_v17  ;;  %8839 = vmatpush3.bf16.msra.mxu1 %v11381_v10  ;;  %v17679_v10 = vld [vmem:[#allocation17_spill] sm:$0xff] }
 0x290   : > { %v1936_v23 = vpack.c.bf16 %v8101_v42, %v8100_v13  ;;  %v1862_v45 = vpop.permute.xlu1 %1861  ;;  %2914 = vperm.xlu0 %9303, %v17673_v38   ;;  %8840 = vmatprep.subr.bf16.mxu1 %v11412_v2  ;;  %v11852_v42 = vld [vmem:[%s10165_s26 + $0x50] sm:$0xff] }
 0x291   : > { %vm1880_vm2 = vcmp.eq.s32.totalorder %v1862_v45, %v10545_v54  ;;  %2501 = vperm.xlu1 %9302, %v11824_v14   ;;  %v11827_v4 = vpop.f32.mrb[4].mxu1  ;;  %17676 = vst [vmem:[#allocation64_spill] sm:$0xff] %v11852_v42 }
 0x292   : > { %vm1896_vm3 = vmor %vm1816_vm1, %vm1880_vm2  ;;  %v11831_v21 = vpop.f32.mrb[5].mxu1  ;;  %8798 = vmatprep.mubr.msk.bf16.mxu1 %vm766_vm11, %v1936_v23  ;;  %v11834_v32 = vpop.permute.xlu0 %2167  ;;  %v17225_v23 = vmov 7   ;;  %vm2190_vm1 = vcmp.eq.s32.totalorder %v11703_v40, %v10545_v54 }
 0x293   : > { %v8102_v46 = vsel %vm1896_vm3, 1.0, %v17587_v17  ;;  %v11840_v22 = vpop.f32.mrb[6].mxu1  ;;  %8841 = vmatpush3.bf16.msra.mxu1 %v11412_v2 }
 0x294   : > { %v1937_v56 = vpack.c.bf16 %v8103_v35, %v8102_v46  ;;  %v11845_v41 = vpop.f32.mrb[7].mxu1  ;;  %2920 = vperm.xlu0 %9303, %v17675_v58   ;;  %8886 = vmatprep.subr.bf16.mxu1 %v11105_v52 }
 0x295   : > { %2507 = vperm.xlu1 %9302, %v11852_v42   ;;  %v11855_v13 = vpop.permute.xlu1 %2076 }
 0x296   : > { %8799 = vmatmul.mubr.msk.bf16.gmra.mrb[28].mxu1 %vm766_vm11, %v1937_v56  ;;  %v11858_v2 = vpop.permute.xlu0 %2173  ;;  %vm2123_vm10 = vcmp.eq.s32.totalorder %v11855_v13, %v10545_v54  ;;  %v17712_v13 = vld [vmem:[#allocation49_spill] sm:$0xff] }
 0x297   : > { %vm2203_vm13 = vmor %vm2123_vm10, %vm2187_vm9 }
 0x298   : > { %9307 = vset.pattern.permute.xlu0 %v17225_v23  ;;  %v17689_v23 = vld [vmem:[#allocation19_spill] sm:$0xff] }
 0x299   : > { %2513 = vperm.xlu1 %9302, %v17673_v38   ;;  %v11862_v45 = vpop.permute.xlu1 %2082  ;;  %v11864_v52 = vpop.f32.mrb[8].mxu1  ;;  %2621 = vperm.xlu0 %9307, %v17565_v59  }
 0x29a   : > { %v11869_v46 = vpop.f32.mrb[9].mxu1  ;;  %v11871_v36 = vpop.permute.xlu0 %2179  ;;  %vm2125_vm2 = vcmp.eq.s32.totalorder %v11862_v45, %v10545_v54 }
 0x29b   : > { %v11875_v39 = vpop.f32.mrb[10].mxu1 }
 0x29c   : > { %v11879_v8 = vpop.f32.mrb[11].mxu1 }
 0x29d   : > { %17677 = vst [vmem:[#allocation55_spill] sm:$0xff] %v11879_v8  ;;  %2519 = vperm.xlu1 %9302, %v17675_v58   ;;  %v11884_v35 = vpop.permute.xlu1 %2085  ;;  %2630 = vperm.xlu0 %9307, %v17569_v0   ;;  %v17691_v0 = vld [vmem:[#allocation21_spill] sm:$0xff] }
 0x29e   : > { %v11887_v63 = vpop.permute.xlu0 %2185  ;;  %vm2126_vm3 = vcmp.eq.s32.totalorder %v11884_v35, %v10545_v54 }
 0x29f   : > { %vm2206_vm10 = vmor %vm2126_vm3, %vm2190_vm1 }
 0x2a1   : > { %9304 = vset.pattern.permute.xlu1 %v17646_v19  ;;  %v11890_v56 = vpop.permute.xlu1 %2091  ;;  %v11892_v15 = vpop.f32.mrb[12].mxu1  ;;  %2636 = vperm.xlu0 %9307, %v17601_v43  }
 0x2a2   : > { %17678 = vst [vmem:[#allocation65_spill] sm:$0xff] %v11892_v15  ;;  %2541 = vperm.xlu1 %9304, %v17679_v10   ;;  %v11898_v58 = vpop.f32.mrb[13].mxu1  ;;  %v11900_v37 = vpop.permute.xlu0 %2477 }
 0x2a3   : > { %17680 = vst [vmem:[#allocation56_spill] sm:$0xff] %v11898_v58  ;;  %17681 = vst [vmem:[#allocation57_spill] sm:$0xff] %v11900_v37  ;;  %v11904_v42 = vpop.f32.mrb[14].mxu1 }
 0x2a4   : > { %17683 = vst [vmem:[#allocation58_spill] sm:$0xff] %v11904_v42  ;;  %v11908_v28 = vpop.f32.mrb[15].mxu1 }
 0x2a5   : > { %17685 = vst [vmem:[#allocation59_spill] sm:$0xff] %v11908_v28  ;;  %v11912_v38 = vpop.permute.xlu1 %2097  ;;  %2642 = vperm.xlu0 %9307, %v17603_v51  }
 0x2a6   : > { %2547 = vperm.xlu1 %9304, %v17687_v24   ;;  %v11916_v37 = vpop.permute.xlu0 %2486 }
 0x2a7   : > { %17688 = vst [vmem:[#allocation60_spill] sm:$0xff] %v11916_v37  ;;  %v17693_v37 = vld [vmem:[#allocation23_spill] sm:$0xff] }
 0x2a9   : > { %v11918_v59 = vpop.permute.xlu1 %2103  ;;  %2648 = vperm.xlu0 %9307, %v17648_v16  }
 0x2aa   : > { %2550 = vperm.xlu1 %9304, %v17689_v23   ;;  %v11922_v11 = vpop.permute.xlu0 %2492 }
 0x2ab   : > { %17690 = vst [vmem:[#allocation79_spill] sm:$0xff] %v11922_v11  ;;  %v17695_v11 = vld [vmem:[#allocation25_spill] sm:$0xff] }
 0x2ad   : > { %v11924_v60 = vpop.permute.xlu1 %2109  ;;  %2654 = vperm.xlu0 %9307, %v17650_v55   ;;  %v17697_v55 = vld [vmem:[#allocation27_spill] sm:$0xff] }
 0x2ae   : > { %2556 = vperm.xlu1 %9304, %v17691_v0   ;;  %v11928_v48 = vpop.permute.xlu0 %2498 }
 0x2af   : > { %17692 = vst [vmem:[#allocation80_spill] sm:$0xff] %v11928_v48 }
 0x2b1   : > { %v11930_v51 = vpop.permute.xlu1 %2115  ;;  %2660 = vperm.xlu0 %9307, %v17652_v53   ;;  %v17699_v53 = vld [vmem:[#allocation29_spill] sm:$0xff] }
 0x2b2   : > { %2562 = vperm.xlu1 %9304, %v17693_v37   ;;  %v11934_v61 = vpop.permute.xlu0 %2504 }
 0x2b3   : > { %17694 = vst [vmem:[#allocation81_spill] sm:$0xff] %v11934_v61 }
 0x2b5   : > { %v11936_v16 = vpop.permute.xlu1 %2121  ;;  %2666 = vperm.xlu0 %9307, %v17654_v31   ;;  %v17701_v31 = vld [vmem:[#allocation31_spill] sm:$0xff] }
 0x2b6   : > { %2568 = vperm.xlu1 %9304, %v17695_v11   ;;  %v11940_v24 = vpop.permute.xlu0 %2510 }
 0x2b7   : > { %17696 = vst [vmem:[#allocation82_spill] sm:$0xff] %v11940_v24 }
 0x2b9   : > { %2942 = vperm.xlu0 %9307, %v17679_v10   ;;  %v17702_v10 = vmov 7  }
 0x2ba   : > { %2574 = vperm.xlu1 %9304, %v17697_v55   ;;  %v2144_v48 = vpop.permute.xlu1 %2143  ;;  %v11944_v28 = vpop.permute.xlu0 %2516 }
 0x2bb   : > { %17698 = vst [vmem:[#allocation83_spill] sm:$0xff] %v11944_v28  ;;  %v17703_v28 = vld [vmem:[#allocation42_spill] sm:$0xff]  ;;  %vm2188_vm6 = vcmp.eq.s32.totalorder %v2144_v48, %v10545_v54 }
 0x2bd   : > { %2951 = vperm.xlu0 %9307, %v17689_v23  }
 0x2be   : > { %2580 = vperm.xlu1 %9304, %v17699_v53   ;;  %v2147_v61 = vpop.permute.xlu1 %2146  ;;  %v11948_v43 = vpop.permute.xlu0 %2522 }
 0x2bf   : > { %17700 = vst [vmem:[#allocation84_spill] sm:$0xff] %v11948_v43  ;;  %vm2189_vm15 = vcmp.eq.s32.totalorder %v2147_v61, %v10545_v54  ;;  %v17713_v61 = vld [vmem:[#allocation52_spill] sm:$0xff] }
 0x2c1   : > { %2957 = vperm.xlu0 %9307, %v17691_v0   ;;  %v17704_v0 = vld [vmem:[#allocation33_spill] sm:$0xff] }
 0x2c2   : > { %2586 = vperm.xlu1 %9304, %v17701_v31   ;;  %v11952_v42 = vpop.permute.xlu1 %2152 }
 0x2c3   : > { %v2224_v24 = vpop.permute.xlu0 %2223 }
 0x2c4   : > { %vm2268_vm7 = vcmp.eq.s32.totalorder %v2224_v24, %v10545_v54  ;;  %v17711_v24 = vld [vmem:[#allocation51_spill] sm:$0xff] }
 0x2c5   : > { %2963 = vperm.xlu0 %9307, %v17693_v37   ;;  %v17705_v37 = vld [vmem:[#allocation44_spill] sm:$0xff] }
 0x2c6   : > { %9305 = vset.pattern.permute.xlu1 %v17702_v10  ;;  %v11956_v14 = vpop.permute.xlu1 %2158 }
 0x2c7   : > { %2624 = vperm.xlu1 %9305, %v17703_v28   ;;  %v11959_v23 = vpop.permute.xlu0 %2232  ;;  %vm2193_vm1 = vcmp.eq.s32.totalorder %v11956_v14, %v10545_v54 }
 0x2c9   : > { %2969 = vperm.xlu0 %9307, %v17695_v11  }
 0x2ca   : > { %v11962_v43 = vpop.permute.xlu1 %2164 }
 0x2cb   : > { %2627 = vperm.xlu1 %9305, %v17704_v0   ;;  %v11965_v58 = vpop.permute.xlu0 %2238 }
 0x2cd   : > { %2975 = vperm.xlu0 %9307, %v17697_v55   ;;  %v17707_v55 = vld [vmem:[#allocation68_spill] sm:$0xff] }
 0x2ce   : > { %v11968_v26 = vpop.permute.xlu1 %2170  ;;  %vm2124_vm4 = vcmp.eq.s32.totalorder %v17707_v55, %v10545_v54 }
 0x2cf   : > { %2633 = vperm.xlu1 %9305, %v17705_v37   ;;  %v11971_v10 = vpop.permute.xlu0 %2244  ;;  %v17708_v37 = vld [vmem:[#allocation47_spill] sm:$0xff]  ;;  %vm2204_vm8 = vmor %vm2124_vm4, %vm2188_vm6 }
 0x2d0   : > { %vm2284_vm12 = vmor %vm2204_vm8, %vm2268_vm7  ;;  %vm2191_vm7 = vcmp.eq.s32.totalorder %v11952_v42, %v10545_v54  ;;  %vm2271_vm8 = vcmp.eq.s32.totalorder %v11959_v23, %v10545_v54  ;;  %v17716_v42 = vld [vmem:[#allocation53_spill] sm:$0xff] }
 0x2d1   : > { %2981 = vperm.xlu0 %9307, %v17699_v53   ;;  %v17710_v53 = vld [vmem:[#allocation48_spill] sm:$0xff]  ;;  %v8113_v7 = vsel %vm2284_vm12, 1.0, %v17587_v17  ;;  %vm2205_vm4 = vmor %vm2125_vm2, %vm2189_vm15 }
 0x2d2   : > { %v11974_v15 = vpop.permute.xlu1 %2176 }
 0x2d3   : > { %2639 = vperm.xlu1 %9305, %v17706_v25   ;;  %v11977_v11 = vpop.permute.xlu0 %2250 }
 0x2d5   : > { %2987 = vperm.xlu0 %9307, %v17701_v31   ;;  %v17709_v31 = vld [vmem:[#allocation40_spill] sm:$0xff] }
 0x2d6   : > { %v11980_v0 = vpop.permute.xlu1 %2182 }
 0x2d7   : > { %2645 = vperm.xlu1 %9305, %v17708_v37   ;;  %v11986_v8 = vpop.permute.xlu0 %2256 }
 0x2d9   : > { %3279 = vperm.xlu0 %9307, %v17709_v31  }
 0x2db   : > { %2651 = vperm.xlu1 %9305, %v17710_v53   ;;  %v2221_v55 = vpop.permute.xlu1 %2220  ;;  %v11995_v48 = vpop.permute.xlu0 %2262 }
 0x2dc   : > { %vm2267_vm14 = vcmp.eq.s32.totalorder %v2221_v55, %v10545_v54 }
 0x2dd   : > { %vm2283_vm5 = vmor %vm2203_vm13, %vm2267_vm14  ;;  %3288 = vperm.xlu0 %9307, %v17711_v24   ;;  %vm2192_vm13 = vcmp.eq.s32.totalorder %v11753_v27, %v10545_v54  ;;  %vm2128_vm14 = vcmp.eq.s32.totalorder %v11890_v56, %v10545_v54  ;;  %v17717_v24 = vld [vmem:[#allocation74_spill] sm:$0xff] }
 0x2de   : > { %v8112_v37 = vsel %vm2283_vm5, 1.0, %v17587_v17  ;;  %vm2208_vm3 = vmor %vm2128_vm14, %vm2192_vm13  ;;  %vm2195_vm13 = vcmp.eq.s32.totalorder %v11962_v43, %v10545_v54  ;;  %v17730_v43 = vld [vmem:[#allocation76_spill] sm:$0xff] }
 0x2df   : > { %v2331_v31 = vpack.c.bf16 %v8113_v7, %v8112_v37  ;;  %2657 = vperm.xlu1 %9305, %v17712_v13   ;;  %v2227_v25 = vpop.permute.xlu1 %2226  ;;  %v12003_v53 = vpop.permute.xlu0 %2544  ;;  %v17714_v37 = vld [vmem:[#allocation69_spill] sm:$0xff] }
 0x2e0   : > { %vm2269_vm0 = vcmp.eq.s32.totalorder %v2227_v25, %v10545_v54  ;;  %vm2127_vm6 = vcmp.eq.s32.totalorder %v17714_v37, %v10545_v54  ;;  %v17715_v25 = vld [vmem:[#allocation50_spill] sm:$0xff] }
 0x2e1   : > { %8814 = vmatprep.mubr.msk.bf16.mxu0 %vm766_vm11, %v2331_v31  ;;  %3294 = vperm.xlu0 %9307, %v17713_v61   ;;  %vm2285_vm9 = vmor %vm2205_vm4, %vm2269_vm0  ;;  %vm2129_vm0 = vcmp.eq.s32.totalorder %v17717_v24, %v10545_v54  ;;  %vm2273_vm4 = vcmp.eq.s32.totalorder %v11965_v58, %v10545_v54  ;;  %v12046_v31 = vld [vmem:[%s10165_s26] sm:$0xff]  ;;  %v17725_v24 = vmax.f32 %v11441_v47, %v11742_v18 }
 0x2e2   : > { %vm2207_vm15 = vmor %vm2127_vm6, %vm2191_vm7  ;;  %v8114_v45 = vsel %vm2285_vm9, 1.0, %v17587_v17  ;;  %17720 = vst [vmem:[#allocation68_spill] sm:$0xff] %v12046_v31  ;;  %vm2194_vm7 = vcmp.eq.s32.totalorder %v11807_v29, %v10545_v54  ;;  %vm2130_vm9 = vcmp.eq.s32.totalorder %v11912_v38, %v10545_v54  ;;  %v17726_v47 = vmax.f32 %v11449_v34, %v11750_v3  ;;  %v17728_v3 = vld [vmem:[#allocation45_spill] sm:$0xff] }
 0x2e3   : > { %2663 = vperm.xlu1 %9305, %v17715_v25   ;;  %v2230_v40 = vpop.permute.xlu1 %2229  ;;  %v12019_v55 = vpop.permute.xlu0 %2553  ;;  %vm12035_vm2 = vmor %vm2207_vm15, %vm2271_vm8  ;;  %vm2275_vm15 = vcmp.eq.s32.totalorder %v11971_v10, %v10545_v54  ;;  %v17727_v29 = vmax.f32 %v11452_v30, %v11769_v49  ;;  %v17729_v49 = vmax.f32 %v11454_v33, %v11783_v1  ;;  %v12142_v33 = vld [vmem:[#allocation2 + $0x10] sm:$0xff]   ;;  %v12155_v1 = vld [vmem:[%s10165_s26 + $0x18] sm:$0xff] }
 0x2e4   : > { %vm2270_vm12 = vcmp.eq.s32.totalorder %v2230_v40, %v10545_v54  ;;  %vm2209_vm8 = vmor %vm2129_vm0, %vm2193_vm1  ;;  %v8116_v61 = vsel %vm12035_vm2, 1.0, %v17587_v17  ;;  %vm2196_vm1 = vcmp.eq.s32.totalorder %v11834_v32, %v10545_v54  ;;  %vm2132_vm2 = vcmp.eq.s32.totalorder %v11918_v59, %v10545_v54  ;;  %17733 = vst [vmem:[#allocation40_spill] sm:$0xff] %v12155_v1  ;;  %v17734_v59 = vld [vmem:[#allocation66_spill] sm:$0xff] }
 0x2e5   : > { %vm2286_vm5 = vmor %vm2206_vm10, %vm2270_vm12  ;;  %3300 = vperm.xlu0 %9307, %v17716_v42   ;;  %v12065_v42 = vld [vmem:[#allocation2] sm:$0xff]  }
 0x2e6   : > { %v8115_v35 = vsel %vm2286_vm5, 1.0, %v17587_v17  ;;  %vm12075_vm14 = vmor %vm2209_vm8, %vm2273_vm4  ;;  %vm2277_vm8 = vcmp.eq.s32.totalorder %v11977_v11, %v10545_v54 }
 0x2e7   : > { %v2332_v23 = vpack.c.bf16 %v8115_v35, %v8114_v45  ;;  %9306 = vset.pattern.permute.xlu1 %v17646_v19  ;;  %v2236_v56 = vpop.permute.xlu1 %2235  ;;  %v12040_v7 = vpop.permute.xlu0 %2559  ;;  %v17721_v19 = vld [vmem:[#allocation43_spill] sm:$0xff]  ;;  %vm2210_vm5 = vmor %vm2130_vm9, %vm2194_vm7  ;;  %vm2197_vm7 = vcmp.eq.s32.totalorder %v11968_v26, %v10545_v54 }
 0x2e8   : > { %vm2272_vm6 = vcmp.eq.s32.totalorder %v2236_v56, %v10545_v54  ;;  %2878 = vperm.xlu1 %9306, %v12046_v31   ;;  %v17722_v45 = vld [vmem:[#allocation75_spill] sm:$0xff] }
 0x2e9   : > { %vm2288_vm10 = vmor %vm2208_vm3, %vm2272_vm6  ;;  %8815 = vmatmul.mubr.msk.bf16.vlgmr.msra.gmra.mrb[32].mxu0 %vm766_vm11, %v2332_v23  ;;  %3306 = vperm.xlu0 %9307, %v17721_v19   ;;  %vm2131_vm12 = vcmp.eq.s32.totalorder %v17722_v45, %v10545_v54  ;;  %v12084_v19 = vld [vmem:[#allocation2 + $0x8] sm:$0xff]   ;;  %vm2133_vm6 = vcmp.eq.s32.totalorder %v17730_v43, %v10545_v54 }
 0x2ea   : > { %v8117_v37 = vsel %vm2288_vm10, 1.0, %v17587_v17  ;;  %v8760_v40 = vpop.f32.mrb[16].mxu0  ;;  %8859 = vmatpush3.bf16.msra.mxu0 %v12065_v42  ;;  %vm2211_vm4 = vmor %vm2131_vm12, %vm2195_vm13  ;;  %vm2198_vm13 = vcmp.eq.s32.totalorder %v11858_v2, %v10545_v54 }
 0x2eb   : > { %v2333_v35 = vpack.c.bf16 %v8117_v37, %v8116_v61  ;;  %v12082_v27 = vmax.f32 %v8760_v40, %v17725_v24  ;;  %v2242_v23 = vpop.permute.xlu1 %2241  ;;  %v1595_v56 = vpop.f32.mrb[17].mxu0  ;;  %8860 = vmatprep.subr.bf16.mxu0 %v12084_v19  ;;  %vm12138_vm9 = vmor %vm2211_vm4, %vm2275_vm15  ;;  %vm2279_vm4 = vcmp.eq.s32.totalorder %v11986_v8, %v10545_v54  ;;  %v12267_v8 = vld [vmem:[%s10165_s26 + $0x38] sm:$0xff]  ;;  %v17763_v40 = vld [vmem:[#allocation65_spill] sm:$0xff] }
 0x2ec   : > { %vm2274_vm0 = vcmp.eq.s32.totalorder %v2242_v23, %v10545_v54  ;;  %v12099_v18 = vmax.f32 %v1595_v56, %v17726_v47  ;;  %2884 = vperm.xlu1 %9306, %v11695_v12   ;;  %v8761_v58 = vpop.f32.mrb[18].mxu0  ;;  %v12102_v61 = vpop.permute.xlu0 %2565  ;;  %v8118_v12 = vsel %vm12075_vm14, 1.0, %v17587_v17  ;;  %vm2212_vm10 = vmor %vm2132_vm2, %vm2196_vm1  ;;  %vm2134_vm14 = vcmp.eq.s32.totalorder %v11924_v60, %v10545_v54  ;;  %v17735_v23 = vld [vmem:[#allocation77_spill] sm:$0xff]  ;;  %17747 = vst [vmem:[#allocation52_spill] sm:$0xff] %v12267_v8 }
 0x2ed   : > { %vm2290_vm3 = vmor %vm2210_vm5, %vm2274_vm0  ;;  %v12111_v38 = vmax.f32 %v8761_v58, %v17727_v29  ;;  %v1598_v34 = vpop.f32.mrb[19].mxu0  ;;  %8818 = vmatprep.mubr.msk.bf16.mxu0 %vm766_vm11, %v2333_v35  ;;  %3312 = vperm.xlu0 %9307, %v17728_v3   ;;  %v8120_v32 = vsel %vm12138_vm9, 1.0, %v17587_v17  ;;  %vm2135_vm0 = vcmp.eq.s32.totalorder %v17735_v23, %v10545_v54  ;;  %vm2199_vm1 = vcmp.eq.s32.totalorder %v11974_v15, %v10545_v54  ;;  %v12193_v3 = vld [vmem:[#allocation2 + $0x18] sm:$0xff]  }
 0x2ee   : > { %v8119_v30 = vsel %vm2290_vm3, 1.0, %v17587_v17  ;;  %v12128_v37 = vmax.f32 %v1598_v34, %v17729_v49  ;;  %8861 = vmatpush3.bf16.msra.mxu0 %v12084_v19  ;;  %vm2213_vm15 = vmor %vm2133_vm6, %vm2197_vm7  ;;  %v17738_v47 = vmax.f32 %v11467_v5, %v11827_v4  ;;  %v17739_v5 = vmax.f32 %v11472_v62, %v11831_v21  ;;  %v12211_v4 = vld [vmem:[%s10165_s26 + $0x28] sm:$0xff]  ;;  %v17744_v15 = vld [vmem:[#allocation78_spill] sm:$0xff] }
 0x2ef   : > { %v2334_v45 = vpack.c.bf16 %v8119_v30, %v8118_v12  ;;  %v2248_v14 = vpop.permute.xlu1 %2247  ;;  %8862 = vmatprep.subr.bf16.mxu0 %v12142_v33  ;;  %vm12184_vm2 = vmor %vm2213_vm15, %vm2277_vm8  ;;  %17740 = vst [vmem:[#allocation51_spill] sm:$0xff] %v12211_v4  ;;  %vm2200_vm7 = vcmp.eq.s32.totalorder %v11871_v36, %v10545_v54  ;;  %vm2136_vm9 = vcmp.eq.s32.totalorder %v11930_v51, %v10545_v54  ;;  %v17742_v30 = vld [vmem:[#allocation67_spill] sm:$0xff]  ;;  %v17263_v51 = vmov 8  }
 0x2f0   : > { %vm2276_vm12 = vcmp.eq.s32.totalorder %v2248_v14, %v10545_v54  ;;  %2887 = vperm.xlu1 %9306, %v12155_v1   ;;  %v12158_v10 = vpop.permute.xlu0 %2571  ;;  %vm2214_vm3 = vmor %vm2134_vm14, %vm2198_vm13  ;;  %v17741_v60 = vmax.f32 %v11476_v50, %v11840_v22  ;;  %v8122_v49 = vsel %vm12184_vm2, 1.0, %v17587_v17  ;;  %v17743_v22 = vmax.f32 %v11478_v44, %v11845_v41  ;;  %v12254_v44 = vld [vmem:[#allocation2 + $0x20] sm:$0xff]  }
 0x2f1   : > { %vm2292_vm5 = vmor %vm2212_vm10, %vm2276_vm12  ;;  %8819 = vmatmul.mubr.msk.bf16.gmra.mrb[36].mxu0 %vm766_vm11, %v2334_v45  ;;  %3318 = vperm.xlu0 %9307, %v17734_v59   ;;  %vm2137_vm12 = vcmp.eq.s32.totalorder %v17744_v15, %v10545_v54  ;;  %vm2201_vm13 = vcmp.eq.s32.totalorder %v11980_v0, %v10545_v54  ;;  %vm2281_vm15 = vcmp.eq.s32.totalorder %v11995_v48, %v10545_v54  ;;  %v12318_v48 = vld [vmem:[%s10165_s26 + $0x48] sm:$0xff]  ;;  %v17762_v15 = vld [vmem:[#allocation70_spill] sm:$0xff] }
 0x2f2   : > { %v8121_v35 = vsel %vm2292_vm5, 1.0, %v17587_v17  ;;  %v8764_v24 = vpop.f32.mrb[20].mxu0  ;;  %8863 = vmatpush3.bf16.msra.mxu0 %v12142_v33  ;;  %vm2215_vm8 = vmor %vm2135_vm0, %vm2199_vm1  ;;  %vm2202_vm1 = vcmp.eq.s32.totalorder %v11887_v63, %v10545_v54  ;;  %vm2138_vm2 = vcmp.eq.s32.totalorder %v11936_v16, %v10545_v54  ;;  %17752 = vst [vmem:[#allocation69_spill] sm:$0xff] %v12318_v48  ;;  %v17754_v16 = vmax.f32 %v11496_v57, %v11875_v39  ;;  %v12342_v39 = vld [vmem:[%s10165_s26 + $0x58] sm:$0xff] }
 0x2f3   : > { %v2335_v56 = vpack.c.bf16 %v8121_v35, %v8120_v32  ;;  %v12191_v58 = vmax.f32 %v8764_v24, %v17738_v47  ;;  %v2254_v29 = vpop.permute.xlu1 %2253  ;;  %v1611_v34 = vpop.f32.mrb[21].mxu0  ;;  %8864 = vmatprep.subr.bf16.mxu0 %v12193_v3  ;;  %vm12250_vm14 = vmor %vm2215_vm8, %vm2279_vm4  ;;  %v17750_v24 = vmax.f32 %v11488_v6, %v11864_v52  ;;  %v12302_v47 = vld [vmem:[#allocation2 + $0x28] sm:$0xff]   ;;  %v17751_v6 = vmax.f32 %v11492_v20, %v11869_v46 }
 0x2f4   : > { %vm2278_vm6 = vcmp.eq.s32.totalorder %v2254_v29, %v10545_v54  ;;  %v12208_v11 = vmax.f32 %v1611_v34, %v17739_v5  ;;  %2893 = vperm.xlu1 %9306, %v12211_v4   ;;  %v8765_v12 = vpop.f32.mrb[22].mxu0  ;;  %v12214_v2 = vpop.permute.xlu0 %2577  ;;  %vm2216_vm5 = vmor %vm2136_vm9, %vm2200_vm7  ;;  %v8124_v36 = vsel %vm12250_vm14, 1.0, %v17587_v17  ;;  %17759 = vst [vmem:[#allocation43_spill] sm:$0xff] %v12342_v39  ;;  %v17801_v4 = vld [vmem:[#allocation62_spill] sm:$0xff] }
 0x2f5   : > { %vm2294_vm10 = vmor %vm2214_vm3, %vm2278_vm6  ;;  %v12223_v62 = vmax.f32 %v8765_v12, %v17741_v60  ;;  %v1614_v21 = vpop.f32.mrb[23].mxu0  ;;  %8822 = vmatprep.mubr.msk.bf16.mxu0 %vm766_vm11, %v2335_v56  ;;  %3324 = vperm.xlu0 %9307, %v17742_v30   ;;  %v17755_v12 = vld [vmem:[#allocation55_spill] sm:$0xff]  ;;  %v17758_v30 = vld [vmem:[#allocation44_spill] sm:$0xff] }
 0x2f6   : > { %v8123_v50 = vsel %vm2294_vm10, 1.0, %v17587_v17  ;;  %v12240_v43 = vmax.f32 %v1614_v21, %v17743_v22  ;;  %8865 = vmatpush3.bf16.msra.mxu0 %v12193_v3  ;;  %vm2217_vm4 = vmor %vm2137_vm12, %vm2201_vm13  ;;  %v17756_v60 = vmax.f32 %v11499_v9, %v17755_v12  ;;  %v17761_v22 = vld [vmem:[#allocation46_spill] sm:$0xff]  ;;  %v17776_v12 = vld [vmem:[#allocation73_spill] sm:$0xff]  ;;  %vm2589_vm13 = vcmp.eq.s32.totalorder %v12003_v53, %v10545_v54 }
 0x2f7   : > { %v2336_v45 = vpack.c.bf16 %v8123_v50, %v8122_v49  ;;  %v2260_v14 = vpop.permute.xlu1 %2259  ;;  %8866 = vmatprep.subr.bf16.mxu0 %v12254_v44  ;;  %vm12293_vm6 = vmor %vm2217_vm4, %vm2281_vm15  ;;  %v17812_v53 = vld [vmem:[#allocation38_spill] sm:$0xff] }
 0x2f8   : > { %vm2280_vm0 = vcmp.eq.s32.totalorder %v2260_v14, %v10545_v54  ;;  %2899 = vperm.xlu1 %9306, %v12267_v8   ;;  %v12270_v41 = vpop.permute.xlu0 %2583  ;;  %vm2218_vm7 = vmor %vm2138_vm2, %vm2202_vm1  ;;  %v8126_v20 = vsel %vm12293_vm6, 1.0, %v17587_v17 }
 0x2f9   : > { %vm2296_vm3 = vmor %vm2216_vm5, %vm2280_vm0  ;;  %8823 = vmatmul.mubr.msk.bf16.gmra.mrb[40].mxu0 %vm766_vm11, %v2336_v45  ;;  %9311 = vset.pattern.permute.xlu0 %v17263_v51  ;;  %v17764_v45 = vmax.f32 %v17762_v15, %v17763_v40  ;;  %v17780_v15 = vld [vmem:[#allocation47_spill] sm:$0xff] }
 0x2fa   : > { %v8125_v59 = vsel %vm2296_vm3, 1.0, %v17587_v17  ;;  %v8768_v32 = vpop.f32.mrb[24].mxu0  ;;  %3025 = vperm.xlu0 %9311, %v17703_v28   ;;  %8867 = vmatpush3.bf16.msra.mxu0 %v12254_v44  ;;  %v12381_v40 = vld [vmem:[%s10165_s26 + $0x78] sm:$0xff] }
 0x2fb   : > { %v2337_v35 = vpack.c.bf16 %v8125_v59, %v8124_v36  ;;  %v12300_v23 = vmax.f32 %v8768_v32, %v17750_v24  ;;  %v2266_v26 = vpop.permute.xlu1 %2265  ;;  %v1627_v56 = vpop.f32.mrb[25].mxu0  ;;  %8868 = vmatprep.subr.bf16.mxu0 %v12302_v47  ;;  %v17766_v59 = vld [vmem:[#allocation71_spill] sm:$0xff]  ;;  %v17767_v32 = vld [vmem:[#allocation56_spill] sm:$0xff]  ;;  %17781 = vst [vmem:[#allocation55_spill] sm:$0xff] %v12381_v40  ;;  %v17800_v28 = vld [vmem:[#allocation34_spill] sm:$0xff] }
 0x2fc   : > { %vm2282_vm9 = vcmp.eq.s32.totalorder %v2266_v26, %v10545_v54  ;;  %v12315_v52 = vmax.f32 %v1627_v56, %v17751_v6  ;;  %2905 = vperm.xlu1 %9306, %v12318_v48   ;;  %v8769_v29 = vpop.f32.mrb[26].mxu0  ;;  %v12321_v34 = vpop.permute.xlu0 %2881  ;;  %v17768_v0 = vmax.f32 %v17766_v59, %v17767_v32  ;;  %v12362_v24 = vld [vmem:[%s10165_s26 + $0x68] sm:$0xff]  ;;  %v17784_v32 = vmov 7  }
 0x2fd   : > { %17753 = vst [vmem:[#allocation53_spill] sm:$0xff] %v12321_v34  ;;  %vm2298_vm10 = vmor %vm2218_vm7, %vm2282_vm9  ;;  %v12326_v63 = vmax.f32 %v8769_v29, %v17754_v16  ;;  %v1630_v5 = vpop.f32.mrb[27].mxu0  ;;  %8826 = vmatprep.mubr.msk.bf16.mxu0 %vm766_vm11, %v2337_v35  ;;  %v17771_v6 = vld [vmem:[#allocation72_spill] sm:$0xff]  ;;  %v17772_v29 = vld [vmem:[#allocation58_spill] sm:$0xff] }
 0x2fe   : > { %v8127_v46 = vsel %vm2298_vm10, 1.0, %v17587_v17  ;;  %v12336_v21 = vmax.f32 %v1630_v5, %v17756_v60  ;;  %3034 = vperm.xlu0 %9311, %v17758_v30   ;;  %8869 = vmatpush3.bf16.msra.mxu0 %v12302_v47  ;;  %17770 = vst [vmem:[#allocation66_spill] sm:$0xff] %v12362_v24  ;;  %v17773_v16 = vmax.f32 %v17771_v6, %v17772_v29  ;;  %v17777_v60 = vld [vmem:[#allocation59_spill] sm:$0xff]  ;;  %v17783_v59 = vld [vmem:[#allocation48_spill] sm:$0xff]  ;;  %v17799_v48 = vld [vmem:[#allocation61_spill] sm:$0xff] }
 0x2ff   : > { %v2338_v57 = vpack.c.bf16 %v8127_v46, %v8126_v20  ;;  %8914 = vmatprep.subr.bf16.mxu0 %v12065_v42 }
 0x300   : > { %17757 = vst [vmem:[#allocation74_spill] sm:$0xff] %v12336_v21  ;;  %2911 = vperm.xlu1 %9306, %v12342_v39   ;;  %v12345_v49 = vpop.permute.xlu1 %2480  ;;  %v12347_v50 = vpop.permute.xlu0 %2890  ;;  %v17901_v21 = vld [vmem:[#allocation47_spill] sm:$0xff] }
 0x301   : > { %17760 = vst [vmem:[#allocation75_spill] sm:$0xff] %v12347_v50  ;;  %8827 = vmatmul.mubr.msk.bf16.gmra.mrb[44].mxu0 %vm766_vm11, %v2338_v57  ;;  %v17778_v57 = vmax.f32 %v17776_v12, %v17777_v60  ;;  %v17789_v60 = vld [vmem:[#allocation20_spill] sm:$0xff]  ;;  %v17793_v50 = vld [vmem:[#allocation26_spill] sm:$0xff]  ;;  %vm2525_vm14 = vcmp.eq.s32.totalorder %v12345_v49, %v10545_v54 }
 0x302   : > { %v8772_v9 = vpop.f32.mrb[28].mxu0  ;;  %3040 = vperm.xlu0 %9311, %v17761_v22   ;;  %vm2605_vm2 = vmor %vm2525_vm14, %vm2589_vm13 }
 0x303   : > { %v12354_v14 = vmax.f32 %v8772_v9, %v17764_v45  ;;  %v1643_v36 = vpop.f32.mrb[29].mxu0 }
 0x304   : > { %v12359_v35 = vmax.f32 %v1643_v36, %v17768_v0  ;;  %2917 = vperm.xlu1 %9306, %v12362_v24   ;;  %v12365_v26 = vpop.permute.xlu1 %2483  ;;  %v8773_v56 = vpop.f32.mrb[30].mxu0 }
 0x305   : > { %17765 = vst [vmem:[#allocation45_spill] sm:$0xff] %v12354_v14  ;;  %v12370_v5 = vmax.f32 %v8773_v56, %v17773_v16  ;;  %v1646_v20 = vpop.f32.mrb[31].mxu0  ;;  %v12372_v46 = vpop.permute.xlu0 %2896  ;;  %v17785_v56 = vld [vmem:[#allocation16_spill] sm:$0xff]  ;;  %v17787_v16 = vld [vmem:[#allocation18_spill] sm:$0xff]  ;;  %v17896_v14 = vld [vmem:[#allocation43_spill] sm:$0xff] }
 0x306   : > { %17769 = vst [vmem:[#allocation76_spill] sm:$0xff] %v12359_v35  ;;  %17775 = vst [vmem:[#allocation67_spill] sm:$0xff] %v12372_v46  ;;  %v12377_v9 = vmax.f32 %v1646_v20, %v17778_v57  ;;  %3046 = vperm.xlu0 %9311, %v17780_v15  }
 0x307   : > { %17774 = vst [vmem:[#allocation77_spill] sm:$0xff] %v12370_v5  ;;  %v17808_v5 = vld [vmem:[#allocation57_spill] sm:$0xff] }
 0x308   : > { %17779 = vst [vmem:[#allocation78_spill] sm:$0xff] %v12377_v9  ;;  %2923 = vperm.xlu1 %9306, %v12381_v40   ;;  %v12384_v45 = vpop.permute.xlu1 %2489  ;;  %v17807_v9 = vld [vmem:[#allocation54_spill] sm:$0xff]  ;;  %vm2524_vm8 = vcmp.eq.s32.totalorder %v17808_v5, %v10545_v54  ;;  %v17811_v5 = vld [vmem:[#allocation60_spill] sm:$0xff] }
 0x309   : > { %v12386_v36 = vpop.permute.xlu0 %2902  ;;  %vm2527_vm0 = vcmp.eq.s32.totalorder %v17811_v5, %v10545_v54 }
 0x30a   : > { %17782 = vst [vmem:[#allocation70_spill] sm:$0xff] %v12386_v36  ;;  %3052 = vperm.xlu0 %9311, %v17783_v59  }
 0x30c   : > { %9308 = vset.pattern.permute.xlu1 %v17784_v32  ;;  %v12390_v0 = vpop.permute.xlu1 %2495 }
 0x30d   : > { %2945 = vperm.xlu1 %9308, %v17785_v56   ;;  %v12393_v6 = vpop.permute.xlu0 %2908 }
 0x30e   : > { %17786 = vst [vmem:[#allocation65_spill] sm:$0xff] %v12393_v6  ;;  %3058 = vperm.xlu0 %9311, %v17712_v13   ;;  %v17791_v6 = vld [vmem:[#allocation22_spill] sm:$0xff] }
 0x310   : > { %v12396_v29 = vpop.permute.xlu1 %2501 }
 0x311   : > { %2948 = vperm.xlu1 %9308, %v17787_v16   ;;  %v12399_v20 = vpop.permute.xlu0 %2914  ;;  %v17804_v16 = vld [vmem:[#allocation63_spill] sm:$0xff] }
 0x312   : > { %17788 = vst [vmem:[#allocation71_spill] sm:$0xff] %v12399_v20  ;;  %3064 = vperm.xlu0 %9311, %v17715_v25   ;;  %v17792_v20 = vld [vmem:[#allocation24_spill] sm:$0xff] }
 0x314   : > { %v12402_v12 = vpop.permute.xlu1 %2507 }
 0x315   : > { %2954 = vperm.xlu1 %9308, %v17789_v60   ;;  %v12405_v57 = vpop.permute.xlu0 %2920 }
 0x316   : > { %17790 = vst [vmem:[#allocation56_spill] sm:$0xff] %v12405_v57  ;;  %3346 = vperm.xlu0 %9311, %v17785_v56   ;;  %v17794_v56 = vld [vmem:[#allocation28_spill] sm:$0xff] }
 0x318   : > { %v12408_v51 = vpop.permute.xlu1 %2513 }
 0x319   : > { %2960 = vperm.xlu1 %9308, %v17791_v6   ;;  %v2622_v36 = vpop.permute.xlu0 %2621 }
 0x31a   : > { %3355 = vperm.xlu0 %9311, %v17789_v60   ;;  %v17795_v60 = vld [vmem:[#allocation30_spill] sm:$0xff]  ;;  %vm2668_vm15 = vcmp.eq.s32.totalorder %v2622_v36, %v10545_v54 }
 0x31c   : > { %v12412_v46 = vpop.permute.xlu1 %2519 }
 0x31d   : > { %2966 = vperm.xlu1 %9308, %v17792_v20   ;;  %v12415_v25 = vpop.permute.xlu0 %2630 }
 0x31e   : > { %3361 = vperm.xlu0 %9311, %v17791_v6   ;;  %v17796_v6 = vmov 8   ;;  %vm2671_vm7 = vcmp.eq.s32.totalorder %v12415_v25, %v10545_v54 }
 0x321   : > { %2972 = vperm.xlu1 %9308, %v17793_v50   ;;  %v2542_v57 = vpop.permute.xlu1 %2541  ;;  %v12419_v13 = vpop.permute.xlu0 %2636 }
 0x322   : > { %3367 = vperm.xlu0 %9311, %v17792_v20   ;;  %v17797_v20 = vld [vmem:[#allocation32_spill] sm:$0xff]  ;;  %vm2588_vm12 = vcmp.eq.s32.totalorder %v2542_v57, %v10545_v54 }
 0x323   : > { %vm2604_vm5 = vmor %vm2524_vm8, %vm2588_vm12  ;;  %v12481_v57 = vld [vmem:[%s10165_s26 + $0x60] sm:$0xff]  ;;  %vm2526_vm8 = vcmp.eq.s32.totalorder %v12365_v26, %v10545_v54 }
 0x324   : > { %vm2684_vm3 = vmor %vm2604_vm5, %vm2668_vm15  ;;  %17813 = vst [vmem:[#allocation73_spill] sm:$0xff] %v12481_v57  ;;  %vm2592_vm5 = vcmp.eq.s32.totalorder %v12019_v55, %v10545_v54  ;;  %vm2528_vm15 = vcmp.eq.s32.totalorder %v12384_v45, %v10545_v54  ;;  %v17819_v45 = vld [vmem:[#allocation80_spill] sm:$0xff] }
 0x325   : > { %2978 = vperm.xlu1 %9308, %v17794_v56   ;;  %v2548_v59 = vpop.permute.xlu1 %2547  ;;  %v12423_v40 = vpop.permute.xlu0 %2642 }
 0x326   : > { %3373 = vperm.xlu0 %9311, %v17793_v50   ;;  %v17798_v50 = vld [vmem:[#allocation33_spill] sm:$0xff]  ;;  %vm2590_vm4 = vcmp.eq.s32.totalorder %v2548_v59, %v10545_v54 }
 0x327   : > { %vm12493_vm14 = vmor %vm2526_vm8, %vm2590_vm4  ;;  %vm2531_vm4 = vcmp.eq.s32.totalorder %v17819_v45, %v10545_v54  ;;  %vm2530_vm8 = vcmp.eq.s32.totalorder %v12390_v0, %v10545_v54 }
 0x329   : > { %2984 = vperm.xlu1 %9308, %v17795_v60   ;;  %v2551_v15 = vpop.permute.xlu1 %2550  ;;  %v12427_v24 = vpop.permute.xlu0 %2648 }
 0x32a   : > { %3379 = vperm.xlu0 %9311, %v17794_v56   ;;  %vm2591_vm1 = vcmp.eq.s32.totalorder %v2551_v15, %v10545_v54  ;;  %v8136_v15 = vsel %vm2684_vm3, 1.0, %v17587_v17 }
 0x32b   : > { %vm2607_vm6 = vmor %vm2527_vm0, %vm2591_vm1 }
 0x32c   : > { %vm2687_vm0 = vmor %vm2607_vm6, %vm2671_vm7 }
 0x32d   : > { %9309 = vset.pattern.permute.xlu1 %v17796_v6  ;;  %v2557_v34 = vpop.permute.xlu1 %2556  ;;  %v12431_v22 = vpop.permute.xlu0 %2654 }
 0x32e   : > { %3022 = vperm.xlu1 %9309, %v17797_v20   ;;  %3385 = vperm.xlu0 %9311, %v17795_v60   ;;  %v17803_v60 = vld [vmem:[#allocation35_spill] sm:$0xff]  ;;  %vm2593_vm12 = vcmp.eq.s32.totalorder %v2557_v34, %v10545_v54 }
 0x32f   : > { %v17818_v34 = vld [vmem:[#allocation39_spill] sm:$0xff] }
 0x331   : > { %v12435_v39 = vpop.permute.xlu1 %2562  ;;  %v12437_v30 = vpop.permute.xlu0 %2660 }
 0x332   : > { %3028 = vperm.xlu1 %9309, %v17798_v50   ;;  %3683 = vperm.xlu0 %9311, %v17799_v48   ;;  %v17806_v48 = vld [vmem:[#allocation36_spill] sm:$0xff]  ;;  %vm2595_vm6 = vcmp.eq.s32.totalorder %v12435_v39, %v10545_v54 }
 0x335   : > { %v12441_v8 = vpop.permute.xlu1 %2568  ;;  %v12443_v56 = vpop.permute.xlu0 %2666 }
 0x336   : > { %3031 = vperm.xlu1 %9309, %v17800_v28   ;;  %3692 = vperm.xlu0 %9311, %v17801_v4  }
 0x339   : > { %v12447_v1 = vpop.permute.xlu1 %2574  ;;  %v12449_v31 = vpop.permute.xlu0 %2942 }
 0x33a   : > { %17802 = vst [vmem:[#allocation72_spill] sm:$0xff] %v12449_v31  ;;  %3037 = vperm.xlu1 %9309, %v17803_v60   ;;  %3698 = vperm.xlu0 %9311, %v17804_v16   ;;  %v17809_v16 = vld [vmem:[#allocation37_spill] sm:$0xff] }
 0x33d   : > { %v12453_v6 = vpop.permute.xlu1 %2580  ;;  %v12455_v50 = vpop.permute.xlu0 %2951 }
 0x33e   : > { %17805 = vst [vmem:[#allocation58_spill] sm:$0xff] %v12455_v50  ;;  %3043 = vperm.xlu1 %9309, %v17806_v48   ;;  %3704 = vperm.xlu0 %9311, %v17807_v9   ;;  %v17810_v50 = vld [vmem:[#allocation64_spill] sm:$0xff] }
 0x341   : > { %v12462_v4 = vpop.permute.xlu1 %2586  ;;  %v12464_v31 = vpop.permute.xlu0 %2957 }
 0x342   : > { %3049 = vperm.xlu1 %9309, %v17809_v16   ;;  %3710 = vperm.xlu0 %9311, %v17810_v50   ;;  %v17814_v50 = vld [vmem:[#allocation79_spill] sm:$0xff] }
 0x343   : > { %vm2529_vm10 = vcmp.eq.s32.totalorder %v17814_v50, %v10545_v54 }
 0x344   : > { %vm2609_vm1 = vmor %vm2529_vm10, %vm2593_vm12  ;;  %vm2594_vm10 = vcmp.eq.s32.totalorder %v12040_v7, %v10545_v54 }
 0x345   : > { %v12476_v9 = vpop.permute.xlu0 %2963 }
 0x346   : > { %3055 = vperm.xlu1 %9309, %v17812_v53   ;;  %v2625_v49 = vpop.permute.xlu1 %2624  ;;  %3716 = vperm.xlu0 %9311, %v12481_v57  }
 0x347   : > { %vm2669_vm9 = vcmp.eq.s32.totalorder %v2625_v49, %v10545_v54  ;;  %v12506_v49 = vld [vmem:[%s10165_s26 + $0x70] sm:$0xff] }
 0x348   : > { %vm2685_vm13 = vmor %vm2605_vm2, %vm2669_vm9  ;;  %vm2673_vm2 = vcmp.eq.s32.totalorder %v12419_v13, %v10545_v54  ;;  %v8139_v13 = vsel %vm2687_vm0, 1.0, %v17587_v17  ;;  %vm2597_vm0 = vcmp.eq.s32.totalorder %v12441_v8, %v10545_v54 }
 0x349   : > { %v8137_v25 = vsel %vm2685_vm13, 1.0, %v17587_v17  ;;  %v12498_v59 = vpop.permute.xlu0 %2969  ;;  %vm12525_vm9 = vmor %vm2528_vm15, %vm2592_vm5 }
 0x34a   : > { %17817 = vst [vmem:[#allocation59_spill] sm:$0xff] %v12498_v59  ;;  %v2732_v26 = vpack.c.bf16 %v8137_v25, %v8136_v15  ;;  %3061 = vperm.xlu1 %9309, %v17818_v34   ;;  %v2628_v5 = vpop.permute.xlu1 %2627  ;;  %3722 = vperm.xlu0 %9311, %v12506_v49   ;;  %vm12537_vm12 = vmor %vm2609_vm1, %vm2673_vm2  ;;  %v17291_v59 = vmov 9   ;;  %vm2596_vm2 = vcmp.eq.s32.totalorder %v12102_v61, %v10545_v54 }
 0x34b   : > { %vm2670_vm3 = vcmp.eq.s32.totalorder %v2628_v5, %v10545_v54  ;;  %vm12549_vm13 = vmor %vm2531_vm4, %vm2595_vm6  ;;  %v8141_v45 = vsel %vm12537_vm12, 1.0, %v17587_v17  ;;  %vm2532_vm4 = vcmp.eq.s32.totalorder %v12396_v29, %v10545_v54  ;;  %vm2599_vm12 = vcmp.eq.s32.totalorder %v12447_v1, %v10545_v54  ;;  %v17843_v1 = vld [vmem:[#allocation83_spill] sm:$0xff] }
 0x34c   : > { %vm2686_vm7 = vmor %vm12493_vm14, %vm2670_vm3  ;;  %8842 = vmatprep.mubr.msk.bf16.mxu1 %vm766_vm11, %v2732_v26  ;;  %v17825_v26 = vld [vmem:[#allocation41_spill] sm:$0xff]  ;;  %vm2675_vm14 = vcmp.eq.s32.totalorder %v12423_v40, %v10545_v54 }
 0x34d   : > { %v8138_v15 = vsel %vm2686_vm7, 1.0, %v17587_v17  ;;  %v12531_v25 = vpop.permute.xlu0 %2975  ;;  %vm12572_vm3 = vmor %vm2530_vm8, %vm2594_vm10 }
 0x34e   : > { %17822 = vst [vmem:[#allocation61_spill] sm:$0xff] %v12531_v25  ;;  %v2733_v55 = vpack.c.bf16 %v8139_v13, %v8138_v15  ;;  %3067 = vperm.xlu1 %9309, %v17825_v26   ;;  %v2634_v5 = vpop.permute.xlu1 %2633  ;;  %9315 = vset.pattern.permute.xlu0 %v17291_v59  ;;  %v17828_v13 = vld [vmem:[#allocation81_spill] sm:$0xff]  ;;  %vm12592_vm6 = vmor %vm12549_vm13, %vm2675_vm14 }
 0x34f   : > { %vm2672_vm5 = vcmp.eq.s32.totalorder %v2634_v5, %v10545_v54  ;;  %3423 = vperm.xlu0 %9315, %v17797_v20   ;;  %vm2533_vm15 = vcmp.eq.s32.totalorder %v17828_v13, %v10545_v54  ;;  %v12618_v25 = vld [vmem:[%s10165_s26 + $0x8] sm:$0xff]  ;;  %v17836_v13 = vld [vmem:[#allocation82_spill] sm:$0xff]  ;;  %vm12641_vm14 = vmor %vm2532_vm4, %vm2596_vm2  ;;  %v8143_v39 = vsel %vm12592_vm6, 1.0, %v17587_v17  ;;  %vm2679_vm2 = vcmp.eq.s32.totalorder %v12431_v22, %v10545_v54 }
 0x350   : > { %vm2688_vm1 = vmor %vm12525_vm9, %vm2672_vm5  ;;  %8843 = vmatmul.mubr.msk.bf16.vlgmr.msra.gmra.mrb[32].mxu1 %vm766_vm11, %v2733_v55  ;;  %vm2677_vm9 = vcmp.eq.s32.totalorder %v12427_v24, %v10545_v54  ;;  %17835 = vst [vmem:[#allocation62_spill] sm:$0xff] %v12618_v25  ;;  %vm2535_vm8 = vcmp.eq.s32.totalorder %v17836_v13, %v10545_v54  ;;  %vm2598_vm5 = vcmp.eq.s32.totalorder %v12158_v10, %v10545_v54  ;;  %v12682_v24 = vld [vmem:[%s10165_s26 + $0x10] sm:$0xff]  ;;  %v17882_v20 = vld [vmem:[#allocation31_spill] sm:$0xff] }
 0x351   : > { %v8140_v50 = vsel %vm2688_vm1, 1.0, %v17587_v17  ;;  %v12580_v15 = vpop.f32.mrb[16].mxu1  ;;  %v12582_v55 = vpop.permute.xlu0 %2981  ;;  %8887 = vmatpush3.bf16.msra.mxu1 %v12065_v42  ;;  %vm12608_vm7 = vmor %vm2533_vm15, %vm2597_vm0  ;;  %vm2534_vm15 = vcmp.eq.s32.totalorder %v12402_v12, %v10545_v54  ;;  %vm2537_vm4 = vcmp.eq.s32.totalorder %v17843_v1, %v10545_v54  ;;  %vm2601_vm6 = vcmp.eq.s32.totalorder %v12453_v6, %v10545_v54  ;;  %v17851_v6 = vld [vmem:[#allocation84_spill] sm:$0xff]  ;;  %v9703_v10 = vld [vmem:[%s10165_s26 + $0x50] sm:$0xff] }
 0x352   : > { %v2734_v0 = vpack.c.bf16 %v8141_v45, %v8140_v50  ;;  %9310 = vset.pattern.permute.xlu1 %v17784_v32  ;;  %v2640_v5 = vpop.permute.xlu1 %2639  ;;  %v12599_v59 = vpop.f32.mrb[17].mxu1  ;;  %8888 = vmatprep.subr.bf16.mxu1 %v12084_v19  ;;  %vm12663_vm0 = vmor %vm12608_vm7, %vm2677_vm9 }
 0x353   : > { %vm2674_vm10 = vcmp.eq.s32.totalorder %v2640_v5, %v10545_v54  ;;  %3282 = vperm.xlu1 %9310, %v12618_v25   ;;  %v12621_v8 = vpop.f32.mrb[18].mxu1  ;;  %3432 = vperm.xlu0 %9315, %v17800_v28   ;;  %vm12674_vm1 = vmor %vm2535_vm8, %vm2599_vm12  ;;  %v8145_v13 = vsel %vm12663_vm0, 1.0, %v17587_v17  ;;  %vm2536_vm8 = vcmp.eq.s32.totalorder %v12408_v51, %v10545_v54  ;;  %vm2603_vm0 = vcmp.eq.s32.totalorder %v12462_v4, %v10545_v54 }
 0x354   : > { %vm2690_vm13 = vmor %vm12572_vm3, %vm2674_vm10  ;;  %v12632_v50 = vpop.f32.mrb[19].mxu1  ;;  %8846 = vmatprep.mubr.msk.bf16.mxu1 %vm766_vm11, %v2734_v0  ;;  %vm2600_vm10 = vcmp.eq.s32.totalorder %v12214_v2, %v10545_v54  ;;  %v17871_v0 = vld [vmem:[#allocation17_spill] sm:$0xff] }
 0x355   : > { %v8142_v45 = vsel %vm2690_vm13, 1.0, %v17587_v17  ;;  %v12651_v32 = vpop.permute.xlu0 %2987  ;;  %8889 = vmatpush3.bf16.msra.mxu1 %v12084_v19  ;;  %vm12699_vm9 = vmor %vm2534_vm15, %vm2598_vm5  ;;  %v9700_v19 = vld [vmem:[%s10165_s26 + $0x20] sm:$0xff]  ;;  %vm2539_vm15 = vcmp.eq.s32.totalorder %v17851_v6, %v10545_v54 }
 0x356   : > { %v2735_v29 = vpack.c.bf16 %v8143_v39, %v8142_v45  ;;  %v2646_v7 = vpop.permute.xlu1 %2645  ;;  %8890 = vmatprep.subr.bf16.mxu1 %v12142_v33  ;;  %vm12721_vm12 = vmor %vm12674_vm1, %vm2679_vm2 }
 0x357   : > { %vm2676_vm3 = vcmp.eq.s32.totalorder %v2646_v7, %v10545_v54  ;;  %3285 = vperm.xlu1 %9310, %v12682_v24   ;;  %3438 = vperm.xlu0 %9315, %v17803_v60   ;;  %vm12736_vm13 = vmor %vm2537_vm4, %vm2601_vm6  ;;  %v8147_v40 = vsel %vm12721_vm12, 1.0, %v17587_v17  ;;  %vm2683_vm6 = vcmp.eq.s32.totalorder %v12443_v56, %v10545_v54 }
 0x358   : > { %vm2692_vm7 = vmor %vm12641_vm14, %vm2676_vm3  ;;  %8847 = vmatmul.mubr.msk.bf16.gmra.mrb[36].mxu1 %vm766_vm11, %v2735_v29  ;;  %vm2681_vm14 = vcmp.eq.s32.totalorder %v12437_v30, %v10545_v54 }
 0x359   : > { %v8144_v45 = vsel %vm2692_vm7, 1.0, %v17587_v17  ;;  %v12707_v5 = vpop.f32.mrb[20].mxu1  ;;  %v12709_v39 = vpop.permute.xlu0 %3279  ;;  %8891 = vmatpush3.bf16.msra.mxu1 %v12142_v33  ;;  %vm12766_vm2 = vmor %vm2536_vm8, %vm2600_vm10  ;;  %vm2538_vm10 = vcmp.eq.s32.totalorder %v12412_v46, %v10545_v54 }
 0x35a   : > { %17846 = vst [vmem:[#allocation63_spill] sm:$0xff] %v12709_v39  ;;  %v2736_v12 = vpack.c.bf16 %v8145_v13, %v8144_v45  ;;  %v2652_v33 = vpop.permute.xlu1 %2651  ;;  %v12727_v29 = vpop.f32.mrb[21].mxu1  ;;  %8892 = vmatprep.subr.bf16.mxu1 %v12193_v3  ;;  %vm2697_vm3 = vmor %vm12736_vm13, %vm2681_vm14 }
 0x35b   : > { %vm2678_vm5 = vcmp.eq.s32.totalorder %v2652_v33, %v10545_v54  ;;  %3291 = vperm.xlu1 %9310, %v9700_v19   ;;  %v12746_v13 = vpop.f32.mrb[22].mxu1  ;;  %3444 = vperm.xlu0 %9315, %v17806_v48   ;;  %vm12791_vm4 = vmor %vm2539_vm15, %vm2603_vm0  ;;  %v8149_v30 = vsel %vm2697_vm3, 1.0, %v17587_v17 }
 0x35c   : > { %vm2694_vm1 = vmor %vm12699_vm9, %vm2678_vm5  ;;  %v12757_v45 = vpop.f32.mrb[23].mxu1  ;;  %8850 = vmatprep.mubr.msk.bf16.mxu1 %vm766_vm11, %v2736_v12  ;;  %vm2602_vm9 = vcmp.eq.s32.totalorder %v12270_v41, %v10545_v54 }
 0x35d   : > { %v8146_v19 = vsel %vm2694_vm1, 1.0, %v17587_v17  ;;  %v12776_v12 = vpop.permute.xlu0 %3288  ;;  %8893 = vmatpush3.bf16.msra.mxu1 %v12193_v3  ;;  %v9701_v3 = vld [vmem:[%s10165_s26 + $0x30] sm:$0xff]  ;;  %vm12816_vm12 = vmor %vm12791_vm4, %vm2683_vm6 }
 0x35e   : > { %17854 = vst [vmem:[#allocation54_spill] sm:$0xff] %v12776_v12  ;;  %v2737_v2 = vpack.c.bf16 %v8147_v40, %v8146_v19  ;;  %v2658_v51 = vpop.permute.xlu1 %2657  ;;  %8894 = vmatprep.subr.bf16.mxu1 %v12254_v44  ;;  %vm2618_vm13 = vmor %vm2538_vm10, %vm2602_vm9 }
 0x35f   : > { %vm2680_vm7 = vcmp.eq.s32.totalorder %v2658_v51, %v10545_v54  ;;  %3297 = vperm.xlu1 %9310, %v9701_v3   ;;  %3450 = vperm.xlu0 %9315, %v17809_v16   ;;  %v8151_v3 = vsel %vm12816_vm12, 1.0, %v17587_v17  ;;  %v17880_v16 = vld [vmem:[#allocation27_spill] sm:$0xff] }
 0x360   : > { %vm2696_vm8 = vmor %vm12766_vm2, %vm2680_vm7  ;;  %8851 = vmatmul.mubr.msk.bf16.gmra.mrb[40].mxu1 %vm766_vm11, %v2737_v2  ;;  %v12832_v2 = vld [vmem:[%s10165_s26 + $0x40] sm:$0xff] }
 0x361   : > { %v8148_v56 = vsel %vm2696_vm8, 1.0, %v17587_v17  ;;  %v12809_v4 = vpop.f32.mrb[24].mxu1  ;;  %v12811_v22 = vpop.permute.xlu0 %3294  ;;  %8895 = vmatpush3.bf16.msra.mxu1 %v12254_v44  ;;  %17860 = vst [vmem:[#allocation64_spill] sm:$0xff] %v12832_v2 }
 0x362   : > { %17857 = vst [vmem:[#allocation57_spill] sm:$0xff] %v12811_v22  ;;  %v2738_v6 = vpack.c.bf16 %v8149_v30, %v8148_v56  ;;  %v2664_v40 = vpop.permute.xlu1 %2663  ;;  %v12822_v19 = vpop.f32.mrb[25].mxu1  ;;  %8896 = vmatprep.subr.bf16.mxu1 %v12302_v47 }
 0x363   : > { %vm2682_vm14 = vcmp.eq.s32.totalorder %v2664_v40, %v10545_v54  ;;  %3303 = vperm.xlu1 %9310, %v12832_v2   ;;  %v12835_v51 = vpop.f32.mrb[26].mxu1  ;;  %3456 = vperm.xlu0 %9315, %v17812_v53   ;;  %v17883_v2 = vld [vmem:[#allocation68_spill] sm:$0xff] }
 0x364   : > { %vm2698_vm5 = vmor %vm2618_vm13, %vm2682_vm14  ;;  %v12840_v41 = vpop.f32.mrb[27].mxu1  ;;  %8854 = vmatprep.mubr.msk.bf16.mxu1 %vm766_vm11, %v2738_v6 }
 0x365   : > { %17861 = vst [vmem:[#allocation60_spill] sm:$0xff] %v12840_v41  ;;  %v8150_v30 = vsel %vm2698_vm5, 1.0, %v17587_v17  ;;  %v12849_v40 = vpop.permute.xlu0 %3300  ;;  %8897 = vmatpush3.bf16.msra.mxu1 %v12302_v47 }
 0x366   : > { %17862 = vst [vmem:[#allocation79_spill] sm:$0xff] %v12849_v40  ;;  %v2739_v44 = vpack.c.bf16 %v8151_v3, %v8150_v30  ;;  %8942 = vmatprep.subr.bf16.mxu1 %v12065_v42  ;;  %v17874_v3 = vld [vmem:[#allocation19_spill] sm:$0xff] }
 0x367   : > { %3309 = vperm.xlu1 %9310, %v9703_v10   ;;  %v12854_v33 = vpop.permute.xlu1 %2878  ;;  %3462 = vperm.xlu0 %9315, %v17818_v34  }
 0x368   : > { %8855 = vmatmul.mubr.msk.bf16.gmra.mrb[44].mxu1 %vm766_vm11, %v2739_v44  ;;  %vm2925_vm4 = vcmp.eq.s32.totalorder %v12854_v33, %v10545_v54 }
 0x369   : > { %v12858_v46 = vpop.f32.mrb[28].mxu1  ;;  %v12860_v6 = vpop.permute.xlu0 %3306 }
 0x36a   : > { %17863 = vst [vmem:[#allocation80_spill] sm:$0xff] %v12858_v46  ;;  %17864 = vst [vmem:[#allocation81_spill] sm:$0xff] %v12860_v6  ;;  %v12864_v1 = vpop.f32.mrb[29].mxu1  ;;  %v17873_v6 = vmov 8  }
 0x36b   : > { %17865 = vst [vmem:[#allocation82_spill] sm:$0xff] %v12864_v1  ;;  %3315 = vperm.xlu1 %9310, %v12481_v57   ;;  %v12869_v47 = vpop.permute.xlu1 %2884  ;;  %v12871_v10 = vpop.f32.mrb[30].mxu1  ;;  %3468 = vperm.xlu0 %9315, %v17825_v26   ;;  %v17893_v1 = vld [vmem:[#allocation69_spill] sm:$0xff] }
 0x36c   : > { %17866 = vst [vmem:[#allocation83_spill] sm:$0xff] %v12871_v10  ;;  %v12876_v30 = vpop.f32.mrb[31].mxu1  ;;  %v17890_v10 = vld [vmem:[#allocation52_spill] sm:$0xff] }
 0x36d   : > { %17868 = vst [vmem:[#allocation84_spill] sm:$0xff] %v12876_v30  ;;  %v12880_v61 = vpop.permute.xlu0 %3312  ;;  %v17886_v30 = vld [vmem:[#allocation51_spill] sm:$0xff] }
 0x36e   : > { %17870 = vst [vmem:[#allocation85_spill] sm:$0xff] %v12880_v61  ;;  %v17876_v61 = vld [vmem:[#allocation21_spill] sm:$0xff] }
 0x36f   : > { %3321 = vperm.xlu1 %9310, %v12506_v49   ;;  %v12883_v42 = vpop.permute.xlu1 %2887  ;;  %3744 = vperm.xlu0 %9315, %v17871_v0   ;;  %v17877_v49 = vld [vmem:[#allocation18_spill] sm:$0xff] }
 0x370   : > { %vm2928_vm12 = vcmp.eq.s32.totalorder %v12883_v42, %v10545_v54  ;;  %v13048_v42 = vld [vmem:[%s10165_s26] sm:$0xff] }
 0x371   : > { %v12886_v36 = vpop.permute.xlu0 %3318 }
 0x372   : > { %17872 = vst [vmem:[#allocation86_spill] sm:$0xff] %v12886_v36  ;;  %v17878_v36 = vld [vmem:[#allocation23_spill] sm:$0xff] }
 0x373   : > { %9312 = vset.pattern.permute.xlu1 %v17873_v6  ;;  %v12889_v40 = vpop.permute.xlu1 %2893  ;;  %3753 = vperm.xlu0 %9315, %v17874_v3  }
 0x374   : > { %3343 = vperm.xlu1 %9312, %v17871_v0   ;;  %v17879_v0 = vld [vmem:[#allocation25_spill] sm:$0xff] }
 0x375   : > { %v12893_v26 = vpop.permute.xlu0 %3324 }
 0x376   : > { %17875 = vst [vmem:[#allocation87_spill] sm:$0xff] %v12893_v26 }
 0x377   : > { %v12895_v56 = vpop.permute.xlu1 %2899  ;;  %3759 = vperm.xlu0 %9315, %v17876_v61  }
 0x378   : > { %3349 = vperm.xlu1 %9312, %v17877_v49   ;;  %v17884_v49 = vld [vmem:[#allocation40_spill] sm:$0xff] }
 0x379   : > { %v3026_v22 = vpop.permute.xlu0 %3025 }
 0x37a   : > { %vm3070_vm2 = vcmp.eq.s32.totalorder %v3026_v22, %v10545_v54  ;;  %v17907_v22 = vld [vmem:[#allocation58_spill] sm:$0xff] }
 0x37b   : > { %v12899_v34 = vpop.permute.xlu1 %2905  ;;  %3765 = vperm.xlu0 %9315, %v17878_v36   ;;  %vm2992_vm8 = vcmp.eq.s32.totalorder %v17907_v22, %v10545_v54  ;;  %v17910_v22 = vld [vmem:[#allocation75_spill] sm:$0xff]  ;;  %17923 = vst [vmem:[#allocation58_spill] sm:$0xff] %v13048_v42 }
 0x37c   : > { %3352 = vperm.xlu1 %9312, %v17874_v3   ;;  %v17881_v3 = vld [vmem:[#allocation29_spill] sm:$0xff]  ;;  %vm2929_vm5 = vcmp.eq.s32.totalorder %v17910_v22, %v10545_v54 }
 0x37d   : > { %v12903_v12 = vpop.permute.xlu0 %3034 }
 0x37f   : > { %v12905_v53 = vpop.permute.xlu1 %2911  ;;  %3771 = vperm.xlu0 %9315, %v17879_v0  }
 0x380   : > { %3358 = vperm.xlu1 %9312, %v17876_v61  }
 0x381   : > { %v12909_v26 = vpop.permute.xlu0 %3040 }
 0x383   : > { %v12911_v39 = vpop.permute.xlu1 %2917  ;;  %3777 = vperm.xlu0 %9315, %v17880_v16  }
 0x384   : > { %3364 = vperm.xlu1 %9312, %v17878_v36  }
 0x385   : > { %v12915_v48 = vpop.permute.xlu0 %3046 }
 0x387   : > { %v12917_v60 = vpop.permute.xlu1 %2923  ;;  %3783 = vperm.xlu0 %9315, %v17881_v3  }
 0x388   : > { %3370 = vperm.xlu1 %9312, %v17879_v0  }
 0x389   : > { %v12921_v28 = vpop.permute.xlu0 %3052 }
 0x38b   : > { %3789 = vperm.xlu0 %9315, %v17882_v20  }
 0x38c   : > { %3376 = vperm.xlu1 %9312, %v17880_v16   ;;  %v2946_v61 = vpop.permute.xlu1 %2945  ;;  %v17887_v16 = vmov 9  }
 0x38d   : > { %v12925_v57 = vpop.permute.xlu0 %3058  ;;  %vm2990_vm0 = vcmp.eq.s32.totalorder %v2946_v61, %v10545_v54  ;;  %v17905_v61 = vld [vmem:[#allocation48_spill] sm:$0xff] }
 0x38f   : > { %4081 = vperm.xlu0 %9315, %v17883_v2   ;;  %v17888_v2 = vld [vmem:[#allocation42_spill] sm:$0xff] }
 0x390   : > { %3382 = vperm.xlu1 %9312, %v17881_v3   ;;  %v2949_v36 = vpop.permute.xlu1 %2948 }
 0x391   : > { %v12929_v25 = vpop.permute.xlu0 %3064  ;;  %vm2991_vm13 = vcmp.eq.s32.totalorder %v2949_v36, %v10545_v54  ;;  %v17913_v36 = vld [vmem:[#allocation50_spill] sm:$0xff] }
 0x393   : > { %4090 = vperm.xlu0 %9315, %v17884_v49   ;;  %v17891_v49 = vld [vmem:[#allocation33_spill] sm:$0xff] }
 0x394   : > { %3388 = vperm.xlu1 %9312, %v17882_v20   ;;  %v12933_v0 = vpop.permute.xlu1 %2954 }
 0x395   : > { %v12935_v7 = vpop.permute.xlu0 %3346 }
 0x396   : > { %17885 = vst [vmem:[#allocation68_spill] sm:$0xff] %v12935_v7 }
 0x397   : > { %4096 = vperm.xlu0 %9315, %v17886_v30   ;;  %v17894_v30 = vld [vmem:[#allocation44_spill] sm:$0xff] }
 0x398   : > { %9313 = vset.pattern.permute.xlu1 %v17887_v16  ;;  %v12939_v44 = vpop.permute.xlu1 %2960 }
 0x399   : > { %3426 = vperm.xlu1 %9313, %v17888_v2   ;;  %v12942_v3 = vpop.permute.xlu0 %3355 }
 0x39a   : > { %17889 = vst [vmem:[#allocation40_spill] sm:$0xff] %v12942_v3  ;;  %v17897_v3 = vld [vmem:[#allocation46_spill] sm:$0xff] }
 0x39b   : > { %4102 = vperm.xlu0 %9315, %v17890_v10  }
 0x39c   : > { %v12945_v35 = vpop.permute.xlu1 %2966 }
 0x39d   : > { %3429 = vperm.xlu1 %9313, %v17891_v49   ;;  %v12948_v20 = vpop.permute.xlu0 %3361  ;;  %v17899_v49 = vld [vmem:[#allocation53_spill] sm:$0xff] }
 0x39e   : > { %17892 = vst [vmem:[#allocation51_spill] sm:$0xff] %v12948_v20  ;;  %vm2926_vm15 = vcmp.eq.s32.totalorder %v17899_v49, %v10545_v54  ;;  %v17904_v49 = vld [vmem:[#allocation55_spill] sm:$0xff] }
 0x39f   : > { %4108 = vperm.xlu0 %9315, %v17893_v1   ;;  %v17900_v1 = vld [vmem:[#allocation66_spill] sm:$0xff]  ;;  %vm3006_vm1 = vmor %vm2926_vm15, %vm2990_vm0  ;;  %vm2927_vm15 = vcmp.eq.s32.totalorder %v12869_v47, %v10545_v54 }
 0x3a0   : > { %v12951_v7 = vpop.permute.xlu1 %2972  ;;  %vm3086_vm6 = vmor %vm3006_vm1, %vm3070_vm2  ;;  %vm2993_vm1 = vcmp.eq.s32.totalorder %v12933_v0, %v10545_v54  ;;  %v17915_v0 = vld [vmem:[#allocation67_spill] sm:$0xff] }
 0x3a1   : > { %3435 = vperm.xlu1 %9313, %v17894_v30   ;;  %v12954_v16 = vpop.permute.xlu0 %3367  ;;  %v8161_v33 = vsel %vm3086_vm6, 1.0, %v17587_v17  ;;  %vm12998_vm0 = vmor %vm2928_vm12, %vm2992_vm8  ;;  %vm2931_vm8 = vcmp.eq.s32.totalorder %v17915_v0, %v10545_v54  ;;  %vm2995_vm12 = vcmp.eq.s32.totalorder %v12939_v44, %v10545_v54 }
 0x3a2   : > { %17895 = vst [vmem:[#allocation52_spill] sm:$0xff] %v12954_v16  ;;  %vm3007_vm2 = vmor %vm2927_vm15, %vm2991_vm13  ;;  %vm2932_vm15 = vcmp.eq.s32.totalorder %v12895_v56, %v10545_v54  ;;  %v17946_v56 = vld [vmem:[#allocation71_spill] sm:$0xff] }
 0x3a3   : > { %4114 = vperm.xlu0 %9315, %v17896_v14   ;;  %v17903_v14 = vld [vmem:[#allocation72_spill] sm:$0xff] }
 0x3a4   : > { %v12957_v46 = vpop.permute.xlu1 %2978  ;;  %vm2989_vm3 = vcmp.eq.s32.totalorder %v17903_v14, %v10545_v54 }
 0x3a5   : > { %3441 = vperm.xlu1 %9313, %v17897_v3   ;;  %v12960_v10 = vpop.permute.xlu0 %3373  ;;  %vm3005_vm7 = vmor %vm2925_vm4, %vm2989_vm3  ;;  %vm2994_vm3 = vcmp.eq.s32.totalorder %v12464_v31, %v10545_v54  ;;  %vm2930_vm4 = vcmp.eq.s32.totalorder %v12889_v40, %v10545_v54 }
 0x3a6   : > { %17898 = vst [vmem:[#allocation69_spill] sm:$0xff] %v12960_v10 }
 0x3a7   : > { %4120 = vperm.xlu0 %9315, %v17900_v1  }
 0x3a8   : > { %v12966_v20 = vpop.permute.xlu1 %2984 }
 0x3a9   : > { %3447 = vperm.xlu1 %9313, %v17901_v21   ;;  %v12969_v16 = vpop.permute.xlu0 %3379 }
 0x3aa   : > { %17902 = vst [vmem:[#allocation43_spill] sm:$0xff] %v12969_v16  ;;  %v17331_v16 = vmov 10  }
 0x3ab   : > { %4126 = vperm.xlu0 %9315, %v17904_v49  }
 0x3ad   : > { %3453 = vperm.xlu1 %9313, %v17905_v61   ;;  %v3023_v1 = vpop.permute.xlu1 %3022  ;;  %v12978_v10 = vpop.permute.xlu0 %3385 }
 0x3ae   : > { %17906 = vst [vmem:[#allocation53_spill] sm:$0xff] %v12978_v10  ;;  %vm3069_vm9 = vcmp.eq.s32.totalorder %v3023_v1, %v10545_v54  ;;  %v17908_v1 = vld [vmem:[#allocation49_spill] sm:$0xff] }
 0x3af   : > { %vm3085_vm10 = vmor %vm3005_vm7, %vm3069_vm9  ;;  %9319 = vset.pattern.permute.xlu0 %v17331_v16  ;;  %vm3073_vm9 = vcmp.eq.s32.totalorder %v12903_v12, %v10545_v54 }
 0x3b0   : > { %v8160_v14 = vsel %vm3085_vm10, 1.0, %v17587_v17  ;;  %3827 = vperm.xlu0 %9319, %v17888_v2   ;;  %vm3009_vm7 = vmor %vm2929_vm5, %vm2993_vm1  ;;  %vm2996_vm5 = vcmp.eq.s32.totalorder %v12476_v9, %v10545_v54  ;;  %v17927_v9 = vld [vmem:[#allocation59_spill] sm:$0xff] }
 0x3b1   : > { %v3133_v49 = vpack.c.bf16 %v8161_v33, %v8160_v14  ;;  %3459 = vperm.xlu1 %9313, %v17908_v1   ;;  %v3029_v10 = vpop.permute.xlu1 %3028  ;;  %v12991_v41 = vpop.permute.xlu0 %3683  ;;  %vm13033_vm1 = vmor %vm3009_vm7, %vm3073_vm9 }
 0x3b2   : > { %17909 = vst [vmem:[#allocation66_spill] sm:$0xff] %v12991_v41  ;;  %vm3071_vm14 = vcmp.eq.s32.totalorder %v3029_v10, %v10545_v54  ;;  %vm13064_vm9 = vmor %vm2932_vm15, %vm2996_vm5  ;;  %v8164_v0 = vsel %vm13033_vm1, 1.0, %v17587_v17  ;;  %vm2999_vm1 = vcmp.eq.s32.totalorder %v12951_v7, %v10545_v54  ;;  %v17982_v7 = vld [vmem:[#allocation82_spill] sm:$0xff] }
 0x3b3   : > { %8870 = vmatprep.mubr.msk.bf16.mxu0 %vm766_vm11, %v3133_v49  ;;  %vm3087_vm6 = vmor %vm3007_vm2, %vm3071_vm14  ;;  %vm3075_vm2 = vcmp.eq.s32.totalorder %v12909_v26, %v10545_v54 }
 0x3b4   : > { %3836 = vperm.xlu0 %9319, %v17894_v30   ;;  %vm13022_vm14 = vmor %vm2930_vm4, %vm2994_vm3  ;;  %v8162_v40 = vsel %vm3087_vm6, 1.0, %v17587_v17  ;;  %vm2997_vm6 = vcmp.eq.s32.totalorder %v12945_v35, %v10545_v54 }
 0x3b5   : > { %3465 = vperm.xlu1 %9313, %v17913_v36   ;;  %v3032_v47 = vpop.permute.xlu1 %3031  ;;  %v13011_v10 = vpop.permute.xlu0 %3692 }
 0x3b6   : > { %17914 = vst [vmem:[#allocation72_spill] sm:$0xff] %v13011_v10  ;;  %vm3072_vm10 = vcmp.eq.s32.totalorder %v3032_v47, %v10545_v54  ;;  %v17924_v47 = vld [vmem:[#allocation70_spill] sm:$0xff] }
 0x3b7   : > { %vm3088_vm13 = vmor %vm12998_vm0, %vm3072_vm10  ;;  %vm2933_vm4 = vcmp.eq.s32.totalorder %v17924_v47, %v10545_v54  ;;  %vm2998_vm10 = vcmp.eq.s32.totalorder %v17927_v9, %v10545_v54  ;;  %v17935_v47 = vld [vmem:[#allocation65_spill] sm:$0xff] }
 0x3b8   : > { %v8163_v12 = vsel %vm3088_vm13, 1.0, %v17587_v17  ;;  %3842 = vperm.xlu0 %9319, %v17897_v3   ;;  %vm13040_vm0 = vmor %vm2931_vm8, %vm2995_vm12  ;;  %vm2934_vm8 = vcmp.eq.s32.totalorder %v12899_v34, %v10545_v54  ;;  %vm2935_vm15 = vcmp.eq.s32.totalorder %v17935_v47, %v10545_v54  ;;  %v17940_v34 = vld [vmem:[#allocation61_spill] sm:$0xff] }
 0x3b9   : > { %v3134_v33 = vpack.c.bf16 %v8163_v12, %v8162_v40  ;;  %9314 = vset.pattern.permute.xlu1 %v17873_v6  ;;  %v3038_v14 = vpop.permute.xlu1 %3037  ;;  %v13038_v49 = vpop.permute.xlu0 %3698  ;;  %v13073_v12 = vld [vmem:[#allocation2] sm:$0xff]   ;;  %vm13085_vm12 = vmor %vm13040_vm0, %vm3075_vm2 }
 0x3ba   : > { %17920 = vst [vmem:[#allocation55_spill] sm:$0xff] %v13038_v49  ;;  %vm3074_vm3 = vcmp.eq.s32.totalorder %v3038_v14, %v10545_v54  ;;  %3680 = vperm.xlu1 %9314, %v13048_v42   ;;  %v13094_v42 = vld [vmem:[#allocation2 + $0x8] sm:$0xff]   ;;  %vm13103_vm13 = vmor %vm2933_vm4, %vm2997_vm6  ;;  %vm2936_vm4 = vcmp.eq.s32.totalorder %v12905_v53, %v10545_v54 }
 0x3bb   : > { %vm3090_vm7 = vmor %vm13022_vm14, %vm3074_vm3  ;;  %8871 = vmatmul.mubr.msk.bf16.vlgmr.msra.gmra.mrb[48].mxu0 %vm766_vm11, %v3134_v33  ;;  %v17930_v33 = vmax.f32 %v12580_v15, %v12082_v27  ;;  %vm3077_vm14 = vcmp.eq.s32.totalorder %v12915_v48, %v10545_v54  ;;  %v17933_v27 = vmax.f32 %v12599_v59, %v12099_v18  ;;  %vm3000_vm3 = vcmp.eq.s32.totalorder %v17940_v34, %v10545_v54  ;;  %v13289_v48 = vld [vmem:[#allocation2 + $0x20] sm:$0xff]  }
 0x3bc   : > { %v8165_v40 = vsel %vm3090_vm7, 1.0, %v17587_v17  ;;  %v8816_v31 = vpop.f32.mrb[32].mxu0  ;;  %3848 = vperm.xlu0 %9319, %v17901_v21   ;;  %8915 = vmatpush3.bf16.msra.mxu0 %v13073_v12  ;;  %vm13136_vm2 = vmor %vm2934_vm8, %vm2998_vm10  ;;  %vm2937_vm8 = vcmp.eq.s32.totalorder %v17946_v56, %v10545_v54  ;;  %v17965_v56 = vld [vmem:[#allocation16_spill] sm:$0xff] }
 0x3bd   : > { %v3135_v44 = vpack.c.bf16 %v8165_v40, %v8164_v0  ;;  %v13092_v14 = vmax.f32 %v8816_v31, %v17930_v33  ;;  %v3044_v16 = vpop.permute.xlu1 %3043  ;;  %v2397_v49 = vpop.f32.mrb[33].mxu0  ;;  %8916 = vmatprep.subr.bf16.mxu0 %v13094_v42  ;;  %vm13160_vm6 = vmor %vm13103_vm13, %vm3077_vm14  ;;  %v13164_v40 = vld [vmem:[#allocation2 + $0x10] sm:$0xff]   ;;  %v9708_v31 = vld [vmem:[%s10165_s26 + $0x18] sm:$0xff] }
 0x3be   : > { %vm3076_vm5 = vcmp.eq.s32.totalorder %v3044_v16, %v10545_v54  ;;  %v13113_v15 = vmax.f32 %v2397_v49, %v17933_v27  ;;  %3686 = vperm.xlu1 %9314, %v12682_v24   ;;  %v8817_v35 = vpop.f32.mrb[34].mxu0  ;;  %v13116_v22 = vpop.permute.xlu0 %3704  ;;  %v17936_v16 = vmax.f32 %v12621_v8, %v12111_v38  ;;  %v8166_v38 = vsel %vm13085_vm12, 1.0, %v17587_v17  ;;  %vm13173_vm7 = vmor %vm2935_vm15, %vm2999_vm1  ;;  %v13224_v24 = vld [vmem:[#allocation2 + $0x18] sm:$0xff]   ;;  %v17976_v0 = vld [vmem:[#allocation20_spill] sm:$0xff] }
 0x3bf   : > { %17934 = vst [vmem:[#allocation75_spill] sm:$0xff] %v13116_v22  ;;  %vm3092_vm0 = vmor %vm13064_vm9, %vm3076_vm5  ;;  %v2400_v59 = vpop.f32.mrb[35].mxu0  ;;  %8874 = vmatprep.mubr.msk.bf16.mxu0 %vm766_vm11, %v3135_v44  ;;  %v17939_v49 = vmax.f32 %v12632_v50, %v12128_v37  ;;  %vm3079_vm9 = vcmp.eq.s32.totalorder %v12921_v28, %v10545_v54  ;;  %vm3001_vm12 = vcmp.eq.s32.totalorder %v12957_v46, %v10545_v54  ;;  %v8168_v44 = vsel %vm13160_vm6, 1.0, %v17587_v17  ;;  %v18002_v22 = vld [vmem:[#allocation64_spill] sm:$0xff] }
 0x3c0   : > { %v13127_v18 = vmax.f32 %v8817_v35, %v17936_v16  ;;  %v8167_v8 = vsel %vm3092_vm0, 1.0, %v17587_v17  ;;  %3854 = vperm.xlu0 %9319, %v17905_v61   ;;  %8917 = vmatpush3.bf16.msra.mxu0 %v13094_v42  ;;  %vm13196_vm14 = vmor %vm2936_vm4, %vm3000_vm3  ;;  %vm3002_vm5 = vcmp.eq.s32.totalorder %v12582_v55, %v10545_v54  ;;  %vm2938_vm15 = vcmp.eq.s32.totalorder %v12911_v39, %v10545_v54 }
 0x3c1   : > { %v13147_v6 = vmax.f32 %v2400_v59, %v17939_v49  ;;  %v3136_v37 = vpack.c.bf16 %v8167_v8, %v8166_v38  ;;  %v3050_v50 = vpop.permute.xlu1 %3049  ;;  %8918 = vmatprep.subr.bf16.mxu0 %v13164_v40  ;;  %vm13215_vm1 = vmor %vm13173_vm7, %vm3079_vm9  ;;  %v17951_v35 = vmax.f32 %v12707_v5, %v12191_v58  ;;  %v17954_v58 = vmax.f32 %v12727_v29, %v12208_v11  ;;  %v13246_v38 = vld [vmem:[%s10165_s26 + $0x28] sm:$0xff] }
 0x3c2   : > { %vm3078_vm10 = vcmp.eq.s32.totalorder %v3050_v50, %v10545_v54  ;;  %3689 = vperm.xlu1 %9314, %v9708_v31   ;;  %v13181_v9 = vpop.permute.xlu0 %3710  ;;  %vm13233_vm0 = vmor %vm2937_vm8, %vm3001_vm12  ;;  %v17956_v49 = vld [vmem:[#allocation56_spill] sm:$0xff]  ;;  %vm3003_vm6 = vcmp.eq.s32.totalorder %v12966_v20, %v10545_v54  ;;  %v17957_v11 = vmax.f32 %v12746_v13, %v12223_v62  ;;  %v8170_v62 = vsel %vm13215_vm1, 1.0, %v17587_v17 }
 0x3c3   : > { %17945 = vst [vmem:[#allocation67_spill] sm:$0xff] %v13181_v9  ;;  %vm3094_vm13 = vmor %vm13136_vm2, %vm3078_vm10  ;;  %8875 = vmatmul.mubr.msk.bf16.gmra.mrb[52].mxu0 %vm766_vm11, %v3136_v37  ;;  %vm3081_vm2 = vcmp.eq.s32.totalorder %v12925_v57, %v10545_v54  ;;  %vm2939_vm4 = vcmp.eq.s32.totalorder %v17956_v49, %v10545_v54  ;;  %v17960_v37 = vmax.f32 %v12757_v45, %v12240_v43  ;;  %v13306_v57 = vld [vmem:[%s10165_s26 + $0x38] sm:$0xff]  ;;  %v17979_v43 = vld [vmem:[#allocation45_spill] sm:$0xff] }
 0x3c4   : > { %v8169_v33 = vsel %vm3094_vm13, 1.0, %v17587_v17  ;;  %v8820_v26 = vpop.f32.mrb[36].mxu0  ;;  %3860 = vperm.xlu0 %9319, %v17908_v1   ;;  %8919 = vmatpush3.bf16.msra.mxu0 %v13164_v40  ;;  %vm13269_vm9 = vmor %vm2938_vm15, %vm3002_vm5  ;;  %vm3083_vm12 = vcmp.eq.s32.totalorder %v12929_v25, %v10545_v54  ;;  %17963 = vst [vmem:[#allocation59_spill] sm:$0xff] %v13306_v57  ;;  %vm2940_vm5 = vcmp.eq.s32.totalorder %v12917_v60, %v10545_v54  ;;  %v17973_v49 = vld [vmem:[#allocation74_spill] sm:$0xff] }
 0x3c5   : > { %v3137_v27 = vpack.c.bf16 %v8169_v33, %v8168_v44  ;;  %v13222_v47 = vmax.f32 %v8820_v26, %v17951_v35  ;;  %v3056_v16 = vpop.permute.xlu1 %3055  ;;  %v2413_v59 = vpop.f32.mrb[37].mxu0  ;;  %8920 = vmatprep.subr.bf16.mxu0 %v13224_v24  ;;  %vm3097_vm10 = vmor %vm13233_vm0, %vm3081_vm2  ;;  %v17968_v33 = vmax.f32 %v12809_v4, %v12300_v23  ;;  %v13333_v35 = vld [vmem:[#allocation2 + $0x28] sm:$0xff]   ;;  %v17969_v23 = vmax.f32 %v12822_v19, %v12315_v52 }
 0x3c6   : > { %vm3080_vm3 = vcmp.eq.s32.totalorder %v3056_v16, %v10545_v54  ;;  %v13243_v5 = vmax.f32 %v2413_v59, %v17954_v58  ;;  %3695 = vperm.xlu1 %9314, %v13246_v38   ;;  %v8821_v46 = vpop.f32.mrb[38].mxu0  ;;  %v13249_v8 = vpop.permute.xlu0 %3716  ;;  %vm13298_vm8 = vmor %vm2939_vm4, %vm3003_vm6  ;;  %v8172_v20 = vsel %vm3097_vm10, 1.0, %v17587_v17  ;;  %v9714_v16 = vld [vmem:[%s10165_s26 + $0x48] sm:$0xff] }
 0x3c7   : > { %17955 = vst [vmem:[#allocation70_spill] sm:$0xff] %v13249_v8  ;;  %vm3096_vm7 = vmor %vm13196_vm14, %vm3080_vm3  ;;  %v13260_v29 = vmax.f32 %v8821_v46, %v17957_v11  ;;  %v2416_v34 = vpop.f32.mrb[39].mxu0  ;;  %8878 = vmatprep.mubr.msk.bf16.mxu0 %vm766_vm11, %v3137_v27  ;;  %vm3004_vm14 = vcmp.eq.s32.totalorder %v12651_v32, %v10545_v54  ;;  %v17970_v32 = vmax.f32 %v12835_v51, %v12326_v63  ;;  %v17972_v46 = vld [vmem:[#allocation60_spill] sm:$0xff]  ;;  %v13370_v51 = vld [vmem:[%s10165_s26 + $0x58] sm:$0xff] }
 0x3c8   : > { %v8171_v13 = vsel %vm3096_vm7, 1.0, %v17587_v17  ;;  %v13280_v50 = vmax.f32 %v2416_v34, %v17960_v37  ;;  %3866 = vperm.xlu0 %9319, %v17913_v36   ;;  %8921 = vmatpush3.bf16.msra.mxu0 %v13224_v24  ;;  %vm13324_vm1 = vmor %vm13298_vm8, %vm3083_vm12  ;;  %v17974_v11 = vmax.f32 %v17972_v46, %v17973_v49  ;;  %v17990_v49 = vld [vmem:[#allocation84_spill] sm:$0xff] }
 0x3c9   : > { %v3138_v55 = vpack.c.bf16 %v8171_v13, %v8170_v62  ;;  %v3062_v39 = vpop.permute.xlu1 %3061  ;;  %8922 = vmatprep.subr.bf16.mxu0 %v13289_v48  ;;  %vm3020_vm0 = vmor %vm2940_vm5, %vm3004_vm14  ;;  %v8174_v52 = vsel %vm13324_vm1, 1.0, %v17587_v17 }
 0x3ca   : > { %vm3082_vm13 = vcmp.eq.s32.totalorder %v3062_v39, %v10545_v54  ;;  %3701 = vperm.xlu1 %9314, %v13306_v57   ;;  %v13309_v45 = vpop.permute.xlu0 %3722  ;;  %v17978_v39 = vld [vmem:[#allocation80_spill] sm:$0xff] }
 0x3cb   : > { %17964 = vst [vmem:[#allocation65_spill] sm:$0xff] %v13309_v45  ;;  %vm3098_vm15 = vmor %vm13269_vm9, %vm3082_vm13  ;;  %8879 = vmatmul.mubr.msk.bf16.gmra.mrb[56].mxu0 %vm766_vm11, %v3138_v55  ;;  %v17977_v55 = vld [vmem:[#allocation22_spill] sm:$0xff] }
 0x3cc   : > { %v8173_v25 = vsel %vm3098_vm15, 1.0, %v17587_v17  ;;  %v8824_v31 = vpop.f32.mrb[40].mxu0  ;;  %4148 = vperm.xlu0 %9319, %v17965_v56   ;;  %8923 = vmatpush3.bf16.msra.mxu0 %v13289_v48 }
 0x3cd   : > { %v3139_v44 = vpack.c.bf16 %v8173_v25, %v8172_v20  ;;  %v13331_v26 = vmax.f32 %v8824_v31, %v17968_v33  ;;  %v3068_v53 = vpop.permute.xlu1 %3067  ;;  %v2429_v27 = vpop.f32.mrb[41].mxu0  ;;  %8924 = vmatprep.subr.bf16.mxu0 %v13333_v35  ;;  %v17980_v20 = vmax.f32 %v17978_v39, %v17979_v43  ;;  %v17994_v39 = vld [vmem:[#allocation24_spill] sm:$0xff]  ;;  %v13406_v43 = vld [vmem:[%s10165_s26 + $0x78] sm:$0xff] }
 0x3ce   : > { %vm3084_vm2 = vcmp.eq.s32.totalorder %v3068_v53, %v10545_v54  ;;  %v13346_v4 = vmax.f32 %v2429_v27, %v17969_v23  ;;  %3707 = vperm.xlu1 %9314, %v9714_v16   ;;  %v8825_v59 = vpop.f32.mrb[42].mxu0  ;;  %v13349_v28 = vpop.permute.xlu0 %3423  ;;  %v9716_v27 = vld [vmem:[%s10165_s26 + $0x68] sm:$0xff] }
 0x3cf   : > { %vm3100_vm3 = vmor %vm3020_vm0, %vm3084_vm2  ;;  %v13354_v58 = vmax.f32 %v8825_v59, %v17970_v32  ;;  %v2432_v60 = vpop.f32.mrb[43].mxu0  ;;  %8882 = vmatprep.mubr.msk.bf16.mxu0 %vm766_vm11, %v3139_v44  ;;  %v17983_v44 = vld [vmem:[#allocation76_spill] sm:$0xff]  ;;  %v17986_v59 = vld [vmem:[#allocation83_spill] sm:$0xff]  ;;  %vm3470_vm10 = vcmp.eq.s32.totalorder %v13349_v28, %v10545_v54 }
 0x3d0   : > { %v8175_v19 = vsel %vm3100_vm3, 1.0, %v17587_v17  ;;  %v13364_v34 = vmax.f32 %v2432_v60, %v17974_v11  ;;  %4157 = vperm.xlu0 %9319, %v17976_v0   ;;  %8925 = vmatpush3.bf16.msra.mxu0 %v13333_v35  ;;  %v17984_v33 = vmax.f32 %v17982_v7, %v17983_v44  ;;  %v17987_v32 = vld [vmem:[#allocation77_spill] sm:$0xff]  ;;  %v17991_v11 = vld [vmem:[#allocation78_spill] sm:$0xff]  ;;  %v17996_v44 = vmov 9   ;;  %v18025_v28 = vld [vmem:[#allocation39_spill] sm:$0xff] }
 0x3d1   : > { %17971 = vst [vmem:[#allocation61_spill] sm:$0xff] %v13354_v58  ;;  %v3140_v63 = vpack.c.bf16 %v8175_v19, %v8174_v52  ;;  %8970 = vmatprep.subr.bf16.mxu0 %v13073_v12  ;;  %v17988_v60 = vmax.f32 %v17986_v59, %v17987_v32  ;;  %v17995_v7 = vld [vmem:[#allocation26_spill] sm:$0xff]  ;;  %v18096_v58 = vld [vmem:[#allocation31_spill] sm:$0xff] }
 0x3d2   : > { %17975 = vst [vmem:[#allocation71_spill] sm:$0xff] %v13364_v34  ;;  %3713 = vperm.xlu1 %9314, %v13370_v51   ;;  %v13373_v62 = vpop.permute.xlu1 %3282  ;;  %v13375_v13 = vpop.permute.xlu0 %3432  ;;  %v17998_v32 = vld [vmem:[#allocation18_spill] sm:$0xff] }
 0x3d3   : > { %8883 = vmatmul.mubr.msk.bf16.gmra.mrb[60].mxu0 %vm766_vm11, %v3140_v63  ;;  %v17992_v63 = vmax.f32 %v17990_v49, %v17991_v11  ;;  %vm3327_vm9 = vcmp.eq.s32.totalorder %v13373_v62, %v10545_v54  ;;  %vm3473_vm1 = vcmp.eq.s32.totalorder %v13375_v13, %v10545_v54 }
 0x3d4   : > { %v8828_v37 = vpop.f32.mrb[44].mxu0  ;;  %4163 = vperm.xlu0 %9319, %v17977_v55  }
 0x3d5   : > { %v13382_v25 = vmax.f32 %v8828_v37, %v17980_v20  ;;  %v2445_v31 = vpop.f32.mrb[45].mxu0 }
 0x3d6   : > { %v13387_v53 = vmax.f32 %v2445_v31, %v17984_v33  ;;  %3719 = vperm.xlu1 %9314, %v9716_v27   ;;  %v13390_v23 = vpop.permute.xlu1 %3285  ;;  %v8829_v16 = vpop.f32.mrb[46].mxu0 }
 0x3d7   : > { %17981 = vst [vmem:[#allocation56_spill] sm:$0xff] %v13382_v25  ;;  %v13395_v52 = vmax.f32 %v8829_v16, %v17988_v60  ;;  %v2448_v19 = vpop.f32.mrb[47].mxu0  ;;  %v13397_v46 = vpop.permute.xlu0 %3438  ;;  %v17997_v16 = vld [vmem:[#allocation28_spill] sm:$0xff]  ;;  %v18086_v25 = vld [vmem:[#allocation21_spill] sm:$0xff] }
 0x3d8   : > { %17985 = vst [vmem:[#allocation60_spill] sm:$0xff] %v13387_v53  ;;  %v13402_v37 = vmax.f32 %v2448_v19, %v17992_v63  ;;  %4169 = vperm.xlu0 %9319, %v17994_v39   ;;  %v17999_v19 = vld [vmem:[#allocation30_spill] sm:$0xff] }
 0x3d9   : > { %17989 = vst [vmem:[#allocation74_spill] sm:$0xff] %v13395_v52  ;;  %v18000_v63 = vld [vmem:[#allocation62_spill] sm:$0xff]  ;;  %v18084_v52 = vld [vmem:[#allocation19_spill] sm:$0xff] }
 0x3da   : > { %17993 = vst [vmem:[#allocation80_spill] sm:$0xff] %v13402_v37  ;;  %3725 = vperm.xlu1 %9314, %v13406_v43   ;;  %v13409_v20 = vpop.permute.xlu1 %3291 }
 0x3db   : > { %v13411_v31 = vpop.permute.xlu0 %3444 }
 0x3dc   : > { %4175 = vperm.xlu0 %9319, %v17995_v7  }
 0x3de   : > { %9316 = vset.pattern.permute.xlu1 %v17996_v44  ;;  %v13415_v33 = vpop.permute.xlu1 %3297 }
 0x3df   : > { %3747 = vperm.xlu1 %9316, %v17965_v56   ;;  %v13418_v27 = vpop.permute.xlu0 %3450 }
 0x3e0   : > { %4181 = vperm.xlu0 %9319, %v17997_v16  }
 0x3e2   : > { %v13421_v59 = vpop.permute.xlu1 %3303 }
 0x3e3   : > { %3750 = vperm.xlu1 %9316, %v17998_v32   ;;  %v13424_v60 = vpop.permute.xlu0 %3456 }
 0x3e4   : > { %4187 = vperm.xlu0 %9319, %v17999_v19  }
 0x3e6   : > { %v13427_v49 = vpop.permute.xlu1 %3309 }
 0x3e7   : > { %3756 = vperm.xlu1 %9316, %v17976_v0   ;;  %v13430_v11 = vpop.permute.xlu0 %3462 }
 0x3e8   : > { %4485 = vperm.xlu0 %9319, %v18000_v63  }
 0x3ea   : > { %v13433_v45 = vpop.permute.xlu1 %3315 }
 0x3eb   : > { %3762 = vperm.xlu1 %9316, %v17977_v55   ;;  %v13436_v8 = vpop.permute.xlu0 %3468 }
 0x3ec   : > { %4497 = vperm.xlu0 %9319, %v13246_v38   ;;  %v18005_v38 = vld [vmem:[#allocation73_spill] sm:$0xff] }
 0x3ee   : > { %v13439_v9 = vpop.permute.xlu1 %3321 }
 0x3ef   : > { %3768 = vperm.xlu1 %9316, %v17994_v39   ;;  %v13442_v57 = vpop.permute.xlu0 %3744  ;;  %v18016_v39 = vld [vmem:[#allocation36_spill] sm:$0xff] }
 0x3f0   : > { %18001 = vst [vmem:[#allocation45_spill] sm:$0xff] %v13442_v57  ;;  %4506 = vperm.xlu0 %9319, %v18002_v22   ;;  %v18007_v22 = vmov 10   ;;  %v18009_v57 = vld [vmem:[#allocation32_spill] sm:$0xff] }
 0x3f3   : > { %3774 = vperm.xlu1 %9316, %v17995_v7   ;;  %v3344_v0 = vpop.permute.xlu1 %3343  ;;  %v13446_v63 = vpop.permute.xlu0 %3753 }
 0x3f4   : > { %18003 = vst [vmem:[#allocation82_spill] sm:$0xff] %v13446_v63  ;;  %4515 = vperm.xlu0 %9319, %v13370_v51   ;;  %vm3390_vm6 = vcmp.eq.s32.totalorder %v3344_v0, %v10545_v54 }
 0x3f7   : > { %3780 = vperm.xlu1 %9316, %v17997_v16   ;;  %v3350_v36 = vpop.permute.xlu1 %3349  ;;  %v13450_v10 = vpop.permute.xlu0 %3759  ;;  %v17350_v16 = vmov 11  }
 0x3f8   : > { %18004 = vst [vmem:[#allocation76_spill] sm:$0xff] %v13450_v10  ;;  %4518 = vperm.xlu0 %9319, %v18005_v38   ;;  %v18011_v10 = vld [vmem:[#allocation33_spill] sm:$0xff]  ;;  %vm3392_vm15 = vcmp.eq.s32.totalorder %v3350_v36, %v10545_v54 }
 0x3fb   : > { %3786 = vperm.xlu1 %9316, %v17999_v19   ;;  %v3353_v1 = vpop.permute.xlu1 %3352  ;;  %v13454_v61 = vpop.permute.xlu0 %3765 }
 0x3fc   : > { %18006 = vst [vmem:[#allocation83_spill] sm:$0xff] %v13454_v61  ;;  %4527 = vperm.xlu0 %9319, %v13406_v43   ;;  %v18012_v61 = vld [vmem:[#allocation34_spill] sm:$0xff]  ;;  %vm3393_vm13 = vcmp.eq.s32.totalorder %v3353_v1, %v10545_v54 }
 0x3ff   : > { %9317 = vset.pattern.permute.xlu1 %v18007_v22  ;;  %v3359_v7 = vpop.permute.xlu1 %3358  ;;  %v13458_v63 = vpop.permute.xlu0 %3771 }
 0x400   : > { %18008 = vst [vmem:[#allocation77_spill] sm:$0xff] %v13458_v63  ;;  %3824 = vperm.xlu1 %9317, %v18009_v57   ;;  %9358 = vset.pattern.permute.xlu0 %v17350_v16  ;;  %v18014_v63 = vld [vmem:[#allocation35_spill] sm:$0xff] }
 0x401   : > { %4225 = vperm.xlu0 %9358, %v18009_v57  }
 0x403   : > { %v13463_v38 = vpop.permute.xlu1 %3364  ;;  %v13465_v19 = vpop.permute.xlu0 %3777 }
 0x404   : > { %18010 = vst [vmem:[#allocation84_spill] sm:$0xff] %v13465_v19  ;;  %3830 = vperm.xlu1 %9317, %v18011_v10   ;;  %v18018_v10 = vld [vmem:[#allocation37_spill] sm:$0xff] }
 0x405   : > { %4234 = vperm.xlu0 %9358, %v18012_v61  }
 0x407   : > { %v13469_v41 = vpop.permute.xlu1 %3370  ;;  %v13471_v3 = vpop.permute.xlu0 %3783 }
 0x408   : > { %18013 = vst [vmem:[#allocation78_spill] sm:$0xff] %v13471_v3  ;;  %3833 = vperm.xlu1 %9317, %v18012_v61   ;;  %v18019_v61 = vld [vmem:[#allocation63_spill] sm:$0xff] }
 0x409   : > { %4240 = vperm.xlu0 %9358, %v18014_v63   ;;  %vm3326_vm4 = vcmp.eq.s32.totalorder %v18019_v61, %v10545_v54  ;;  %v18023_v61 = vld [vmem:[#allocation54_spill] sm:$0xff] }
 0x40a   : > { %vm3406_vm8 = vmor %vm3326_vm4, %vm3390_vm6  ;;  %vm3329_vm12 = vcmp.eq.s32.totalorder %v18023_v61, %v10545_v54  ;;  %vm3328_vm4 = vcmp.eq.s32.totalorder %v13390_v23, %v10545_v54  ;;  %vm3395_vm6 = vcmp.eq.s32.totalorder %v3359_v7, %v10545_v54 }
 0x40b   : > { %v13475_v21 = vpop.permute.xlu1 %3376  ;;  %v13477_v16 = vpop.permute.xlu0 %3789  ;;  %vm3486_vm5 = vmor %vm3406_vm8, %vm3470_vm10  ;;  %vm3330_vm8 = vcmp.eq.s32.totalorder %v13409_v20, %v10545_v54 }
 0x40c   : > { %18015 = vst [vmem:[#allocation62_spill] sm:$0xff] %v13477_v16  ;;  %3839 = vperm.xlu1 %9317, %v18014_v63   ;;  %v18021_v63 = vld [vmem:[#allocation68_spill] sm:$0xff]  ;;  %vm3409_vm0 = vmor %vm3329_vm12, %vm3393_vm13  ;;  %v8184_v1 = vsel %vm3486_vm5, 1.0, %v17587_v17  ;;  %vm3475_vm13 = vcmp.eq.s32.totalorder %v13397_v46, %v10545_v54 }
 0x40d   : > { %4246 = vperm.xlu0 %9358, %v18016_v39   ;;  %vm3391_vm7 = vcmp.eq.s32.totalorder %v18021_v63, %v10545_v54  ;;  %v18026_v63 = vld [vmem:[#allocation57_spill] sm:$0xff]  ;;  %vm3489_vm12 = vmor %vm3409_vm0, %vm3473_vm1  ;;  %vm3397_vm1 = vcmp.eq.s32.totalorder %v13463_v38, %v10545_v54 }
 0x40e   : > { %vm3407_vm14 = vmor %vm3327_vm9, %vm3391_vm7  ;;  %vm3331_vm3 = vcmp.eq.s32.totalorder %v18026_v63, %v10545_v54  ;;  %v8187_v20 = vsel %vm3489_vm12, 1.0, %v17587_v17  ;;  %vm3399_vm12 = vcmp.eq.s32.totalorder %v13469_v41, %v10545_v54  ;;  %v18050_v41 = vld [vmem:[#allocation85_spill] sm:$0xff] }
 0x40f   : > { %v13481_v19 = vpop.permute.xlu1 %3382  ;;  %v13483_v2 = vpop.permute.xlu0 %4081  ;;  %vm13519_vm9 = vmor %vm3328_vm4, %vm3392_vm15  ;;  %vm3332_vm4 = vcmp.eq.s32.totalorder %v13415_v33, %v10545_v54  ;;  %v18040_v33 = vld [vmem:[#allocation81_spill] sm:$0xff] }
 0x410   : > { %18017 = vst [vmem:[#allocation64_spill] sm:$0xff] %v13483_v2  ;;  %3845 = vperm.xlu1 %9317, %v18016_v39   ;;  %v18022_v2 = vld [vmem:[#allocation38_spill] sm:$0xff] }
 0x411   : > { %4252 = vperm.xlu0 %9358, %v18018_v10  }
 0x413   : > { %v13490_v3 = vpop.permute.xlu1 %3388  ;;  %v13492_v16 = vpop.permute.xlu0 %4090 }
 0x414   : > { %18020 = vst [vmem:[#allocation73_spill] sm:$0xff] %v13492_v16  ;;  %3851 = vperm.xlu1 %9317, %v18018_v10   ;;  %v18031_v10 = vld [vmem:[#allocation41_spill] sm:$0xff] }
 0x415   : > { %4258 = vperm.xlu0 %9358, %v18022_v2  }
 0x417   : > { %v13505_v0 = vpop.permute.xlu0 %4096 }
 0x418   : > { %18024 = vst [vmem:[#allocation63_spill] sm:$0xff] %v13505_v0  ;;  %3857 = vperm.xlu1 %9317, %v18022_v2   ;;  %v3427_v62 = vpop.permute.xlu1 %3426 }
 0x419   : > { %vm3471_vm2 = vcmp.eq.s32.totalorder %v3427_v62, %v10545_v54  ;;  %4264 = vperm.xlu0 %9358, %v18025_v28   ;;  %v18030_v62 = vld [vmem:[#allocation40_spill] sm:$0xff] }
 0x41a   : > { %vm3487_vm7 = vmor %vm3407_vm14, %vm3471_vm2  ;;  %vm3394_vm10 = vcmp.eq.s32.totalorder %v18030_v62, %v10545_v54  ;;  %v18032_v62 = vld [vmem:[#allocation79_spill] sm:$0xff] }
 0x41b   : > { %v8185_v13 = vsel %vm3487_vm7, 1.0, %v17587_v17  ;;  %v13524_v61 = vpop.permute.xlu0 %4102  ;;  %vm3411_vm14 = vmor %vm3331_vm3, %vm3395_vm6  ;;  %vm3333_vm15 = vcmp.eq.s32.totalorder %v18032_v62, %v10545_v54  ;;  %vm3477_vm7 = vcmp.eq.s32.totalorder %v13411_v31, %v10545_v54  ;;  %v18041_v62 = vld [vmem:[#allocation52_spill] sm:$0xff]  ;;  %v18059_v31 = vld [vmem:[#allocation86_spill] sm:$0xff] }
 0x41c   : > { %18029 = vst [vmem:[#allocation68_spill] sm:$0xff] %v13524_v61  ;;  %v3534_v23 = vpack.c.bf16 %v8185_v13, %v8184_v1  ;;  %3863 = vperm.xlu1 %9317, %v18025_v28   ;;  %v3430_v7 = vpop.permute.xlu1 %3429  ;;  %vm13545_vm2 = vmor %vm3330_vm8, %vm3394_vm10  ;;  %v18036_v13 = vld [vmem:[#allocation51_spill] sm:$0xff]  ;;  %vm3335_vm8 = vcmp.eq.s32.totalorder %v18040_v33, %v10545_v54 }
 0x41d   : > { %vm3472_vm5 = vcmp.eq.s32.totalorder %v3430_v7, %v10545_v54  ;;  %4270 = vperm.xlu0 %9358, %v18031_v10   ;;  %vm3396_vm3 = vcmp.eq.s32.totalorder %v18036_v13, %v10545_v54  ;;  %vm3491_vm6 = vmor %vm3411_vm14, %vm3475_vm13  ;;  %v18039_v7 = vld [vmem:[#allocation17_spill] sm:$0xff]  ;;  %vm3398_vm14 = vcmp.eq.s32.totalorder %v18041_v62, %v10545_v54 }
 0x41e   : > { %vm3488_vm0 = vmor %vm13519_vm9, %vm3472_vm5  ;;  %8898 = vmatprep.mubr.msk.bf16.mxu1 %vm766_vm11, %v3534_v23  ;;  %v13625_v23 = vld [vmem:[%s10165_s26 + $0x8] sm:$0xff] }
 0x41f   : > { %v8186_v63 = vsel %vm3488_vm0, 1.0, %v17587_v17  ;;  %v13551_v1 = vpop.permute.xlu0 %4108  ;;  %vm13563_vm9 = vmor %vm3333_vm15, %vm3397_vm1  ;;  %vm3334_vm15 = vcmp.eq.s32.totalorder %v13421_v59, %v10545_v54  ;;  %vm3479_vm0 = vcmp.eq.s32.totalorder %v13418_v27, %v10545_v54  ;;  %18049 = vst [vmem:[#allocation40_spill] sm:$0xff] %v13625_v23  ;;  %v18054_v59 = vld [vmem:[#allocation69_spill] sm:$0xff] }
 0x420   : > { %18035 = vst [vmem:[#allocation54_spill] sm:$0xff] %v13551_v1  ;;  %v3535_v38 = vpack.c.bf16 %v8187_v20, %v8186_v63  ;;  %3869 = vperm.xlu1 %9317, %v18031_v10   ;;  %v3436_v36 = vpop.permute.xlu1 %3435  ;;  %vm13581_vm5 = vmor %vm3332_vm4, %vm3396_vm3  ;;  %v8189_v63 = vsel %vm3491_vm6, 1.0, %v17587_v17  ;;  %vm3337_vm4 = vcmp.eq.s32.totalorder %v18050_v41, %v10545_v54  ;;  %vm3401_vm6 = vcmp.eq.s32.totalorder %v13475_v21, %v10545_v54  ;;  %v13689_v27 = vld [vmem:[%s10165_s26 + $0x10] sm:$0xff] }
 0x421   : > { %vm3474_vm10 = vcmp.eq.s32.totalorder %v3436_v36, %v10545_v54  ;;  %4546 = vperm.xlu0 %9358, %v18039_v7   ;;  %vm13599_vm1 = vmor %vm13563_vm9, %vm3477_vm7 }
 0x422   : > { %vm3490_vm13 = vmor %vm13545_vm2, %vm3474_vm10  ;;  %8899 = vmatmul.mubr.msk.bf16.vlgmr.msra.gmra.mrb[48].mxu1 %vm766_vm11, %v3535_v38  ;;  %v8191_v20 = vsel %vm13599_vm1, 1.0, %v17587_v17  ;;  %vm3400_vm10 = vcmp.eq.s32.totalorder %v18054_v59, %v10545_v54  ;;  %vm3403_vm1 = vcmp.eq.s32.totalorder %v13481_v19, %v10545_v54  ;;  %v18068_v19 = vld [vmem:[#allocation87_spill] sm:$0xff] }
 0x423   : > { %v8188_v36 = vsel %vm3490_vm13, 1.0, %v17587_v17  ;;  %v13587_v28 = vpop.f32.mrb[32].mxu1  ;;  %v13589_v46 = vpop.permute.xlu0 %4114  ;;  %8943 = vmatpush3.bf16.msra.mxu1 %v13073_v12  ;;  %vm13617_vm2 = vmor %vm3335_vm8, %vm3399_vm12  ;;  %vm3336_vm8 = vcmp.eq.s32.totalorder %v13427_v49, %v10545_v54  ;;  %vm3481_vm13 = vcmp.eq.s32.totalorder %v13424_v60, %v10545_v54 }
 0x424   : > { %18044 = vst [vmem:[#allocation57_spill] sm:$0xff] %v13589_v46  ;;  %v3536_v38 = vpack.c.bf16 %v8189_v63, %v8188_v36  ;;  %9318 = vset.pattern.permute.xlu1 %v17996_v44  ;;  %v3442_v46 = vpop.permute.xlu1 %3441  ;;  %v13606_v61 = vpop.f32.mrb[33].mxu1  ;;  %8944 = vmatprep.subr.bf16.mxu1 %v13094_v42  ;;  %vm13648_vm9 = vmor %vm3334_vm15, %vm3398_vm14  ;;  %vm3339_vm15 = vcmp.eq.s32.totalorder %v18059_v31, %v10545_v54 }
 0x425   : > { %vm3476_vm3 = vcmp.eq.s32.totalorder %v3442_v46, %v10545_v54  ;;  %4084 = vperm.xlu1 %9318, %v13625_v23   ;;  %v13628_v63 = vpop.f32.mrb[34].mxu1  ;;  %4886 = vperm.xlu0 %9358, %v13625_v23   ;;  %vm13670_vm12 = vmor %vm13617_vm2, %vm3479_vm0 }
 0x426   : > { %vm3492_vm7 = vmor %vm13581_vm5, %vm3476_vm3  ;;  %v13639_v36 = vpop.f32.mrb[35].mxu1  ;;  %8902 = vmatprep.mubr.msk.bf16.mxu1 %vm766_vm11, %v3536_v38  ;;  %v8193_v41 = vsel %vm13670_vm12, 1.0, %v17587_v17  ;;  %vm3405_vm12 = vcmp.eq.s32.totalorder %v13490_v3, %v10545_v54 }
 0x427   : > { %v8190_v33 = vsel %vm3492_vm7, 1.0, %v17587_v17  ;;  %v13658_v44 = vpop.permute.xlu0 %4120  ;;  %8945 = vmatpush3.bf16.msra.mxu1 %v13094_v42  ;;  %vm13683_vm14 = vmor %vm3337_vm4, %vm3401_vm6  ;;  %vm3338_vm4 = vcmp.eq.s32.totalorder %v13433_v45, %v10545_v54  ;;  %vm3483_vm7 = vcmp.eq.s32.totalorder %v13430_v11, %v10545_v54  ;;  %v18072_v11 = vld [vmem:[#allocation53_spill] sm:$0xff] }
 0x428   : > { %18053 = vst [vmem:[#allocation79_spill] sm:$0xff] %v13658_v44  ;;  %v3537_v13 = vpack.c.bf16 %v8191_v20, %v8190_v33  ;;  %v3448_v38 = vpop.permute.xlu1 %3447  ;;  %8946 = vmatprep.subr.bf16.mxu1 %v13164_v40  ;;  %vm13706_vm2 = vmor %vm3336_vm8, %vm3400_vm10  ;;  %vm3341_vm8 = vcmp.eq.s32.totalorder %v18068_v19, %v10545_v54  ;;  %v17374_v44 = vmov 15  }
 0x429   : > { %vm3478_vm5 = vcmp.eq.s32.totalorder %v3448_v38, %v10545_v54  ;;  %4087 = vperm.xlu1 %9318, %v13689_v27   ;;  %4889 = vperm.xlu0 %9358, %v13689_v27   ;;  %v18063_v38 = vld [vmem:[#allocation43_spill] sm:$0xff]  ;;  %vm13728_vm6 = vmor %vm13683_vm14, %vm3481_vm13 }
 0x42a   : > { %vm3494_vm0 = vmor %vm13648_vm9, %vm3478_vm5  ;;  %8903 = vmatmul.mubr.msk.bf16.gmra.mrb[52].mxu1 %vm766_vm11, %v3537_v13  ;;  %vm3402_vm3 = vcmp.eq.s32.totalorder %v18063_v38, %v10545_v54  ;;  %v8195_v21 = vsel %vm13728_vm6, 1.0, %v17587_v17 }
 0x42b   : > { %v8192_v33 = vsel %vm3494_vm0, 1.0, %v17587_v17  ;;  %v13714_v46 = vpop.f32.mrb[36].mxu1  ;;  %v13716_v20 = vpop.permute.xlu0 %4126  ;;  %8947 = vmatpush3.bf16.msra.mxu1 %v13164_v40  ;;  %vm13745_vm9 = vmor %vm3339_vm15, %vm3403_vm1  ;;  %vm3485_vm15 = vcmp.eq.s32.totalorder %v13436_v8, %v10545_v54 }
 0x42c   : > { %18062 = vst [vmem:[#allocation51_spill] sm:$0xff] %v13716_v20  ;;  %v3538_v59 = vpack.c.bf16 %v8193_v41, %v8192_v33  ;;  %v3454_v40 = vpop.permute.xlu1 %3453  ;;  %v13734_v13 = vpop.f32.mrb[37].mxu1  ;;  %8948 = vmatprep.subr.bf16.mxu1 %v13224_v24  ;;  %v13753_v41 = vld [vmem:[%s10165_s26 + $0x20] sm:$0xff]  ;;  %vm13776_vm14 = vmor %vm3338_vm4, %vm3402_vm3  ;;  %vm3340_vm3 = vcmp.eq.s32.totalorder %v13439_v9, %v10545_v54 }
 0x42d   : > { %vm3480_vm10 = vcmp.eq.s32.totalorder %v3454_v40, %v10545_v54  ;;  %4093 = vperm.xlu1 %9318, %v13753_v41   ;;  %v13756_v33 = vpop.f32.mrb[38].mxu1  ;;  %4895 = vperm.xlu0 %9358, %v13753_v41   ;;  %vm3499_vm5 = vmor %vm13745_vm9, %vm3483_vm7 }
 0x42e   : > { %vm3496_vm13 = vmor %vm13706_vm2, %vm3480_vm10  ;;  %v13767_v40 = vpop.f32.mrb[39].mxu1  ;;  %8906 = vmatprep.mubr.msk.bf16.mxu1 %vm766_vm11, %v3538_v59  ;;  %vm3404_vm2 = vcmp.eq.s32.totalorder %v18072_v11, %v10545_v54  ;;  %v8197_v3 = vsel %vm3499_vm5, 1.0, %v17587_v17 }
 0x42f   : > { %v8194_v31 = vsel %vm3496_vm13, 1.0, %v17587_v17  ;;  %v13786_v59 = vpop.permute.xlu0 %3827  ;;  %8949 = vmatpush3.bf16.msra.mxu1 %v13224_v24  ;;  %vm3421_vm1 = vmor %vm3341_vm8, %vm3405_vm12  ;;  %v13805_v24 = vld [vmem:[%s10165_s26 + $0x30] sm:$0xff] }
 0x430   : > { %v3539_v45 = vpack.c.bf16 %v8195_v21, %v8194_v31  ;;  %v3460_v38 = vpop.permute.xlu1 %3459  ;;  %8950 = vmatprep.subr.bf16.mxu1 %v13289_v48  ;;  %18071 = vst [vmem:[#allocation81_spill] sm:$0xff] %v13805_v24  ;;  %vm13826_vm6 = vmor %vm3421_vm1, %vm3485_vm15  ;;  %vm3872_vm13 = vcmp.eq.s32.totalorder %v13786_v59, %v10545_v54  ;;  %v18114_v59 = vld [vmem:[#allocation82_spill] sm:$0xff] }
 0x431   : > { %vm3482_vm0 = vcmp.eq.s32.totalorder %v3460_v38, %v10545_v54  ;;  %4099 = vperm.xlu1 %9318, %v13805_v24   ;;  %4564 = vperm.xlu0 %9358, %v17977_v55   ;;  %vm3420_vm7 = vmor %vm3340_vm3, %vm3404_vm2 }
 0x432   : > { %vm3498_vm4 = vmor %vm13776_vm14, %vm3482_vm0  ;;  %8907 = vmatmul.mubr.msk.bf16.gmra.mrb[56].mxu1 %vm766_vm11, %v3539_v45 }
 0x433   : > { %v8196_v49 = vsel %vm3498_vm4, 1.0, %v17587_v17  ;;  %v13818_v60 = vpop.f32.mrb[40].mxu1  ;;  %v13820_v19 = vpop.permute.xlu0 %3836  ;;  %8951 = vmatpush3.bf16.msra.mxu1 %v13289_v48  ;;  %v13842_v48 = vld [vmem:[%s10165_s26 + $0x40] sm:$0xff]  ;;  %vm3794_vm4 = vcmp.eq.s32.totalorder %v18114_v59, %v10545_v54 }
 0x434   : > { %v3540_v42 = vpack.c.bf16 %v8197_v3, %v8196_v49  ;;  %v3466_v21 = vpop.permute.xlu1 %3465  ;;  %v13832_v45 = vpop.f32.mrb[41].mxu1  ;;  %8952 = vmatprep.subr.bf16.mxu1 %v13333_v35  ;;  %v18076_v3 = vld [vmem:[#allocation25_spill] sm:$0xff]  ;;  %v18116_v59 = vld [vmem:[#allocation72_spill] sm:$0xff] }
 0x435   : > { %vm3484_vm9 = vcmp.eq.s32.totalorder %v3466_v21, %v10545_v54  ;;  %4105 = vperm.xlu1 %9318, %v13842_v48   ;;  %v13845_v38 = vpop.f32.mrb[42].mxu1  ;;  %4573 = vperm.xlu0 %9358, %v18076_v3   ;;  %v8199_v21 = vsel %vm13826_vm6, 1.0, %v17587_v17  ;;  %v9723_v49 = vld [vmem:[%s10165_s26 + $0x50] sm:$0xff] }
 0x436   : > { %18075 = vst [vmem:[#allocation52_spill] sm:$0xff] %v13845_v38  ;;  %vm3500_vm10 = vmor %vm3420_vm7, %vm3484_vm9  ;;  %v13850_v11 = vpop.f32.mrb[43].mxu1  ;;  %8910 = vmatprep.mubr.msk.bf16.mxu1 %vm766_vm11, %v3540_v42 }
 0x437   : > { %18077 = vst [vmem:[#allocation85_spill] sm:$0xff] %v13850_v11  ;;  %v8198_v8 = vsel %vm3500_vm10, 1.0, %v17587_v17  ;;  %v13859_v62 = vpop.permute.xlu0 %3842  ;;  %8953 = vmatpush3.bf16.msra.mxu1 %v13333_v35  ;;  %v18092_v11 = vld [vmem:[#allocation27_spill] sm:$0xff]  ;;  %vm3731_vm10 = vcmp.eq.s32.totalorder %v18116_v59, %v10545_v54 }
 0x438   : > { %v3541_v1 = vpack.c.bf16 %v8199_v21, %v8198_v8  ;;  %8998 = vmatprep.subr.bf16.mxu1 %v13073_v12  ;;  %v13879_v8 = vld [vmem:[%s10165_s26 + $0x60] sm:$0xff]  ;;  %v9725_v12 = vld [vmem:[%s10165_s26 + $0x70] sm:$0xff] }
 0x439   : > { %4111 = vperm.xlu1 %9318, %v9723_v49   ;;  %v13864_v42 = vpop.permute.xlu1 %3680  ;;  %4916 = vperm.xlu0 %9358, %v13370_v51   ;;  %v18126_v59 = vld [vmem:[#allocation83_spill] sm:$0xff] }
 0x43a   : > { %8911 = vmatmul.mubr.msk.bf16.gmra.mrb[60].mxu1 %vm766_vm11, %v3541_v1  ;;  %v18081_v1 = vld [vmem:[#allocation29_spill] sm:$0xff]  ;;  %vm3727_vm15 = vcmp.eq.s32.totalorder %v13864_v42, %v10545_v54 }
 0x43b   : > { %v13868_v9 = vpop.f32.mrb[44].mxu1  ;;  %v13870_v20 = vpop.permute.xlu0 %3848 }
 0x43c   : > { %18078 = vst [vmem:[#allocation69_spill] sm:$0xff] %v13868_v9  ;;  %v13874_v35 = vpop.f32.mrb[45].mxu1  ;;  %v18088_v9 = vld [vmem:[#allocation23_spill] sm:$0xff] }
 0x43d   : > { %18079 = vst [vmem:[#allocation86_spill] sm:$0xff] %v13874_v35  ;;  %4117 = vperm.xlu1 %9318, %v13879_v8   ;;  %v13882_v49 = vpop.permute.xlu1 %3686  ;;  %v13884_v21 = vpop.f32.mrb[46].mxu1  ;;  %4585 = vperm.xlu0 %9358, %v18081_v1  }
 0x43e   : > { %18080 = vst [vmem:[#allocation43_spill] sm:$0xff] %v13884_v21  ;;  %v13889_v0 = vpop.f32.mrb[47].mxu1  ;;  %v17381_v21 = vmov 12  }
 0x43f   : > { %18082 = vst [vmem:[#allocation87_spill] sm:$0xff] %v13889_v0  ;;  %v13893_v24 = vpop.permute.xlu0 %3854 }
 0x441   : > { %4123 = vperm.xlu1 %9318, %v9725_v12   ;;  %v13896_v16 = vpop.permute.xlu1 %3689  ;;  %4928 = vperm.xlu0 %9358, %v13406_v43  }
 0x442   : > { %vm3730_vm6 = vcmp.eq.s32.totalorder %v13896_v16, %v10545_v54 }
 0x443   : > { %v13899_v23 = vpop.permute.xlu0 %3860 }
 0x445   : > { %9320 = vset.pattern.permute.xlu1 %v18007_v22  ;;  %v13902_v53 = vpop.permute.xlu1 %3695  ;;  %9374 = vset.pattern.permute.xlu0 %v17374_v44 }
 0x446   : > { %4145 = vperm.xlu1 %9320, %v18039_v7   ;;  %5829 = vperm.xlu0 %9374, %v18009_v57  }
 0x447   : > { %v13907_v31 = vpop.permute.xlu0 %3866 }
 0x449   : > { %v13909_v12 = vpop.permute.xlu1 %3701 }
 0x44a   : > { %4151 = vperm.xlu1 %9320, %v17998_v32   ;;  %5841 = vperm.xlu0 %9374, %v17894_v30  }
 0x44b   : > { %v13913_v37 = vpop.permute.xlu0 %4148 }
 0x44c   : > { %18083 = vst [vmem:[#allocation53_spill] sm:$0xff] %v13913_v37 }
 0x44d   : > { %v13915_v0 = vpop.permute.xlu1 %3707 }
 0x44e   : > { %4154 = vperm.xlu1 %9320, %v18084_v52   ;;  %9386 = vset.pattern.permute.xlu0 %v17381_v21 }
 0x44f   : > { %4950 = vperm.xlu0 %9386, %v17965_v56   ;;  %v13920_v44 = vpop.permute.xlu0 %4157 }
 0x450   : > { %18085 = vst [vmem:[#allocation88_spill] sm:$0xff] %v13920_v44  ;;  %v18090_v44 = vld [vmem:[#allocation33_spill] sm:$0xff] }
 0x451   : > { %v13922_v35 = vpop.permute.xlu1 %3713 }
 0x452   : > { %4160 = vperm.xlu1 %9320, %v18086_v25  }
 0x453   : > { %4626 = vperm.xlu0 %9386, %v18009_v57   ;;  %v13926_v32 = vpop.permute.xlu0 %4163 }
 0x454   : > { %18087 = vst [vmem:[#allocation89_spill] sm:$0xff] %v13926_v32 }
 0x455   : > { %v13928_v37 = vpop.permute.xlu1 %3719 }
 0x456   : > { %4166 = vperm.xlu1 %9320, %v18088_v9  }
 0x457   : > { %4956 = vperm.xlu0 %9386, %v18084_v52   ;;  %v13932_v7 = vpop.permute.xlu0 %4169  ;;  %v18094_v52 = vld [vmem:[#allocation35_spill] sm:$0xff] }
 0x458   : > { %18089 = vst [vmem:[#allocation90_spill] sm:$0xff] %v13932_v7 }
 0x459   : > { %v13934_v21 = vpop.permute.xlu1 %3725 }
 0x45a   : > { %4172 = vperm.xlu1 %9320, %v18076_v3  }
 0x45b   : > { %4632 = vperm.xlu0 %9386, %v18090_v44   ;;  %v13938_v34 = vpop.permute.xlu0 %4175 }
 0x45c   : > { %18091 = vst [vmem:[#allocation91_spill] sm:$0xff] %v13938_v34 }
 0x45e   : > { %4178 = vperm.xlu1 %9320, %v18092_v11   ;;  %v3748_v57 = vpop.permute.xlu1 %3747  ;;  %v18098_v11 = vmov 11  }
 0x45f   : > { %4962 = vperm.xlu0 %9386, %v18086_v25   ;;  %v13942_v32 = vpop.permute.xlu0 %4181  ;;  %v18099_v25 = vld [vmem:[#allocation42_spill] sm:$0xff]  ;;  %vm3792_vm12 = vcmp.eq.s32.totalorder %v3748_v57, %v10545_v54  ;;  %v18111_v57 = vld [vmem:[#allocation48_spill] sm:$0xff] }
 0x460   : > { %18093 = vst [vmem:[#allocation92_spill] sm:$0xff] %v13942_v32 }
 0x462   : > { %4184 = vperm.xlu1 %9320, %v18081_v1   ;;  %v3751_v9 = vpop.permute.xlu1 %3750 }
 0x463   : > { %4641 = vperm.xlu0 %9386, %v18094_v52   ;;  %v13946_v7 = vpop.permute.xlu0 %4187  ;;  %vm3793_vm7 = vcmp.eq.s32.totalorder %v3751_v9, %v10545_v54  ;;  %v18119_v9 = vld [vmem:[#allocation76_spill] sm:$0xff] }
 0x464   : > { %18095 = vst [vmem:[#allocation93_spill] sm:$0xff] %v13946_v7 }
 0x466   : > { %4190 = vperm.xlu1 %9320, %v18096_v58   ;;  %v3757_v3 = vpop.permute.xlu1 %3756  ;;  %v18101_v58 = vld [vmem:[#allocation24_spill] sm:$0xff] }
 0x467   : > { %4965 = vperm.xlu0 %9386, %v17977_v55   ;;  %v13950_v34 = vpop.permute.xlu0 %4485 }
 0x468   : > { %18097 = vst [vmem:[#allocation94_spill] sm:$0xff] %v13950_v34  ;;  %v18103_v34 = vld [vmem:[#allocation47_spill] sm:$0xff] }
 0x46a   : > { %9321 = vset.pattern.permute.xlu1 %v18098_v11  ;;  %v13953_v38 = vpop.permute.xlu1 %3762 }
 0x46b   : > { %4228 = vperm.xlu1 %9321, %v18099_v25   ;;  %4647 = vperm.xlu0 %9386, %v18016_v39   ;;  %v13957_v32 = vpop.permute.xlu0 %4497  ;;  %v18105_v39 = vld [vmem:[#allocation46_spill] sm:$0xff] }
 0x46c   : > { %18100 = vst [vmem:[#allocation95_spill] sm:$0xff] %v13957_v32 }
 0x46e   : > { %v13959_v52 = vpop.permute.xlu1 %3768 }
 0x46f   : > { %4231 = vperm.xlu1 %9321, %v18090_v44   ;;  %4971 = vperm.xlu0 %9386, %v18101_v58   ;;  %v13963_v7 = vpop.permute.xlu0 %4506  ;;  %v18107_v58 = vld [vmem:[#allocation66_spill] sm:$0xff] }
 0x470   : > { %18102 = vst [vmem:[#allocation96_spill] sm:$0xff] %v13963_v7  ;;  %vm3728_vm8 = vcmp.eq.s32.totalorder %v18107_v58, %v10545_v54 }
 0x471   : > { %vm3808_vm14 = vmor %vm3728_vm8, %vm3792_vm12  ;;  %vm3729_vm8 = vcmp.eq.s32.totalorder %v13882_v49, %v10545_v54  ;;  %v18121_v49 = vld [vmem:[#allocation58_spill] sm:$0xff] }
 0x472   : > { %v13965_v55 = vpop.permute.xlu1 %3774  ;;  %vm3888_vm1 = vmor %vm3808_vm14, %vm3872_vm13  ;;  %vm3795_vm13 = vcmp.eq.s32.totalorder %v3757_v3, %v10545_v54  ;;  %v18123_v3 = vld [vmem:[#allocation55_spill] sm:$0xff] }
 0x473   : > { %4237 = vperm.xlu1 %9321, %v17894_v30   ;;  %4650 = vperm.xlu0 %9386, %v18103_v34   ;;  %v13969_v1 = vpop.permute.xlu0 %4515  ;;  %v18108_v30 = vld [vmem:[#allocation28_spill] sm:$0xff]  ;;  %vm14013_vm12 = vmor %vm3730_vm6, %vm3794_vm4  ;;  %vm3733_vm4 = vcmp.eq.s32.totalorder %v18123_v3, %v10545_v54  ;;  %vm3797_vm6 = vcmp.eq.s32.totalorder %v13953_v38, %v10545_v54 }
 0x474   : > { %18104 = vst [vmem:[#allocation97_spill] sm:$0xff] %v13969_v1  ;;  %vm3809_vm14 = vmor %vm3729_vm8, %vm3793_vm7  ;;  %vm3734_vm8 = vcmp.eq.s32.totalorder %v13909_v12, %v10545_v54 }
 0x476   : > { %v13971_v25 = vpop.permute.xlu1 %3780 }
 0x477   : > { %4243 = vperm.xlu1 %9321, %v18105_v39   ;;  %4659 = vperm.xlu0 %9386, %v18022_v2   ;;  %v13975_v32 = vpop.permute.xlu0 %4518  ;;  %v18110_v2 = vld [vmem:[#allocation45_spill] sm:$0xff] }
 0x478   : > { %18106 = vst [vmem:[#allocation98_spill] sm:$0xff] %v13975_v32  ;;  %vm3791_vm5 = vcmp.eq.s32.totalorder %v18110_v2, %v10545_v54  ;;  %v18112_v32 = vld [vmem:[#allocation49_spill] sm:$0xff]  ;;  %v8209_v2 = vsel %vm3888_vm1, 1.0, %v17587_v17 }
 0x479   : > { %vm3807_vm0 = vmor %vm3727_vm15, %vm3791_vm5  ;;  %vm3796_vm5 = vcmp.eq.s32.totalorder %v18119_v9, %v10545_v54  ;;  %vm3732_vm15 = vcmp.eq.s32.totalorder %v13902_v53, %v10545_v54  ;;  %v18138_v9 = vmax.f32 %v13587_v28, %v13092_v14  ;;  %v18142_v28 = vmax.f32 %v13606_v61, %v13113_v15 }
 0x47a   : > { %v13980_v7 = vpop.permute.xlu1 %3786 }
 0x47b   : > { %4249 = vperm.xlu1 %9321, %v18103_v34   ;;  %4983 = vperm.xlu0 %9386, %v18108_v30   ;;  %v13984_v1 = vpop.permute.xlu0 %4527 }
 0x47c   : > { %18109 = vst [vmem:[#allocation66_spill] sm:$0xff] %v13984_v1 }
 0x47f   : > { %4255 = vperm.xlu1 %9321, %v18111_v57   ;;  %v3825_v58 = vpop.permute.xlu1 %3824  ;;  %4662 = vperm.xlu0 %9386, %v18112_v32  }
 0x480   : > { %vm3871_vm2 = vcmp.eq.s32.totalorder %v3825_v58, %v10545_v54  ;;  %v13995_v1 = vpop.permute.xlu0 %4225 }
 0x481   : > { %18113 = vst [vmem:[#allocation45_spill] sm:$0xff] %v13995_v1  ;;  %vm3887_vm3 = vmor %vm3807_vm0, %vm3871_vm2  ;;  %vm3875_vm0 = vcmp.eq.s32.totalorder %v13820_v19, %v10545_v54  ;;  %v14108_v1 = vld [vmem:[#allocation2 + $0x8] sm:$0xff]  }
 0x482   : > { %v8208_v42 = vsel %vm3887_vm3, 1.0, %v17587_v17  ;;  %vm3811_vm2 = vmor %vm3731_vm10, %vm3795_vm13  ;;  %vm3798_vm10 = vcmp.eq.s32.totalorder %v18126_v59, %v10545_v54 }
 0x483   : > { %v3935_v30 = vpack.c.bf16 %v8209_v2, %v8208_v42  ;;  %4261 = vperm.xlu1 %9321, %v18112_v32   ;;  %v3831_v57 = vpop.permute.xlu1 %3830  ;;  %4671 = vperm.xlu0 %9386, %v18031_v10   ;;  %vm14046_vm13 = vmor %vm3811_vm2, %vm3875_vm0  ;;  %v14088_v10 = vld [vmem:[#allocation2] sm:$0xff]  }
 0x484   : > { %vm3873_vm9 = vcmp.eq.s32.totalorder %v3831_v57, %v10545_v54  ;;  %v14007_v58 = vpop.permute.xlu0 %4234  ;;  %v18120_v57 = vld [vmem:[#allocation50_spill] sm:$0xff]  ;;  %v8212_v53 = vsel %vm14046_vm13, 1.0, %v17587_v17  ;;  %vm3801_vm13 = vcmp.eq.s32.totalorder %v13965_v55, %v10545_v54 }
 0x485   : > { %18115 = vst [vmem:[#allocation82_spill] sm:$0xff] %v14007_v58  ;;  %8926 = vmatprep.mubr.msk.bf16.mxu0 %vm766_vm11, %v3935_v30  ;;  %vm3889_vm1 = vmor %vm3809_vm14, %vm3873_vm9  ;;  %v18139_v58 = vld [vmem:[#allocation59_spill] sm:$0xff]  ;;  %v18154_v55 = vld [vmem:[#allocation78_spill] sm:$0xff] }
 0x486   : > { %vm14036_vm9 = vmor %vm3732_vm15, %vm3796_vm5  ;;  %v8210_v19 = vsel %vm3889_vm1, 1.0, %v17587_v17  ;;  %vm3799_vm1 = vcmp.eq.s32.totalorder %v13959_v52, %v10545_v54  ;;  %v18143_v52 = vld [vmem:[#allocation67_spill] sm:$0xff] }
 0x487   : > { %4267 = vperm.xlu1 %9321, %v18120_v57   ;;  %v3834_v2 = vpop.permute.xlu1 %3833  ;;  %5284 = vperm.xlu0 %9386, %v18121_v49   ;;  %vm14054_vm14 = vmor %vm3733_vm4, %vm3797_vm6  ;;  %v14060_v49 = vld [vmem:[%s10165_s26] sm:$0xff]  ;;  %vm3736_vm4 = vcmp.eq.s32.totalorder %v13915_v0, %v10545_v54 }
 0x488   : > { %vm3874_vm3 = vcmp.eq.s32.totalorder %v3834_v2, %v10545_v54  ;;  %v14028_v30 = vpop.permute.xlu0 %4240  ;;  %v18144_v2 = vmax.f32 %v13628_v63, %v13127_v18  ;;  %v18148_v0 = vld [vmem:[#allocation84_spill] sm:$0xff] }
 0x489   : > { %18122 = vst [vmem:[#allocation72_spill] sm:$0xff] %v14028_v30  ;;  %vm3890_vm7 = vmor %vm14013_vm12, %vm3874_vm3  ;;  %vm3877_vm12 = vcmp.eq.s32.totalorder %v13859_v62, %v10545_v54 }
 0x48a   : > { %v8211_v42 = vsel %vm3890_vm7, 1.0, %v17587_v17  ;;  %vm14080_vm3 = vmor %vm3734_vm8, %vm3798_vm10  ;;  %vm3879_vm7 = vcmp.eq.s32.totalorder %v13870_v20, %v10545_v54  ;;  %vm3737_vm8 = vcmp.eq.s32.totalorder %v18143_v52, %v10545_v54  ;;  %v18171_v20 = vmax.f32 %v13818_v60, %v13331_v26 }
 0x48b   : > { %v3936_v38 = vpack.c.bf16 %v8211_v42, %v8210_v19  ;;  %9322 = vset.pattern.permute.xlu1 %v18007_v22  ;;  %v3840_v16 = vpop.permute.xlu1 %3839  ;;  %5296 = vperm.xlu0 %9386, %v13753_v41   ;;  %v18132_v19 = vld [vmem:[#allocation75_spill] sm:$0xff]  ;;  %v18133_v42 = vld [vmem:[#allocation77_spill] sm:$0xff]  ;;  %vm14098_vm6 = vmor %vm14054_vm14, %vm3877_vm12  ;;  %v18172_v26 = vmax.f32 %v13832_v45, %v13346_v4 }
 0x48c   : > { %vm3876_vm5 = vcmp.eq.s32.totalorder %v3840_v16, %v10545_v54  ;;  %4482 = vperm.xlu1 %9322, %v14060_v49   ;;  %v14063_v3 = vpop.permute.xlu0 %4246  ;;  %vm3735_vm15 = vcmp.eq.s32.totalorder %v18132_v19, %v10545_v54  ;;  %vm3800_vm2 = vcmp.eq.s32.totalorder %v18133_v42, %v10545_v54  ;;  %v8214_v18 = vsel %vm14098_vm6, 1.0, %v17587_v17  ;;  %v14178_v42 = vld [vmem:[#allocation2 + $0x10] sm:$0xff]  }
 0x48d   : > { %18131 = vst [vmem:[#allocation76_spill] sm:$0xff] %v14063_v3  ;;  %vm3892_vm0 = vmor %vm14036_vm9, %vm3876_vm5  ;;  %8927 = vmatmul.mubr.msk.bf16.vlgmr.msra.gmra.mrb[64].mxu0 %vm766_vm11, %v3936_v38  ;;  %vm3802_vm5 = vcmp.eq.s32.totalorder %v18148_v0, %v10545_v54  ;;  %vm3803_vm6 = vcmp.eq.s32.totalorder %v13971_v25, %v10545_v54  ;;  %v18163_v25 = vld [vmem:[#allocation65_spill] sm:$0xff] }
 0x48e   : > { %v8213_v57 = vsel %vm3892_vm0, 1.0, %v17587_v17  ;;  %v8872_v38 = vpop.f32.mrb[48].mxu0  ;;  %8971 = vmatpush3.bf16.msra.mxu0 %v14088_v10  ;;  %vm14119_vm9 = vmor %vm3735_vm15, %vm3799_vm1  ;;  %vm3738_vm15 = vcmp.eq.s32.totalorder %v13922_v35, %v10545_v54  ;;  %vm3881_vm0 = vcmp.eq.s32.totalorder %v13893_v24, %v10545_v54 }
 0x48f   : > { %v3937_v59 = vpack.c.bf16 %v8213_v57, %v8212_v53  ;;  %v14105_v39 = vmax.f32 %v8872_v38, %v18138_v9  ;;  %v3846_v3 = vpop.permute.xlu1 %3845  ;;  %v3199_v30 = vpop.f32.mrb[49].mxu0  ;;  %5305 = vperm.xlu0 %9386, %v18139_v58   ;;  %8972 = vmatprep.subr.bf16.mxu0 %v14108_v1  ;;  %vm14150_vm14 = vmor %vm3736_vm4, %vm3800_vm2  ;;  %v18153_v53 = vld [vmem:[#allocation70_spill] sm:$0xff]  ;;  %v14339_v38 = vld [vmem:[#allocation2 + $0x28] sm:$0xff]  }
 0x490   : > { %vm3878_vm10 = vcmp.eq.s32.totalorder %v3846_v3, %v10545_v54  ;;  %v14127_v62 = vmax.f32 %v3199_v30, %v18142_v28  ;;  %4488 = vperm.xlu1 %9322, %v13689_v27   ;;  %v8873_v58 = vpop.f32.mrb[50].mxu0  ;;  %v14130_v57 = vpop.permute.xlu0 %4252  ;;  %v18147_v30 = vmax.f32 %v13639_v36, %v13147_v6  ;;  %vm14173_vm1 = vmor %vm14119_vm9, %vm3879_vm7  ;;  %vm3739_vm4 = vcmp.eq.s32.totalorder %v18153_v53, %v10545_v54 }
 0x491   : > { %vm3894_vm12 = vmor %vm14080_vm3, %vm3878_vm10  ;;  %v14141_v15 = vmax.f32 %v8873_v58, %v18144_v2  ;;  %v3202_v61 = vpop.f32.mrb[51].mxu0  ;;  %8930 = vmatprep.mubr.msk.bf16.mxu0 %vm766_vm11, %v3937_v59  ;;  %vm3804_vm9 = vcmp.eq.s32.totalorder %v18154_v55, %v10545_v54  ;;  %v8216_v12 = vsel %vm14173_vm1, 1.0, %v17587_v17  ;;  %v18159_v28 = vmax.f32 %v13714_v46, %v13222_v47 }
 0x492   : > { %v8215_v63 = vsel %vm3894_vm12, 1.0, %v17587_v17  ;;  %v14161_v3 = vmax.f32 %v3202_v61, %v18147_v30  ;;  %8973 = vmatpush3.bf16.msra.mxu0 %v14108_v1  ;;  %vm14189_vm2 = vmor %vm3737_vm8, %vm3801_vm13  ;;  %vm3740_vm8 = vcmp.eq.s32.totalorder %v13928_v37, %v10545_v54  ;;  %v14241_v61 = vld [vmem:[#allocation2 + $0x18] sm:$0xff]   ;;  %vm3883_vm12 = vcmp.eq.s32.totalorder %v13899_v23, %v10545_v54 }
 0x493   : > { %v3938_v6 = vpack.c.bf16 %v8215_v63, %v8214_v18  ;;  %v3852_v36 = vpop.permute.xlu1 %3851  ;;  %5308 = vperm.xlu0 %9386, %v13842_v48   ;;  %8974 = vmatprep.subr.bf16.mxu0 %v14178_v42  ;;  %v14195_v48 = vld [vmem:[%s10165_s26 + $0x18] sm:$0xff]  ;;  %vm14215_vm10 = vmor %vm3738_vm15, %vm3802_vm5  ;;  %vm3741_vm15 = vcmp.eq.s32.totalorder %v18163_v25, %v10545_v54  ;;  %vm3805_vm1 = vcmp.eq.s32.totalorder %v13980_v7, %v10545_v54 }
 0x494   : > { %vm3880_vm3 = vcmp.eq.s32.totalorder %v3852_v36, %v10545_v54  ;;  %4491 = vperm.xlu1 %9322, %v14195_v48   ;;  %v14198_v16 = vpop.permute.xlu0 %4258  ;;  %vm14231_vm13 = vmor %vm14189_vm2, %vm3881_vm0  ;;  %v18164_v18 = vmax.f32 %v13756_v33, %v13260_v29  ;;  %v18167_v30 = vmax.f32 %v13767_v40, %v13280_v50  ;;  %v18168_v23 = vld [vmem:[#allocation62_spill] sm:$0xff] }
 0x495   : > { %vm3896_vm7 = vmor %vm14150_vm14, %vm3880_vm3  ;;  %8931 = vmatmul.mubr.msk.bf16.gmra.mrb[68].mxu0 %vm766_vm11, %v3938_v6  ;;  %v8218_v29 = vsel %vm14231_vm13, 1.0, %v17587_v17  ;;  %v14304_v6 = vld [vmem:[#allocation2 + $0x20] sm:$0xff]  }
 0x496   : > { %v8217_v59 = vsel %vm3896_vm7, 1.0, %v17587_v17  ;;  %v8876_v9 = vpop.f32.mrb[52].mxu0  ;;  %8975 = vmatpush3.bf16.msra.mxu0 %v14178_v42  ;;  %vm14252_vm14 = vmor %vm3739_vm4, %vm3803_vm6  ;;  %vm3885_vm4 = vcmp.eq.s32.totalorder %v13907_v31, %v10545_v54 }
 0x497   : > { %v3939_v14 = vpack.c.bf16 %v8217_v59, %v8216_v12  ;;  %v14238_v58 = vmax.f32 %v8876_v9, %v18159_v28  ;;  %v3858_v52 = vpop.permute.xlu1 %3857  ;;  %v3215_v2 = vpop.f32.mrb[53].mxu0  ;;  %5317 = vperm.xlu0 %9386, %v13370_v51   ;;  %8976 = vmatprep.subr.bf16.mxu0 %v14241_v61  ;;  %v18162_v51 = vmax.f32 %v13734_v13, %v13243_v5  ;;  %vm14284_vm2 = vmor %vm3740_vm8, %vm3804_vm9  ;;  %v18173_v59 = vld [vmem:[#allocation52_spill] sm:$0xff]  ;;  %v18174_v9 = vld [vmem:[#allocation61_spill] sm:$0xff]  ;;  %v18176_v28 = vmov 12  }
 0x498   : > { %vm3882_vm5 = vcmp.eq.s32.totalorder %v3858_v52, %v10545_v54  ;;  %9323 = vset.pattern.permute.xlu1 %v18098_v11  ;;  %v8877_v24 = vpop.f32.mrb[54].mxu0  ;;  %v14263_v27 = vpop.permute.xlu0 %4264  ;;  %vm3899_vm3 = vmor %vm14252_vm14, %vm3883_vm12  ;;  %vm3806_vm9 = vcmp.eq.s32.totalorder %v18168_v23, %v10545_v54  ;;  %v18175_v35 = vmax.f32 %v18173_v59, %v18174_v9  ;;  %v18177_v52 = vld [vmem:[#allocation85_spill] sm:$0xff]  ;;  %v18186_v23 = vld [vmem:[#allocation18_spill] sm:$0xff] }
 0x499   : > { %v14260_v46 = vmax.f32 %v3215_v2, %v18162_v51  ;;  %vm3898_vm0 = vmor %vm14215_vm10, %vm3882_vm5  ;;  %v14274_v5 = vmax.f32 %v8877_v24, %v18164_v18  ;;  %4549 = vperm.xlu1 %9323, %v17965_v56   ;;  %v3218_v13 = vpop.f32.mrb[55].mxu0  ;;  %8934 = vmatprep.mubr.msk.bf16.mxu0 %vm766_vm11, %v3939_v14  ;;  %vm3742_vm10 = vcmp.eq.s32.totalorder %v13934_v21, %v10545_v54  ;;  %v8220_v7 = vsel %vm3899_vm3, 1.0, %v17587_v17  ;;  %v18178_v2 = vld [vmem:[#allocation71_spill] sm:$0xff]  ;;  %v18180_v24 = vld [vmem:[#allocation17_spill] sm:$0xff] }
 0x49a   : > { %v8219_v33 = vsel %vm3898_vm0, 1.0, %v17587_v17  ;;  %v14295_v0 = vmax.f32 %v3218_v13, %v18167_v30  ;;  %8977 = vmatpush3.bf16.msra.mxu0 %v14241_v61  ;;  %vm3821_vm6 = vmor %vm3741_vm15, %vm3805_vm1  ;;  %v18179_v47 = vmax.f32 %v18177_v52, %v18178_v2  ;;  %v17401_v18 = vmov 13   ;;  %v18183_v30 = vld [vmem:[#allocation56_spill] sm:$0xff] }
 0x49b   : > { %v3940_v37 = vpack.c.bf16 %v8219_v33, %v8218_v29  ;;  %v3864_v19 = vpop.permute.xlu1 %3863  ;;  %5320 = vperm.xlu0 %9386, %v13879_v8   ;;  %8978 = vmatprep.subr.bf16.mxu0 %v14304_v6  ;;  %vm14329_vm13 = vmor %vm3821_vm6, %vm3885_vm4  ;;  %v18182_v33 = vld [vmem:[#allocation69_spill] sm:$0xff] }
 0x49c   : > { %vm3884_vm7 = vcmp.eq.s32.totalorder %v3864_v19, %v10545_v54  ;;  %v14316_v50 = vpop.permute.xlu0 %4270  ;;  %vm3822_vm12 = vmor %vm3742_vm10, %vm3806_vm9  ;;  %v8222_v4 = vsel %vm14329_vm13, 1.0, %v17587_v17 }
 0x49d   : > { %vm3900_vm8 = vmor %vm14284_vm2, %vm3884_vm7  ;;  %4883 = vperm.xlu1 %9323, %v14060_v49   ;;  %8935 = vmatmul.mubr.msk.bf16.gmra.mrb[72].mxu0 %vm766_vm11, %v3940_v37  ;;  %v18184_v37 = vmax.f32 %v18182_v33, %v18183_v30  ;;  %v18203_v33 = vld [vmem:[#allocation42_spill] sm:$0xff] }
 0x49e   : > { %v8221_v40 = vsel %vm3900_vm8, 1.0, %v17587_v17  ;;  %v8880_v31 = vpop.f32.mrb[56].mxu0  ;;  %8979 = vmatpush3.bf16.msra.mxu0 %v14304_v6 }
 0x49f   : > { %v3941_v36 = vpack.c.bf16 %v8221_v40, %v8220_v7  ;;  %v14336_v53 = vmax.f32 %v8880_v31, %v18171_v20  ;;  %v3870_v49 = vpop.permute.xlu1 %3869  ;;  %v3231_v55 = vpop.f32.mrb[57].mxu0  ;;  %5329 = vperm.xlu0 %9386, %v13406_v43   ;;  %8980 = vmatprep.subr.bf16.mxu0 %v14339_v38  ;;  %v18187_v40 = vld [vmem:[#allocation86_spill] sm:$0xff]  ;;  %v18188_v31 = vld [vmem:[#allocation60_spill] sm:$0xff] }
 0x4a0   : > { %vm3886_vm14 = vcmp.eq.s32.totalorder %v3870_v49, %v10545_v54  ;;  %v14352_v60 = vmax.f32 %v3231_v55, %v18172_v26  ;;  %v8881_v12 = vpop.f32.mrb[58].mxu0  ;;  %v14354_v43 = vpop.permute.xlu0 %4546  ;;  %v18189_v8 = vmax.f32 %v18187_v40, %v18188_v31  ;;  %v18191_v55 = vld [vmem:[#allocation44_spill] sm:$0xff]  ;;  %v18192_v26 = vld [vmem:[#allocation43_spill] sm:$0xff] }
 0x4a1   : > { %vm3902_vm5 = vmor %vm3822_vm12, %vm3886_vm14  ;;  %v14359_v14 = vmax.f32 %v8881_v12, %v18175_v35  ;;  %9324 = vset.pattern.permute.xlu1 %v18176_v28  ;;  %v3234_v21 = vpop.f32.mrb[59].mxu0  ;;  %8938 = vmatprep.mubr.msk.bf16.mxu0 %vm766_vm11, %v3941_v36  ;;  %v18193_v12 = vld [vmem:[#allocation74_spill] sm:$0xff] }
 0x4a2   : > { %v8223_v45 = vsel %vm3902_vm5, 1.0, %v17587_v17  ;;  %v14370_v51 = vmax.f32 %v3234_v21, %v18179_v47  ;;  %4947 = vperm.xlu1 %9324, %v18180_v24   ;;  %8981 = vmatpush3.bf16.msra.mxu0 %v14339_v38  ;;  %v18194_v59 = vmax.f32 %v18192_v26, %v18193_v12  ;;  %v18201_v47 = vld [vmem:[#allocation19_spill] sm:$0xff] }
 0x4a3   : > { %v3942_v25 = vpack.c.bf16 %v8223_v45, %v8222_v4  ;;  %9405 = vset.pattern.permute.xlu0 %v17401_v18  ;;  %9026 = vmatprep.subr.bf16.mxu0 %v14088_v10  ;;  %v18197_v4 = vld [vmem:[#allocation87_spill] sm:$0xff]  ;;  %v18198_v45 = vld [vmem:[#allocation80_spill] sm:$0xff] }
 0x4a4   : > { %v14376_v13 = vpop.permute.xlu1 %4084  ;;  %5033 = vperm.xlu0 %9405, %v18090_v44   ;;  %v14379_v63 = vpop.permute.xlu0 %4886  ;;  %v18199_v52 = vmax.f32 %v18197_v4, %v18198_v45  ;;  %v14450_v45 = vld [vmem:[%s10165_s26 + $0x38] sm:$0xff] }
 0x4a5   : > { %18181 = vst [vmem:[#allocation58_spill] sm:$0xff] %v14379_v63  ;;  %8939 = vmatmul.mubr.msk.bf16.gmra.mrb[76].mxu0 %vm766_vm11, %v3942_v25  ;;  %v9737_v63 = vld [vmem:[%s10165_s26 + $0x28] sm:$0xff]  ;;  %vm4129_vm2 = vcmp.eq.s32.totalorder %v14376_v13, %v10545_v54  ;;  %v18231_v13 = vld [vmem:[#allocation82_spill] sm:$0xff] }
 0x4a6   : > { %9325 = vset.pattern.permute.xlu1 %v18098_v11  ;;  %v8884_v29 = vpop.f32.mrb[60].mxu0  ;;  %vm4275_vm13 = vcmp.eq.s32.totalorder %v18231_v13, %v10545_v54 }
 0x4a7   : > { %v14386_v19 = vmax.f32 %v8884_v29, %v18184_v37  ;;  %4552 = vperm.xlu1 %9325, %v18186_v23   ;;  %v3247_v7 = vpop.f32.mrb[61].mxu0 }
 0x4a8   : > { %v14392_v36 = vmax.f32 %v3247_v7, %v18189_v8  ;;  %v14394_v20 = vpop.permute.xlu1 %4087  ;;  %v8885_v49 = vpop.f32.mrb[62].mxu0  ;;  %5039 = vperm.xlu0 %9405, %v18191_v55   ;;  %v18206_v8 = vld [vmem:[#allocation40_spill] sm:$0xff] }
 0x4a9   : > { %18185 = vst [vmem:[#allocation55_spill] sm:$0xff] %v14386_v19  ;;  %v14400_v9 = vmax.f32 %v8885_v49, %v18194_v59  ;;  %v3250_v35 = vpop.f32.mrb[63].mxu0  ;;  %v14402_v21 = vpop.permute.xlu0 %4889 }
 0x4aa   : > { %18190 = vst [vmem:[#allocation83_spill] sm:$0xff] %v14392_v36  ;;  %18196 = vst [vmem:[#allocation77_spill] sm:$0xff] %v14402_v21  ;;  %v14407_v2 = vmax.f32 %v3250_v35, %v18199_v52  ;;  %v18210_v35 = vld [vmem:[#allocation21_spill] sm:$0xff]  ;;  %v18222_v21 = vld [vmem:[#allocation20_spill] sm:$0xff] }
 0x4ab   : > { %18195 = vst [vmem:[#allocation75_spill] sm:$0xff] %v14400_v9  ;;  %4555 = vperm.xlu1 %9325, %v18201_v47   ;;  %v14462_v47 = vld [vmem:[%s10165_s26 + $0x58] sm:$0xff]  ;;  %v9740_v36 = vld [vmem:[%s10165_s26 + $0x50] sm:$0xff] }
 0x4ac   : > { %18200 = vst [vmem:[#allocation59_spill] sm:$0xff] %v14407_v2  ;;  %v14410_v25 = vpop.permute.xlu1 %4093  ;;  %5051 = vperm.xlu0 %9405, %v18103_v34   ;;  %18217 = vst [vmem:[#allocation85_spill] sm:$0xff] %v14462_v47  ;;  %v18227_v34 = vld [vmem:[#allocation53_spill] sm:$0xff]  ;;  %v14864_v2 = vld [vmem:[%s10165_s26 + $0x40] sm:$0xff] }
 0x4ad   : > { %v14413_v29 = vpop.permute.xlu0 %4895  ;;  %vm4193_vm0 = vcmp.eq.s32.totalorder %v18227_v34, %v10545_v54 }
 0x4ae   : > { %18202 = vst [vmem:[#allocation67_spill] sm:$0xff] %v14413_v29  ;;  %v14474_v29 = vld [vmem:[%s10165_s26 + $0x78] sm:$0xff]  ;;  %vm4209_vm9 = vmor %vm4129_vm2, %vm4193_vm0 }
 0x4af   : > { %9326 = vset.pattern.permute.xlu1 %v18176_v28  ;;  %18220 = vst [vmem:[#allocation69_spill] sm:$0xff] %v14474_v29 }
 0x4b0   : > { %4629 = vperm.xlu1 %9326, %v18203_v33   ;;  %v14417_v30 = vpop.permute.xlu1 %4099  ;;  %5063 = vperm.xlu0 %9405, %v18112_v32  }
 0x4b1   : > { %v14420_v37 = vpop.permute.xlu0 %4564 }
 0x4b2   : > { %18204 = vst [vmem:[#allocation84_spill] sm:$0xff] %v14420_v37 }
 0x4b4   : > { %9327 = vset.pattern.permute.xlu1 %v18098_v11  ;;  %v14423_v7 = vpop.permute.xlu1 %4105  ;;  %5348 = vperm.xlu0 %9405, %v18180_v24   ;;  %v18219_v24 = vld [vmem:[#allocation29_spill] sm:$0xff] }
 0x4b5   : > { %4892 = vperm.xlu1 %9327, %v14195_v48   ;;  %v14427_v40 = vpop.permute.xlu0 %4573  ;;  %v18209_v48 = vld [vmem:[#allocation32_spill] sm:$0xff] }
 0x4b6   : > { %18205 = vst [vmem:[#allocation70_spill] sm:$0xff] %v14427_v40 }
 0x4b8   : > { %v14429_v31 = vpop.permute.xlu1 %4111  ;;  %5688 = vperm.xlu0 %9405, %v18206_v8  }
 0x4b9   : > { %9328 = vset.pattern.permute.xlu1 %v18176_v28  ;;  %v14433_v49 = vpop.permute.xlu0 %4916 }
 0x4ba   : > { %18207 = vst [vmem:[#allocation78_spill] sm:$0xff] %v14433_v49  ;;  %4953 = vperm.xlu1 %9328, %v18186_v23  }
 0x4bc   : > { %v14436_v26 = vpop.permute.xlu1 %4117  ;;  %5354 = vperm.xlu0 %9405, %v18186_v23  }
 0x4bd   : > { %v14439_v12 = vpop.permute.xlu0 %4585 }
 0x4be   : > { %18208 = vst [vmem:[#allocation65_spill] sm:$0xff] %v14439_v12  ;;  %9329 = vset.pattern.permute.xlu1 %v17401_v18  ;;  %v18213_v18 = vld [vmem:[#allocation34_spill] sm:$0xff]  ;;  %v18214_v12 = vld [vmem:[#allocation25_spill] sm:$0xff] }
 0x4bf   : > { %5027 = vperm.xlu1 %9329, %v18209_v48  }
 0x4c0   : > { %v14443_v59 = vpop.permute.xlu1 %4123  ;;  %5363 = vperm.xlu0 %9405, %v18210_v35  }
 0x4c1   : > { %v14446_v4 = vpop.permute.xlu0 %4928 }
 0x4c2   : > { %18211 = vst [vmem:[#allocation62_spill] sm:$0xff] %v14446_v4  ;;  %v18216_v4 = vmov 13  }
 0x4c3   : > { %5030 = vperm.xlu1 %9329, %v18203_v33  }
 0x4c4   : > { %5706 = vperm.xlu0 %9405, %v14450_v45  }
 0x4c5   : > { %v4146_v52 = vpop.permute.xlu1 %4145  ;;  %v14453_v8 = vpop.permute.xlu0 %5829 }
 0x4c6   : > { %18212 = vst [vmem:[#allocation52_spill] sm:$0xff] %v14453_v8  ;;  %vm4192_vm1 = vcmp.eq.s32.totalorder %v4146_v52, %v10545_v54  ;;  %v18230_v52 = vld [vmem:[#allocation81_spill] sm:$0xff] }
 0x4c7   : > { %9330 = vset.pattern.permute.xlu1 %v18176_v28 }
 0x4c8   : > { %4635 = vperm.xlu1 %9330, %v18213_v18   ;;  %5375 = vperm.xlu0 %9405, %v18214_v12  }
 0x4c9   : > { %v4152_v44 = vpop.permute.xlu1 %4151  ;;  %v14458_v49 = vpop.permute.xlu0 %5841 }
 0x4ca   : > { %18215 = vst [vmem:[#allocation61_spill] sm:$0xff] %v14458_v49  ;;  %vm4194_vm8 = vcmp.eq.s32.totalorder %v4152_v44, %v10545_v54 }
 0x4cc   : > { %9331 = vset.pattern.permute.xlu1 %v18216_v4  ;;  %5718 = vperm.xlu0 %9405, %v14462_v47  }
 0x4cd   : > { %5036 = vperm.xlu1 %9331, %v18213_v18   ;;  %v4155_v40 = vpop.permute.xlu1 %4154 }
 0x4ce   : > { %v14466_v8 = vpop.permute.xlu0 %4950  ;;  %vm4195_vm7 = vcmp.eq.s32.totalorder %v4155_v40, %v10545_v54 }
 0x4cf   : > { %18218 = vst [vmem:[#allocation71_spill] sm:$0xff] %v14466_v8 }
 0x4d0   : > { %5387 = vperm.xlu0 %9405, %v18219_v24  }
 0x4d1   : > { %9332 = vset.pattern.permute.xlu1 %v18007_v22  ;;  %v4161_v37 = vpop.permute.xlu1 %4160 }
 0x4d2   : > { %4494 = vperm.xlu1 %9332, %v13753_v41   ;;  %v14471_v49 = vpop.permute.xlu0 %4626 }
 0x4d4   : > { %5730 = vperm.xlu0 %9405, %v14474_v29  }
 0x4d5   : > { %v14477_v47 = vpop.permute.xlu1 %4166 }
 0x4d6   : > { %9333 = vset.pattern.permute.xlu1 %v18098_v11  ;;  %v14480_v32 = vpop.permute.xlu0 %4956 }
 0x4d7   : > { %18221 = vst [vmem:[#allocation56_spill] sm:$0xff] %v14480_v32  ;;  %4558 = vperm.xlu1 %9333, %v18222_v21   ;;  %v18225_v32 = vld [vmem:[#allocation64_spill] sm:$0xff] }
 0x4d8   : > { %vm4128_vm15 = vcmp.eq.s32.totalorder %v18225_v32, %v10545_v54  ;;  %v18229_v32 = vld [vmem:[#allocation73_spill] sm:$0xff] }
 0x4d9   : > { %v14483_v24 = vpop.permute.xlu1 %4172  ;;  %vm4208_vm4 = vmor %vm4128_vm15, %vm4192_vm1  ;;  %vm4131_vm6 = vcmp.eq.s32.totalorder %v18229_v32, %v10545_v54  ;;  %v18233_v32 = vld [vmem:[#allocation63_spill] sm:$0xff]  ;;  %vm4130_vm15 = vcmp.eq.s32.totalorder %v14394_v20, %v10545_v54  ;;  %vm4197_vm1 = vcmp.eq.s32.totalorder %v4161_v37, %v10545_v54  ;;  %v18235_v20 = vld [vmem:[#allocation72_spill] sm:$0xff] }
 0x4da   : > { %v14485_v8 = vpop.permute.xlu0 %4632  ;;  %vm4211_vm12 = vmor %vm4131_vm6, %vm4195_vm7  ;;  %vm4133_vm5 = vcmp.eq.s32.totalorder %v18233_v32, %v10545_v54  ;;  %vm4277_vm7 = vcmp.eq.s32.totalorder %v18235_v20, %v10545_v54  ;;  %v18236_v37 = vld [vmem:[#allocation68_spill] sm:$0xff]  ;;  %v18241_v20 = vld [vmem:[#allocation23_spill] sm:$0xff] }
 0x4db   : > { %18223 = vst [vmem:[#allocation18_spill] sm:$0xff] %v14485_v8  ;;  %4561 = vperm.xlu1 %9333, %v18210_v35   ;;  %vm4210_vm2 = vmor %vm4130_vm15, %vm4194_vm8  ;;  %vm4135_vm8 = vcmp.eq.s32.totalorder %v18236_v37, %v10545_v54 }
 0x4dc   : > { %vm4291_vm6 = vmor %vm4211_vm12, %vm4275_vm13  ;;  %vm4134_vm12 = vcmp.eq.s32.totalorder %v14417_v30, %v10545_v54  ;;  %v18244_v30 = vld [vmem:[#allocation90_spill] sm:$0xff] }
 0x4dd   : > { %v14488_v41 = vpop.permute.xlu1 %4178 }
 0x4de   : > { %v14491_v12 = vpop.permute.xlu0 %4962 }
 0x4df   : > { %4898 = vperm.xlu1 %9333, %v9737_v63   ;;  %18224 = vst [vmem:[#allocation86_spill] sm:$0xff] %v14491_v12  ;;  %v18228_v63 = vld [vmem:[#allocation45_spill] sm:$0xff]  ;;  %v18242_v12 = vld [vmem:[#allocation76_spill] sm:$0xff] }
 0x4e0   : > { %vm4272_vm3 = vcmp.eq.s32.totalorder %v18228_v63, %v10545_v54 }
 0x4e1   : > { %v14493_v29 = vpop.permute.xlu1 %4184  ;;  %vm4288_vm10 = vmor %vm4208_vm4, %vm4272_vm3  ;;  %vm4132_vm4 = vcmp.eq.s32.totalorder %v14410_v25, %v10545_v54 }
 0x4e2   : > { %v14502_v35 = vpop.permute.xlu0 %4641  ;;  %v8232_v44 = vsel %vm4288_vm10, 1.0, %v17587_v17 }
 0x4e3   : > { %9334 = vset.pattern.permute.xlu1 %v18176_v28  ;;  %18226 = vst [vmem:[#allocation60_spill] sm:$0xff] %v14502_v35 }
 0x4e4   : > { %4959 = vperm.xlu1 %9334, %v18222_v21  }
 0x4e5   : > { %v14500_v8 = vpop.permute.xlu1 %4190 }
 0x4e6   : > { %v14519_v63 = vpop.permute.xlu0 %4965 }
 0x4e7   : > { %18232 = vst [vmem:[#allocation44_spill] sm:$0xff] %v14519_v63 }
 0x4e8   : > { %9335 = vset.pattern.permute.xlu1 %v18007_v22 }
 0x4e9   : > { %4500 = vperm.xlu1 %9335, %v18230_v52  }
 0x4ea   : > { %v4229_v34 = vpop.permute.xlu1 %4228 }
 0x4eb   : > { %vm4273_vm14 = vcmp.eq.s32.totalorder %v4229_v34, %v10545_v54  ;;  %v18234_v34 = vld [vmem:[#allocation88_spill] sm:$0xff] }
 0x4ec   : > { %vm4289_vm0 = vmor %vm4209_vm9, %vm4273_vm14  ;;  %vm4196_vm3 = vcmp.eq.s32.totalorder %v18234_v34, %v10545_v54  ;;  %vm4199_vm14 = vcmp.eq.s32.totalorder %v14477_v47, %v10545_v54  ;;  %v14548_v34 = vpop.permute.xlu0 %4647 }
 0x4ed   : > { %v8233_v40 = vsel %vm4289_vm0, 1.0, %v17587_v17  ;;  %4503 = vperm.xlu1 %9335, %v14450_v45   ;;  %vm4213_vm9 = vmor %vm4133_vm5, %vm4197_vm1  ;;  %18239 = vst [vmem:[#allocation43_spill] sm:$0xff] %v14548_v34  ;;  %vm4279_vm1 = vcmp.eq.s32.totalorder %v18242_v12, %v10545_v54 }
 0x4ee   : > { %v4336_v13 = vpack.c.bf16 %v8233_v40, %v8232_v44  ;;  %v4232_v32 = vpop.permute.xlu1 %4231  ;;  %vm14541_vm0 = vmor %vm4132_vm4, %vm4196_vm3  ;;  %v8235_v44 = vsel %vm4291_vm6, 1.0, %v17587_v17  ;;  %vm4201_vm6 = vcmp.eq.s32.totalorder %v14483_v24, %v10545_v54  ;;  %v18252_v24 = vld [vmem:[#allocation57_spill] sm:$0xff] }
 0x4ef   : > { %vm4274_vm10 = vcmp.eq.s32.totalorder %v4232_v32, %v10545_v54  ;;  %v18240_v32 = vld [vmem:[#allocation89_spill] sm:$0xff]  ;;  %vm4293_vm5 = vmor %vm4213_vm9, %vm4277_vm7  ;;  %vm4200_vm9 = vcmp.eq.s32.totalorder %v18244_v30, %v10545_v54  ;;  %v18255_v30 = vld [vmem:[#allocation91_spill] sm:$0xff] }
 0x4f0   : > { %vm4290_vm15 = vmor %vm4210_vm2, %vm4274_vm10  ;;  %8954 = vmatprep.mubr.msk.bf16.mxu1 %vm766_vm11, %v4336_v13  ;;  %vm4198_vm13 = vcmp.eq.s32.totalorder %v18240_v32, %v10545_v54  ;;  %v18243_v32 = vld [vmem:[#allocation54_spill] sm:$0xff]  ;;  %v8237_v12 = vsel %vm4293_vm5, 1.0, %v17587_v17  ;;  %v14612_v35 = vpop.permute.xlu0 %4971  ;;  %vm4203_vm5 = vcmp.eq.s32.totalorder %v14488_v41, %v10545_v54 }
 0x4f1   : > { %v8234_v40 = vsel %vm4290_vm15, 1.0, %v17587_v17  ;;  %9336 = vset.pattern.permute.xlu1 %v18098_v11  ;;  %vm4215_vm2 = vmor %vm4135_vm8, %vm4199_vm14  ;;  %vm4137_vm4 = vcmp.eq.s32.totalorder %v18243_v32, %v10545_v54  ;;  %vm4136_vm8 = vcmp.eq.s32.totalorder %v14423_v7, %v10545_v54  ;;  %vm4281_vm15 = vcmp.eq.s32.totalorder %v14130_v57, %v10545_v54  ;;  %18251 = vst [vmem:[#allocation74_spill] sm:$0xff] %v14612_v35  ;;  %v18258_v57 = vld [vmem:[#allocation79_spill] sm:$0xff] }
 0x4f2   : > { %v4337_v13 = vpack.c.bf16 %v8235_v44, %v8234_v40  ;;  %4567 = vperm.xlu1 %9336, %v18241_v20   ;;  %v4238_v63 = vpop.permute.xlu1 %4237  ;;  %vm14573_vm10 = vmor %vm4134_vm12, %vm4198_vm13  ;;  %vm4139_vm12 = vcmp.eq.s32.totalorder %v18252_v24, %v10545_v54 }
 0x4f3   : > { %vm4276_vm3 = vcmp.eq.s32.totalorder %v4238_v63, %v10545_v54  ;;  %vm14584_vm14 = vmor %vm4215_vm2, %vm4279_vm1 }
 0x4f4   : > { %vm4292_vm7 = vmor %vm14541_vm0, %vm4276_vm3  ;;  %8955 = vmatmul.mubr.msk.bf16.vlgmr.msra.gmra.mrb[64].mxu1 %vm766_vm11, %v4337_v13  ;;  %v8239_v47 = vsel %vm14584_vm14, 1.0, %v17587_v17  ;;  %vm4202_vm3 = vcmp.eq.s32.totalorder %v18255_v30, %v10545_v54  ;;  %vm4205_vm14 = vcmp.eq.s32.totalorder %v14493_v29, %v10545_v54  ;;  %v18275_v30 = vld [vmem:[#allocation46_spill] sm:$0xff] }
 0x4f5   : > { %v8236_v63 = vsel %vm4292_vm7, 1.0, %v17587_v17  ;;  %v14579_v37 = vpop.f32.mrb[48].mxu1  ;;  %8999 = vmatpush3.bf16.msra.mxu1 %v14088_v10  ;;  %vm14602_vm0 = vmor %vm4137_vm4, %vm4201_vm6  ;;  %vm4138_vm4 = vcmp.eq.s32.totalorder %v14429_v31, %v10545_v54  ;;  %vm4283_vm7 = vcmp.eq.s32.totalorder %v14198_v16, %v10545_v54 }
 0x4f6   : > { %v4338_v44 = vpack.c.bf16 %v8237_v12, %v8236_v63  ;;  %9337 = vset.pattern.permute.xlu1 %v18176_v28  ;;  %v4244_v13 = vpop.permute.xlu1 %4243  ;;  %v14591_v34 = vpop.f32.mrb[49].mxu1  ;;  %9000 = vmatprep.subr.bf16.mxu1 %v14108_v1  ;;  %vm14631_vm2 = vmor %vm4136_vm8, %vm4200_vm9  ;;  %vm4141_vm8 = vcmp.eq.s32.totalorder %v18258_v57, %v10545_v54 }
 0x4f7   : > { %vm4278_vm13 = vcmp.eq.s32.totalorder %v4244_v13, %v10545_v54  ;;  %4638 = vperm.xlu1 %9337, %v18191_v55   ;;  %v14610_v40 = vpop.f32.mrb[50].mxu1  ;;  %vm4297_vm6 = vmor %vm14602_vm0, %vm4281_vm15 }
 0x4f8   : > { %vm4294_vm1 = vmor %vm14573_vm10, %vm4278_vm13  ;;  %v14622_v13 = vpop.f32.mrb[51].mxu1  ;;  %8958 = vmatprep.mubr.msk.bf16.mxu1 %vm766_vm11, %v4338_v44  ;;  %v8241_v44 = vsel %vm4297_vm6, 1.0, %v17587_v17  ;;  %vm4207_vm6 = vcmp.eq.s32.totalorder %v14500_v8, %v10545_v54 }
 0x4f9   : > { %v8238_v32 = vsel %vm4294_vm1, 1.0, %v17587_v17  ;;  %9001 = vmatpush3.bf16.msra.mxu1 %v14108_v1  ;;  %vm14660_vm9 = vmor %vm4139_vm12, %vm4203_vm5  ;;  %vm4140_vm12 = vcmp.eq.s32.totalorder %v14436_v26, %v10545_v54  ;;  %vm4285_vm1 = vcmp.eq.s32.totalorder %v14263_v27, %v10545_v54  ;;  %v18270_v27 = vld [vmem:[#allocation93_spill] sm:$0xff] }
 0x4fa   : > { %v4339_v7 = vpack.c.bf16 %v8239_v47, %v8238_v32  ;;  %v4250_v25 = vpop.permute.xlu1 %4249  ;;  %9002 = vmatprep.subr.bf16.mxu1 %v14178_v42  ;;  %vm14677_vm0 = vmor %vm4138_vm4, %vm4202_vm3  ;;  %v14685_v32 = vpop.permute.xlu0 %4650 }
 0x4fb   : > { %vm4280_vm10 = vcmp.eq.s32.totalorder %v4250_v25, %v10545_v54  ;;  %9338 = vset.pattern.permute.xlu1 %v18098_v11  ;;  %18261 = vst [vmem:[#allocation87_spill] sm:$0xff] %v14685_v32  ;;  %vm14697_vm5 = vmor %vm14660_vm9, %vm4283_vm7 }
 0x4fc   : > { %vm4296_vm15 = vmor %vm14631_vm2, %vm4280_vm10  ;;  %4901 = vperm.xlu1 %9338, %v18230_v52   ;;  %8959 = vmatmul.mubr.msk.bf16.gmra.mrb[68].mxu1 %vm766_vm11, %v4339_v7  ;;  %v18262_v52 = vld [vmem:[#allocation92_spill] sm:$0xff]  ;;  %v8243_v41 = vsel %vm14697_vm5, 1.0, %v17587_v17 }
 0x4fd   : > { %v8240_v12 = vsel %vm4296_vm15, 1.0, %v17587_v17  ;;  %v14683_v24 = vpop.f32.mrb[52].mxu1  ;;  %9003 = vmatpush3.bf16.msra.mxu1 %v14178_v42  ;;  %vm4204_vm13 = vcmp.eq.s32.totalorder %v18262_v52, %v10545_v54  ;;  %vm14714_vm2 = vmor %vm4141_vm8, %vm4205_vm14  ;;  %vm4287_vm8 = vcmp.eq.s32.totalorder %v14316_v50, %v10545_v54 }
 0x4fe   : > { %v4340_v47 = vpack.c.bf16 %v8241_v44, %v8240_v12  ;;  %v4256_v7 = vpop.permute.xlu1 %4255  ;;  %v14703_v25 = vpop.f32.mrb[53].mxu1  ;;  %9004 = vmatprep.subr.bf16.mxu1 %v14241_v61  ;;  %v18267_v12 = vld [vmem:[#allocation51_spill] sm:$0xff]  ;;  %vm14741_vm9 = vmor %vm4140_vm12, %vm4204_vm13  ;;  %vm4142_vm13 = vcmp.eq.s32.totalorder %v14443_v59, %v10545_v54 }
 0x4ff   : > { %vm4282_vm3 = vcmp.eq.s32.totalorder %v4256_v7, %v10545_v54  ;;  %v14721_v44 = vpop.f32.mrb[54].mxu1  ;;  %vm4143_vm4 = vcmp.eq.s32.totalorder %v18267_v12, %v10545_v54  ;;  %vm4301_vm10 = vmor %vm14714_vm2, %vm4285_vm1  ;;  %v14777_v50 = vpop.permute.xlu0 %4659 }
 0x500   : > { %vm4298_vm7 = vmor %vm14677_vm0, %vm4282_vm3  ;;  %4904 = vperm.xlu1 %9338, %v14450_v45   ;;  %v14732_v57 = vpop.f32.mrb[55].mxu1  ;;  %8962 = vmatprep.mubr.msk.bf16.mxu1 %vm766_vm11, %v4340_v47  ;;  %v17410_v47 = vmov 17   ;;  %vm4206_vm0 = vcmp.eq.s32.totalorder %v18270_v27, %v10545_v54  ;;  %18271 = vst [vmem:[#allocation80_spill] sm:$0xff] %v14777_v50  ;;  %v8245_v8 = vsel %vm4301_vm10, 1.0, %v17587_v17 }
 0x501   : > { %v8242_v29 = vsel %vm4298_vm7, 1.0, %v17587_v17  ;;  %9005 = vmatpush3.bf16.msra.mxu1 %v14241_v61  ;;  %9421 = vset.pattern.permute.xlu0 %v17410_v47  ;;  %vm4223_vm14 = vmor %vm4143_vm4, %vm4207_vm6  ;;  %vm4593_vm4 = vcmp.eq.s32.totalorder %v14354_v43, %v10545_v54  ;;  %vm4673_vm7 = vcmp.eq.s32.totalorder %v14471_v49, %v10545_v54  ;;  %v18289_v49 = vld [vmem:[#allocation38_spill] sm:$0xff] }
 0x502   : > { %v4341_v26 = vpack.c.bf16 %v8243_v41, %v8242_v29  ;;  %v4262_v52 = vpop.permute.xlu1 %4261  ;;  %9006 = vmatprep.subr.bf16.mxu1 %v14304_v6  ;;  %6636 = vperm.xlu0 %9421, %v18209_v48   ;;  %vm4303_vm5 = vmor %vm4223_vm14, %vm4287_vm8  ;;  %v9738_v48 = vld [vmem:[%s10165_s26 + $0x48] sm:$0xff] }
 0x503   : > { %vm4284_vm15 = vcmp.eq.s32.totalorder %v4262_v52, %v10545_v54  ;;  %vm4222_vm1 = vmor %vm4142_vm13, %vm4206_vm0  ;;  %v8247_v27 = vsel %vm4303_vm5, 1.0, %v17587_v17  ;;  %v14814_v29 = vpop.permute.xlu0 %4983 }
 0x504   : > { %vm4300_vm12 = vmor %vm14741_vm9, %vm4284_vm15  ;;  %9339 = vset.pattern.permute.xlu1 %v18176_v28  ;;  %8963 = vmatmul.mubr.msk.bf16.gmra.mrb[72].mxu1 %vm766_vm11, %v4341_v26  ;;  %v18272_v26 = vld [vmem:[#allocation35_spill] sm:$0xff]  ;;  %18273 = vst [vmem:[#allocation40_spill] sm:$0xff] %v14814_v29 }
 0x505   : > { %v8244_v63 = vsel %vm4300_vm12, 1.0, %v17587_v17  ;;  %4968 = vperm.xlu1 %9339, %v18241_v20   ;;  %v14782_v16 = vpop.f32.mrb[56].mxu1  ;;  %9007 = vmatpush3.bf16.msra.mxu1 %v14304_v6 }
 0x506   : > { %v4342_v12 = vpack.c.bf16 %v8245_v8, %v8244_v63  ;;  %v4268_v7 = vpop.permute.xlu1 %4267  ;;  %v14787_v41 = vpop.f32.mrb[57].mxu1  ;;  %9008 = vmatprep.subr.bf16.mxu1 %v14339_v38  ;;  %6648 = vperm.xlu0 %9421, %v18191_v55  }
 0x507   : > { %vm4286_vm2 = vcmp.eq.s32.totalorder %v4268_v7, %v10545_v54  ;;  %v14800_v52 = vpop.f32.mrb[58].mxu1  ;;  %v14838_v7 = vpop.permute.xlu0 %4662 }
 0x508   : > { %vm4302_vm3 = vmor %vm4222_vm1, %vm4286_vm2  ;;  %v14804_v63 = vpop.f32.mrb[59].mxu1  ;;  %8966 = vmatprep.mubr.msk.bf16.mxu1 %vm766_vm11, %v4342_v12  ;;  %v17412_v12 = vmov 16   ;;  %18278 = vst [vmem:[#allocation73_spill] sm:$0xff] %v14838_v7 }
 0x509   : > { %v8246_v59 = vsel %vm4302_vm3, 1.0, %v17587_v17  ;;  %9340 = vset.pattern.permute.xlu1 %v18216_v4  ;;  %9009 = vmatpush3.bf16.msra.mxu1 %v14339_v38 }
 0x50a   : > { %v4343_v47 = vpack.c.bf16 %v8247_v27, %v8246_v59  ;;  %5042 = vperm.xlu1 %9340, %v18272_v26   ;;  %9054 = vmatprep.subr.bf16.mxu1 %v14088_v10 }
 0x50b   : > { %v4483_v8 = vpop.permute.xlu1 %4482  ;;  %9433 = vset.pattern.permute.xlu0 %v17412_v12  ;;  %v14848_v29 = vpop.permute.xlu0 %4671  ;;  %v18280_v12 = vld [vmem:[#allocation36_spill] sm:$0xff] }
 0x50c   : > { %8967 = vmatmul.mubr.msk.bf16.gmra.mrb[76].mxu1 %vm766_vm11, %v4343_v47  ;;  %6559 = vperm.xlu0 %9433, %v17965_v56   ;;  %18279 = vst [vmem:[#allocation81_spill] sm:$0xff] %v14848_v29  ;;  %v18282_v29 = vld [vmem:[#allocation24_spill] sm:$0xff]  ;;  %vm4529_vm6 = vcmp.eq.s32.totalorder %v4483_v8, %v10545_v54 }
 0x50d   : > { %v14819_v31 = vpop.f32.mrb[60].mxu1  ;;  %vm4609_vm9 = vmor %vm4529_vm6, %vm4593_vm4 }
 0x50e   : > { %9341 = vset.pattern.permute.xlu1 %v18176_v28  ;;  %v14825_v27 = vpop.f32.mrb[61].mxu1  ;;  %vm4689_vm14 = vmor %vm4609_vm9, %vm4673_vm7 }
 0x50f   : > { %18274 = vst [vmem:[#allocation64_spill] sm:$0xff] %v14825_v27  ;;  %4644 = vperm.xlu1 %9341, %v18275_v30   ;;  %v14830_v47 = vpop.permute.xlu1 %4488  ;;  %v14832_v35 = vpop.f32.mrb[62].mxu1 }
 0x510   : > { %18276 = vst [vmem:[#allocation53_spill] sm:$0xff] %v14832_v35  ;;  %v14836_v26 = vpop.f32.mrb[63].mxu1  ;;  %6233 = vperm.xlu0 %9433, %v18203_v33   ;;  %v14853_v7 = vpop.permute.xlu0 %5284  ;;  %vm4531_vm9 = vcmp.eq.s32.totalorder %v14830_v47, %v10545_v54 }
 0x511   : > { %18277 = vst [vmem:[#allocation45_spill] sm:$0xff] %v14836_v26  ;;  %18281 = vst [vmem:[#allocation82_spill] sm:$0xff] %v14853_v7 }
 0x513   : > { %9342 = vset.pattern.permute.xlu1 %v18216_v4  ;;  %v14844_v59 = vpop.permute.xlu1 %4491 }
 0x514   : > { %5045 = vperm.xlu1 %9342, %v18275_v30   ;;  %6562 = vperm.xlu0 %9433, %v18186_v23   ;;  %v14860_v32 = vpop.permute.xlu0 %5296 }
 0x515   : > { %18283 = vst [vmem:[#allocation63_spill] sm:$0xff] %v14860_v32  ;;  %v18285_v32 = vld [vmem:[#allocation94_spill] sm:$0xff] }
 0x516   : > { %vm4530_vm10 = vcmp.eq.s32.totalorder %v18285_v32, %v10545_v54  ;;  %v8256_v32 = vsel %vm4689_vm14, 1.0, %v17587_v17 }
 0x518   : > { %5048 = vperm.xlu1 %9342, %v18280_v12   ;;  %v4550_v50 = vpop.permute.xlu1 %4549  ;;  %6239 = vperm.xlu0 %9433, %v18213_v18   ;;  %v14867_v26 = vpop.permute.xlu0 %5305 }
 0x519   : > { %18284 = vst [vmem:[#allocation88_spill] sm:$0xff] %v14867_v26  ;;  %vm4594_vm8 = vcmp.eq.s32.totalorder %v4550_v50, %v10545_v54  ;;  %v18286_v26 = vld [vmem:[#allocation47_spill] sm:$0xff] }
 0x51a   : > { %vm4610_vm15 = vmor %vm4530_vm10, %vm4594_vm8 }
 0x51c   : > { %9343 = vset.pattern.permute.xlu1 %v18007_v22  ;;  %v4884_v20 = vpop.permute.xlu1 %4883  ;;  %6568 = vperm.xlu0 %9433, %v18222_v21   ;;  %v14881_v43 = vpop.permute.xlu0 %5308 }
 0x51d   : > { %4509 = vperm.xlu1 %9343, %v9738_v48   ;;  %18287 = vst [vmem:[#allocation72_spill] sm:$0xff] %v14881_v43  ;;  %vm4930_vm4 = vcmp.eq.s32.totalorder %v4884_v20, %v10545_v54  ;;  %v18301_v20 = vld [vmem:[#allocation77_spill] sm:$0xff] }
 0x520   : > { %6242 = vperm.xlu0 %9433, %v18191_v55   ;;  %v14890_v43 = vpop.permute.xlu0 %5317 }
 0x521   : > { %9344 = vset.pattern.permute.xlu1 %v18098_v11  ;;  %v4948_v30 = vpop.permute.xlu1 %4947  ;;  %18290 = vst [vmem:[#allocation68_spill] sm:$0xff] %v14890_v43  ;;  %v18294_v43 = vld [vmem:[#allocation71_spill] sm:$0xff] }
 0x522   : > { %4570 = vperm.xlu1 %9344, %v18282_v29   ;;  %vm4995_vm5 = vcmp.eq.s32.totalorder %v18294_v43, %v10545_v54  ;;  %vm4994_vm1 = vcmp.eq.s32.totalorder %v4948_v30, %v10545_v54  ;;  %v18299_v30 = vld [vmem:[#allocation37_spill] sm:$0xff] }
 0x523   : > { %vm5010_vm7 = vmor %vm4930_vm4, %vm4994_vm1  ;;  %vm4532_vm1 = vcmp.eq.s32.totalorder %v14844_v59, %v10545_v54 }
 0x524   : > { %6251 = vperm.xlu0 %9433, %v18280_v12  }
 0x526   : > { %4907 = vperm.xlu1 %9344, %v14864_v2   ;;  %v4553_v7 = vpop.permute.xlu1 %4552 }
 0x527   : > { %vm4595_vm6 = vcmp.eq.s32.totalorder %v4553_v7, %v10545_v54 }
 0x528   : > { %6580 = vperm.xlu0 %9433, %v18282_v29   ;;  %vm4611_vm14 = vmor %vm4531_vm9, %vm4595_vm6 }
 0x52a   : > { %4910 = vperm.xlu1 %9344, %v9738_v48   ;;  %v14873_v9 = vpop.permute.xlu1 %4555  ;;  %v18288_v48 = vld [vmem:[#allocation25_spill] sm:$0xff] }
 0x52c   : > { %6254 = vperm.xlu0 %9433, %v18286_v26  }
 0x52e   : > { %9345 = vset.pattern.permute.xlu1 %v18176_v28 }
 0x52f   : > { %4974 = vperm.xlu1 %9345, %v18288_v48   ;;  %v4630_v8 = vpop.permute.xlu1 %4629  ;;  %v17425_v48 = vmov 14  }
 0x530   : > { %vm4674_vm0 = vcmp.eq.s32.totalorder %v4630_v8, %v10545_v54  ;;  %6263 = vperm.xlu0 %9433, %v18289_v49   ;;  %v18291_v8 = vld [vmem:[#allocation26_spill] sm:$0xff] }
 0x531   : > { %vm4690_vm13 = vmor %vm4610_vm15, %vm4674_vm0  ;;  %vm4596_vm0 = vcmp.eq.s32.totalorder %v14873_v9, %v10545_v54 }
 0x532   : > { %v8257_v50 = vsel %vm4690_vm13, 1.0, %v17587_v17 }
 0x533   : > { %v4737_v35 = vpack.c.bf16 %v8257_v50, %v8256_v32  ;;  %9346 = vset.pattern.permute.xlu1 %v18007_v22  ;;  %v14898_v32 = vpop.permute.xlu0 %5320  ;;  %v18293_v50 = vld [vmem:[#allocation58_spill] sm:$0xff] }
 0x534   : > { %4512 = vperm.xlu1 %9346, %v9740_v36   ;;  %v4893_v27 = vpop.permute.xlu1 %4892  ;;  %9447 = vset.pattern.permute.xlu0 %v17425_v48  ;;  %18292 = vst [vmem:[#allocation89_spill] sm:$0xff] %v14898_v32  ;;  %vm4931_vm12 = vcmp.eq.s32.totalorder %v18293_v50, %v10545_v54 }
 0x535   : > { %8982 = vmatprep.mubr.msk.bf16.mxu0 %vm766_vm11, %v4737_v35  ;;  %5752 = vperm.xlu0 %9447, %v17965_v56   ;;  %v18295_v35 = vld [vmem:[#allocation27_spill] sm:$0xff]  ;;  %vm14909_vm3 = vmor %vm4931_vm12, %vm4995_vm5  ;;  %vm4932_vm12 = vcmp.eq.s32.totalorder %v18301_v20, %v10545_v54 }
 0x537   : > { %v14915_v50 = vpop.permute.xlu0 %5329 }
 0x538   : > { %9347 = vset.pattern.permute.xlu1 %v18098_v11  ;;  %18298 = vst [vmem:[#allocation76_spill] sm:$0xff] %v14915_v50 }
 0x539   : > { %4576 = vperm.xlu1 %9347, %v18291_v8   ;;  %v4954_v19 = vpop.permute.xlu1 %4953  ;;  %5431 = vperm.xlu0 %9447, %v18203_v33  }
 0x53a   : > { %vm4996_vm5 = vcmp.eq.s32.totalorder %v4954_v19, %v10545_v54  ;;  %v18302_v19 = vld [vmem:[#allocation56_spill] sm:$0xff] }
 0x53b   : > { %vm5012_vm4 = vmor %vm4932_vm12, %vm4996_vm5 }
 0x53d   : > { %4579 = vperm.xlu1 %9347, %v18295_v35   ;;  %5755 = vperm.xlu0 %9447, %v18186_v23  }
 0x53e   : > { %v5028_v48 = vpop.permute.xlu1 %5027 }
 0x53f   : > { %vm5074_vm2 = vcmp.eq.s32.totalorder %v5028_v48, %v10545_v54  ;;  %v18300_v48 = vld [vmem:[#allocation18_spill] sm:$0xff] }
 0x540   : > { %vm5090_vm10 = vmor %vm5010_vm7, %vm5074_vm2  ;;  %vm4675_vm8 = vcmp.eq.s32.totalorder %v18300_v48, %v10545_v54 }
 0x541   : > { %9348 = vset.pattern.permute.xlu1 %v18176_v28  ;;  %5437 = vperm.xlu0 %9447, %v18213_v18   ;;  %v8280_v7 = vsel %vm5090_vm10, 1.0, %v17587_v17  ;;  %vm4691_vm2 = vmor %vm4611_vm14, %vm4675_vm8  ;;  %vm4997_vm10 = vcmp.eq.s32.totalorder %v18302_v19, %v10545_v54  ;;  %vm4933_vm8 = vcmp.eq.s32.totalorder %v4893_v27, %v10545_v54 }
 0x542   : > { %4653 = vperm.xlu1 %9348, %v18299_v30   ;;  %v5031_v43 = vpop.permute.xlu1 %5030  ;;  %v8258_v9 = vsel %vm4691_vm2, 1.0, %v17587_v17 }
 0x543   : > { %vm5075_vm15 = vcmp.eq.s32.totalorder %v5031_v43, %v10545_v54  ;;  %v5034_v43 = vpop.permute.xlu0 %5033 }
 0x544   : > { %vm5091_vm13 = vmor %vm14909_vm3, %vm5075_vm15  ;;  %vm5076_vm7 = vcmp.eq.s32.totalorder %v5034_v43, %v10545_v54  ;;  %v9741_v43 = vld [vmem:[#allocation2] sm:$0xff]  }
 0x545   : > { %v8281_v47 = vsel %vm5091_vm13, 1.0, %v17587_v17  ;;  %5761 = vperm.xlu0 %9447, %v18222_v21   ;;  %vm4612_vm3 = vmor %vm4532_vm1, %vm4596_vm0 }
 0x546   : > { %v5138_v48 = vpack.c.bf16 %v8281_v47, %v8280_v7  ;;  %9349 = vset.pattern.permute.xlu1 %v18098_v11  ;;  %vm5092_vm14 = vmor %vm5012_vm4, %vm5076_vm7 }
 0x547   : > { %4913 = vperm.xlu1 %9349, %v9740_v36   ;;  %v4636_v56 = vpop.permute.xlu1 %4635  ;;  %vm5013_vm15 = vmor %vm4933_vm8, %vm4997_vm10  ;;  %v8282_v27 = vsel %vm5092_vm14, 1.0, %v17587_v17 }
 0x548   : > { %vm4676_vm6 = vcmp.eq.s32.totalorder %v4636_v56, %v10545_v54  ;;  %9010 = vmatprep.mubr.msk.bf16.mxu1 %vm766_vm11, %v5138_v48 }
 0x549   : > { %vm4692_vm9 = vmor %vm4612_vm3, %vm4676_vm6  ;;  %5440 = vperm.xlu0 %9447, %v18191_v55  }
 0x54a   : > { %v8259_v59 = vsel %vm4692_vm9, 1.0, %v17587_v17 }
 0x54b   : > { %v4738_v36 = vpack.c.bf16 %v8259_v59, %v8258_v9  ;;  %9350 = vset.pattern.permute.xlu1 %v18176_v28  ;;  %v18304_v9 = vld [vmem:[#allocation28_spill] sm:$0xff] }
 0x54c   : > { %4977 = vperm.xlu1 %9350, %v18291_v8   ;;  %v5037_v20 = vpop.permute.xlu1 %5036 }
 0x54d   : > { %vm5077_vm0 = vcmp.eq.s32.totalorder %v5037_v20, %v10545_v54  ;;  %8983 = vmatmul.mubr.msk.bf16.vlgmr.msra.gmra.mrb[80].mxu0 %vm766_vm11, %v4738_v36  ;;  %5449 = vperm.xlu0 %9447, %v18280_v12  }
 0x54e   : > { %vm5093_vm13 = vmor %vm5013_vm15, %vm5077_vm0  ;;  %9027 = vmatpush3.bf16.msra.mxu0 %v14088_v10  ;;  %v9742_v10 = vld [vmem:[#allocation2 + $0x8] sm:$0xff]  }
 0x54f   : > { %v8283_v55 = vsel %vm5093_vm13, 1.0, %v17587_v17  ;;  %9028 = vmatprep.subr.bf16.mxu0 %v14108_v1 }
 0x550   : > { %v5139_v7 = vpack.c.bf16 %v8283_v55, %v8282_v27  ;;  %4980 = vperm.xlu1 %9350, %v18295_v35   ;;  %v18306_v27 = vmax.f32 %v14591_v34, %v14127_v62  ;;  %v18309_v62 = vmax.f32 %v14622_v13, %v14161_v3  ;;  %v18311_v3 = vmax.f32 %v14683_v24, %v14238_v58 }
 0x551   : > { %v14957_v47 = vpop.permute.xlu1 %4494  ;;  %5773 = vperm.xlu0 %9447, %v18282_v29   ;;  %v18314_v24 = vmax.f32 %v14732_v57, %v14295_v0  ;;  %v18316_v0 = vmax.f32 %v14782_v16, %v14336_v53  ;;  %v18319_v53 = vmax.f32 %v14800_v52, %v14359_v14 }
 0x552   : > { %9011 = vmatmul.mubr.msk.bf16.vlgmr.msra.gmra.mrb[80].mxu1 %vm766_vm11, %v5139_v7  ;;  %9029 = vmatpush3.bf16.msra.mxu0 %v14108_v1  ;;  %v18303_v1 = vld [vmem:[#allocation48_spill] sm:$0xff]  ;;  %vm4533_vm4 = vcmp.eq.s32.totalorder %v14957_v47, %v10545_v54 }
 0x553   : > { %9055 = vmatpush3.bf16.msra.mxu1 %v9741_v43  ;;  %9030 = vmatprep.subr.bf16.mxu0 %v14178_v42 }
 0x554   : > { %9351 = vset.pattern.permute.xlu1 %v18216_v4  ;;  %9056 = vmatprep.subr.bf16.mxu1 %v9742_v10 }
 0x555   : > { %5054 = vperm.xlu1 %9351, %v18299_v30   ;;  %5452 = vperm.xlu0 %9447, %v18286_v26  }
 0x556   : > { %v14965_v48 = vpop.permute.xlu1 %4558  ;;  %9031 = vmatpush3.bf16.msra.mxu0 %v14178_v42 }
 0x557   : > { %9057 = vmatpush3.bf16.msra.mxu1 %v9742_v10  ;;  %9032 = vmatprep.subr.bf16.mxu0 %v14241_v61  ;;  %v18307_v10 = vld [vmem:[#allocation49_spill] sm:$0xff]  ;;  %vm4597_vm3 = vcmp.eq.s32.totalorder %v14965_v48, %v10545_v54 }
 0x558   : > { %9058 = vmatprep.subr.bf16.mxu1 %v14178_v42  ;;  %vm4613_vm7 = vmor %vm4533_vm4, %vm4597_vm3 }
 0x559   : > { %9352 = vset.pattern.permute.xlu1 %v18176_v28  ;;  %5461 = vperm.xlu0 %9447, %v18289_v49  }
 0x55a   : > { %4656 = vperm.xlu1 %9352, %v18303_v1   ;;  %v14973_v56 = vpop.permute.xlu1 %4561  ;;  %9033 = vmatpush3.bf16.msra.mxu0 %v14241_v61 }
 0x55b   : > { %9059 = vmatpush3.bf16.msra.mxu1 %v14178_v42  ;;  %9034 = vmatprep.subr.bf16.mxu0 %v14304_v6  ;;  %v18305_v42 = vmax.f32 %v14579_v37, %v14105_v39  ;;  %vm4598_vm5 = vcmp.eq.s32.totalorder %v14973_v56, %v10545_v54  ;;  %v18318_v56 = vld [vmem:[#allocation60_spill] sm:$0xff] }
 0x55c   : > { %9060 = vmatprep.subr.bf16.mxu1 %v14241_v61  ;;  %vm4678_vm1 = vcmp.eq.s32.totalorder %v18318_v56, %v10545_v54  ;;  %v18331_v56 = vld [vmem:[#allocation75_spill] sm:$0xff] }
 0x55d   : > { %5785 = vperm.xlu0 %9447, %v18304_v9  }
 0x55e   : > { %9353 = vset.pattern.permute.xlu1 %v18216_v4  ;;  %v14981_v19 = vpop.permute.xlu1 %4898  ;;  %9035 = vmatpush3.bf16.msra.mxu0 %v14304_v6 }
 0x55f   : > { %5057 = vperm.xlu1 %9353, %v18303_v1   ;;  %9036 = vmatprep.subr.bf16.mxu0 %v14339_v38  ;;  %vm4935_vm0 = vcmp.eq.s32.totalorder %v14981_v19, %v10545_v54  ;;  %v18344_v19 = vld [vmem:[#allocation43_spill] sm:$0xff] }
 0x560   : > { %v8928_v59 = vpop.f32.mrb[64].mxu0  ;;  %9061 = vmatpush3.bf16.msra.mxu1 %v14241_v61  ;;  %v18308_v61 = vmax.f32 %v14610_v40, %v14141_v15  ;;  %v18310_v15 = vld [vmem:[#allocation41_spill] sm:$0xff] }
 0x561   : > { %v14991_v36 = vmax.f32 %v8928_v59, %v18305_v42  ;;  %v4001_v20 = vpop.f32.mrb[65].mxu0  ;;  %9062 = vmatprep.subr.bf16.mxu1 %v14304_v6  ;;  %5464 = vperm.xlu0 %9447, %v18307_v10   ;;  %v9743_v40 = vld [vmem:[%s10165_s26 + $0x68] sm:$0xff] }
 0x562   : > { %v14997_v55 = vmax.f32 %v4001_v20, %v18306_v27  ;;  %v8929_v7 = vpop.f32.mrb[66].mxu0  ;;  %9037 = vmatpush3.bf16.msra.mxu0 %v14339_v38  ;;  %v18312_v20 = vmax.f32 %v14703_v25, %v14260_v46  ;;  %v15051_v25 = vld [vmem:[%s10165_s26 + $0x20] sm:$0xff] }
 0x563   : > { %v15003_v50 = vmax.f32 %v8929_v7, %v18308_v61  ;;  %5060 = vperm.xlu1 %9353, %v18289_v49   ;;  %v15006_v39 = vpop.permute.xlu1 %4959  ;;  %v4004_v37 = vpop.f32.mrb[67].mxu0  ;;  %9082 = vmatprep.subr.bf16.mxu0 %v9741_v43  ;;  %v15033_v61 = vld [vmem:[%s10165_s26] sm:$0xff] }
 0x564   : > { %v15012_v34 = vmax.f32 %v4004_v37, %v18309_v62  ;;  %9063 = vmatpush3.bf16.msra.mxu1 %v14304_v6  ;;  %v9746_v62 = vld [vmem:[%s10165_s26 + $0x60] sm:$0xff]  ;;  %vm4998_vm14 = vcmp.eq.s32.totalorder %v15006_v39, %v10545_v54 }
 0x565   : > { %9064 = vmatprep.subr.bf16.mxu1 %v14339_v38  ;;  %5473 = vperm.xlu0 %9447, %v18310_v15   ;;  %v18343_v39 = vld [vmem:[#allocation31_spill] sm:$0xff] }
 0x567   : > { %9354 = vset.pattern.permute.xlu1 %v18007_v22 }
 0x568   : > { %4521 = vperm.xlu1 %9354, %v9743_v40   ;;  %v15019_v59 = vpop.permute.xlu1 %4500  ;;  %v8932_v42 = vpop.f32.mrb[68].mxu0  ;;  %9065 = vmatpush3.bf16.msra.mxu1 %v14339_v38  ;;  %v18313_v38 = vmax.f32 %v14721_v44, %v14274_v5  ;;  %v18315_v5 = vld [vmem:[#allocation95_spill] sm:$0xff] }
 0x569   : > { %v15025_v13 = vmax.f32 %v8932_v42, %v18311_v3  ;;  %v4017_v6 = vpop.f32.mrb[69].mxu0  ;;  %9110 = vmatprep.subr.bf16.mxu1 %v9741_v43  ;;  %6086 = vperm.xlu0 %9447, %v15033_v61   ;;  %vm4534_vm12 = vcmp.eq.s32.totalorder %v18315_v5, %v10545_v54 }
 0x56a   : > { %v15030_v27 = vmax.f32 %v4017_v6, %v18312_v20  ;;  %v8933_v7 = vpop.f32.mrb[70].mxu0  ;;  %v18317_v6 = vmax.f32 %v14787_v41, %v14352_v60  ;;  %vm4614_vm2 = vmor %vm4534_vm12, %vm4598_vm5  ;;  %v18320_v60 = vmax.f32 %v14804_v63, %v14370_v51  ;;  %v18321_v51 = vld [vmem:[#allocation55_spill] sm:$0xff] }
 0x56b   : > { %v15039_v37 = vmax.f32 %v8933_v7, %v18313_v38  ;;  %v4020_v58 = vpop.f32.mrb[71].mxu0  ;;  %vm4694_vm6 = vmor %vm4614_vm2, %vm4678_vm1  ;;  %v18322_v63 = vmax.f32 %v14819_v31, %v18321_v51  ;;  %v9747_v51 = vld [vmem:[%s10165_s26 + $0x70] sm:$0xff] }
 0x56c   : > { %v15044_v43 = vmax.f32 %v4020_v58, %v18314_v24  ;;  %9355 = vset.pattern.permute.xlu1 %v18098_v11  ;;  %v15047_v46 = vpop.permute.xlu1 %4503  ;;  %v8261_v52 = vsel %vm4694_vm6, 1.0, %v17587_v17  ;;  %v18325_v24 = vld [vmem:[#allocation83_spill] sm:$0xff] }
 0x56d   : > { %4582 = vperm.xlu1 %9355, %v18304_v9   ;;  %6098 = vperm.xlu0 %9447, %v15051_v25   ;;  %vm4536_vm3 = vcmp.eq.s32.totalorder %v15047_v46, %v10545_v54 }
 0x570   : > { %v8936_v44 = vpop.f32.mrb[72].mxu0 }
 0x571   : > { %v15061_v57 = vmax.f32 %v8936_v44, %v18316_v0  ;;  %4919 = vperm.xlu1 %9355, %v9746_v62   ;;  %v4568_v42 = vpop.permute.xlu1 %4567  ;;  %v4033_v3 = vpop.f32.mrb[73].mxu0  ;;  %6107 = vperm.xlu0 %9447, %v14450_v45   ;;  %v18328_v0 = vld [vmem:[#allocation29_spill] sm:$0xff] }
 0x572   : > { %v15067_v20 = vmax.f32 %v4033_v3, %v18317_v6  ;;  %v8937_v7 = vpop.f32.mrb[74].mxu0  ;;  %v18329_v6 = vld [vmem:[#allocation85_spill] sm:$0xff]  ;;  %vm4600_vm5 = vcmp.eq.s32.totalorder %v4568_v42, %v10545_v54  ;;  %v18345_v42 = vld [vmem:[#allocation84_spill] sm:$0xff] }
 0x573   : > { %v15075_v16 = vmax.f32 %v8937_v7, %v18319_v53  ;;  %v4036_v38 = vpop.f32.mrb[75].mxu0  ;;  %v18330_v7 = vld [vmem:[#allocation53_spill] sm:$0xff]  ;;  %vm4616_vm4 = vmor %vm4536_vm3, %vm4600_vm5 }
 0x574   : > { %v15082_v41 = vmax.f32 %v4036_v38, %v18320_v60  ;;  %v18332_v31 = vmax.f32 %v18330_v7, %v18331_v56  ;;  %v18346_v56 = vld [vmem:[#allocation39_spill] sm:$0xff] }
 0x575   : > { %4922 = vperm.xlu1 %9355, %v9743_v40   ;;  %6110 = vperm.xlu0 %9447, %v14864_v2   ;;  %v18324_v2 = vld [vmem:[#allocation64_spill] sm:$0xff] }
 0x576   : > { %v4639_v45 = vpop.permute.xlu1 %4638  ;;  %v18326_v5 = vmax.f32 %v18324_v2, %v18325_v24  ;;  %v18339_v2 = vld [vmem:[#allocation67_spill] sm:$0xff]  ;;  %v5040_v24 = vpop.permute.xlu0 %5039 }
 0x577   : > { %vm4677_vm9 = vcmp.eq.s32.totalorder %v4639_v45, %v10545_v54  ;;  %v18334_v45 = vld [vmem:[#allocation45_spill] sm:$0xff]  ;;  %vm4934_vm8 = vcmp.eq.s32.totalorder %v18339_v2, %v10545_v54  ;;  %vm5078_vm12 = vcmp.eq.s32.totalorder %v5040_v24, %v10545_v54 }
 0x578   : > { %vm4693_vm10 = vmor %vm4613_vm7, %vm4677_vm9  ;;  %v8940_v14 = vpop.f32.mrb[76].mxu0  ;;  %vm4680_vm7 = vcmp.eq.s32.totalorder %v18344_v19, %v10545_v54  ;;  %v9748_v24 = vld [vmem:[%s10165_s26 + $0x8] sm:$0xff] }
 0x579   : > { %v8260_v48 = vsel %vm4693_vm10, 1.0, %v17587_v17  ;;  %v15093_v40 = vmax.f32 %v8940_v14, %v18322_v63  ;;  %9356 = vset.pattern.permute.xlu1 %v18176_v28  ;;  %v4049_v47 = vpop.f32.mrb[77].mxu0  ;;  %6119 = vperm.xlu0 %9447, %v18329_v6   ;;  %v18335_v14 = vld [vmem:[#allocation59_spill] sm:$0xff]  ;;  %vm5014_vm13 = vmor %vm4934_vm8, %vm4998_vm14  ;;  %vm4599_vm10 = vcmp.eq.s32.totalorder %v18345_v42, %v10545_v54  ;;  %vm4535_vm8 = vcmp.eq.s32.totalorder %v15019_v59, %v10545_v54 }
 0x57a   : > { %v4739_v58 = vpack.c.bf16 %v8261_v52, %v8260_v48  ;;  %v15099_v44 = vmax.f32 %v4049_v47, %v18326_v5  ;;  %4986 = vperm.xlu1 %9356, %v18328_v0   ;;  %v8941_v3 = vpop.f32.mrb[78].mxu0  ;;  %v18336_v52 = vmax.f32 %v18334_v45, %v18335_v14  ;;  %v18338_v47 = vld [vmem:[#allocation69_spill] sm:$0xff]  ;;  %v18340_v5 = vld [vmem:[#allocation30_spill] sm:$0xff]  ;;  %vm5094_vm2 = vmor %vm5014_vm13, %vm5078_vm12  ;;  %v15152_v14 = vpop.permute.xlu0 %5051 }
 0x57b   : > { %18323 = vst [vmem:[#allocation54_spill] sm:$0xff] %v15093_v40  ;;  %v15106_v53 = vmax.f32 %v8941_v3, %v18332_v31  ;;  %v4902_v38 = vpop.permute.xlu1 %4901  ;;  %v4052_v60 = vpop.f32.mrb[79].mxu0  ;;  %v8284_v6 = vsel %vm5094_vm2, 1.0, %v17587_v17  ;;  %vm4696_vm14 = vmor %vm4616_vm4, %vm4680_vm7 }
 0x57c   : > { %18327 = vst [vmem:[#allocation90_spill] sm:$0xff] %v15099_v44  ;;  %v15111_v48 = vmax.f32 %v4052_v60, %v18336_v52  ;;  %8986 = vmatprep.mubr.msk.bf16.mxu0 %vm766_vm11, %v4739_v58  ;;  %v18347_v60 = vld [vmem:[#allocation17_spill] sm:$0xff]  ;;  %v8263_v59 = vsel %vm4696_vm14, 1.0, %v17587_v17  ;;  %vm4936_vm5 = vcmp.eq.s32.totalorder %v4902_v38, %v10545_v54 }
 0x57d   : > { %18333 = vst [vmem:[#allocation57_spill] sm:$0xff] %v15106_v53  ;;  %6122 = vperm.xlu0 %9447, %v9746_v62   ;;  %v18342_v62 = vmov 15   ;;  %v18378_v53 = vld [vmem:[#allocation98_spill] sm:$0xff] }
 0x57e   : > { %18337 = vst [vmem:[#allocation91_spill] sm:$0xff] %v15111_v48  ;;  %9357 = vset.pattern.permute.xlu1 %v18007_v22  ;;  %v18341_v22 = vld [vmem:[#allocation86_spill] sm:$0xff] }
 0x57f   : > { %4524 = vperm.xlu1 %9357, %v9747_v51   ;;  %v4905_v63 = vpop.permute.xlu1 %4904  ;;  %vm4999_vm15 = vcmp.eq.s32.totalorder %v18341_v22, %v10545_v54  ;;  %v15161_v22 = vpop.permute.xlu0 %5063 }
 0x580   : > { %vm5015_vm1 = vmor %vm4935_vm0, %vm4999_vm15  ;;  %vm4937_vm4 = vcmp.eq.s32.totalorder %v4905_v63, %v10545_v54 }
 0x581   : > { %6131 = vperm.xlu0 %9447, %v18338_v47   ;;  %vm4615_vm15 = vmor %vm4535_vm8, %vm4599_vm10  ;;  %v18348_v47 = vld [vmem:[#allocation44_spill] sm:$0xff] }
 0x582   : > { %vm5000_vm12 = vcmp.eq.s32.totalorder %v18348_v47, %v10545_v54 }
 0x583   : > { %9359 = vset.pattern.permute.xlu1 %v18098_v11  ;;  %vm5016_vm3 = vmor %vm4936_vm5, %vm5000_vm12  ;;  %v15171_v63 = vpop.permute.xlu0 %5348 }
 0x584   : > { %4588 = vperm.xlu1 %9359, %v18340_v5   ;;  %v4969_v58 = vpop.permute.xlu1 %4968 }
 0x585   : > { %9453 = vset.pattern.permute.xlu0 %v18342_v62  ;;  %vm5001_vm2 = vcmp.eq.s32.totalorder %v4969_v58, %v10545_v54 }
 0x586   : > { %5853 = vperm.xlu0 %9453, %v18286_v26   ;;  %vm5017_vm7 = vmor %vm4937_vm4, %vm5001_vm2 }
 0x588   : > { %4591 = vperm.xlu1 %9359, %v18343_v39  }
 0x589   : > { %v5043_v3 = vpop.permute.xlu1 %5042 }
 0x58a   : > { %vm5079_vm6 = vcmp.eq.s32.totalorder %v5043_v3, %v10545_v54  ;;  %5865 = vperm.xlu0 %9453, %v18307_v10   ;;  %v18349_v3 = vld [vmem:[#allocation21_spill] sm:$0xff] }
 0x58b   : > { %vm5095_vm9 = vmor %vm5015_vm1, %vm5079_vm6 }
 0x58c   : > { %v8285_v46 = vsel %vm5095_vm9, 1.0, %v17587_v17  ;;  %9360 = vset.pattern.permute.xlu1 %v18176_v28 }
 0x58d   : > { %v5140_v7 = vpack.c.bf16 %v8285_v46, %v8284_v6  ;;  %4665 = vperm.xlu1 %9360, %v18346_v56   ;;  %v15178_v6 = vpop.permute.xlu0 %5688  ;;  %v18350_v46 = vld [vmem:[#allocation25_spill] sm:$0xff] }
 0x58e   : > { %v4645_v31 = vpop.permute.xlu1 %4644  ;;  %6150 = vperm.xlu0 %9453, %v18347_v60  }
 0x58f   : > { %vm4679_vm0 = vcmp.eq.s32.totalorder %v4645_v31, %v10545_v54  ;;  %9014 = vmatprep.mubr.msk.bf16.mxu1 %vm766_vm11, %v5140_v7  ;;  %v18351_v7 = vld [vmem:[#allocation50_spill] sm:$0xff] }
 0x590   : > { %vm4695_vm13 = vmor %vm4615_vm15, %vm4679_vm0 }
 0x591   : > { %v8262_v45 = vsel %vm4695_vm13, 1.0, %v17587_v17  ;;  %9361 = vset.pattern.permute.xlu1 %v18098_v11 }
 0x592   : > { %v4740_v52 = vpack.c.bf16 %v8263_v59, %v8262_v45  ;;  %4925 = vperm.xlu1 %9361, %v9747_v51   ;;  %6495 = vperm.xlu0 %9453, %v9748_v24   ;;  %v15185_v59 = vpop.permute.xlu0 %5354  ;;  %v9750_v45 = vld [vmem:[%s10165_s26 + $0x58] sm:$0xff] }
 0x593   : > { %v5046_v2 = vpop.permute.xlu1 %5045 }
 0x594   : > { %vm5080_vm1 = vcmp.eq.s32.totalorder %v5046_v2, %v10545_v54  ;;  %8987 = vmatmul.mubr.msk.bf16.gmra.mrb[84].mxu0 %vm766_vm11, %v4740_v52 }
 0x595   : > { %vm5096_vm6 = vmor %vm5016_vm3, %vm5080_vm1 }
 0x596   : > { %9362 = vset.pattern.permute.xlu1 %v18176_v28  ;;  %6156 = vperm.xlu0 %9453, %v18186_v23   ;;  %v8286_v38 = vsel %vm5096_vm6, 1.0, %v17587_v17  ;;  %v9749_v23 = vld [vmem:[%s10165_s26 + $0x38] sm:$0xff]  ;;  %v15193_v47 = vpop.permute.xlu0 %5363 }
 0x597   : > { %4989 = vperm.xlu1 %9362, %v18340_v5   ;;  %v5049_v11 = vpop.permute.xlu1 %5048  ;;  %18352 = vst [vmem:[#allocation79_spill] sm:$0xff] %v15193_v47  ;;  %v18366_v5 = vld [vmem:[#allocation97_spill] sm:$0xff] }
 0x598   : > { %vm5081_vm9 = vcmp.eq.s32.totalorder %v5049_v11, %v10545_v54  ;;  %v9751_v11 = vld [vmem:[%s10165_s26 + $0x78] sm:$0xff] }
 0x599   : > { %vm5097_vm10 = vmor %vm5017_vm7, %vm5081_vm9  ;;  %vm5082_vm9 = vcmp.eq.s32.totalorder %v15152_v14, %v10545_v54 }
 0x59a   : > { %v8287_v51 = vsel %vm5097_vm10, 1.0, %v17587_v17  ;;  %6165 = vperm.xlu0 %9453, %v18349_v3  }
 0x59b   : > { %v5141_v58 = vpack.c.bf16 %v8287_v51, %v8286_v38  ;;  %4992 = vperm.xlu1 %9362, %v18343_v39   ;;  %v15202_v51 = vpop.permute.xlu0 %5706 }
 0x59c   : > { %v4510_v19 = vpop.permute.xlu1 %4509  ;;  %18353 = vst [vmem:[#allocation92_spill] sm:$0xff] %v15202_v51 }
 0x59d   : > { %9015 = vmatmul.mubr.msk.bf16.gmra.mrb[84].mxu1 %vm766_vm11, %v5141_v58  ;;  %v18354_v58 = vmov 17   ;;  %vm4538_vm12 = vcmp.eq.s32.totalorder %v4510_v19, %v10545_v54 }
 0x59e   : > { %6513 = vperm.xlu0 %9453, %v9749_v23   ;;  %v18355_v23 = vld [vmem:[#allocation16_spill] sm:$0xff] }
 0x59f   : > { %9363 = vset.pattern.permute.xlu1 %v18216_v4 }
 0x5a0   : > { %5066 = vperm.xlu1 %9363, %v18346_v56   ;;  %v18364_v56 = vld [vmem:[#allocation74_spill] sm:$0xff] }
 0x5a1   : > { %v4571_v42 = vpop.permute.xlu1 %4570  ;;  %vm5002_vm4 = vcmp.eq.s32.totalorder %v18364_v56, %v10545_v54  ;;  %v18367_v56 = vld [vmem:[#allocation32_spill] sm:$0xff] }
 0x5a2   : > { %6177 = vperm.xlu0 %9453, %v18350_v46   ;;  %vm4601_vm14 = vcmp.eq.s32.totalorder %v4571_v42, %v10545_v54  ;;  %v18362_v42 = vmov 14  }
 0x5a4   : > { %9364 = vset.pattern.permute.xlu1 %v18176_v28 }
 0x5a5   : > { %4668 = vperm.xlu1 %9364, %v18351_v7   ;;  %v15183_v31 = vpop.permute.xlu1 %4907 }
 0x5a6   : > { %6525 = vperm.xlu0 %9453, %v9750_v45   ;;  %vm4938_vm6 = vcmp.eq.s32.totalorder %v15183_v31, %v10545_v54 }
 0x5a7   : > { %vm5018_vm7 = vmor %vm4938_vm6, %vm5002_vm4 }
 0x5a9   : > { %9365 = vset.pattern.permute.xlu1 %v18216_v4  ;;  %v15189_v52 = vpop.permute.xlu1 %4910 }
 0x5aa   : > { %5069 = vperm.xlu1 %9365, %v18351_v7   ;;  %6189 = vperm.xlu0 %9453, %v18328_v0   ;;  %v18358_v7 = vmov 16  }
 0x5ae   : > { %5072 = vperm.xlu1 %9365, %v18310_v15   ;;  %v15196_v2 = vpop.permute.xlu1 %4974  ;;  %6537 = vperm.xlu0 %9453, %v9751_v11   ;;  %v15211_v11 = vpop.permute.xlu0 %5375 }
 0x5af   : > { %18356 = vst [vmem:[#allocation51_spill] sm:$0xff] %v15211_v11  ;;  %vm5003_vm10 = vcmp.eq.s32.totalorder %v15196_v2, %v10545_v54 }
 0x5b2   : > { %9366 = vset.pattern.permute.xlu1 %v18176_v28  ;;  %9457 = vset.pattern.permute.xlu0 %v18354_v58 }
 0x5b3   : > { %5287 = vperm.xlu1 %9366, %v9748_v24   ;;  %v15200_v38 = vpop.permute.xlu1 %4512  ;;  %6660 = vperm.xlu0 %9457, %v18286_v26   ;;  %v18357_v24 = vld [vmem:[#allocation96_spill] sm:$0xff]  ;;  %v18359_v26 = vld [vmem:[#allocation87_spill] sm:$0xff] }
 0x5b4   : > { %vm4537_vm8 = vcmp.eq.s32.totalorder %v18357_v24, %v10545_v54  ;;  %vm4681_vm15 = vcmp.eq.s32.totalorder %v18359_v26, %v10545_v54  ;;  %v15224_v24 = vpop.permute.xlu0 %5718  ;;  %vm4539_vm4 = vcmp.eq.s32.totalorder %v15200_v38, %v10545_v54 }
 0x5b5   : > { %vm4617_vm0 = vmor %vm4537_vm8, %vm4601_vm14  ;;  %18361 = vst [vmem:[#allocation93_spill] sm:$0xff] %v15224_v24  ;;  %vm4540_vm8 = vcmp.eq.s32.totalorder %v18366_v5, %v10545_v54 }
 0x5b6   : > { %vm4697_vm5 = vmor %vm4617_vm0, %vm4681_vm15  ;;  %vm4939_vm0 = vcmp.eq.s32.totalorder %v15189_v52, %v10545_v54 }
 0x5b7   : > { %9367 = vset.pattern.permute.xlu1 %v18216_v4  ;;  %6672 = vperm.xlu0 %9457, %v18307_v10   ;;  %v8264_v26 = vsel %vm4697_vm5, 1.0, %v17587_v17  ;;  %vm5098_vm15 = vmor %vm5018_vm7, %vm5082_vm9 }
 0x5b8   : > { %5351 = vperm.xlu1 %9367, %v18355_v23   ;;  %v15208_v45 = vpop.permute.xlu1 %4576  ;;  %v18360_v23 = vld [vmem:[#allocation70_spill] sm:$0xff]  ;;  %v15233_v24 = vpop.permute.xlu0 %5387  ;;  %v8288_v14 = vsel %vm5098_vm15, 1.0, %v17587_v17 }
 0x5b9   : > { %vm4602_vm13 = vcmp.eq.s32.totalorder %v18360_v23, %v10545_v54  ;;  %18363 = vst [vmem:[#allocation36_spill] sm:$0xff] %v15233_v24 }
 0x5ba   : > { %vm4618_vm1 = vmor %vm4538_vm12, %vm4602_vm13 }
 0x5bb   : > { %9459 = vset.pattern.permute.xlu0 %v18358_v7  ;;  %vm5019_vm13 = vmor %vm4939_vm0, %vm5003_vm10 }
 0x5bc   : > { %5685 = vperm.xlu1 %9367, %v15033_v61   ;;  %v4580_v32 = vpop.permute.xlu1 %4579  ;;  %6592 = vperm.xlu0 %9459, %v18304_v9  }
 0x5bd   : > { %vm4604_vm14 = vcmp.eq.s32.totalorder %v4580_v32, %v10545_v54  ;;  %v18368_v32 = vld [vmem:[#allocation80_spill] sm:$0xff] }
 0x5be   : > { %vm4620_vm12 = vmor %vm4540_vm8, %vm4604_vm14 }
 0x5c0   : > { %9368 = vset.pattern.permute.xlu1 %v18362_v42  ;;  %6266 = vperm.xlu0 %9459, %v18307_v10  }
 0x5c1   : > { %5749 = vperm.xlu1 %9368, %v18347_v60   ;;  %v4654_v61 = vpop.permute.xlu1 %4653  ;;  %v9752_v60 = vld [vmem:[%s10165_s26 + $0x10] sm:$0xff] }
 0x5c2   : > { %vm4682_vm2 = vcmp.eq.s32.totalorder %v4654_v61, %v10545_v54 }
 0x5c3   : > { %vm4698_vm3 = vmor %vm4618_vm1, %vm4682_vm2  ;;  %vm4684_vm1 = vcmp.eq.s32.totalorder %v18368_v32, %v10545_v54 }
 0x5c4   : > { %v8265_v23 = vsel %vm4698_vm3, 1.0, %v17587_v17  ;;  %6275 = vperm.xlu0 %9459, %v18310_v15   ;;  %v9753_v15 = vld [vmem:[%s10165_s26 + $0x18] sm:$0xff]  ;;  %vm4603_vm3 = vcmp.eq.s32.totalorder %v15208_v45, %v10545_v54  ;;  %vm4700_vm6 = vmor %vm4620_vm12, %vm4684_vm1 }
 0x5c5   : > { %v4741_v19 = vpack.c.bf16 %v8265_v23, %v8264_v26  ;;  %9369 = vset.pattern.permute.xlu1 %v18176_v28  ;;  %v18365_v26 = vld [vmem:[#allocation19_spill] sm:$0xff]  ;;  %vm4619_vm7 = vmor %vm4539_vm4, %vm4603_vm3  ;;  %v8267_v32 = vsel %vm4700_vm6, 1.0, %v17587_v17  ;;  %vm4541_vm4 = vcmp.eq.s32.totalorder %v18378_v53, %v10545_v54 }
 0x5c6   : > { %5290 = vperm.xlu1 %9369, %v9752_v60   ;;  %v15237_v7 = vpop.permute.xlu1 %4913 }
 0x5c7   : > { %v15239_v10 = vpop.f32.mrb[64].mxu1  ;;  %8990 = vmatprep.mubr.msk.bf16.mxu0 %vm766_vm11, %v4741_v19  ;;  %vm4940_vm0 = vcmp.eq.s32.totalorder %v15237_v7, %v10545_v54 }
 0x5c8   : > { %v15244_v11 = vpop.f32.mrb[65].mxu1  ;;  %9463 = vset.pattern.permute.xlu0 %v18354_v58 }
 0x5c9   : > { %v15248_v23 = vpop.f32.mrb[66].mxu1 }
 0x5ca   : > { %5293 = vperm.xlu1 %9369, %v9753_v15   ;;  %v15254_v51 = vpop.f32.mrb[67].mxu1 }
 0x5cb   : > { %v15258_v61 = vpop.permute.xlu1 %4977 }
 0x5cc   : > { %vm5004_vm8 = vcmp.eq.s32.totalorder %v15258_v61, %v10545_v54 }
 0x5cd   : > { %vm5020_vm12 = vmor %vm4940_vm0, %vm5004_vm8 }
 0x5ce   : > { %9370 = vset.pattern.permute.xlu1 %v18216_v4 }
 0x5cf   : > { %5357 = vperm.xlu1 %9370, %v18365_v26   ;;  %v15266_v24 = vpop.permute.xlu1 %4980  ;;  %v15268_v58 = vpop.f32.mrb[68].mxu1 }
 0x5d0   : > { %v15274_v39 = vpop.f32.mrb[69].mxu1 }
 0x5d1   : > { %v15280_v31 = vpop.f32.mrb[70].mxu1 }
 0x5d2   : > { %v15287_v0 = vpop.f32.mrb[71].mxu1 }
 0x5d3   : > { %9371 = vset.pattern.permute.xlu1 %v18362_v42 }
 0x5d4   : > { %5428 = vperm.xlu1 %9371, %v18367_v56   ;;  %v5055_v5 = vpop.permute.xlu1 %5054 }
 0x5d5   : > { %vm5083_vm5 = vcmp.eq.s32.totalorder %v5055_v5, %v10545_v54 }
 0x5d6   : > { %vm5099_vm2 = vmor %vm5019_vm13, %vm5083_vm5  ;;  %vm5005_vm13 = vcmp.eq.s32.totalorder %v15266_v24, %v10545_v54 }
 0x5d7   : > { %v8289_v52 = vsel %vm5099_vm2, 1.0, %v17587_v17  ;;  %v15302_v2 = vpop.f32.mrb[72].mxu1 }
 0x5d8   : > { %v5142_v19 = vpack.c.bf16 %v8289_v52, %v8288_v14  ;;  %9372 = vset.pattern.permute.xlu1 %v18216_v4  ;;  %v15307_v5 = vpop.f32.mrb[73].mxu1 }
 0x5d9   : > { %5691 = vperm.xlu1 %9372, %v9752_v60   ;;  %v4657_v45 = vpop.permute.xlu1 %4656  ;;  %v15313_v47 = vpop.f32.mrb[74].mxu1 }
 0x5da   : > { %vm4683_vm9 = vcmp.eq.s32.totalorder %v4657_v45, %v10545_v54  ;;  %v15318_v52 = vpop.f32.mrb[75].mxu1  ;;  %9018 = vmatprep.mubr.msk.bf16.mxu1 %vm766_vm11, %v5142_v19  ;;  %v18370_v19 = vld [vmem:[#allocation78_spill] sm:$0xff] }
 0x5db   : > { %vm4699_vm10 = vmor %vm4619_vm7, %vm4683_vm9  ;;  %vm4941_vm15 = vcmp.eq.s32.totalorder %v18370_v19, %v10545_v54 }
 0x5dc   : > { %v8266_v60 = vsel %vm4699_vm10, 1.0, %v17587_v17  ;;  %vm5021_vm1 = vmor %vm4941_vm15, %vm5005_vm13 }
 0x5dd   : > { %v4742_v56 = vpack.c.bf16 %v8267_v32, %v8266_v60  ;;  %5694 = vperm.xlu1 %9372, %v9753_v15  }
 0x5de   : > { %v5058_v45 = vpop.permute.xlu1 %5057 }
 0x5df   : > { %vm5084_vm14 = vcmp.eq.s32.totalorder %v5058_v45, %v10545_v54  ;;  %v15328_v14 = vpop.f32.mrb[76].mxu1  ;;  %8991 = vmatmul.mubr.msk.bf16.gmra.mrb[88].mxu0 %vm766_vm11, %v4742_v56 }
 0x5e0   : > { %18369 = vst [vmem:[#allocation24_spill] sm:$0xff] %v15328_v14  ;;  %v15339_v61 = vpop.f32.mrb[77].mxu1  ;;  %vm5100_vm5 = vmor %vm5020_vm12, %vm5084_vm14 }
 0x5e1   : > { %18371 = vst [vmem:[#allocation94_spill] sm:$0xff] %v15339_v61  ;;  %9373 = vset.pattern.permute.xlu1 %v18362_v42  ;;  %v15344_v56 = vpop.f32.mrb[78].mxu1  ;;  %v8290_v19 = vsel %vm5100_vm5, 1.0, %v17587_v17 }
 0x5e2   : > { %18372 = vst [vmem:[#allocation47_spill] sm:$0xff] %v15344_v56  ;;  %5758 = vperm.xlu1 %9373, %v18365_v26   ;;  %v5061_v24 = vpop.permute.xlu1 %5060  ;;  %v15349_v60 = vpop.f32.mrb[79].mxu1  ;;  %v18379_v56 = vld [vmem:[#allocation73_spill] sm:$0xff] }
 0x5e3   : > { %18373 = vst [vmem:[#allocation26_spill] sm:$0xff] %v15349_v60  ;;  %vm5085_vm2 = vcmp.eq.s32.totalorder %v5061_v24, %v10545_v54  ;;  %v18374_v24 = vld [vmem:[#allocation33_spill] sm:$0xff]  ;;  %vm4685_vm7 = vcmp.eq.s32.totalorder %v18379_v56, %v10545_v54 }
 0x5e4   : > { %vm5101_vm3 = vmor %vm5021_vm1, %vm5085_vm2  ;;  %vm5086_vm1 = vcmp.eq.s32.totalorder %v15161_v22, %v10545_v54 }
 0x5e5   : > { %v8291_v32 = vsel %vm5101_vm3, 1.0, %v17587_v17 }
 0x5e6   : > { %v5143_v15 = vpack.c.bf16 %v8291_v32, %v8290_v19  ;;  %9375 = vset.pattern.permute.xlu1 %v18342_v62  ;;  %v15365_v19 = vpop.permute.xlu0 %5730 }
 0x5e7   : > { %5832 = vperm.xlu1 %9375, %v18203_v33   ;;  %v4522_v7 = vpop.permute.xlu1 %4521  ;;  %18375 = vst [vmem:[#allocation58_spill] sm:$0xff] %v15365_v19  ;;  %v9754_v33 = vld [vmem:[%s10165_s26 + $0x28] sm:$0xff] }
 0x5e8   : > { %9019 = vmatmul.mubr.msk.bf16.gmra.mrb[88].mxu1 %vm766_vm11, %v5143_v15  ;;  %vm4542_vm8 = vcmp.eq.s32.totalorder %v4522_v7, %v10545_v54  ;;  %v15398_v7 = vld [vmem:[%s10165_s26 + $0x30] sm:$0xff] }
 0x5ea   : > { %v15372_v60 = vpop.permute.xlu0 %6636 }
 0x5eb   : > { %9376 = vset.pattern.permute.xlu1 %v18362_v42  ;;  %18376 = vst [vmem:[#allocation71_spill] sm:$0xff] %v15372_v60 }
 0x5ec   : > { %5434 = vperm.xlu1 %9376, %v18374_v24   ;;  %v4583_v38 = vpop.permute.xlu1 %4582 }
 0x5ed   : > { %vm4605_vm6 = vcmp.eq.s32.totalorder %v4583_v38, %v10545_v54 }
 0x5ee   : > { %vm4621_vm9 = vmor %vm4541_vm4, %vm4605_vm6 }
 0x5ef   : > { %vm4701_vm14 = vmor %vm4621_vm9, %vm4685_vm7 }
 0x5f0   : > { %9377 = vset.pattern.permute.xlu1 %v18342_v62  ;;  %v4920_v45 = vpop.permute.xlu1 %4919 }
 0x5f1   : > { %5835 = vperm.xlu1 %9377, %v18374_v24   ;;  %vm4942_vm5 = vcmp.eq.s32.totalorder %v4920_v45, %v10545_v54  ;;  %v18389_v45 = vld [vmem:[#allocation35_spill] sm:$0xff] }
 0x5f4   : > { %v4923_v48 = vpop.permute.xlu1 %4922 }
 0x5f5   : > { %5838 = vperm.xlu1 %9377, %v18213_v18   ;;  %v15377_v18 = vpop.permute.xlu0 %6648  ;;  %vm4943_vm9 = vcmp.eq.s32.totalorder %v4923_v48, %v10545_v54  ;;  %v18393_v48 = vmax.f32 %v15239_v10, %v14991_v36  ;;  %v18396_v36 = vmax.f32 %v15248_v23, %v15003_v50  ;;  %v15534_v23 = vld [vmem:[%s10165_s26 + $0x40] sm:$0xff] }
 0x5f6   : > { %18377 = vst [vmem:[#allocation27_spill] sm:$0xff] %v15377_v18 }
 0x5f9   : > { %9378 = vset.pattern.permute.xlu1 %v18176_v28  ;;  %v4987_v32 = vpop.permute.xlu1 %4986 }
 0x5fa   : > { %5299 = vperm.xlu1 %9378, %v9754_v33   ;;  %vm5007_vm3 = vcmp.eq.s32.totalorder %v4987_v32, %v10545_v54 }
 0x5fe   : > { %9379 = vset.pattern.permute.xlu1 %v18216_v4  ;;  %v15369_v15 = vpop.permute.xlu1 %4524 }
 0x5ff   : > { %5360 = vperm.xlu1 %9379, %v18222_v21   ;;  %v18380_v21 = vld [vmem:[#allocation65_spill] sm:$0xff] }
 0x600   : > { %vm4606_vm10 = vcmp.eq.s32.totalorder %v18380_v21, %v10545_v54 }
 0x601   : > { %vm4622_vm15 = vmor %vm4542_vm8, %vm4606_vm10 }
 0x602   : > { %vm5023_vm10 = vmor %vm4943_vm9, %vm5007_vm3 }
 0x603   : > { %5697 = vperm.xlu1 %9379, %v15051_v25   ;;  %v15375_v24 = vpop.permute.xlu1 %4588  ;;  %v15388_v25 = vpop.permute.xlu0 %6559 }
 0x604   : > { %18381 = vst [vmem:[#allocation37_spill] sm:$0xff] %v15388_v25 }
 0x607   : > { %5700 = vperm.xlu1 %9379, %v9754_v33   ;;  %v4592_v19 = vpop.permute.xlu1 %4591  ;;  %v8268_v33 = vsel %vm4701_vm14, 1.0, %v17587_v17  ;;  %v15395_v21 = vpop.permute.xlu0 %6233 }
 0x608   : > { %18382 = vst [vmem:[#allocation18_spill] sm:$0xff] %v15395_v21  ;;  %vm4608_vm6 = vcmp.eq.s32.totalorder %v4592_v19, %v10545_v54  ;;  %v18392_v19 = vld [vmem:[#allocation81_spill] sm:$0xff] }
 0x60b   : > { %9380 = vset.pattern.permute.xlu1 %v18362_v42  ;;  %v15408_v25 = vpop.permute.xlu0 %6562 }
 0x60c   : > { %5764 = vperm.xlu1 %9380, %v18349_v3   ;;  %v4666_v53 = vpop.permute.xlu1 %4665  ;;  %18384 = vst [vmem:[#allocation77_spill] sm:$0xff] %v15408_v25 }
 0x60d   : > { %vm4686_vm0 = vcmp.eq.s32.totalorder %v4666_v53, %v10545_v54  ;;  %v18383_v53 = vld [vmem:[#allocation22_spill] sm:$0xff] }
 0x60e   : > { %vm4702_vm13 = vmor %vm4622_vm15, %vm4686_vm0  ;;  %vm4688_vm15 = vcmp.eq.s32.totalorder %v18392_v19, %v10545_v54 }
 0x60f   : > { %v8269_v38 = vsel %vm4702_vm13, 1.0, %v17587_v17  ;;  %v15422_v25 = vpop.permute.xlu0 %6239  ;;  %vm4607_vm13 = vcmp.eq.s32.totalorder %v15375_v24, %v10545_v54 }
 0x610   : > { %v4743_v56 = vpack.c.bf16 %v8269_v38, %v8268_v33  ;;  %9381 = vset.pattern.permute.xlu1 %v18176_v28  ;;  %v18385_v33 = vld [vmem:[#allocation40_spill] sm:$0xff]  ;;  %v18386_v38 = vld [vmem:[#allocation23_spill] sm:$0xff]  ;;  %18388 = vst [vmem:[#allocation56_spill] sm:$0xff] %v15422_v25 }
 0x611   : > { %5302 = vperm.xlu1 %9381, %v15398_v7   ;;  %v15401_v18 = vpop.permute.xlu1 %4925  ;;  %vm5006_vm12 = vcmp.eq.s32.totalorder %v18385_v33, %v10545_v54 }
 0x612   : > { %8994 = vmatprep.mubr.msk.bf16.mxu0 %vm766_vm11, %v4743_v56  ;;  %vm5022_vm2 = vmor %vm4942_vm5, %vm5006_vm12  ;;  %v18387_v56 = vld [vmem:[#allocation66_spill] sm:$0xff]  ;;  %vm4543_vm12 = vcmp.eq.s32.totalorder %v15369_v15, %v10545_v54  ;;  %vm4944_vm9 = vcmp.eq.s32.totalorder %v15401_v18, %v10545_v54 }
 0x613   : > { %vm4544_vm4 = vcmp.eq.s32.totalorder %v18387_v56, %v10545_v54  ;;  %vm5102_vm7 = vmor %vm5022_vm2, %vm5086_vm1  ;;  %v15448_v14 = vpop.permute.xlu0 %6568 }
 0x614   : > { %vm15427_vm8 = vmor %vm4544_vm4, %vm4608_vm6  ;;  %v8292_v3 = vsel %vm5102_vm7, 1.0, %v17587_v17  ;;  %18395 = vst [vmem:[#allocation49_spill] sm:$0xff] %v15448_v14 }
 0x615   : > { %9382 = vset.pattern.permute.xlu1 %v18216_v4  ;;  %vm4704_vm5 = vmor %vm15427_vm8, %vm4688_vm15 }
 0x616   : > { %5366 = vperm.xlu1 %9382, %v18383_v53   ;;  %v15406_v60 = vpop.permute.xlu1 %4989  ;;  %vm4623_vm1 = vmor %vm4543_vm12, %vm4607_vm13 }
 0x617   : > { %vm5008_vm4 = vcmp.eq.s32.totalorder %v15406_v60, %v10545_v54  ;;  %v15490_v22 = vpop.permute.xlu0 %6242 }
 0x618   : > { %18398 = vst [vmem:[#allocation95_spill] sm:$0xff] %v15490_v22  ;;  %vm5024_vm8 = vmor %vm4944_vm9, %vm5008_vm4 }
 0x61a   : > { %5369 = vperm.xlu1 %9382, %v18386_v38   ;;  %v15414_v21 = vpop.permute.xlu1 %4992 }
 0x61e   : > { %9383 = vset.pattern.permute.xlu1 %v18362_v42 }
 0x61f   : > { %5443 = vperm.xlu1 %9383, %v18389_v45   ;;  %v5067_v33 = vpop.permute.xlu1 %5066 }
 0x620   : > { %vm5087_vm14 = vcmp.eq.s32.totalorder %v5067_v33, %v10545_v54  ;;  %v8984_v32 = vpop.f32.mrb[80].mxu0  ;;  %v18394_v33 = vmax.f32 %v15244_v11, %v14997_v55  ;;  %v18397_v55 = vmax.f32 %v15254_v51, %v15012_v34  ;;  %v8271_v34 = vsel %vm4704_vm5, 1.0, %v17587_v17 }
 0x621   : > { %vm5103_vm0 = vmor %vm5023_vm10, %vm5087_vm14  ;;  %v15437_v56 = vmax.f32 %v8984_v32, %v18393_v48  ;;  %v4803_v25 = vpop.f32.mrb[81].mxu0  ;;  %vm5009_vm10 = vcmp.eq.s32.totalorder %v15414_v21, %v10545_v54 }
 0x622   : > { %v8293_v44 = vsel %vm5103_vm0, 1.0, %v17587_v17  ;;  %v15446_v61 = vmax.f32 %v4803_v25, %v18394_v33  ;;  %v8985_v40 = vpop.f32.mrb[82].mxu0  ;;  %v18399_v33 = vld [vmem:[#allocation62_spill] sm:$0xff] }
 0x623   : > { %v5144_v26 = vpack.c.bf16 %v8293_v44, %v8292_v3  ;;  %v15453_v10 = vmax.f32 %v8985_v40, %v18396_v36  ;;  %9384 = vset.pattern.permute.xlu1 %v18216_v4  ;;  %v4806_v32 = vpop.f32.mrb[83].mxu0  ;;  %vm4945_vm7 = vcmp.eq.s32.totalorder %v18399_v33, %v10545_v54  ;;  %v15505_v36 = vpop.permute.xlu0 %6251 }
 0x624   : > { %v15466_v44 = vmax.f32 %v4806_v32, %v18397_v55  ;;  %5703 = vperm.xlu1 %9384, %v15398_v7   ;;  %v4669_v50 = vpop.permute.xlu1 %4668  ;;  %vm5025_vm15 = vmor %vm4945_vm7, %vm5009_vm10  ;;  %18400 = vst [vmem:[#allocation60_spill] sm:$0xff] %v15505_v36  ;;  %v18410_v36 = vmax.f32 %v15274_v39, %v15030_v27  ;;  %v18412_v27 = vmax.f32 %v15287_v0, %v15044_v43 }
 0x625   : > { %vm4687_vm2 = vcmp.eq.s32.totalorder %v4669_v50, %v10545_v54  ;;  %v15470_v40 = vpop.f32.mrb[80].mxu1  ;;  %9022 = vmatprep.mubr.msk.bf16.mxu1 %vm766_vm11, %v5144_v26 }
 0x626   : > { %vm4703_vm3 = vmor %vm4623_vm1, %vm4687_vm2  ;;  %v15475_v11 = vpop.f32.mrb[81].mxu1  ;;  %vm5395_vm1 = vcmp.eq.s32.totalorder %v15171_v63, %v10545_v54 }
 0x627   : > { %v8270_v51 = vsel %vm4703_vm3, 1.0, %v17587_v17  ;;  %v15481_v24 = vpop.f32.mrb[82].mxu1  ;;  %v15512_v21 = vpop.permute.xlu0 %6580 }
 0x628   : > { %v4744_v15 = vpack.c.bf16 %v8271_v34, %v8270_v51  ;;  %9385 = vset.pattern.permute.xlu1 %v18362_v42  ;;  %v15486_v26 = vpop.f32.mrb[83].mxu1  ;;  %18401 = vst [vmem:[#allocation55_spill] sm:$0xff] %v15512_v21  ;;  %v18402_v34 = vld [vmem:[#allocation46_spill] sm:$0xff] }
 0x629   : > { %5767 = vperm.xlu1 %9385, %v18383_v53   ;;  %v5070_v48 = vpop.permute.xlu1 %5069  ;;  %v18405_v21 = vld [vmem:[#allocation82_spill] sm:$0xff] }
 0x62a   : > { %vm5088_vm6 = vcmp.eq.s32.totalorder %v5070_v48, %v10545_v54  ;;  %8995 = vmatmul.mubr.msk.bf16.gmra.mrb[92].mxu0 %vm766_vm11, %v4744_v15  ;;  %vm5331_vm5 = vcmp.eq.s32.totalorder %v18405_v21, %v10545_v54 }
 0x62b   : > { %vm5104_vm14 = vmor %vm5024_vm8, %vm5088_vm6  ;;  %v15516_v15 = vpop.permute.xlu0 %6254 }
 0x62c   : > { %v8294_v32 = vsel %vm5104_vm14, 1.0, %v17587_v17  ;;  %18403 = vst [vmem:[#allocation64_spill] sm:$0xff] %v15516_v15  ;;  %vm5411_vm6 = vmor %vm5331_vm5, %vm5395_vm1  ;;  %vm5733_vm14 = vcmp.eq.s32.totalorder %v15178_v6, %v10545_v54 }
 0x62d   : > { %5770 = vperm.xlu1 %9385, %v18386_v38   ;;  %v5073_v60 = vpop.permute.xlu1 %5072 }
 0x62e   : > { %vm5089_vm0 = vcmp.eq.s32.totalorder %v5073_v60, %v10545_v54 }
 0x62f   : > { %vm5105_vm13 = vmor %vm5025_vm15, %vm5089_vm0  ;;  %v15521_v60 = vpop.permute.xlu0 %6263 }
 0x630   : > { %v8295_v55 = vsel %vm5105_vm13, 1.0, %v17587_v17  ;;  %18404 = vst [vmem:[#allocation83_spill] sm:$0xff] %v15521_v60 }
 0x631   : > { %v5145_v50 = vpack.c.bf16 %v8295_v55, %v8294_v32  ;;  %9387 = vset.pattern.permute.xlu1 %v18342_v62  ;;  %v15525_v32 = vld [vmem:[%s10165_s26 + $0x48] sm:$0xff] }
 0x632   : > { %5844 = vperm.xlu1 %9387, %v18389_v45   ;;  %v5288_v18 = vpop.permute.xlu1 %5287 }
 0x633   : > { %9023 = vmatmul.mubr.msk.bf16.gmra.mrb[92].mxu1 %vm766_vm11, %v5145_v50  ;;  %v5753_v50 = vpop.permute.xlu0 %5752  ;;  %vm5332_vm2 = vcmp.eq.s32.totalorder %v5288_v18, %v10545_v54 }
 0x634   : > { %vm5797_vm15 = vcmp.eq.s32.totalorder %v5753_v50, %v10545_v54 }
 0x635   : > { %vm5813_vm1 = vmor %vm5733_vm14, %vm5797_vm15 }
 0x636   : > { %9388 = vset.pattern.permute.xlu1 %v18362_v42 }
 0x637   : > { %5446 = vperm.xlu1 %9388, %v18402_v34   ;;  %v5352_v51 = vpop.permute.xlu1 %5351  ;;  %v5432_v25 = vpop.permute.xlu0 %5431 }
 0x638   : > { %vm5396_vm12 = vcmp.eq.s32.totalorder %v5352_v51, %v10545_v54  ;;  %vm5476_vm4 = vcmp.eq.s32.totalorder %v5432_v25, %v10545_v54  ;;  %v15554_v25 = vld [vmem:[%s10165_s26 + $0x50] sm:$0xff] }
 0x639   : > { %vm5412_vm3 = vmor %vm5332_vm2, %vm5396_vm12 }
 0x63a   : > { %vm5492_vm7 = vmor %vm5412_vm3, %vm5476_vm4 }
 0x63b   : > { %9389 = vset.pattern.permute.xlu1 %v18342_v62  ;;  %v5686_v48 = vpop.permute.xlu1 %5685  ;;  %v8305_v60 = vsel %vm5492_vm7, 1.0, %v17587_v17  ;;  %v5756_v15 = vpop.permute.xlu0 %5755  ;;  %vm5397_vm7 = vcmp.eq.s32.totalorder %v15185_v59, %v10545_v54 }
 0x63c   : > { %5847 = vperm.xlu1 %9389, %v18402_v34   ;;  %vm5732_vm0 = vcmp.eq.s32.totalorder %v5686_v48, %v10545_v54 }
 0x640   : > { %5850 = vperm.xlu1 %9389, %v18280_v12   ;;  %v5750_v33 = vpop.permute.xlu1 %5749 }
 0x641   : > { %vm5796_vm8 = vcmp.eq.s32.totalorder %v5750_v33, %v10545_v54  ;;  %v5438_v33 = vpop.permute.xlu0 %5437 }
 0x642   : > { %vm5812_vm12 = vmor %vm5732_vm0, %vm5796_vm8 }
 0x644   : > { %9390 = vset.pattern.permute.xlu1 %v18176_v28 }
 0x645   : > { %5311 = vperm.xlu1 %9390, %v15525_v32   ;;  %v15528_v55 = vpop.permute.xlu1 %5290 }
 0x646   : > { %vm5333_vm8 = vcmp.eq.s32.totalorder %v15528_v55, %v10545_v54 }
 0x647   : > { %vm5413_vm15 = vmor %vm5333_vm8, %vm5397_vm7 }
 0x649   : > { %9391 = vset.pattern.permute.xlu1 %v18216_v4  ;;  %v5294_v19 = vpop.permute.xlu1 %5293 }
 0x64a   : > { %5372 = vperm.xlu1 %9391, %v18282_v29   ;;  %vm5334_vm3 = vcmp.eq.s32.totalorder %v5294_v19, %v10545_v54 }
 0x64e   : > { %5709 = vperm.xlu1 %9391, %v15534_v23   ;;  %v5358_v3 = vpop.permute.xlu1 %5357 }
 0x64f   : > { %vm5398_vm5 = vcmp.eq.s32.totalorder %v5358_v3, %v10545_v54  ;;  %v18409_v3 = vmax.f32 %v15268_v58, %v15025_v13  ;;  %v18411_v13 = vmax.f32 %v15280_v31, %v15039_v37 }
 0x650   : > { %vm15573_vm4 = vmor %vm5334_vm3, %vm5398_vm5 }
 0x652   : > { %5712 = vperm.xlu1 %9391, %v15525_v32  }
 0x653   : > { %v5429_v51 = vpop.permute.xlu1 %5428 }
 0x654   : > { %vm5475_vm9 = vcmp.eq.s32.totalorder %v5429_v51, %v10545_v54 }
 0x655   : > { %vm5491_vm10 = vmor %vm5411_vm6, %vm5475_vm9  ;;  %vm5478_vm9 = vcmp.eq.s32.totalorder %v5438_v33, %v10545_v54 }
 0x656   : > { %v8304_v21 = vsel %vm5491_vm10, 1.0, %v17587_v17  ;;  %9392 = vset.pattern.permute.xlu1 %v18362_v42  ;;  %vm5494_vm14 = vmor %vm15573_vm4, %vm5478_vm9 }
 0x657   : > { %v5539_v63 = vpack.c.bf16 %v8305_v60, %v8304_v21  ;;  %5776 = vperm.xlu1 %9392, %v18350_v46   ;;  %v18406_v21 = vld [vmem:[#allocation52_spill] sm:$0xff]  ;;  %v8307_v37 = vsel %vm5494_vm14, 1.0, %v17587_v17 }
 0x658   : > { %v15549_v18 = vpop.permute.xlu1 %5691  ;;  %vm5876_vm13 = vcmp.eq.s32.totalorder %v18406_v21, %v10545_v54 }
 0x659   : > { %9038 = vmatprep.mubr.msk.bf16.mxu0 %vm766_vm11, %v5539_v63  ;;  %vm5892_vm2 = vmor %vm5812_vm12, %vm5876_vm13  ;;  %vm5798_vm12 = vcmp.eq.s32.totalorder %v5756_v15, %v10545_v54  ;;  %vm5734_vm5 = vcmp.eq.s32.totalorder %v15549_v18, %v10545_v54  ;;  %v9759_v18 = vld [vmem:[#allocation2] sm:$0xff]  }
 0x65a   : > { %v8328_v21 = vsel %vm5892_vm2, 1.0, %v17587_v17  ;;  %vm5814_vm3 = vmor %vm5734_vm5, %vm5798_vm12 }
 0x65b   : > { %9393 = vset.pattern.permute.xlu1 %v18176_v28 }
 0x65c   : > { %5314 = vperm.xlu1 %9393, %v15554_v25   ;;  %v15557_v51 = vpop.permute.xlu1 %5694 }
 0x65d   : > { %vm5735_vm4 = vcmp.eq.s32.totalorder %v15557_v51, %v10545_v54 }
 0x660   : > { %9394 = vset.pattern.permute.xlu1 %v18216_v4 }
 0x661   : > { %5378 = vperm.xlu1 %9394, %v18291_v8   ;;  %v15562_v60 = vpop.permute.xlu1 %5758 }
 0x662   : > { %vm5799_vm2 = vcmp.eq.s32.totalorder %v15562_v60, %v10545_v54  ;;  %v9762_v60 = vld [vmem:[#allocation2 + $0x18] sm:$0xff]  }
 0x663   : > { %vm5815_vm7 = vmor %vm5735_vm4, %vm5799_vm2 }
 0x665   : > { %5381 = vperm.xlu1 %9394, %v18295_v35  }
 0x666   : > { %v5833_v63 = vpop.permute.xlu1 %5832 }
 0x667   : > { %vm5877_vm6 = vcmp.eq.s32.totalorder %v5833_v63, %v10545_v54  ;;  %v8988_v48 = vpop.f32.mrb[84].mxu0 }
 0x668   : > { %vm5893_vm10 = vmor %vm5813_vm1, %vm5877_vm6  ;;  %v15584_v50 = vmax.f32 %v8988_v48, %v18409_v3  ;;  %v4819_v19 = vpop.f32.mrb[85].mxu0 }
 0x669   : > { %v8329_v63 = vsel %vm5893_vm10, 1.0, %v17587_v17  ;;  %v15593_v14 = vmax.f32 %v4819_v19, %v18410_v36  ;;  %9395 = vset.pattern.permute.xlu1 %v18362_v42  ;;  %v8989_v33 = vpop.f32.mrb[86].mxu0 }
 0x66a   : > { %v5940_v22 = vpack.c.bf16 %v8329_v63, %v8328_v21  ;;  %v15599_v58 = vmax.f32 %v8989_v33, %v18411_v13  ;;  %5455 = vperm.xlu1 %9395, %v18299_v30   ;;  %v4822_v48 = vpop.f32.mrb[87].mxu0  ;;  %v9760_v21 = vld [vmem:[#allocation2 + $0x8] sm:$0xff]   ;;  %v18418_v63 = vld [vmem:[#allocation79_spill] sm:$0xff] }
 0x66b   : > { %v15607_v39 = vmax.f32 %v4822_v48, %v18412_v27  ;;  %v5435_v36 = vpop.permute.xlu1 %5434  ;;  %v9761_v48 = vld [vmem:[#allocation2 + $0x10] sm:$0xff]  }
 0x66c   : > { %vm5477_vm0 = vcmp.eq.s32.totalorder %v5435_v36, %v10545_v54  ;;  %9066 = vmatprep.mubr.msk.bf16.mxu1 %vm766_vm11, %v5940_v22 }
 0x66d   : > { %18413 = vst [vmem:[#allocation85_spill] sm:$0xff] %v15607_v39  ;;  %vm5493_vm13 = vmor %vm5413_vm15, %vm5477_vm0 }
 0x66e   : > { %v8306_v31 = vsel %vm5493_vm13, 1.0, %v17587_v17  ;;  %9396 = vset.pattern.permute.xlu1 %v18216_v4  ;;  %vm5400_vm13 = vcmp.eq.s32.totalorder %v18418_v63, %v10545_v54  ;;  %v18419_v63 = vld [vmem:[#allocation29_spill] sm:$0xff] }
 0x66f   : > { %v5540_v55 = vpack.c.bf16 %v8307_v37, %v8306_v31  ;;  %5715 = vperm.xlu1 %9396, %v15554_v25   ;;  %v9763_v31 = vld [vmem:[#allocation2 + $0x20] sm:$0xff]  }
 0x670   : > { %v5836_v43 = vpop.permute.xlu1 %5835  ;;  %v15621_v0 = vpop.f32.mrb[84].mxu1 }
 0x671   : > { %vm5878_vm1 = vcmp.eq.s32.totalorder %v5836_v43, %v10545_v54  ;;  %v15626_v22 = vpop.f32.mrb[85].mxu1  ;;  %9039 = vmatmul.mubr.msk.bf16.vlgmr.msra.gmra.mrb[96].mxu0 %vm766_vm11, %v5540_v55  ;;  %v9764_v43 = vld [vmem:[#allocation2 + $0x28] sm:$0xff]  }
 0x672   : > { %v15633_v6 = vpop.f32.mrb[86].mxu1  ;;  %9083 = vmatpush3.bf16.msra.mxu0 %v9759_v18  ;;  %vm5894_vm6 = vmor %vm5814_vm3, %vm5878_vm1 }
 0x673   : > { %9397 = vset.pattern.permute.xlu1 %v18362_v42  ;;  %v15638_v19 = vpop.f32.mrb[87].mxu1  ;;  %9084 = vmatprep.subr.bf16.mxu0 %v9760_v21  ;;  %v8330_v13 = vsel %vm5894_vm6, 1.0, %v17587_v17 }
 0x674   : > { %18414 = vst [vmem:[#allocation53_spill] sm:$0xff] %v15638_v19  ;;  %5779 = vperm.xlu1 %9397, %v18291_v8   ;;  %v5839_v33 = vpop.permute.xlu1 %5838 }
 0x675   : > { %vm5879_vm9 = vcmp.eq.s32.totalorder %v5839_v33, %v10545_v54  ;;  %v15664_v33 = vld [vmem:[%s10165_s26 + $0x68] sm:$0xff] }
 0x676   : > { %vm5895_vm10 = vmor %vm5815_vm7, %vm5879_vm9  ;;  %9085 = vmatpush3.bf16.msra.mxu0 %v9760_v21  ;;  %18415 = vst [vmem:[#allocation75_spill] sm:$0xff] %v15664_v33 }
 0x677   : > { %v8331_v51 = vsel %vm5895_vm10, 1.0, %v17587_v17  ;;  %9086 = vmatprep.subr.bf16.mxu0 %v9761_v48 }
 0x678   : > { %v5941_v27 = vpack.c.bf16 %v8331_v51, %v8330_v13  ;;  %5782 = vperm.xlu1 %9397, %v18295_v35   ;;  %v5762_v51 = vpop.permute.xlu0 %5761 }
 0x679   : > { %v5300_v36 = vpop.permute.xlu1 %5299  ;;  %vm5800_vm4 = vcmp.eq.s32.totalorder %v5762_v51, %v10545_v54 }
 0x67a   : > { %9067 = vmatmul.mubr.msk.bf16.vlgmr.msra.gmra.mrb[96].mxu1 %vm766_vm11, %v5941_v27  ;;  %9087 = vmatpush3.bf16.msra.mxu0 %v9761_v48  ;;  %v18416_v27 = vld [vmem:[#allocation63_spill] sm:$0xff]  ;;  %vm5336_vm12 = vcmp.eq.s32.totalorder %v5300_v36, %v10545_v54 }
 0x67b   : > { %9111 = vmatpush3.bf16.msra.mxu1 %v9759_v18  ;;  %9088 = vmatprep.subr.bf16.mxu0 %v9762_v60  ;;  %vm5335_vm8 = vcmp.eq.s32.totalorder %v18416_v27, %v10545_v54  ;;  %vm5416_vm1 = vmor %vm5336_vm12, %vm5400_vm13 }
 0x67c   : > { %9398 = vset.pattern.permute.xlu1 %v18342_v62  ;;  %9112 = vmatprep.subr.bf16.mxu1 %v9760_v21 }
 0x67d   : > { %5856 = vperm.xlu1 %9398, %v18299_v30  }
 0x67e   : > { %v5361_v37 = vpop.permute.xlu1 %5360  ;;  %9089 = vmatpush3.bf16.msra.mxu0 %v9762_v60 }
 0x67f   : > { %9113 = vmatpush3.bf16.msra.mxu1 %v9760_v21  ;;  %9090 = vmatprep.subr.bf16.mxu0 %v9763_v31  ;;  %vm5399_vm14 = vcmp.eq.s32.totalorder %v5361_v37, %v10545_v54 }
 0x680   : > { %9114 = vmatprep.subr.bf16.mxu1 %v9761_v48  ;;  %vm5415_vm15 = vmor %vm5335_vm8, %vm5399_vm14 }
 0x681   : > { %9399 = vset.pattern.permute.xlu1 %v18362_v42 }
 0x682   : > { %5458 = vperm.xlu1 %9399, %v18303_v1   ;;  %v5698_v55 = vpop.permute.xlu1 %5697  ;;  %9091 = vmatpush3.bf16.msra.mxu0 %v9763_v31 }
 0x683   : > { %9115 = vmatpush3.bf16.msra.mxu1 %v9761_v48  ;;  %9092 = vmatprep.subr.bf16.mxu0 %v9764_v43  ;;  %vm5736_vm6 = vcmp.eq.s32.totalorder %v5698_v55, %v10545_v54  ;;  %v18424_v55 = vld [vmem:[#allocation31_spill] sm:$0xff] }
 0x684   : > { %9116 = vmatprep.subr.bf16.mxu1 %v9762_v60  ;;  %vm5816_vm9 = vmor %vm5736_vm6, %vm5800_vm4 }
 0x686   : > { %9400 = vset.pattern.permute.xlu1 %v18342_v62  ;;  %v5701_v18 = vpop.permute.xlu1 %5700  ;;  %9093 = vmatpush3.bf16.msra.mxu0 %v9764_v43 }
 0x687   : > { %5859 = vperm.xlu1 %9400, %v18303_v1   ;;  %9117 = vmatpush3.bf16.msra.mxu1 %v9762_v60  ;;  %v5441_v60 = vpop.permute.xlu0 %5440 }
 0x688   : > { %9118 = vmatprep.subr.bf16.mxu1 %v9763_v31  ;;  %vm5479_vm0 = vcmp.eq.s32.totalorder %v5441_v60, %v10545_v54 }
 0x689   : > { %vm5495_vm5 = vmor %vm5415_vm15, %vm5479_vm0  ;;  %vm5737_vm0 = vcmp.eq.s32.totalorder %v5701_v18, %v10545_v54 }
 0x68a   : > { %v8308_v37 = vsel %vm5495_vm5, 1.0, %v17587_v17 }
 0x68b   : > { %5862 = vperm.xlu1 %9400, %v18289_v49   ;;  %v5765_v21 = vpop.permute.xlu1 %5764  ;;  %9119 = vmatpush3.bf16.msra.mxu1 %v9763_v31  ;;  %v15677_v31 = vld [vmem:[%s10165_s26 + $0x60] sm:$0xff]  ;;  %v5450_v3 = vpop.permute.xlu0 %5449 }
 0x68c   : > { %9120 = vmatprep.subr.bf16.mxu1 %v9764_v43  ;;  %18417 = vst [vmem:[#allocation45_spill] sm:$0xff] %v15677_v31  ;;  %vm5801_vm10 = vcmp.eq.s32.totalorder %v5765_v21, %v10545_v54 }
 0x68d   : > { %vm5817_vm13 = vmor %vm5737_vm0, %vm5801_vm10 }
 0x68f   : > { %9401 = vset.pattern.permute.xlu1 %v18176_v28  ;;  %9121 = vmatpush3.bf16.msra.mxu1 %v9764_v43  ;;  %v15694_v59 = vpop.permute.xlu0 %5773 }
 0x690   : > { %5323 = vperm.xlu1 %9401, %v15664_v33   ;;  %v15667_v13 = vpop.permute.xlu1 %5302 }
 0x691   : > { %vm5337_vm4 = vcmp.eq.s32.totalorder %v15667_v13, %v10545_v54 }
 0x694   : > { %9402 = vset.pattern.permute.xlu1 %v18216_v4 }
 0x695   : > { %5384 = vperm.xlu1 %9402, %v18304_v9   ;;  %v15671_v48 = vpop.permute.xlu1 %5366 }
 0x699   : > { %5721 = vperm.xlu1 %9402, %v15677_v31   ;;  %v5370_v43 = vpop.permute.xlu1 %5369 }
 0x69a   : > { %vm5402_vm14 = vcmp.eq.s32.totalorder %v5370_v43, %v10545_v54  ;;  %v18427_v43 = vmax.f32 %v15302_v2, %v15061_v57  ;;  %v18431_v57 = vmax.f32 %v15313_v47, %v15075_v16 }
 0x69d   : > { %5724 = vperm.xlu1 %9402, %v15664_v33  }
 0x69e   : > { %v5444_v27 = vpop.permute.xlu1 %5443 }
 0x69f   : > { %vm5480_vm2 = vcmp.eq.s32.totalorder %v5444_v27, %v10545_v54  ;;  %v15697_v27 = vld [vmem:[%s10165_s26 + $0x70] sm:$0xff] }
 0x6a0   : > { %vm5496_vm3 = vmor %vm5416_vm1, %vm5480_vm2  ;;  %18420 = vst [vmem:[#allocation59_spill] sm:$0xff] %v15697_v27  ;;  %vm5482_vm1 = vcmp.eq.s32.totalorder %v5450_v3, %v10545_v54  ;;  %v18444_v3 = vld [vmem:[#allocation16_spill] sm:$0xff] }
 0x6a1   : > { %v8309_v15 = vsel %vm5496_vm3, 1.0, %v17587_v17  ;;  %9403 = vset.pattern.permute.xlu1 %v18362_v42  ;;  %vm5401_vm3 = vcmp.eq.s32.totalorder %v15671_v48, %v10545_v54 }
 0x6a2   : > { %v5541_v60 = vpack.c.bf16 %v8309_v15, %v8308_v37  ;;  %5788 = vperm.xlu1 %9403, %v18419_v63   ;;  %v18421_v15 = vld [vmem:[#allocation30_spill] sm:$0xff]  ;;  %v18423_v63 = vld [vmem:[#allocation88_spill] sm:$0xff] }
 0x6a3   : > { %v15690_v36 = vpop.permute.xlu1 %5703  ;;  %vm5338_vm8 = vcmp.eq.s32.totalorder %v18423_v63, %v10545_v54 }
 0x6a4   : > { %9042 = vmatprep.mubr.msk.bf16.mxu0 %vm766_vm11, %v5541_v60  ;;  %v18422_v60 = vld [vmem:[#allocation61_spill] sm:$0xff]  ;;  %vm15716_vm12 = vmor %vm5338_vm8, %vm5402_vm14  ;;  %vm5738_vm0 = vcmp.eq.s32.totalorder %v15690_v36, %v10545_v54 }
 0x6a5   : > { %vm5880_vm7 = vcmp.eq.s32.totalorder %v18422_v60, %v10545_v54  ;;  %vm5498_vm6 = vmor %vm15716_vm12, %vm5482_vm1  ;;  %v9768_v36 = vld [vmem:[%s10165_s26 + $0x8] sm:$0xff] }
 0x6a6   : > { %9404 = vset.pattern.permute.xlu1 %v18176_v28  ;;  %v15708_v28 = vpop.permute.xlu0 %5452  ;;  %vm5896_vm15 = vmor %vm5816_vm9, %vm5880_vm7  ;;  %v8311_v16 = vsel %vm5498_vm6, 1.0, %v17587_v17 }
 0x6a7   : > { %5326 = vperm.xlu1 %9404, %v15697_v27   ;;  %v8332_v33 = vsel %vm5896_vm15, 1.0, %v17587_v17  ;;  %vm5417_vm7 = vmor %vm5337_vm4, %vm5401_vm3 }
 0x6a8   : > { %v5768_v31 = vpop.permute.xlu1 %5767 }
 0x6a9   : > { %vm5802_vm8 = vcmp.eq.s32.totalorder %v5768_v31, %v10545_v54 }
 0x6aa   : > { %v15722_v21 = vpop.permute.xlu0 %5461  ;;  %vm5818_vm12 = vmor %vm5738_vm0, %vm5802_vm8 }
 0x6ab   : > { %9406 = vset.pattern.permute.xlu1 %v18216_v4 }
 0x6ac   : > { %5390 = vperm.xlu1 %9406, %v18421_v15   ;;  %v15704_v37 = vpop.permute.xlu1 %5770 }
 0x6ae   : > { %v15759_v47 = vpop.permute.xlu0 %5785 }
 0x6b0   : > { %5393 = vperm.xlu1 %9406, %v18424_v55  }
 0x6b1   : > { %v5845_v51 = vpop.permute.xlu1 %5844 }
 0x6b2   : > { %vm5881_vm5 = vcmp.eq.s32.totalorder %v5845_v51, %v10545_v54  ;;  %v8992_v60 = vpop.f32.mrb[88].mxu0  ;;  %v18429_v51 = vmax.f32 %v15307_v5, %v15067_v20  ;;  %v18434_v20 = vmax.f32 %v15318_v52, %v15082_v41 }
 0x6b3   : > { %vm5897_vm2 = vmor %vm5817_vm13, %vm5881_vm5  ;;  %v15727_v18 = vmax.f32 %v8992_v60, %v18427_v43  ;;  %v4835_v63 = vpop.f32.mrb[89].mxu0  ;;  %v18433_v60 = vld [vmem:[#allocation39_spill] sm:$0xff]  ;;  %vm5803_vm13 = vcmp.eq.s32.totalorder %v15704_v37, %v10545_v54 }
 0x6b4   : > { %v8333_v49 = vsel %vm5897_vm2, 1.0, %v17587_v17  ;;  %v15736_v1 = vmax.f32 %v4835_v63, %v18429_v51  ;;  %9407 = vset.pattern.permute.xlu1 %v18362_v42  ;;  %v8993_v39 = vpop.f32.mrb[90].mxu0  ;;  %v15788_v63 = vpop.permute.xlu0 %5464 }
 0x6b5   : > { %18428 = vst [vmem:[#allocation69_spill] sm:$0xff] %v15727_v18  ;;  %v5942_v19 = vpack.c.bf16 %v8333_v49, %v8332_v33  ;;  %v15742_v2 = vmax.f32 %v8993_v39, %v18431_v57  ;;  %5467 = vperm.xlu1 %9407, %v18433_v60   ;;  %v4838_v43 = vpop.f32.mrb[91].mxu0  ;;  %v18438_v33 = vld [vmem:[#allocation92_spill] sm:$0xff] }
 0x6b6   : > { %18430 = vst [vmem:[#allocation67_spill] sm:$0xff] %v15736_v1  ;;  %v15754_v49 = vmax.f32 %v4838_v43, %v18434_v20  ;;  %v5447_v5 = vpop.permute.xlu1 %5446  ;;  %vm5739_vm15 = vcmp.eq.s32.totalorder %v18438_v33, %v10545_v54 }
 0x6b7   : > { %18432 = vst [vmem:[#allocation86_spill] sm:$0xff] %v15742_v2  ;;  %vm5481_vm9 = vcmp.eq.s32.totalorder %v5447_v5, %v10545_v54  ;;  %9070 = vmatprep.mubr.msk.bf16.mxu1 %vm766_vm11, %v5942_v19  ;;  %vm5819_vm1 = vmor %vm5739_vm15, %vm5803_vm13 }
 0x6b8   : > { %18435 = vst [vmem:[#allocation43_spill] sm:$0xff] %v15754_v49  ;;  %vm5497_vm10 = vmor %vm5417_vm7, %vm5481_vm9  ;;  %v15797_v5 = vpop.permute.xlu0 %5473  ;;  %vm5483_vm7 = vcmp.eq.s32.totalorder %v15708_v28, %v10545_v54 }
 0x6b9   : > { %v8310_v39 = vsel %vm5497_vm10, 1.0, %v17587_v17  ;;  %9408 = vset.pattern.permute.xlu1 %v18216_v4 }
 0x6ba   : > { %v5542_v9 = vpack.c.bf16 %v8311_v16, %v8310_v39  ;;  %5727 = vperm.xlu1 %9408, %v15697_v27   ;;  %v18464_v27 = vld [vmem:[#allocation57_spill] sm:$0xff] }
 0x6bb   : > { %v5848_v41 = vpop.permute.xlu1 %5847  ;;  %v15765_v52 = vpop.f32.mrb[88].mxu1 }
 0x6bc   : > { %18436 = vst [vmem:[#allocation84_spill] sm:$0xff] %v15765_v52  ;;  %vm5882_vm14 = vcmp.eq.s32.totalorder %v5848_v41, %v10545_v54  ;;  %v15770_v19 = vpop.f32.mrb[89].mxu1  ;;  %9043 = vmatmul.mubr.msk.bf16.gmra.mrb[100].mxu0 %vm766_vm11, %v5542_v9  ;;  %v15802_v39 = vpop.permute.xlu0 %6086  ;;  %v18441_v9 = vld [vmem:[#allocation50_spill] sm:$0xff] }
 0x6bd   : > { %18437 = vst [vmem:[#allocation44_spill] sm:$0xff] %v15770_v19  ;;  %v15781_v13 = vpop.f32.mrb[90].mxu1  ;;  %vm5898_vm5 = vmor %vm5818_vm12, %vm5882_vm14  ;;  %vm5804_vm12 = vcmp.eq.s32.totalorder %v15694_v59, %v10545_v54  ;;  %v18454_v59 = vld [vmem:[#allocation32_spill] sm:$0xff]  ;;  %v18460_v19 = vld [vmem:[#allocation94_spill] sm:$0xff] }
 0x6be   : > { %18439 = vst [vmem:[#allocation25_spill] sm:$0xff] %v15781_v13  ;;  %9409 = vset.pattern.permute.xlu1 %v18362_v42  ;;  %v15786_v31 = vpop.f32.mrb[91].mxu1  ;;  %v8334_v51 = vsel %vm5898_vm5, 1.0, %v17587_v17 }
 0x6bf   : > { %18440 = vst [vmem:[#allocation96_spill] sm:$0xff] %v15786_v31  ;;  %5791 = vperm.xlu1 %9409, %v18421_v15   ;;  %v5851_v37 = vpop.permute.xlu1 %5850  ;;  %v9769_v31 = vld [vmem:[%s10165_s26] sm:$0xff] }
 0x6c0   : > { %vm5883_vm2 = vcmp.eq.s32.totalorder %v5851_v37, %v10545_v54  ;;  %v15806_v33 = vpop.permute.xlu0 %6098  ;;  %v18463_v15 = vld [vmem:[#allocation47_spill] sm:$0xff] }
 0x6c1   : > { %vm5899_vm3 = vmor %vm5819_vm1, %vm5883_vm2 }
 0x6c2   : > { %v8335_v57 = vsel %vm5899_vm3, 1.0, %v17587_v17 }
 0x6c3   : > { %v5943_v43 = vpack.c.bf16 %v8335_v57, %v8334_v51  ;;  %5794 = vperm.xlu1 %9409, %v18424_v55   ;;  %v18442_v51 = vld [vmem:[#allocation41_spill] sm:$0xff] }
 0x6c4   : > { %v5312_v20 = vpop.permute.xlu1 %5311 }
 0x6c5   : > { %9071 = vmatmul.mubr.msk.bf16.gmra.mrb[100].mxu1 %vm766_vm11, %v5943_v43  ;;  %v15811_v43 = vpop.permute.xlu0 %6107  ;;  %vm5340_vm8 = vcmp.eq.s32.totalorder %v5312_v20, %v10545_v54  ;;  %v9770_v20 = vld [vmem:[%s10165_s26 + $0x10] sm:$0xff] }
 0x6c7   : > { %9410 = vset.pattern.permute.xlu1 %v18342_v62 }
 0x6c8   : > { %5868 = vperm.xlu1 %9410, %v18433_v60  }
 0x6c9   : > { %v5373_v16 = vpop.permute.xlu1 %5372  ;;  %v15817_v4 = vpop.permute.xlu0 %6110 }
 0x6ca   : > { %18443 = vst [vmem:[#allocation87_spill] sm:$0xff] %v15817_v4  ;;  %vm5403_vm6 = vcmp.eq.s32.totalorder %v5373_v16, %v10545_v54  ;;  %v18447_v4 = vld [vmem:[#allocation51_spill] sm:$0xff]  ;;  %v18450_v16 = vld [vmem:[#allocation17_spill] sm:$0xff] }
 0x6cb   : > { %vm5404_vm10 = vcmp.eq.s32.totalorder %v18447_v4, %v10545_v54 }
 0x6cc   : > { %9411 = vset.pattern.permute.xlu1 %v18362_v42  ;;  %vm5420_vm15 = vmor %vm5340_vm8, %vm5404_vm10 }
 0x6cd   : > { %5470 = vperm.xlu1 %9411, %v18441_v9   ;;  %v5710_v41 = vpop.permute.xlu1 %5709 }
 0x6ce   : > { %vm5740_vm5 = vcmp.eq.s32.totalorder %v5710_v41, %v10545_v54 }
 0x6cf   : > { %vm5820_vm1 = vmor %vm5740_vm5, %vm5804_vm12 }
 0x6d1   : > { %9412 = vset.pattern.permute.xlu1 %v18342_v62  ;;  %v5713_v37 = vpop.permute.xlu1 %5712 }
 0x6d2   : > { %5871 = vperm.xlu1 %9412, %v18441_v9   ;;  %v18445_v9 = vld [vmem:[#allocation72_spill] sm:$0xff] }
 0x6d3   : > { %vm5339_vm4 = vcmp.eq.s32.totalorder %v18445_v9, %v10545_v54 }
 0x6d4   : > { %vm5419_vm9 = vmor %vm5339_vm4, %vm5403_vm6 }
 0x6d5   : > { %vm5499_vm14 = vmor %vm5419_vm9, %vm5483_vm7  ;;  %vm5741_vm9 = vcmp.eq.s32.totalorder %v5713_v37, %v10545_v54 }
 0x6d6   : > { %5874 = vperm.xlu1 %9412, %v18442_v51   ;;  %v5777_v57 = vpop.permute.xlu1 %5776  ;;  %v15825_v51 = vpop.permute.xlu0 %6119  ;;  %v8312_v28 = vsel %vm5499_vm14, 1.0, %v17587_v17 }
 0x6d7   : > { %18446 = vst [vmem:[#allocation70_spill] sm:$0xff] %v15825_v51  ;;  %vm5805_vm3 = vcmp.eq.s32.totalorder %v5777_v57, %v10545_v54 }
 0x6d8   : > { %vm5821_vm10 = vmor %vm5741_vm9, %vm5805_vm3 }
 0x6da   : > { %9413 = vset.pattern.permute.xlu1 %v18362_v42  ;;  %v15835_v9 = vpop.permute.xlu0 %6122 }
 0x6db   : > { %6089 = vperm.xlu1 %9413, %v9768_v36   ;;  %v15815_v48 = vpop.permute.xlu1 %5314  ;;  %18449 = vst [vmem:[#allocation74_spill] sm:$0xff] %v15835_v9 }
 0x6dc   : > { %vm5341_vm12 = vcmp.eq.s32.totalorder %v15815_v48, %v10545_v54 }
 0x6de   : > { %v15845_v9 = vpop.permute.xlu0 %6131 }
 0x6df   : > { %9414 = vset.pattern.permute.xlu1 %v18342_v62  ;;  %18451 = vst [vmem:[#allocation97_spill] sm:$0xff] %v15845_v9 }
 0x6e0   : > { %6153 = vperm.xlu1 %9414, %v18444_v3   ;;  %v15821_v49 = vpop.permute.xlu1 %5378  ;;  %v18448_v3 = vmov 16  }
 0x6e4   : > { %6492 = vperm.xlu1 %9414, %v9769_v31   ;;  %v5382_v36 = vpop.permute.xlu1 %5381 }
 0x6e5   : > { %vm5406_vm6 = vcmp.eq.s32.totalorder %v5382_v36, %v10545_v54  ;;  %v18457_v36 = vld [vmem:[#allocation24_spill] sm:$0xff] }
 0x6e8   : > { %9415 = vset.pattern.permute.xlu1 %v18448_v3 }
 0x6e9   : > { %6556 = vperm.xlu1 %9415, %v18450_v16   ;;  %v5456_v31 = vpop.permute.xlu1 %5455  ;;  %v9771_v16 = vld [vmem:[%s10165_s26 + $0x18] sm:$0xff] }
 0x6ea   : > { %vm5484_vm0 = vcmp.eq.s32.totalorder %v5456_v31, %v10545_v54  ;;  %v5854_v31 = vpop.permute.xlu0 %5853 }
 0x6eb   : > { %vm5500_vm13 = vmor %vm5420_vm15, %vm5484_vm0  ;;  %vm5884_vm2 = vcmp.eq.s32.totalorder %v5854_v31, %v10545_v54  ;;  %vm5486_vm15 = vcmp.eq.s32.totalorder %v15722_v21, %v10545_v54  ;;  %v18458_v31 = vld [vmem:[#allocation54_spill] sm:$0xff] }
 0x6ec   : > { %v8313_v51 = vsel %vm5500_vm13, 1.0, %v17587_v17  ;;  %vm5900_vm7 = vmor %vm5820_vm1, %vm5884_vm2  ;;  %v18459_v37 = vmax.f32 %v18457_v36, %v18458_v31  ;;  %vm5405_vm13 = vcmp.eq.s32.totalorder %v15821_v49, %v10545_v54  ;;  %v18465_v36 = vmax.f32 %v18463_v15, %v18464_v27  ;;  %v18466_v49 = vld [vmem:[#allocation26_spill] sm:$0xff] }
 0x6ed   : > { %v5543_v4 = vpack.c.bf16 %v8313_v51, %v8312_v28  ;;  %9416 = vset.pattern.permute.xlu1 %v18362_v42  ;;  %v18452_v51 = vld [vmem:[#allocation19_spill] sm:$0xff]  ;;  %vm5421_vm1 = vmor %vm5341_vm12, %vm5405_vm13 }
 0x6ee   : > { %6092 = vperm.xlu1 %9416, %v9770_v20   ;;  %v15843_v60 = vpop.permute.xlu1 %5715 }
 0x6ef   : > { %9046 = vmatprep.mubr.msk.bf16.mxu0 %vm766_vm11, %v5543_v4  ;;  %v18453_v4 = vld [vmem:[#allocation68_spill] sm:$0xff]  ;;  %vm5742_vm9 = vcmp.eq.s32.totalorder %v15843_v60, %v10545_v54 }
 0x6f0   : > { %vm5342_vm4 = vcmp.eq.s32.totalorder %v18453_v4, %v10545_v54 }
 0x6f1   : > { %vm15862_vm8 = vmor %vm5342_vm4, %vm5406_vm6 }
 0x6f2   : > { %6095 = vperm.xlu1 %9416, %v9771_v16   ;;  %vm5502_vm5 = vmor %vm15862_vm8, %vm5486_vm15 }
 0x6f3   : > { %v5780_v2 = vpop.permute.xlu1 %5779  ;;  %v8315_v27 = vsel %vm5502_vm5, 1.0, %v17587_v17 }
 0x6f4   : > { %vm5806_vm4 = vcmp.eq.s32.totalorder %v5780_v2, %v10545_v54 }
 0x6f5   : > { %vm5822_vm8 = vmor %vm5742_vm9, %vm5806_vm4 }
 0x6f6   : > { %9417 = vset.pattern.permute.xlu1 %v18342_v62 }
 0x6f7   : > { %6159 = vperm.xlu1 %9417, %v18452_v51   ;;  %v5783_v28 = vpop.permute.xlu1 %5782 }
 0x6fb   : > { %9418 = vset.pattern.permute.xlu1 %v18448_v3 }
 0x6fc   : > { %6230 = vperm.xlu1 %9418, %v18454_v59   ;;  %v5857_v41 = vpop.permute.xlu1 %5856  ;;  %v8336_v59 = vsel %vm5900_vm7, 1.0, %v17587_v17 }
 0x6fd   : > { %vm5885_vm14 = vcmp.eq.s32.totalorder %v5857_v41, %v10545_v54  ;;  %v8996_v57 = vpop.f32.mrb[92].mxu0  ;;  %v18461_v41 = vld [vmem:[#allocation90_spill] sm:$0xff] }
 0x6fe   : > { %vm5901_vm0 = vmor %vm5821_vm10, %vm5885_vm14  ;;  %v15872_v4 = vmax.f32 %v8996_v57, %v18459_v37  ;;  %v4851_v13 = vpop.f32.mrb[93].mxu0  ;;  %v18462_v18 = vmax.f32 %v18460_v19, %v18461_v41  ;;  %v18467_v19 = vld [vmem:[#allocation91_spill] sm:$0xff]  ;;  %vm5807_vm10 = vcmp.eq.s32.totalorder %v5783_v28, %v10545_v54 }
 0x6ff   : > { %v8337_v1 = vsel %vm5901_vm0, 1.0, %v17587_v17  ;;  %v8997_v21 = vpop.f32.mrb[94].mxu0 }
 0x700   : > { %v15881_v52 = vmax.f32 %v4851_v13, %v18462_v18  ;;  %v5944_v55 = vpack.c.bf16 %v8337_v1, %v8336_v59  ;;  %v15886_v57 = vmax.f32 %v8997_v21, %v18465_v36  ;;  %9419 = vset.pattern.permute.xlu1 %v18342_v62  ;;  %v4854_v31 = vpop.f32.mrb[95].mxu0  ;;  %v18468_v18 = vmax.f32 %v18466_v49, %v18467_v19  ;;  %v18476_v36 = vld [vmem:[#allocation36_spill] sm:$0xff] }
 0x701   : > { %6498 = vperm.xlu1 %9419, %v9770_v20   ;;  %v5459_v1 = vpop.permute.xlu1 %5458  ;;  %v18470_v19 = vmov 17  }
 0x702   : > { %v15896_v13 = vmax.f32 %v4854_v31, %v18468_v18  ;;  %vm5485_vm2 = vcmp.eq.s32.totalorder %v5459_v1, %v10545_v54  ;;  %9074 = vmatprep.mubr.msk.bf16.mxu1 %vm766_vm11, %v5944_v55  ;;  %v18469_v55 = vld [vmem:[#allocation93_spill] sm:$0xff]  ;;  %v18471_v18 = vld [vmem:[#allocation42_spill] sm:$0xff] }
 0x703   : > { %vm5501_vm3 = vmor %vm5421_vm1, %vm5485_vm2  ;;  %vm5743_vm7 = vcmp.eq.s32.totalorder %v18469_v55, %v10545_v54  ;;  %vm5487_vm1 = vcmp.eq.s32.totalorder %v15788_v63, %v10545_v54 }
 0x704   : > { %v8314_v15 = vsel %vm5501_vm3, 1.0, %v17587_v17  ;;  %vm5823_vm15 = vmor %vm5743_vm7, %vm5807_vm10  ;;  %vm5408_vm3 = vcmp.eq.s32.totalorder %v18476_v36, %v10545_v54 }
 0x705   : > { %v5544_v48 = vpack.c.bf16 %v8315_v27, %v8314_v15  ;;  %6501 = vperm.xlu1 %9419, %v9771_v16  }
 0x706   : > { %v5860_v9 = vpop.permute.xlu1 %5859  ;;  %v15903_v37 = vpop.f32.mrb[92].mxu1 }
 0x707   : > { %vm5886_vm6 = vcmp.eq.s32.totalorder %v5860_v9, %v10545_v54  ;;  %v5682_v20 = vmax.f32 %v15903_v37, %v15872_v4  ;;  %v15908_v59 = vpop.f32.mrb[93].mxu1  ;;  %9047 = vmatmul.mubr.msk.bf16.gmra.mrb[104].mxu0 %vm766_vm11, %v5544_v48  ;;  %v18473_v9 = vld [vmem:[#allocation34_spill] sm:$0xff] }
 0x708   : > { %v5680_v2 = vmax.f32 %v15908_v59, %v15881_v52  ;;  %v15918_v16 = vpop.f32.mrb[94].mxu1  ;;  %vm5902_vm14 = vmor %vm5822_vm8, %vm5886_vm6  ;;  %vm5808_vm8 = vcmp.eq.s32.totalorder %v15759_v47, %v10545_v54 }
 0x709   : > { %v5683_v41 = vmax.f32 %v15918_v16, %v15886_v57  ;;  %9420 = vset.pattern.permute.xlu1 %v18448_v3  ;;  %v15923_v21 = vpop.f32.mrb[95].mxu1  ;;  %v8338_v28 = vsel %vm5902_vm14, 1.0, %v17587_v17 }
 0x70a   : > { %6565 = vperm.xlu1 %9420, %v18452_v51   ;;  %v5863_v60 = vpop.permute.xlu1 %5862  ;;  %v18472_v51 = vld [vmem:[#allocation33_spill] sm:$0xff] }
 0x70b   : > { %vm5887_vm0 = vcmp.eq.s32.totalorder %v5863_v60, %v10545_v54  ;;  %v9772_v60 = vld [vmem:[%s10165_s26 + $0x28] sm:$0xff] }
 0x70c   : > { %vm5903_vm13 = vmor %vm5823_vm15, %vm5887_vm0 }
 0x70d   : > { %v8339_v31 = vsel %vm5903_vm13, 1.0, %v17587_v17 }
 0x70e   : > { %v5945_v49 = vpack.c.bf16 %v8339_v31, %v8338_v28  ;;  %9422 = vset.pattern.permute.xlu1 %v18470_v19  ;;  %v18474_v31 = vld [vmem:[#allocation20_spill] sm:$0xff] }
 0x70f   : > { %6639 = vperm.xlu1 %9422, %v18471_v18   ;;  %v5324_v1 = vpop.permute.xlu1 %5323 }
 0x710   : > { %9075 = vmatmul.mubr.msk.bf16.gmra.mrb[104].mxu1 %vm766_vm11, %v5945_v49  ;;  %v9773_v49 = vld [vmem:[%s10165_s26 + $0x20] sm:$0xff]  ;;  %vm5344_vm4 = vcmp.eq.s32.totalorder %v5324_v1, %v10545_v54 }
 0x711   : > { %vm5424_vm7 = vmor %vm5344_vm4, %vm5408_vm3 }
 0x713   : > { %9423 = vset.pattern.permute.xlu1 %v18448_v3 }
 0x714   : > { %6236 = vperm.xlu1 %9423, %v18472_v51   ;;  %v5385_v27 = vpop.permute.xlu1 %5384 }
 0x715   : > { %vm5407_vm5 = vcmp.eq.s32.totalorder %v5385_v27, %v10545_v54 }
 0x718   : > { %9424 = vset.pattern.permute.xlu1 %v18470_v19  ;;  %v5722_v15 = vpop.permute.xlu1 %5721 }
 0x719   : > { %6642 = vperm.xlu1 %9424, %v18472_v51   ;;  %v18475_v51 = vld [vmem:[#allocation89_spill] sm:$0xff]  ;;  %vm5744_vm14 = vcmp.eq.s32.totalorder %v5722_v15, %v10545_v54 }
 0x71a   : > { %vm5343_vm12 = vcmp.eq.s32.totalorder %v18475_v51, %v10545_v54  ;;  %v5866_v51 = vpop.permute.xlu0 %5865  ;;  %vm5824_vm15 = vmor %vm5744_vm14, %vm5808_vm8 }
 0x71b   : > { %vm5423_vm2 = vmor %vm5343_vm12, %vm5407_vm5  ;;  %vm5888_vm0 = vcmp.eq.s32.totalorder %v5866_v51, %v10545_v54 }
 0x71c   : > { %v5725_v48 = vpop.permute.xlu1 %5724  ;;  %vm5503_vm6 = vmor %vm5423_vm2, %vm5487_vm1 }
 0x71d   : > { %6645 = vperm.xlu1 %9424, %v18473_v9   ;;  %v8316_v27 = vsel %vm5503_vm6, 1.0, %v17587_v17  ;;  %vm15982_vm5 = vmor %vm5824_vm15, %vm5888_vm0  ;;  %vm5745_vm1 = vcmp.eq.s32.totalorder %v5725_v48, %v10545_v54 }
 0x721   : > { %9425 = vset.pattern.permute.xlu1 %v18362_v42  ;;  %v5789_v55 = vpop.permute.xlu1 %5788 }
 0x722   : > { %6101 = vperm.xlu1 %9425, %v9772_v60   ;;  %vm5809_vm13 = vcmp.eq.s32.totalorder %v5789_v55, %v10545_v54 }
 0x723   : > { %vm5825_vm3 = vmor %vm5745_vm1, %vm5809_vm13 }
 0x726   : > { %9426 = vset.pattern.permute.xlu1 %v18342_v62  ;;  %v15942_v28 = vpop.permute.xlu1 %5326 }
 0x727   : > { %6162 = vperm.xlu1 %9426, %v18474_v31   ;;  %v18477_v31 = vld [vmem:[#allocation21_spill] sm:$0xff]  ;;  %vm5345_vm8 = vcmp.eq.s32.totalorder %v15942_v28, %v10545_v54 }
 0x72b   : > { %6504 = vperm.xlu1 %9426, %v9773_v49   ;;  %v15946_v18 = vpop.permute.xlu1 %5390 }
 0x72f   : > { %6507 = vperm.xlu1 %9426, %v9772_v60   ;;  %v5394_v9 = vpop.permute.xlu1 %5393 }
 0x730   : > { %vm5410_vm12 = vcmp.eq.s32.totalorder %v5394_v9, %v10545_v54  ;;  %v18482_v9 = vld [vmem:[#allocation76_spill] sm:$0xff] }
 0x731   : > { %vm5346_vm2 = vcmp.eq.s32.totalorder %v18482_v9, %v10545_v54 }
 0x732   : > { %vm5426_vm4 = vmor %vm5346_vm2, %vm5410_vm12 }
 0x733   : > { %9427 = vset.pattern.permute.xlu1 %v18448_v3 }
 0x734   : > { %6571 = vperm.xlu1 %9427, %v18477_v31   ;;  %v5468_v49 = vpop.permute.xlu1 %5467 }
 0x735   : > { %vm5488_vm9 = vcmp.eq.s32.totalorder %v5468_v49, %v10545_v54  ;;  %v18478_v49 = vmax.f32 %v15470_v40, %v15437_v56  ;;  %v18483_v56 = vmax.f32 %v15481_v24, %v15453_v10  ;;  %v8340_v10 = vsel %vm15982_vm5, 1.0, %v17587_v17 }
 0x736   : > { %vm5504_vm10 = vmor %vm5424_vm7, %vm5488_vm9  ;;  %vm5490_vm7 = vcmp.eq.s32.totalorder %v15797_v5, %v10545_v54 }
 0x737   : > { %v8317_v63 = vsel %vm5504_vm10, 1.0, %v17587_v17  ;;  %vm5409_vm10 = vcmp.eq.s32.totalorder %v15946_v18, %v10545_v54  ;;  %vm5506_vm14 = vmor %vm5426_vm4, %vm5490_vm7 }
 0x738   : > { %v5545_v60 = vpack.c.bf16 %v8317_v63, %v8316_v27  ;;  %9428 = vset.pattern.permute.xlu1 %v18362_v42  ;;  %v18481_v63 = vmax.f32 %v15475_v11, %v15446_v61  ;;  %v18484_v61 = vmax.f32 %v15486_v26, %v15466_v44  ;;  %v9774_v44 = vld [vmem:[%s10165_s26 + $0x30] sm:$0xff]  ;;  %vm5425_vm15 = vmor %vm5345_vm8, %vm5409_vm10 }
 0x739   : > { %6104 = vperm.xlu1 %9428, %v15398_v7   ;;  %v15963_v36 = vpop.permute.xlu1 %5727 }
 0x73a   : > { %9050 = vmatprep.mubr.msk.bf16.mxu0 %vm766_vm11, %v5545_v60  ;;  %vm5746_vm2 = vcmp.eq.s32.totalorder %v15963_v36, %v10545_v54 }
 0x73d   : > { %9429 = vset.pattern.permute.xlu1 %v18342_v62 }
 0x73e   : > { %6168 = vperm.xlu1 %9429, %v18383_v53   ;;  %v15968_v1 = vpop.permute.xlu1 %5791 }
 0x73f   : > { %vm5810_vm12 = vcmp.eq.s32.totalorder %v15968_v1, %v10545_v54 }
 0x740   : > { %vm5826_vm4 = vmor %vm5746_vm2, %vm5810_vm12 }
 0x742   : > { %6171 = vperm.xlu1 %9429, %v18386_v38   ;;  %v5795_v31 = vpop.permute.xlu1 %5794 }
 0x744   : > { %v9040_v7 = vpop.f32.mrb[96].mxu0 }
 0x745   : > { %v15980_v27 = vmax.f32 %v9040_v7, %v18478_v49  ;;  %v5605_v47 = vpop.f32.mrb[97].mxu0 }
 0x746   : > { %v15990_v60 = vmax.f32 %v5605_v47, %v18481_v63  ;;  %9430 = vset.pattern.permute.xlu1 %v18448_v3  ;;  %v9041_v55 = vpop.f32.mrb[98].mxu0  ;;  %v8319_v47 = vsel %vm5506_vm14, 1.0, %v17587_v17  ;;  %vm6133_vm14 = vcmp.eq.s32.totalorder %v15802_v39, %v10545_v54 }
 0x747   : > { %v15998_v40 = vmax.f32 %v9041_v55, %v18483_v56  ;;  %6245 = vperm.xlu1 %9430, %v18389_v45   ;;  %v5869_v48 = vpop.permute.xlu1 %5868  ;;  %v5608_v51 = vpop.f32.mrb[99].mxu0 }
 0x748   : > { %vm5889_vm6 = vcmp.eq.s32.totalorder %v5869_v48, %v10545_v54  ;;  %v16005_v11 = vmax.f32 %v5608_v51, %v18484_v61  ;;  %v18485_v61 = vld [vmem:[#allocation58_spill] sm:$0xff] }
 0x749   : > { %vm5905_vm9 = vmor %vm5825_vm3, %vm5889_vm6  ;;  %vm5747_vm1 = vcmp.eq.s32.totalorder %v18485_v61, %v10545_v54  ;;  %vm5811_vm3 = vcmp.eq.s32.totalorder %v5795_v31, %v10545_v54 }
 0x74a   : > { %v8341_v24 = vsel %vm5905_vm9, 1.0, %v17587_v17  ;;  %vm5827_vm7 = vmor %vm5747_vm1, %vm5811_vm3 }
 0x74b   : > { %v5946_v7 = vpack.c.bf16 %v8341_v24, %v8340_v10  ;;  %9431 = vset.pattern.permute.xlu1 %v18342_v62 }
 0x74c   : > { %6510 = vperm.xlu1 %9431, %v9774_v44   ;;  %v5471_v26 = vpop.permute.xlu1 %5470 }
 0x74d   : > { %vm5489_vm0 = vcmp.eq.s32.totalorder %v5471_v26, %v10545_v54  ;;  %v16020_v5 = vpop.f32.mrb[96].mxu1  ;;  %9078 = vmatprep.mubr.msk.bf16.mxu1 %vm766_vm11, %v5946_v7  ;;  %v6151_v26 = vpop.permute.xlu0 %6150 }
 0x74e   : > { %vm5505_vm13 = vmor %vm5425_vm15, %vm5489_vm0  ;;  %v6477_v18 = vmax.f32 %v16020_v5, %v15980_v27  ;;  %v16025_v49 = vpop.f32.mrb[97].mxu1  ;;  %vm6197_vm0 = vcmp.eq.s32.totalorder %v6151_v26, %v10545_v54 }
 0x74f   : > { %v8318_v28 = vsel %vm5505_vm13, 1.0, %v17587_v17  ;;  %v6475_v15 = vmax.f32 %v16025_v49, %v15990_v60  ;;  %v16031_v63 = vpop.f32.mrb[98].mxu1 }
 0x750   : > { %v5546_v55 = vpack.c.bf16 %v8319_v47, %v8318_v28  ;;  %v6478_v9 = vmax.f32 %v16031_v63, %v15998_v40  ;;  %9432 = vset.pattern.permute.xlu1 %v18448_v3  ;;  %v16036_v56 = vpop.f32.mrb[99].mxu1 }
 0x751   : > { %v6476_v48 = vmax.f32 %v16036_v56, %v16005_v11  ;;  %6574 = vperm.xlu1 %9432, %v18383_v53   ;;  %v5872_v51 = vpop.permute.xlu1 %5871 }
 0x752   : > { %vm5890_vm5 = vcmp.eq.s32.totalorder %v5872_v51, %v10545_v54  ;;  %9051 = vmatmul.mubr.msk.bf16.gmra.mrb[108].mxu0 %vm766_vm11, %v5546_v55  ;;  %v6496_v51 = vpop.permute.xlu0 %6495 }
 0x753   : > { %vm5906_vm6 = vmor %vm5826_vm4, %vm5890_vm5 }
 0x754   : > { %v8342_v53 = vsel %vm5906_vm6, 1.0, %v17587_v17  ;;  %vm6213_vm5 = vmor %vm6133_vm14, %vm6197_vm0 }
 0x755   : > { %6577 = vperm.xlu1 %9432, %v18386_v38   ;;  %v5875_v1 = vpop.permute.xlu1 %5874 }
 0x756   : > { %vm5891_vm9 = vcmp.eq.s32.totalorder %v5875_v1, %v10545_v54  ;;  %v6157_v1 = vpop.permute.xlu0 %6156 }
 0x757   : > { %vm5907_vm10 = vmor %vm5827_vm7, %vm5891_vm9  ;;  %vm6540_vm9 = vcmp.eq.s32.totalorder %v6496_v51, %v10545_v54 }
 0x758   : > { %v8343_v10 = vsel %vm5907_vm10, 1.0, %v17587_v17 }
 0x759   : > { %v5947_v24 = vpack.c.bf16 %v8343_v10, %v8342_v53  ;;  %9434 = vset.pattern.permute.xlu1 %v18470_v19 }
 0x75a   : > { %6651 = vperm.xlu1 %9434, %v18389_v45   ;;  %v6090_v36 = vpop.permute.xlu1 %6089 }
 0x75b   : > { %9079 = vmatmul.mubr.msk.bf16.gmra.mrb[108].mxu1 %vm766_vm11, %v5947_v24  ;;  %vm6134_vm15 = vcmp.eq.s32.totalorder %v6090_v36, %v10545_v54  ;;  %v18491_v36 = vld [vmem:[#allocation56_spill] sm:$0xff] }
 0x75e   : > { %9435 = vset.pattern.permute.xlu1 %v18448_v3 }
 0x75f   : > { %6248 = vperm.xlu1 %9435, %v18402_v34   ;;  %v6154_v38 = vpop.permute.xlu1 %6153 }
 0x760   : > { %vm6198_vm8 = vcmp.eq.s32.totalorder %v6154_v38, %v10545_v54  ;;  %v18492_v38 = vmax.f32 %v15621_v0, %v15584_v50  ;;  %v18494_v0 = vmax.f32 %v15633_v6, %v15599_v58 }
 0x761   : > { %vm6214_vm12 = vmor %vm6134_vm15, %vm6198_vm8 }
 0x763   : > { %9436 = vset.pattern.permute.xlu1 %v18470_v19  ;;  %v6493_v31 = vpop.permute.xlu1 %6492 }
 0x764   : > { %6654 = vperm.xlu1 %9436, %v18402_v34   ;;  %vm6539_vm7 = vcmp.eq.s32.totalorder %v6493_v31, %v10545_v54 }
 0x768   : > { %6657 = vperm.xlu1 %9436, %v18280_v12   ;;  %v6557_v7 = vpop.permute.xlu1 %6556  ;;  %v18486_v12 = vld [vmem:[#allocation18_spill] sm:$0xff] }
 0x769   : > { %vm6278_vm13 = vcmp.eq.s32.totalorder %v18486_v12, %v10545_v54  ;;  %vm6603_vm4 = vcmp.eq.s32.totalorder %v6557_v7, %v10545_v54 }
 0x76a   : > { %vm6294_vm1 = vmor %vm6214_vm12, %vm6278_vm13 }
 0x76b   : > { %vm6619_vm8 = vmor %vm6539_vm7, %vm6603_vm4 }
 0x76c   : > { %9437 = vset.pattern.permute.xlu1 %v18362_v42 }
 0x76d   : > { %6113 = vperm.xlu1 %9437, %v15525_v32   ;;  %v16064_v45 = vpop.permute.xlu1 %6092  ;;  %v9775_v32 = vld [vmem:[%s10165_s26 + $0x48] sm:$0xff] }
 0x76e   : > { %vm6135_vm4 = vcmp.eq.s32.totalorder %v16064_v45, %v10545_v54 }
 0x771   : > { %9438 = vset.pattern.permute.xlu1 %v18342_v62  ;;  %v6096_v44 = vpop.permute.xlu1 %6095 }
 0x772   : > { %6174 = vperm.xlu1 %9438, %v18282_v29   ;;  %vm6136_vm13 = vcmp.eq.s32.totalorder %v6096_v44, %v10545_v54 }
 0x776   : > { %6516 = vperm.xlu1 %9438, %v15534_v23   ;;  %v6160_v34 = vpop.permute.xlu1 %6159  ;;  %v8353_v23 = vsel %vm6294_vm1, 1.0, %v17587_v17  ;;  %vm6280_vm1 = vcmp.eq.s32.totalorder %v18491_v36, %v10545_v54 }
 0x777   : > { %vm6200_vm14 = vcmp.eq.s32.totalorder %v6160_v34, %v10545_v54  ;;  %v18493_v34 = vmax.f32 %v15626_v22, %v15593_v14  ;;  %v18495_v14 = vld [vmem:[#allocation53_spill] sm:$0xff] }
 0x778   : > { %vm16103_vm12 = vmor %vm6136_vm13, %vm6200_vm14  ;;  %v18496_v22 = vld [vmem:[#allocation85_spill] sm:$0xff] }
 0x77a   : > { %6519 = vperm.xlu1 %9438, %v9775_v32  }
 0x77b   : > { %v6231_v29 = vpop.permute.xlu1 %6230 }
 0x77c   : > { %vm6277_vm2 = vcmp.eq.s32.totalorder %v6231_v29, %v10545_v54 }
 0x77d   : > { %vm6293_vm3 = vmor %vm6213_vm5, %vm6277_vm2  ;;  %vm6199_vm2 = vcmp.eq.s32.totalorder %v6157_v1, %v10545_v54 }
 0x77e   : > { %v8352_v39 = vsel %vm6293_vm3, 1.0, %v17587_v17  ;;  %9439 = vset.pattern.permute.xlu1 %v18448_v3  ;;  %vm6215_vm7 = vmor %vm6135_vm4, %vm6199_vm2  ;;  %vm6137_vm4 = vcmp.eq.s32.totalorder %v15806_v33, %v10545_v54  ;;  %v18503_v33 = vld [vmem:[#allocation27_spill] sm:$0xff] }
 0x77f   : > { %v6341_v47 = vpack.c.bf16 %v8353_v23, %v8352_v39  ;;  %6583 = vperm.xlu1 %9439, %v18350_v46   ;;  %v18487_v46 = vld [vmem:[#allocation37_spill] sm:$0xff]  ;;  %v18497_v23 = vmax.f32 %v18495_v14, %v18496_v22  ;;  %v18527_v14 = vld [vmem:[#allocation39_spill] sm:$0xff] }
 0x780   : > { %v16082_v28 = vpop.permute.xlu1 %6498  ;;  %vm6604_vm6 = vcmp.eq.s32.totalorder %v18487_v46, %v10545_v54  ;;  %v9776_v46 = vld [vmem:[%s10165_s26 + $0x50] sm:$0xff] }
 0x781   : > { %9094 = vmatprep.mubr.msk.bf16.mxu0 %vm766_vm11, %v6341_v47  ;;  %vm6620_vm15 = vmor %vm6540_vm9, %vm6604_vm6  ;;  %vm6541_vm14 = vcmp.eq.s32.totalorder %v16082_v28, %v10545_v54 }
 0x782   : > { %vm6296_vm6 = vmor %vm16103_vm12, %vm6280_vm1 }
 0x783   : > { %9440 = vset.pattern.permute.xlu1 %v18362_v42  ;;  %v8355_v58 = vsel %vm6296_vm6, 1.0, %v17587_v17 }
 0x784   : > { %6116 = vperm.xlu1 %9440, %v15554_v25   ;;  %v16087_v55 = vpop.permute.xlu1 %6501  ;;  %v18488_v25 = vld [vmem:[#allocation71_spill] sm:$0xff] }
 0x785   : > { %vm6683_vm10 = vcmp.eq.s32.totalorder %v18488_v25, %v10545_v54  ;;  %v18498_v25 = vld [vmem:[#allocation77_spill] sm:$0xff]  ;;  %vm6542_vm12 = vcmp.eq.s32.totalorder %v16087_v55, %v10545_v54 }
 0x786   : > { %vm6699_vm0 = vmor %vm6619_vm8, %vm6683_vm10  ;;  %vm6605_vm8 = vcmp.eq.s32.totalorder %v18498_v25, %v10545_v54  ;;  %v6166_v25 = vpop.permute.xlu0 %6165 }
 0x787   : > { %v8377_v44 = vsel %vm6699_vm0, 1.0, %v17587_v17  ;;  %vm6621_vm13 = vmor %vm6541_vm14, %vm6605_vm8  ;;  %vm6687_vm14 = vcmp.eq.s32.totalorder %v18503_v33, %v10545_v54  ;;  %v18515_v33 = vld [vmem:[#allocation59_spill] sm:$0xff] }
 0x788   : > { %9441 = vset.pattern.permute.xlu1 %v18342_v62 }
 0x789   : > { %6180 = vperm.xlu1 %9441, %v18291_v8   ;;  %v16092_v61 = vpop.permute.xlu1 %6565 }
 0x78a   : > { %vm6606_vm0 = vcmp.eq.s32.totalorder %v16092_v61, %v10545_v54  ;;  %v18529_v61 = vld [vmem:[#allocation43_spill] sm:$0xff] }
 0x78b   : > { %vm6622_vm1 = vmor %vm6542_vm12, %vm6606_vm0  ;;  %vm6140_vm12 = vcmp.eq.s32.totalorder %v15811_v43, %v10545_v54 }
 0x78d   : > { %6183 = vperm.xlu1 %9441, %v18295_v35  }
 0x78e   : > { %v6640_v53 = vpop.permute.xlu1 %6639 }
 0x78f   : > { %vm6684_vm5 = vcmp.eq.s32.totalorder %v6640_v53, %v10545_v54  ;;  %v9044_v24 = vpop.f32.mrb[100].mxu0 }
 0x790   : > { %vm6700_vm3 = vmor %vm6620_vm15, %vm6684_vm5  ;;  %v16114_v31 = vmax.f32 %v9044_v24, %v18492_v38  ;;  %v5621_v7 = vpop.f32.mrb[101].mxu0 }
 0x791   : > { %v8378_v26 = vsel %vm6700_vm3, 1.0, %v17587_v17  ;;  %v16123_v12 = vmax.f32 %v5621_v7, %v18493_v34  ;;  %9442 = vset.pattern.permute.xlu1 %v18448_v3  ;;  %v9045_v32 = vpop.f32.mrb[102].mxu0 }
 0x792   : > { %v6747_v50 = vpack.c.bf16 %v8378_v26, %v8377_v44  ;;  %v16129_v29 = vmax.f32 %v9045_v32, %v18494_v0  ;;  %6257 = vperm.xlu1 %9442, %v18299_v30   ;;  %v5624_v45 = vpop.f32.mrb[103].mxu0  ;;  %v18500_v0 = vld [vmem:[#allocation49_spill] sm:$0xff] }
 0x793   : > { %v16140_v39 = vmax.f32 %v5624_v45, %v18497_v23  ;;  %v6237_v47 = vpop.permute.xlu1 %6236  ;;  %v18507_v23 = vld [vmem:[#allocation38_spill] sm:$0xff] }
 0x794   : > { %vm6279_vm9 = vcmp.eq.s32.totalorder %v6237_v47, %v10545_v54  ;;  %9122 = vmatprep.mubr.msk.bf16.mxu1 %vm766_vm11, %v6747_v50 }
 0x795   : > { %vm6295_vm10 = vmor %vm6215_vm7, %vm6279_vm9 }
 0x796   : > { %v8354_v6 = vsel %vm6295_vm10, 1.0, %v17587_v17  ;;  %9443 = vset.pattern.permute.xlu1 %v18342_v62  ;;  %vm6607_vm10 = vcmp.eq.s32.totalorder %v18500_v0, %v10545_v54 }
 0x797   : > { %v6342_v51 = vpack.c.bf16 %v8355_v58, %v8354_v6  ;;  %6522 = vperm.xlu1 %9443, %v9776_v46   ;;  %v18508_v58 = vld [vmem:[#allocation75_spill] sm:$0xff] }
 0x798   : > { %v6643_v1 = vpop.permute.xlu1 %6642  ;;  %v16154_v53 = vpop.f32.mrb[100].mxu1 }
 0x799   : > { %vm6685_vm15 = vcmp.eq.s32.totalorder %v6643_v1, %v10545_v54  ;;  %v6481_v10 = vmax.f32 %v16154_v53, %v16114_v31  ;;  %v16159_v24 = vpop.f32.mrb[101].mxu1  ;;  %9095 = vmatmul.mubr.msk.bf16.vlgmr.msra.gmra.mrb[112].mxu0 %vm766_vm11, %v6342_v51  ;;  %v18509_v51 = vld [vmem:[#allocation28_spill] sm:$0xff]  ;;  %v18510_v1 = vld [vmem:[#allocation45_spill] sm:$0xff] }
 0x79a   : > { %v6479_v36 = vmax.f32 %v16159_v24, %v16123_v12  ;;  %v16166_v38 = vpop.f32.mrb[102].mxu1  ;;  %vm6701_vm5 = vmor %vm6621_vm13, %vm6685_vm15 }
 0x79b   : > { %v6482_v28 = vmax.f32 %v16166_v38, %v16129_v29  ;;  %9444 = vset.pattern.permute.xlu1 %v18448_v3  ;;  %v16171_v7 = vpop.f32.mrb[103].mxu1  ;;  %v8379_v26 = vsel %vm6701_vm5, 1.0, %v17587_v17 }
 0x79c   : > { %6586 = vperm.xlu1 %9444, %v18291_v8   ;;  %v6646_v44 = vpop.permute.xlu1 %6645  ;;  %v18499_v8 = vld [vmem:[#allocation95_spill] sm:$0xff] }
 0x79d   : > { %vm6686_vm2 = vcmp.eq.s32.totalorder %v6646_v44, %v10545_v54  ;;  %vm6281_vm6 = vcmp.eq.s32.totalorder %v18499_v8, %v10545_v54 }
 0x79e   : > { %vm6702_vm3 = vmor %vm6622_vm1, %vm6686_vm2 }
 0x79f   : > { %v8380_v34 = vsel %vm6702_vm3, 1.0, %v17587_v17 }
 0x7a0   : > { %v6748_v32 = vpack.c.bf16 %v8380_v34, %v8379_v26  ;;  %6589 = vperm.xlu1 %9444, %v18295_v35   ;;  %v18511_v26 = vld [vmem:[#allocation60_spill] sm:$0xff] }
 0x7a1   : > { %v6102_v50 = vpop.permute.xlu1 %6101  ;;  %vm6284_vm1 = vcmp.eq.s32.totalorder %v18511_v26, %v10545_v54 }
 0x7a2   : > { %9123 = vmatmul.mubr.msk.bf16.vlgmr.msra.gmra.mrb[112].mxu1 %vm766_vm11, %v6748_v32  ;;  %vm6138_vm3 = vcmp.eq.s32.totalorder %v6102_v50, %v10545_v54 }
 0x7a4   : > { %9445 = vset.pattern.permute.xlu1 %v18470_v19 }
 0x7a5   : > { %6663 = vperm.xlu1 %9445, %v18299_v30   ;;  %v18504_v30 = vld [vmem:[#allocation48_spill] sm:$0xff] }
 0x7a6   : > { %v6163_v55 = vpop.permute.xlu1 %6162 }
 0x7a7   : > { %vm6201_vm7 = vcmp.eq.s32.totalorder %v6163_v55, %v10545_v54  ;;  %v18514_v55 = vld [vmem:[#allocation29_spill] sm:$0xff] }
 0x7a8   : > { %vm6217_vm9 = vmor %vm6137_vm4, %vm6201_vm7  ;;  %vm6202_vm4 = vcmp.eq.s32.totalorder %v6166_v25, %v10545_v54  ;;  %v18519_v25 = vld [vmem:[#allocation69_spill] sm:$0xff] }
 0x7a9   : > { %vm16192_vm8 = vmor %vm6217_vm9, %vm6281_vm6  ;;  %9446 = vset.pattern.permute.xlu1 %v18448_v3 }
 0x7aa   : > { %6260 = vperm.xlu1 %9446, %v18504_v30   ;;  %v6505_v45 = vpop.permute.xlu1 %6504  ;;  %vm6218_vm7 = vmor %vm6138_vm3, %vm6202_vm4  ;;  %v8356_v32 = vsel %vm16192_vm8, 1.0, %v17587_v17 }
 0x7ab   : > { %vm6543_vm15 = vcmp.eq.s32.totalorder %v6505_v45, %v10545_v54  ;;  %v18516_v45 = vld [vmem:[#allocation30_spill] sm:$0xff] }
 0x7ac   : > { %vm6623_vm0 = vmor %vm6543_vm15, %vm6607_vm10 }
 0x7ad   : > { %vm16201_vm13 = vmor %vm6623_vm0, %vm6687_vm14 }
 0x7ae   : > { %9448 = vset.pattern.permute.xlu1 %v18470_v19  ;;  %v6508_v22 = vpop.permute.xlu1 %6507 }
 0x7af   : > { %6666 = vperm.xlu1 %9448, %v18504_v30   ;;  %vm6544_vm14 = vcmp.eq.s32.totalorder %v6508_v22, %v10545_v54 }
 0x7b3   : > { %6669 = vperm.xlu1 %9448, %v18507_v23   ;;  %v6572_v47 = vpop.permute.xlu1 %6571  ;;  %v18517_v23 = vld [vmem:[#allocation31_spill] sm:$0xff] }
 0x7b4   : > { %vm6608_vm8 = vcmp.eq.s32.totalorder %v6572_v47, %v10545_v54  ;;  %v8381_v47 = vsel %vm16201_vm13, 1.0, %v17587_v17 }
 0x7b5   : > { %vm6624_vm15 = vmor %vm6544_vm14, %vm6608_vm8 }
 0x7b7   : > { %9449 = vset.pattern.permute.xlu1 %v18362_v42 }
 0x7b8   : > { %6125 = vperm.xlu1 %9449, %v18508_v58   ;;  %v6105_v6 = vpop.permute.xlu1 %6104 }
 0x7b9   : > { %vm6139_vm13 = vcmp.eq.s32.totalorder %v6105_v6, %v10545_v54  ;;  %v6514_v6 = vpop.permute.xlu0 %6513 }
 0x7bc   : > { %9450 = vset.pattern.permute.xlu1 %v18342_v62 }
 0x7bd   : > { %6186 = vperm.xlu1 %9450, %v18509_v51   ;;  %v6169_v46 = vpop.permute.xlu1 %6168 }
 0x7c1   : > { %6528 = vperm.xlu1 %9450, %v18510_v1   ;;  %v6172_v44 = vpop.permute.xlu1 %6171 }
 0x7c2   : > { %vm6204_vm5 = vcmp.eq.s32.totalorder %v6172_v44, %v10545_v54 }
 0x7c3   : > { %vm6220_vm2 = vmor %vm6140_vm12, %vm6204_vm5  ;;  %vm6203_vm5 = vcmp.eq.s32.totalorder %v6169_v46, %v10545_v54 }
 0x7c4   : > { %vm16220_vm6 = vmor %vm6220_vm2, %vm6284_vm1 }
 0x7c5   : > { %6531 = vperm.xlu1 %9450, %v18508_v58   ;;  %vm6219_vm1 = vmor %vm6139_vm13, %vm6203_vm5 }
 0x7c6   : > { %v6246_v43 = vpop.permute.xlu1 %6245 }
 0x7c7   : > { %vm6282_vm9 = vcmp.eq.s32.totalorder %v6246_v43, %v10545_v54  ;;  %v18521_v43 = vld [vmem:[#allocation44_spill] sm:$0xff] }
 0x7c8   : > { %vm6298_vm10 = vmor %vm6218_vm7, %vm6282_vm9 }
 0x7c9   : > { %v8357_v8 = vsel %vm6298_vm10, 1.0, %v17587_v17  ;;  %9451 = vset.pattern.permute.xlu1 %v18448_v3  ;;  %vm6546_vm10 = vcmp.eq.s32.totalorder %v6514_v6, %v10545_v54 }
 0x7ca   : > { %v6343_v50 = vpack.c.bf16 %v8357_v8, %v8356_v32  ;;  %6595 = vperm.xlu1 %9451, %v18514_v55   ;;  %v18522_v32 = vld [vmem:[#allocation67_spill] sm:$0xff] }
 0x7cb   : > { %v6511_v0 = vpop.permute.xlu1 %6510  ;;  %v18523_v8 = vmax.f32 %v18521_v43, %v18522_v32 }
 0x7cc   : > { %9098 = vmatprep.mubr.msk.bf16.mxu0 %vm766_vm11, %v6343_v50  ;;  %vm6545_vm7 = vcmp.eq.s32.totalorder %v6511_v0, %v10545_v54  ;;  %v9475_v0 = vld [vmem:[%s17074_s4 + $0x14] ss:$8 sps:$4 sm:$0xff]  }
 0x7ce   : > { %9452 = vset.pattern.permute.xlu1 %v18362_v42  ;;  %v18518_v42 = vld [vmem:[#allocation84_spill] sm:$0xff] }
 0x7cf   : > { %6128 = vperm.xlu1 %9452, %v18515_v33   ;;  %v18520_v1 = vmax.f32 %v18518_v42, %v18519_v25 }
 0x7d0   : > { %v6575_v30 = vpop.permute.xlu1 %6574 }
 0x7d1   : > { %vm6609_vm4 = vcmp.eq.s32.totalorder %v6575_v30, %v10545_v54 }
 0x7d2   : > { %vm6625_vm8 = vmor %vm6545_vm7, %vm6609_vm4 }
 0x7d3   : > { %9454 = vset.pattern.permute.xlu1 %v18342_v62 }
 0x7d4   : > { %6192 = vperm.xlu1 %9454, %v18516_v45   ;;  %v6578_v35 = vpop.permute.xlu1 %6577 }
 0x7d5   : > { %vm6610_vm9 = vcmp.eq.s32.totalorder %v6578_v35, %v10545_v54  ;;  %v9476_v35 = vld [vmem:[%s17074_s4 + $0x20] ss:$8 sps:$4 sm:$0xff]  }
 0x7d8   : > { %6195 = vperm.xlu1 %9454, %v18517_v23  }
 0x7d9   : > { %v6652_v58 = vpop.permute.xlu1 %6651 }
 0x7da   : > { %vm6688_vm0 = vcmp.eq.s32.totalorder %v6652_v58, %v10545_v54  ;;  %v9048_v51 = vpop.f32.mrb[104].mxu0  ;;  %v18524_v58 = vld [vmem:[#allocation25_spill] sm:$0xff] }
 0x7db   : > { %vm6704_vm12 = vmor %vm6624_vm15, %vm6688_vm0  ;;  %v16244_v44 = vmax.f32 %v9048_v51, %v18520_v1  ;;  %v5637_v26 = vpop.f32.mrb[105].mxu0  ;;  %v18525_v51 = vld [vmem:[#allocation86_spill] sm:$0xff]  ;;  %v18528_v1 = vld [vmem:[#allocation96_spill] sm:$0xff] }
 0x7dc   : > { %v8382_v22 = vsel %vm6704_vm12, 1.0, %v17587_v17  ;;  %v16254_v50 = vmax.f32 %v5637_v26, %v18523_v8  ;;  %9455 = vset.pattern.permute.xlu1 %v18448_v3  ;;  %v9049_v55 = vpop.f32.mrb[106].mxu0  ;;  %v18526_v42 = vmax.f32 %v18524_v58, %v18525_v51  ;;  %v18530_v43 = vmax.f32 %v18528_v1, %v18529_v61  ;;  %v9777_v61 = vld [vmem:[%s10165_s26 + $0x70] sm:$0xff]  ;;  %vm6626_vm15 = vmor %vm6546_vm10, %vm6610_vm9  ;;  %s9960_s26 = smov [#allocation8]  }
 0x7dd   : > { %v6749_v33 = vpack.c.bf16 %v8382_v22, %v8381_v47  ;;  %6269 = vperm.xlu1 %9455, %v18527_v14   ;;  %v5640_v46 = vpop.f32.mrb[107].mxu0  ;;  %v8359_v47 = vsel %vm16220_vm6, 1.0, %v17587_v17  ;;  %s9866_s15 = sshll.u32 %s9960_s26, 4  ;;  %s9867_s15 = int_to_ptr.vmem [resolvable:$false] %s9866_s15 }
 0x7de   : > { %v16260_v25 = vmax.f32 %v9049_v55, %v18526_v42  ;;  %v16267_v26 = vmax.f32 %v5640_v46, %v18530_v43  ;;  %v6249_v32 = vpop.permute.xlu1 %6248  ;;  %v9470_v55 = vld [vmem:[%s17074_s4] ss:$8 sps:$4 sm:$0xff]   ;;  %s9868_s21 = scalar_lea.vmem %s9867_s15, 4096  ;;  %p9869_p4 = scmp.lt.s32.totalorder %s17021_s2, %s9867_s15 }
 0x7df   : > { %vm6283_vm2 = vcmp.eq.s32.totalorder %v6249_v32, %v10545_v54  ;;  %9126 = vmatprep.mubr.msk.bf16.mxu1 %vm766_vm11, %v6749_v33  ;;  %v9472_v33 = vld [vmem:[%s17074_s4 + $0x4] ss:$8 sps:$4 sm:$0xff]   ;;  %p9870_p7 = scmp.lt.s32.totalorder %s9868_s21, %s9862_s28 }
 0x7e0   : > { %vm6299_vm3 = vmor %vm6219_vm1, %vm6283_vm2  ;;  %7068 = vmatprep.subr.bf16.mxu0 %v9472_v33  ;;  %v9479_v33 = vld [vmem:[%s17074_s4 + $0x30] ss:$8 sps:$4 sm:$0xff]  }
 0x7e1   : > { %v8358_v22 = vsel %vm6299_vm3, 1.0, %v17587_v17  ;;  %9456 = vset.pattern.permute.xlu1 %v18342_v62  ;;  %7069 = vmatpush1.bf16.msra.mxu0 %v9470_v55  ;;  %v9481_v55 = vld [vmem:[%s17074_s4 + $0x34] ss:$8 sps:$4 sm:$0xff]   ;;  %p9871_p8 = por %p9870_p7, %p9869_p4 }
 0x7e2   : > { %v6344_v8 = vpack.c.bf16 %v8359_v47, %v8358_v22  ;;  %6534 = vperm.xlu1 %9456, %v9777_v61   ;;  %v9473_v47 = vld [vmem:[%s17074_s4 + $0x10] ss:$8 sps:$4 sm:$0xff]   ;;  %7070 = vmatprep.subr.bf16.mxu0 %v9475_v0  ;;  %v9484_v0 = vld [vmem:[%s17074_s4 + $0x44] ss:$8 sps:$4 sm:$0xff]  }
 0x7e3   : > { %v6655_v34 = vpop.permute.xlu1 %6654  ;;  %v16284_v58 = vpop.f32.mrb[104].mxu1  ;;  %p9872_p11 = pnand %p9871_p8, %p9865_p3 }
 0x7e4   : > { %vm6689_vm6 = vcmp.eq.s32.totalorder %v6655_v34, %v10545_v54  ;;  %v6485_v62 = vmax.f32 %v16284_v58, %v16244_v44  ;;  %v16289_v51 = vpop.f32.mrb[105].mxu1  ;;  %9099 = vmatmul.mubr.msk.bf16.gmra.mrb[116].mxu0 %vm766_vm11, %v6344_v8  ;;  %v18531_v34 = vld [vmem:[#allocation87_spill] sm:$0xff] }
 0x7e5   : > { %v6483_v30 = vmax.f32 %v16289_v51, %v16254_v50  ;;  %v16297_v42 = vpop.f32.mrb[106].mxu1  ;;  %vm6705_vm14 = vmor %vm6625_vm8, %vm6689_vm6  ;;  %7071 = vmatpush1.bf16.msra.mxu0 %v9473_v47  ;;  %vm6141_vm5 = vcmp.eq.s32.totalorder %v18531_v34, %v10545_v54  ;;  %v9491_v34 = vld [vmem:[%s17074_s4 + $0x70] ss:$8 sps:$4 sm:$0xff]  }
 0x7e6   : > { %9458 = vset.pattern.permute.xlu1 %v18448_v3  ;;  %v16302_v1 = vpop.f32.mrb[107].mxu1  ;;  %v8383_v22 = vsel %vm6705_vm14, 1.0, %v17587_v17 }
 0x7e7   : > { %6598 = vperm.xlu1 %9458, %v18516_v45   ;;  %v6658_v32 = vpop.permute.xlu1 %6657  ;;  %v9478_v45 = vld [vmem:[%s17074_s4 + $0x24] ss:$8 sps:$4 sm:$0xff]  }
 0x7e8   : > { %vm6690_vm0 = vcmp.eq.s32.totalorder %v6658_v32, %v10545_v54  ;;  %7072 = vmatprep.subr.bf16.mxu0 %v9478_v45  ;;  %v18532_v32 = vld [vmem:[#allocation64_spill] sm:$0xff]  ;;  %v9487_v45 = vld [vmem:[%s17074_s4 + $0x54] ss:$8 sps:$4 sm:$0xff]  }
 0x7e9   : > { %vm6706_vm12 = vmor %vm6626_vm15, %vm6690_vm0  ;;  %7073 = vmatpush1.bf16.msra.mxu0 %v9476_v35  ;;  %vm6285_vm1 = vcmp.eq.s32.totalorder %v18532_v32, %v10545_v54  ;;  %v6178_v32 = vpop.permute.xlu0 %6177 }
 0x7ea   : > { %v8384_v6 = vsel %vm6706_vm12, 1.0, %v17587_v17  ;;  %7074 = vmatprep.subr.bf16.mxu0 %v9481_v55  ;;  %v9488_v55 = vld [vmem:[%s17074_s4 + $0x60] ss:$8 sps:$4 sm:$0xff]   ;;  %vm6206_vm10 = vcmp.eq.s32.totalorder %v6178_v32, %v10545_v54 }
 0x7eb   : > { %v6750_v8 = vpack.c.bf16 %v8384_v6, %v8383_v22  ;;  %6601 = vperm.xlu1 %9458, %v18517_v23   ;;  %v18535_v22 = vld [vmem:[#allocation50_spill] sm:$0xff] }
 0x7ec   : > { %v6114_v61 = vpop.permute.xlu1 %6113 }
 0x7ed   : > { %9127 = vmatmul.mubr.msk.bf16.gmra.mrb[116].mxu1 %vm766_vm11, %v6750_v8  ;;  %7075 = vmatpush1.bf16.msra.mxu0 %v9479_v33  ;;  %v9485_v8 = vld [vmem:[%s17074_s4 + $0x50] ss:$8 sps:$4 sm:$0xff]   ;;  %vm6142_vm8 = vcmp.eq.s32.totalorder %v6114_v61, %v10545_v54 }
 0x7ee   : > { %7076 = vmatprep.subr.bf16.mxu0 %v9484_v0  ;;  %v18536_v33 = vld [vmem:[#allocation41_spill] sm:$0xff]  ;;  %vm6222_vm15 = vmor %vm6142_vm8, %vm6206_vm10 }
 0x7ef   : > { %9460 = vset.pattern.permute.xlu1 %v18470_v19 }
 0x7f0   : > { %6675 = vperm.xlu1 %9460, %v18527_v14   ;;  %v9482_v14 = vld [vmem:[%s17074_s4 + $0x40] ss:$8 sps:$4 sm:$0xff]  }
 0x7f1   : > { %v6175_v23 = vpop.permute.xlu1 %6174  ;;  %7077 = vmatpush1.bf16.msra.mxu0 %v9482_v14 }
 0x7f2   : > { %vm6205_vm13 = vcmp.eq.s32.totalorder %v6175_v23, %v10545_v54  ;;  %7078 = vmatprep.subr.bf16.mxu0 %v9487_v45 }
 0x7f3   : > { %vm6221_vm2 = vmor %vm6141_vm5, %vm6205_vm13 }
 0x7f4   : > { %vm16347_vm3 = vmor %vm6221_vm2, %vm6285_vm1  ;;  %9461 = vset.pattern.permute.xlu1 %v18448_v3  ;;  %v9490_v3 = vld [vmem:[%s17074_s4 + $0x64] ss:$8 sps:$4 sm:$0xff]  }
 0x7f5   : > { %6272 = vperm.xlu1 %9461, %v18535_v22   ;;  %v6517_v6 = vpop.permute.xlu1 %6516  ;;  %7079 = vmatpush1.bf16.msra.mxu0 %v9485_v8  ;;  %v18537_v8 = vld [vmem:[#allocation70_spill] sm:$0xff] }
 0x7f6   : > { %7080 = vmatprep.subr.bf16.mxu0 %v9490_v3  ;;  %vm6144_vm4 = vcmp.eq.s32.totalorder %v18537_v8, %v10545_v54  ;;  %v18538_v3 = vld [vmem:[#allocation83_spill] sm:$0xff]  ;;  %vm6547_vm5 = vcmp.eq.s32.totalorder %v6517_v6, %v10545_v54 }
 0x7f7   : > { %vm6288_vm7 = vcmp.eq.s32.totalorder %v18538_v3, %v10545_v54 }
 0x7f9   : > { %9462 = vset.pattern.permute.xlu1 %v18470_v19  ;;  %v6520_v35 = vpop.permute.xlu1 %6519  ;;  %7081 = vmatpush1.bf16.msra.mxu0 %v9488_v55  ;;  %v9493_v19 = vld [vmem:[%s17074_s4 + $0x74] ss:$8 sps:$4 sm:$0xff]  }
 0x7fa   : > { %6678 = vperm.xlu1 %9462, %v18535_v22   ;;  %7082 = vmatprep.subr.bf16.mxu0 %v9493_v19  ;;  %v16374_v22 = vpop.permute.xlu0 %6525 }
 0x7fd   : > { %7083 = vmatpush1.bf16.msra.mxu0 %v9491_v34  ;;  %v8360_v34 = vsel %vm16347_vm3, 1.0, %v17587_v17 }
 0x7fe   : > { %6681 = vperm.xlu1 %9462, %v18536_v33   ;;  %v6584_v23 = vpop.permute.xlu1 %6583  ;;  %v16387_v19 = vpop.permute.xlu0 %6189 }
 0x7ff   : > { %vm6612_vm3 = vcmp.eq.s32.totalorder %v6584_v23, %v10545_v54 }
 0x802   : > { %v16395_v61 = vpop.permute.xlu0 %6537 }
 0x803   : > { %v6117_v0 = vpop.permute.xlu1 %6116 }
 0x806   : > { %v6661_v43 = vpop.permute.xlu0 %6660 }
 0x807   : > { %vm6691_vm2 = vcmp.eq.s32.totalorder %v6661_v43, %v10545_v54 }
 0x808   : > { %v6181_v14 = vpop.permute.xlu1 %6180 }
 0x809   : > { %vm6207_vm8 = vcmp.eq.s32.totalorder %v6181_v14, %v10545_v54 }
 0x80c   : > { %v6184_v45 = vpop.permute.xlu1 %6183 }
 0x80d   : > { %vm6208_vm6 = vcmp.eq.s32.totalorder %v6184_v45, %v10545_v54 }
 0x80e   : > { %vm6224_vm9 = vmor %vm6144_vm4, %vm6208_vm6  ;;  %vm6548_vm6 = vcmp.eq.s32.totalorder %v6520_v35, %v10545_v54 }
 0x80f   : > { %vm16383_vm14 = vmor %vm6224_vm9, %vm6288_vm7 }
 0x810   : > { %vm6628_vm7 = vmor %vm6548_vm6, %vm6612_vm3  ;;  %v8363_v52 = vsel %vm16383_vm14, 1.0, %v17587_v17  ;;  %vm6550_vm14 = vcmp.eq.s32.totalorder %v16374_v22, %v10545_v54 }
 0x811   : > { %v6258_v33 = vpop.permute.xlu1 %6257 }
 0x812   : > { %vm6286_vm0 = vcmp.eq.s32.totalorder %v6258_v33, %v10545_v54  ;;  %v18541_v33 = vld [vmem:[#allocation55_spill] sm:$0xff] }
 0x813   : > { %vm6302_vm12 = vmor %vm6222_vm15, %vm6286_vm0  ;;  %vm6611_vm13 = vcmp.eq.s32.totalorder %v18541_v33, %v10545_v54  ;;  %vm6143_vm15 = vcmp.eq.s32.totalorder %v6117_v0, %v10545_v54 }
 0x814   : > { %v8361_v45 = vsel %vm6302_vm12, 1.0, %v17587_v17  ;;  %vm6627_vm1 = vmor %vm6547_vm5, %vm6611_vm13 }
 0x815   : > { %v6345_v32 = vpack.c.bf16 %v8361_v45, %v8360_v34  ;;  %vm6707_vm4 = vmor %vm6627_vm1, %vm6691_vm2 }
 0x816   : > { %v6523_v8 = vpop.permute.xlu1 %6522  ;;  %vm6223_vm0 = vmor %vm6143_vm15, %vm6207_vm8 }
 0x817   : > { %9102 = vmatprep.mubr.msk.bf16.mxu0 %vm766_vm11, %v6345_v32  ;;  %v8385_v32 = vsel %vm6707_vm4, 1.0, %v17587_v17  ;;  %vm6549_vm2 = vcmp.eq.s32.totalorder %v6523_v8, %v10545_v54 }
 0x81b   : > { %v6587_v3 = vpop.permute.xlu1 %6586 }
 0x81c   : > { %vm6613_vm13 = vcmp.eq.s32.totalorder %v6587_v3, %v10545_v54 }
 0x81d   : > { %vm6629_vm4 = vmor %vm6549_vm2, %vm6613_vm13 }
 0x81f   : > { %v6590_v46 = vpop.permute.xlu1 %6589 }
 0x820   : > { %vm6614_vm3 = vcmp.eq.s32.totalorder %v6590_v46, %v10545_v54 }
 0x824   : > { %v6664_v47 = vpop.permute.xlu1 %6663 }
 0x825   : > { %vm6692_vm9 = vcmp.eq.s32.totalorder %v6664_v47, %v10545_v54  ;;  %v9052_v34 = vpop.f32.mrb[108].mxu0 }
 0x826   : > { %vm6708_vm10 = vmor %vm6628_vm7, %vm6692_vm9  ;;  %v16407_v6 = vmax.f32 %v9052_v34, %v5682_v20  ;;  %v5653_v45 = vpop.f32.mrb[109].mxu0  ;;  %v18542_v20 = vmax.f32 %v15923_v21, %v15896_v13 }
 0x827   : > { %v8386_v43 = vsel %vm6708_vm10, 1.0, %v17587_v17  ;;  %v16415_v35 = vmax.f32 %v5653_v45, %v5680_v2  ;;  %v9053_v23 = vpop.f32.mrb[110].mxu0  ;;  %vm6630_vm7 = vmor %vm6550_vm14, %vm6614_vm3 }
 0x828   : > { %v6751_v33 = vpack.c.bf16 %v8386_v43, %v8385_v32  ;;  %v16420_v4 = vmax.f32 %v9053_v23, %v5683_v41  ;;  %v5656_v37 = vpop.f32.mrb[111].mxu0 }
 0x829   : > { %v16426_v14 = vmax.f32 %v5656_v37, %v18542_v20  ;;  %v6261_v47 = vpop.permute.xlu1 %6260  ;;  %v6673_v20 = vpop.permute.xlu0 %6672 }
 0x82a   : > { %vm6287_vm12 = vcmp.eq.s32.totalorder %v6261_v47, %v10545_v54  ;;  %9130 = vmatprep.mubr.msk.bf16.mxu1 %vm766_vm11, %v6751_v33 }
 0x82b   : > { %vm6303_vm5 = vmor %vm6223_vm0, %vm6287_vm12 }
 0x82c   : > { %v8362_v57 = vsel %vm6303_vm5, 1.0, %v17587_v17  ;;  %vm6210_vm5 = vcmp.eq.s32.totalorder %v16387_v19, %v10545_v54 }
 0x82d   : > { %v6346_v59 = vpack.c.bf16 %v8363_v52, %v8362_v57  ;;  %v6593_v52 = vpop.permute.xlu0 %6592 }
 0x82e   : > { %v6667_v2 = vpop.permute.xlu1 %6666  ;;  %v16435_v13 = vpop.f32.mrb[108].mxu1 }
 0x82f   : > { %vm6693_vm1 = vcmp.eq.s32.totalorder %v6667_v2, %v10545_v54  ;;  %v6489_v16 = vmax.f32 %v16435_v13, %v16407_v6  ;;  %v16440_v41 = vpop.f32.mrb[109].mxu1  ;;  %9103 = vmatmul.mubr.msk.bf16.gmra.mrb[120].mxu0 %vm766_vm11, %v6346_v59 }
 0x830   : > { %v6487_v21 = vmax.f32 %v16440_v41, %v16415_v35  ;;  %v16449_v0 = vpop.f32.mrb[110].mxu1  ;;  %vm6709_vm6 = vmor %vm6629_vm4, %vm6693_vm1  ;;  %vm6615_vm4 = vcmp.eq.s32.totalorder %v6593_v52, %v10545_v54 }
 0x831   : > { %v16453_v3 = vpop.f32.mrb[111].mxu1  ;;  %v8387_v46 = vsel %vm6709_vm6, 1.0, %v17587_v17  ;;  %v6267_v59 = vpop.permute.xlu0 %6266 }
 0x832   : > { %v6670_v22 = vpop.permute.xlu1 %6669  ;;  %vm6289_vm12 = vcmp.eq.s32.totalorder %v6267_v59, %v10545_v54  ;;  %v18553_v13 = vmax.f32 %v16453_v3, %v16426_v14 }
 0x833   : > { %vm6694_vm9 = vcmp.eq.s32.totalorder %v6670_v22, %v10545_v54  ;;  %v18543_v22 = vld [vmem:[#allocation74_spill] sm:$0xff] }
 0x834   : > { %vm6710_vm10 = vmor %vm6630_vm7, %vm6694_vm9  ;;  %vm6145_vm15 = vcmp.eq.s32.totalorder %v18543_v22, %v10545_v54  ;;  %vm6695_vm7 = vcmp.eq.s32.totalorder %v6673_v20, %v10545_v54  ;;  %v18546_v20 = vld [vmem:[#allocation97_spill] sm:$0xff] }
 0x835   : > { %v8388_v8 = vsel %vm6710_vm10, 1.0, %v17587_v17 }
 0x836   : > { %v6752_v45 = vpack.c.bf16 %v8388_v8, %v8387_v46 }
 0x837   : > { %v6126_v32 = vpop.permute.xlu1 %6125 }
 0x838   : > { %9131 = vmatmul.mubr.msk.bf16.gmra.mrb[120].mxu1 %vm766_vm11, %v6752_v45  ;;  %vm6146_vm13 = vcmp.eq.s32.totalorder %v6126_v32, %v10545_v54  ;;  %v16480_v32 = vld [vmem:[#allocation7 + $0xe] ss:$0 sm:$0xff] }
 0x839   : > { %vm6226_vm14 = vmor %vm6146_vm13, %vm6210_vm5 }
 0x83c   : > { %v6187_v43 = vpop.permute.xlu1 %6186 }
 0x83d   : > { %vm6209_vm8 = vcmp.eq.s32.totalorder %v6187_v43, %v10545_v54 }
 0x83e   : > { %vm6225_vm0 = vmor %vm6145_vm15, %vm6209_vm8 }
 0x83f   : > { %vm6305_vm1 = vmor %vm6225_vm0, %vm6289_vm12  ;;  %vm6148_vm12 = vcmp.eq.s32.totalorder %v18546_v20, %v10545_v54 }
 0x840   : > { %v6529_v23 = vpop.permute.xlu1 %6528  ;;  %v8364_v8 = vsel %vm6305_vm1, 1.0, %v17587_v17 }
 0x841   : > { %vm6551_vm6 = vcmp.eq.s32.totalorder %v6529_v23, %v10545_v54  ;;  %v6276_v23 = vpop.permute.xlu0 %6275 }
 0x842   : > { %vm6631_vm9 = vmor %vm6551_vm6, %vm6615_vm4 }
 0x843   : > { %vm16486_vm15 = vmor %vm6631_vm9, %vm6695_vm7 }
 0x844   : > { %v6532_v33 = vpop.permute.xlu1 %6531  ;;  %v8389_v5 = vsel %vm16486_vm15, 1.0, %v17587_v17 }
 0x845   : > { %vm6552_vm0 = vcmp.eq.s32.totalorder %v6532_v33, %v10545_v54 }
 0x849   : > { %v6596_v37 = vpop.permute.xlu1 %6595 }
 0x84a   : > { %vm6616_vm10 = vcmp.eq.s32.totalorder %v6596_v37, %v10545_v54 }
 0x84b   : > { %vm6632_vm5 = vmor %vm6552_vm0, %vm6616_vm10 }
 0x84e   : > { %v6129_v47 = vpop.permute.xlu1 %6128 }
 0x84f   : > { %vm6147_vm4 = vcmp.eq.s32.totalorder %v6129_v47, %v10545_v54 }
 0x853   : > { %v6193_v57 = vpop.permute.xlu1 %6192 }
 0x857   : > { %v6196_v2 = vpop.permute.xlu1 %6195 }
 0x858   : > { %vm6212_vm8 = vcmp.eq.s32.totalorder %v6196_v2, %v10545_v54 }
 0x859   : > { %vm6228_vm13 = vmor %vm6148_vm12, %vm6212_vm8 }
 0x85c   : > { %v6270_v46 = vpop.permute.xlu1 %6269 }
 0x85d   : > { %vm6290_vm2 = vcmp.eq.s32.totalorder %v6270_v46, %v10545_v54 }
 0x85e   : > { %vm6306_vm3 = vmor %vm6226_vm14, %vm6290_vm2  ;;  %vm6292_vm14 = vcmp.eq.s32.totalorder %v6276_v23, %v10545_v54 }
 0x85f   : > { %v8365_v45 = vsel %vm6306_vm3, 1.0, %v17587_v17  ;;  %vm6211_vm3 = vcmp.eq.s32.totalorder %v6193_v57, %v10545_v54  ;;  %vm6308_vm6 = vmor %vm6228_vm13, %vm6292_vm14  ;;  %vm6554_vm13 = vcmp.eq.s32.totalorder %v16395_v61, %v10545_v54 }
 0x860   : > { %v6347_v43 = vpack.c.bf16 %v8365_v45, %v8364_v8  ;;  %vm6227_vm7 = vmor %vm6147_vm4, %vm6211_vm3  ;;  %v8367_v11 = vsel %vm6308_vm6, 1.0, %v17587_v17 }
 0x861   : > { %v16471_v22 = vpop.permute.xlu1 %6534 }
 0x862   : > { %9106 = vmatprep.mubr.msk.bf16.mxu0 %vm766_vm11, %v6347_v43  ;;  %vm6553_vm0 = vcmp.eq.s32.totalorder %v16471_v22, %v10545_v54 }
 0x866   : > { %v16474_v59 = vpop.permute.xlu1 %6598 }
 0x867   : > { %vm6617_vm8 = vcmp.eq.s32.totalorder %v16474_v59, %v10545_v54  ;;  %v18547_v59 = vmov 0  }
 0x86a   : > { %v16478_v19 = vpop.permute.xlu1 %6601 }
 0x86b   : > { %vm6618_vm12 = vcmp.eq.s32.totalorder %v16478_v19, %v10545_v54 }
 0x86c   : > { %v9096_v46 = vpop.f32.mrb[112].mxu0  ;;  %vm6634_vm14 = vmor %vm6554_vm13, %vm6618_vm12 }
 0x86d   : > { %v6421_v8 = vadd.f32 %v9096_v46, %v16480_v32  ;;  %v6412_v45 = vpop.f32.mrb[113].mxu0 }
 0x86e   : > { %v6413_v52 = vadd.f32 %v16480_v32, %v6412_v45  ;;  %v9097_v34 = vpop.f32.mrb[114].mxu0 }
 0x86f   : > { %v16497_v37 = vmax.f32 %v6421_v8, %v6477_v18  ;;  %v6424_v2 = vadd.f32 %v9097_v34, %v16480_v32  ;;  %v6676_v46 = vpop.permute.xlu1 %6675  ;;  %v6415_v55 = vpop.f32.mrb[115].mxu0  ;;  %v16527_v8 = vld [vmem:[#allocation5] ss:$0 sm:$0xff] }
 0x870   : > { %v6881_v33 = vmax.f32 %v6413_v52, %v6475_v15  ;;  %vm6696_vm1 = vcmp.eq.s32.totalorder %v6676_v46, %v10545_v54  ;;  %v6416_v45 = vadd.f32 %v16480_v32, %v6415_v55  ;;  %v16517_v15 = vld [vmem:[#allocation7 + $0xf] ss:$0 sm:$0xff] }
 0x871   : > { %v6884_v27 = vmax.f32 %v6424_v2, %v6478_v9  ;;  %vm6712_vm2 = vmor %vm6632_vm5, %vm6696_vm1 }
 0x872   : > { %v8390_v60 = vsel %vm6712_vm2, 1.0, %v17587_v17  ;;  %v6882_v18 = vmax.f32 %v6416_v45, %v6476_v48  ;;  %vm6633_vm5 = vmor %vm6553_vm0, %vm6617_vm8 }
 0x873   : > { %v6753_v49 = vpack.c.bf16 %v8390_v60, %v8389_v5 }
 0x874   : > { %v6273_v40 = vpop.permute.xlu1 %6272 }
 0x875   : > { %vm6291_vm9 = vcmp.eq.s32.totalorder %v6273_v40, %v10545_v54  ;;  %v9124_v63 = vpop.f32.mrb[112].mxu1  ;;  %9134 = vmatprep.mubr.msk.bf16.mxu1 %vm766_vm11, %v6753_v49 }
 0x876   : > { %vm6307_vm10 = vmor %vm6227_vm7, %vm6291_vm9  ;;  %v6827_v9 = vadd.f32 %v9124_v63, %v16517_v15  ;;  %v6818_v55 = vpop.f32.mrb[113].mxu1 }
 0x877   : > { %v8366_v56 = vsel %vm6307_vm10, 1.0, %v17587_v17  ;;  %v6819_v48 = vadd.f32 %v16517_v15, %v6818_v55  ;;  %v9125_v34 = vpop.f32.mrb[114].mxu1 }
 0x878   : > { %v6348_v47 = vpack.c.bf16 %v8367_v11, %v8366_v56  ;;  %v6899_v57 = vmax.f32 %v6827_v9, %v16497_v37  ;;  %v6830_v43 = vadd.f32 %v9125_v34, %v16517_v15  ;;  %v6821_v23 = vpop.f32.mrb[115].mxu1 }
 0x879   : > { %v6897_v52 = vmax.f32 %v6819_v48, %v6881_v33  ;;  %v6822_v20 = vadd.f32 %v16517_v15, %v6821_v23  ;;  %v6679_v2 = vpop.permute.xlu1 %6678 }
 0x87a   : > { %v6900_v46 = vmax.f32 %v6830_v43, %v6884_v27  ;;  %vm6697_vm15 = vcmp.eq.s32.totalorder %v6679_v2, %v10545_v54  ;;  %9107 = vmatmul.mubr.msk.bf16.gmra.mrb[124].mxu0 %vm766_vm11, %v6348_v47 }
 0x87b   : > { %v16540_v37 = vadd.f32 %v16527_v8, %v6897_v52  ;;  %v6898_v45 = vmax.f32 %v6822_v20, %v6882_v18  ;;  %7100 = vmatprep.mubr.bf16.mxu0 %v18547_v59  ;;  %vm6713_vm1 = vmor %vm6633_vm5, %vm6697_vm15  ;;  %v18548_v20 = vmax.f32 %v16171_v7, %v16140_v39 }
 0x87c   : > { %v8391_v5 = vsel %vm6713_vm1, 1.0, %v17587_v17  ;;  %v16558_v49 = vadd.f32 %v16527_v8, %v6900_v46 }
 0x87d   : > { %v16546_v33 = vadd.f32 %v16527_v8, %v6898_v45  ;;  %v6682_v27 = vpop.permute.xlu1 %6681  ;;  %v6936_v22 = vmax.f32 %v16540_v37, 0.0 }
 0x87e   : > { %vm6698_vm2 = vcmp.eq.s32.totalorder %v6682_v27, %v10545_v54  ;;  %v16562_v54 = vadd.f32 %v16527_v8, %v6899_v57 }
 0x87f   : > { %v6937_v19 = vmax.f32 %v16546_v33, 0.0  ;;  %vm6714_vm3 = vmor %vm6634_vm14, %vm6698_vm2 }
 0x880   : > { %v8392_v60 = vsel %vm6714_vm3, 1.0, %v17587_v17  ;;  %v6939_v17 = vmax.f32 %v16558_v49, 0.0  ;;  %v6938_v40 = vmax.f32 %v16562_v54, 0.0 }
 0x881   : > { %v6969_v61 = vpack.c.bf16 %v6937_v19, %v6936_v22  ;;  %v6754_v18 = vpack.c.bf16 %v8392_v60, %v8391_v5 }
 0x882   : > { %v6970_v63 = vpack.c.bf16 %v6939_v17, %v6938_v40 }
 0x883   : > { %9135 = vmatmul.mubr.msk.bf16.gmra.mrb[124].mxu1 %vm766_vm11, %v6754_v18  ;;  %7101 = vmatmul.mubr.bf16.vlgmr.msra.gmra.mrb[128].mxu0 %v6969_v61 }
 0x884   : > { %7110 = vmatprep.mubr.bf16.mxu0 %v18547_v59  ;;  %7473 = vmatprep.mubr.bf16.mxu1 %v18547_v59 }
 0x88b   : > { %7111 = vmatmul.mubr.bf16.gmra.mrb[132].mxu0 %v6970_v63 }
 0x88c   : > { %7120 = vmatprep.mubr.bf16.mxu0 %v18547_v59 }
 0x8b7   : > { %v9100_v9 = vpop.f32.mrb[116].mxu0 }
 0x8b8   : > { %v6437_v55 = vadd.f32 %v9100_v9, %v16480_v32  ;;  %v6428_v11 = vpop.f32.mrb[117].mxu0 }
 0x8b9   : > { %v6429_v56 = vadd.f32 %v16480_v32, %v6428_v11  ;;  %v9101_v48 = vpop.f32.mrb[118].mxu0 }
 0x8ba   : > { %v6887_v34 = vmax.f32 %v6437_v55, %v6481_v10  ;;  %v6440_v47 = vadd.f32 %v9101_v48, %v16480_v32  ;;  %v6431_v57 = vpop.f32.mrb[119].mxu0  ;;  %v9494_v48 = vld [vmem:[%s17076_s6] ss:$8 sps:$4 sm:$0xff]  }
 0x8bb   : > { %v6885_v43 = vmax.f32 %v6429_v56, %v6479_v36  ;;  %v6432_v23 = vadd.f32 %v16480_v32, %v6431_v57  ;;  %v9496_v56 = vld [vmem:[%s17076_s6 + $0x4] ss:$8 sps:$4 sm:$0xff]  }
 0x8bc   : > { %v6888_v52 = vmax.f32 %v6440_v47, %v6482_v28  ;;  %7441 = vmatprep.subr.bf16.mxu1 %v9496_v56  ;;  %v9497_v47 = vld [vmem:[%s17076_s6 + $0x10] ss:$8 sps:$4 sm:$0xff]   ;;  %v9502_v57 = vld [vmem:[%s17076_s6 + $0x24] ss:$8 sps:$4 sm:$0xff]  }
 0x8bd   : > { %v6886_v2 = vmax.f32 %v6432_v23, %v18548_v20  ;;  %7442 = vmatpush1.bf16.msra.mxu1 %v9494_v48  ;;  %v9505_v23 = vld [vmem:[%s17076_s6 + $0x34] ss:$8 sps:$4 sm:$0xff]   ;;  %v9508_v20 = vld [vmem:[%s17076_s6 + $0x44] ss:$8 sps:$4 sm:$0xff]  }
 0x8c0   : > { %v9128_v46 = vpop.f32.mrb[116].mxu1 }
 0x8c1   : > { %v6843_v31 = vadd.f32 %v9128_v46, %v16517_v15  ;;  %v6834_v53 = vpop.f32.mrb[117].mxu1  ;;  %v9511_v46 = vld [vmem:[%s17076_s6 + $0x54] ss:$8 sps:$4 sm:$0xff]  }
 0x8c2   : > { %v6835_v10 = vadd.f32 %v16517_v15, %v6834_v53  ;;  %v9129_v45 = vpop.f32.mrb[118].mxu1  ;;  %v9512_v53 = vld [vmem:[%s17076_s6 + $0x60] ss:$8 sps:$4 sm:$0xff]  }
 0x8c3   : > { %v6903_v27 = vmax.f32 %v6843_v31, %v6887_v34  ;;  %v6846_v12 = vadd.f32 %v9129_v45, %v16517_v15  ;;  %v6837_v24 = vpop.f32.mrb[119].mxu1  ;;  %v9499_v34 = vld [vmem:[%s17076_s6 + $0x14] ss:$8 sps:$4 sm:$0xff]   ;;  %v9509_v31 = vld [vmem:[%s17076_s6 + $0x50] ss:$8 sps:$4 sm:$0xff]  }
 0x8c4   : > { %v6901_v36 = vmax.f32 %v6835_v10, %v6885_v43  ;;  %v6838_v5 = vadd.f32 %v16517_v15, %v6837_v24  ;;  %7443 = vmatprep.subr.bf16.mxu1 %v9499_v34  ;;  %v9500_v43 = vld [vmem:[%s17076_s6 + $0x20] ss:$8 sps:$4 sm:$0xff]   ;;  %v9514_v10 = vld [vmem:[%s17076_s6 + $0x64] ss:$8 sps:$4 sm:$0xff]   ;;  %v9517_v45 = vld [vmem:[%s17076_s6 + $0x74] ss:$8 sps:$4 sm:$0xff]   ;;  %v18549_v34 = vmax.f32 %v16297_v42, %v16260_v25 }
 0x8c5   : > { %v6904_v29 = vmax.f32 %v6846_v12, %v6888_v52  ;;  %v16609_v63 = vadd.f32 %v16527_v8, %v6903_v27  ;;  %7444 = vmatpush1.bf16.msra.mxu1 %v9497_v47  ;;  %v9503_v52 = vld [vmem:[%s17076_s6 + $0x30] ss:$8 sps:$4 sm:$0xff]  }
 0x8c6   : > { %v6902_v38 = vmax.f32 %v6838_v5, %v6886_v2  ;;  %v16594_v28 = vadd.f32 %v16527_v8, %v6901_v36  ;;  %7445 = vmatprep.subr.bf16.mxu1 %v9502_v57  ;;  %v9506_v2 = vld [vmem:[%s17076_s6 + $0x40] ss:$8 sps:$4 sm:$0xff]   ;;  %v9515_v27 = vld [vmem:[%s17076_s6 + $0x70] ss:$8 sps:$4 sm:$0xff]   ;;  %v18550_v57 = vmax.f32 %v16302_v1, %v16267_v26 }
 0x8c7   : > { %v16606_v18 = vadd.f32 %v16527_v8, %v6904_v29  ;;  %v6942_v55 = vmax.f32 %v16609_v63, 0.0 }
 0x8c8   : > { %v16597_v39 = vadd.f32 %v16527_v8, %v6902_v38  ;;  %v6940_v7 = vmax.f32 %v16594_v28, 0.0 }
 0x8c9   : > { %v6943_v9 = vmax.f32 %v16606_v18, 0.0  ;;  %7446 = vmatpush1.bf16.msra.mxu1 %v9500_v43  ;;  %v9518_v18 = vld [vmem:[%s17078_s8] sm:$0xff]  }
 0x8ca   : > { %v6941_v60 = vmax.f32 %v16597_v39, 0.0  ;;  %7447 = vmatprep.subr.bf16.mxu1 %v9505_v23  ;;  %9138 = vmatprep.subr.bf16.mxu0 %v9518_v18 }
 0x8cb   : > { %v6972_v11 = vpack.c.bf16 %v6943_v9, %v6942_v55  ;;  %9139 = vmatpush3.bf16.msra.mxu0 %v9518_v18 }
 0x8cc   : > { %v6971_v61 = vpack.c.bf16 %v6941_v60, %v6940_v7 }
 0x8cd   : > { %7448 = vmatpush1.bf16.msra.mxu1 %v9503_v52 }
 0x8ce   : > { %7121 = vmatmul.mubr.bf16.gmra.mrb[136].mxu0 %v6971_v61  ;;  %7449 = vmatprep.subr.bf16.mxu1 %v9508_v20 }
 0x8cf   : > { %7130 = vmatprep.mubr.bf16.mxu0 %v18547_v59 }
 0x8d1   : > { %7450 = vmatpush1.bf16.msra.mxu1 %v9506_v2 }
 0x8d2   : > { %7451 = vmatprep.subr.bf16.mxu1 %v9511_v46 }
 0x8d5   : > { %7452 = vmatpush1.bf16.msra.mxu1 %v9509_v31 }
 0x8d6   : > { %7131 = vmatmul.mubr.bf16.gmra.mrb[140].mxu0 %v6972_v11  ;;  %7453 = vmatprep.subr.bf16.mxu1 %v9514_v10 }
 0x8d7   : > { %7140 = vmatprep.mubr.bf16.mxu0 %v18547_v59 }
 0x8d9   : > { %7454 = vmatpush1.bf16.msra.mxu1 %v9512_v53 }
 0x8da   : > { %7455 = vmatprep.subr.bf16.mxu1 %v9517_v45 }
 0x8dd   : > { %7456 = vmatpush1.bf16.msra.mxu1 %v9515_v27 }
 0x8de   : > { %9170 = vmatprep.subr.bf16.mxu1 %v9518_v18 }
 0x902   : > { %v9104_v12 = vpop.f32.mrb[120].mxu0 }
 0x903   : > { %v6453_v24 = vadd.f32 %v9104_v12, %v16480_v32  ;;  %v6444_v36 = vpop.f32.mrb[121].mxu0 }
 0x904   : > { %v6445_v5 = vadd.f32 %v16480_v32, %v6444_v36  ;;  %v9105_v29 = vpop.f32.mrb[122].mxu0  ;;  %v18551_v36 = vlaneseq }
 0x905   : > { %v6891_v38 = vmax.f32 %v6453_v24, %v6485_v62  ;;  %v6456_v61 = vadd.f32 %v9105_v29, %v16480_v32  ;;  %v6447_v11 = vpop.f32.mrb[123].mxu0 }
 0x906   : > { %v6889_v56 = vmax.f32 %v6445_v5, %v6483_v30  ;;  %v6448_v48 = vadd.f32 %v16480_v32, %v6447_v11  ;;  %v16714_v5 = vshrl.u32 %v18551_v36, 7 }
 0x907   : > { %v6892_v47 = vmax.f32 %v6456_v61, %v18549_v34 }
 0x908   : > { %v6890_v43 = vmax.f32 %v6448_v48, %v18550_v57  ;;  %v6984_v57 = vsub.s32 1, %v16714_v5 }
 0x90b   : > { %v9132_v23 = vpop.f32.mrb[120].mxu1 }
 0x90c   : > { %v6859_v44 = vadd.f32 %v9132_v23, %v16517_v15  ;;  %v6850_v58 = vpop.f32.mrb[121].mxu1 }
 0x90d   : > { %v6851_v62 = vadd.f32 %v16517_v15, %v6850_v58  ;;  %v9133_v52 = vpop.f32.mrb[122].mxu1  ;;  %v18552_v58 = vmax.f32 %v16449_v0, %v16420_v4 }
 0x90e   : > { %v6907_v20 = vmax.f32 %v6859_v44, %v6891_v38  ;;  %v6862_v50 = vadd.f32 %v9133_v52, %v16517_v15  ;;  %v6853_v51 = vpop.f32.mrb[123].mxu1  ;;  %v6968_v44 = vld [vmem:[%s17075_s5] sm:$0x3] }
 0x90f   : > { %v6905_v30 = vmax.f32 %v6851_v62, %v6889_v56  ;;  %v6854_v2 = vadd.f32 %v16517_v15, %v6853_v51  ;;  %v16738_v62 = vrot.slane %v6968_v44, %v6984_v57 }
 0x910   : > { %v6908_v25 = vmax.f32 %v6862_v50, %v6892_v47  ;;  %v16703_v45 = vadd.f32 %v16527_v8, %v6907_v20 }
 0x911   : > { %v6906_v42 = vmax.f32 %v6854_v2, %v6890_v43  ;;  %v16688_v46 = vadd.f32 %v16527_v8, %v6905_v30 }
 0x912   : > { %v16700_v10 = vadd.f32 %v16527_v8, %v6908_v25  ;;  %v6946_v12 = vmax.f32 %v16703_v45, 0.0 }
 0x913   : > { %v16691_v26 = vadd.f32 %v16527_v8, %v6906_v42  ;;  %v6944_v1 = vmax.f32 %v16688_v46, 0.0 }
 0x914   : > { %v6947_v27 = vmax.f32 %v16700_v10, 0.0 }
 0x915   : > { %v6945_v31 = vmax.f32 %v16691_v26, 0.0 }
 0x916   : > { %v6974_v24 = vpack.c.bf16 %v6947_v27, %v6946_v12 }
 0x917   : > { %v6973_v53 = vpack.c.bf16 %v6945_v31, %v6944_v1 }
 0x919   : > { %7141 = vmatmul.mubr.bf16.gmra.mrb[144].mxu0 %v6973_v53 }
 0x91a   : > { %7150 = vmatprep.mubr.bf16.mxu0 %v18547_v59 }
 0x921   : > { %7151 = vmatmul.mubr.bf16.gmra.mrb[148].mxu0 %v6974_v24 }
 0x922   : > { %7160 = vmatprep.mubr.bf16.mxu0 %v18547_v59 }
 0x94d   : > { %v9108_v29 = vpop.f32.mrb[124].mxu0 }
 0x94e   : > { %v6469_v38 = vadd.f32 %v9108_v29, %v16480_v32  ;;  %v6460_v61 = vpop.f32.mrb[125].mxu0 }
 0x94f   : > { %v6461_v11 = vadd.f32 %v16480_v32, %v6460_v61  ;;  %v9109_v56 = vpop.f32.mrb[126].mxu0 }
 0x950   : > { %v6895_v48 = vmax.f32 %v6469_v38, %v6489_v16  ;;  %v6472_v34 = vadd.f32 %v9109_v56, %v16480_v32  ;;  %v6463_v47 = vpop.f32.mrb[127].mxu0 }
 0x951   : > { %v6893_v43 = vmax.f32 %v6461_v11, %v6487_v21  ;;  %v6464_v23 = vadd.f32 %v16480_v32, %v6463_v47 }
 0x952   : > { %v6896_v6 = vmax.f32 %v6472_v34, %v18552_v58 }
 0x953   : > { %v6894_v16 = vmax.f32 %v6464_v23, %v18553_v13 }
 0x956   : > { %v9136_v35 = vpop.f32.mrb[124].mxu1  ;;  %v7102_v41 = vpop.f32.mrb[128].mxu0 }
 0x957   : > { %v6875_v21 = vadd.f32 %v9136_v35, %v16517_v15  ;;  %v6866_v32 = vpop.f32.mrb[125].mxu1  ;;  %v7104_v52 = vpop.f32.mrb[129].mxu0 }
 0x958   : > { %v6867_v20 = vadd.f32 %v16517_v15, %v6866_v32  ;;  %v9137_v50 = vpop.f32.mrb[126].mxu1  ;;  %v7105_v4 = vadd.f32 %v7104_v52, %v16738_v62  ;;  %v7106_v0 = vpop.f32.mrb[130].mxu0 }
 0x959   : > { %v6911_v51 = vmax.f32 %v6875_v21, %v6895_v48  ;;  %v6878_v14 = vadd.f32 %v9137_v50, %v16517_v15  ;;  %v6869_v3 = vpop.f32.mrb[127].mxu1  ;;  %v7108_v30 = vpop.f32.mrb[131].mxu0  ;;  %v6980_v21 = vsub.s32 0, %v16714_v5 }
 0x95a   : > { %v6909_v2 = vmax.f32 %v6867_v20, %v6893_v43  ;;  %v6870_v25 = vadd.f32 %v16517_v15, %v6869_v3  ;;  %v7197_v42 = vsub.f32 0.0, %v7105_v4  ;;  %v7109_v53 = vadd.f32 %v7108_v30, %v16738_v62 }
 0x95b   : > { %v6912_v24 = vmax.f32 %v6878_v14, %v6896_v6  ;;  %v16765_v20 = vadd.f32 %v16527_v8, %v6911_v51  ;;  %v16771_v3 = vrot.slane %v6968_v44, %v6980_v21 }
 0x95c   : > { %v6910_v36 = vmax.f32 %v6870_v25, %v6894_v16  ;;  %v7213_v29 = vmul.f32 1.442695, %v7197_v42  ;;  %v7198_v38 = vsub.f32 0.0, %v7109_v53  ;;  %v16747_v61 = vadd.f32 %v16527_v8, %v6909_v2 }
 0x95d   : > { %v16761_v35 = vadd.f32 %v16527_v8, %v6912_v24  ;;  %v6950_v30 = vmax.f32 %v16765_v20, 0.0  ;;  %v7103_v42 = vadd.f32 %v7102_v41, %v16771_v3  ;;  %v7107_v53 = vadd.f32 %v7106_v0, %v16771_v3 }
 0x95e   : > { %9526 = vpow2.f32 %v7213_v29  ;;  %v7215_v11 = vmul.f32 1.442695, %v7198_v38  ;;  %v7112_v56 = vpop.f32.mrb[132].mxu0  ;;  %v16750_v48 = vadd.f32 %v16527_v8, %v6910_v36  ;;  %v6948_v43 = vmax.f32 %v16747_v61, 0.0 }
 0x95f   : > { %v7114_v34 = vpop.f32.mrb[133].mxu0  ;;  %v6951_v4 = vmax.f32 %v16761_v35, 0.0  ;;  %v7181_v24 = vmax.f32 %v7103_v42, 0.0  ;;  %v7182_v38 = vmax.f32 %v7107_v53, 0.0 }
 0x960   : > { %9528 = vpow2.f32 %v7215_v11  ;;  %v7115_v15 = vadd.f32 %v7114_v34, %v16738_v62  ;;  %v7116_v47 = vpop.f32.mrb[134].mxu0  ;;  %v6949_v23 = vmax.f32 %v16750_v48, 0.0 }
 0x961   : > { %v7118_v58 = vpop.f32.mrb[135].mxu0  ;;  %v6976_v8 = vpack.c.bf16 %v6951_v4, %v6950_v30  ;;  %v7277_v34 = vsub.f32 %v6936_v22, %v7181_v24  ;;  %v7278_v41 = vsub.f32 %v6937_v19, %v7182_v38 }
 0x962   : > { %v7199_v6 = vsub.f32 0.0, %v7115_v15  ;;  %v7119_v13 = vadd.f32 %v7118_v58, %v16738_v62  ;;  %v6975_v16 = vpack.c.bf16 %v6949_v23, %v6948_v43  ;;  %v7113_v15 = vadd.f32 %v7112_v56, %v16771_v3 }
 0x964   : > { %v7217_v32 = vmul.f32 1.442695, %v7199_v6  ;;  %v7200_v52 = vsub.f32 0.0, %v7119_v13  ;;  %7161 = vmatmul.mubr.bf16.gmra.mrb[152].mxu0 %v6975_v16  ;;  %v7117_v6 = vadd.f32 %v7116_v47, %v16771_v3  ;;  %v7183_v16 = vmax.f32 %v7113_v15, 0.0 }
 0x965   : > { %7170 = vmatprep.mubr.bf16.mxu0 %v18547_v59 }
 0x966   : > { %9530 = vpow2.f32 %v7217_v32  ;;  %v7219_v50 = vmul.f32 1.442695, %v7200_v52  ;;  %v7279_v37 = vsub.f32 %v6938_v40, %v7183_v16 }
 0x968   : > { %v9527_v14 = vpop.eup %9526  ;;  %9532 = vpow2.f32 %v7219_v50  ;;  %v7184_v50 = vmax.f32 %v7117_v6, 0.0 }
 0x969   : > { %v7245_v2 = vadd.f32 1.0, %v9527_v14 }
 0x96a   : > { %v9529_v25 = vpop.eup %9528  ;;  %v7280_v33 = vsub.f32 %v6939_v17, %v7184_v50 }
 0x96b   : > { %9534 = vrcp.f32 %v7245_v2  ;;  %v7246_v51 = vadd.f32 1.0, %v9529_v25 }
 0x96c   : > { %7171 = vmatmul.mubr.bf16.gmra.mrb[156].mxu0 %v6976_v8 }
 0x96d   : > { %9536 = vrcp.f32 %v7246_v51 }
 0x970   : > { %v9531_v44 = vpop.eup %9530 }
 0x971   : > { %v7247_v36 = vadd.f32 1.0, %v9531_v44 }
 0x972   : > { %v9533_v29 = vpop.eup %9532 }
 0x973   : > { %9538 = vrcp.f32 %v7247_v36  ;;  %v7248_v11 = vadd.f32 1.0, %v9533_v29 }
 0x975   : > { %v9535_v58 = vpop.eup %9534  ;;  %9540 = vrcp.f32 %v7248_v11 }
 0x976   : > { %v7293_v0 = vmul.f32 %v9535_v58, %v7277_v34 }
 0x977   : > { %v9537_v13 = vpop.eup %9536 }
 0x978   : > { %v7294_v32 = vmul.f32 %v9537_v13, %v7278_v41  ;;  %v16786_v52 = vadd.f32 %v7293_v0, %v7181_v24 }
 0x97a   : > { %v16788_v14 = vadd.f32 %v7294_v32, %v7182_v38 }
 0x97c   : > { %v7342_v22 = vpack.c.bf16 %v16788_v14, %v16786_v52 }
 0x97d   : > { %v9539_v56 = vpop.eup %9538 }
 0x97e   : > { %7474 = vmatmul.mubr.bf16.vlgmr.msra.gmra.mrb[128].mxu1 %v7342_v22  ;;  %v7295_v19 = vmul.f32 %v9539_v56, %v7279_v37 }
 0x97f   : > { %v9541_v47 = vpop.eup %9540  ;;  %7483 = vmatprep.mubr.bf16.mxu1 %v18547_v59  ;;  %9178 = vmatpush3.bf16.msra.mxu1 %v9518_v18 }
 0x980   : > { %v7296_v2 = vmul.f32 %v9541_v47, %v7280_v33  ;;  %v16797_v25 = vadd.f32 %v7295_v19, %v7183_v16 }
 0x982   : > { %v16799_v8 = vadd.f32 %v7296_v2, %v7184_v50 }
 0x984   : > { %v7343_v54 = vpack.c.bf16 %v16799_v8, %v16797_v25 }
 0x986   : > { %7484 = vmatmul.mubr.bf16.gmra.mrb[132].mxu1 %v7343_v54 }
 0x987   : > { %7493 = vmatprep.mubr.bf16.mxu1 %v18547_v59 }
 0x9a1   : > { %v7122_v40 = vpop.f32.mrb[136].mxu0 }
 0x9a2   : > { %v7124_v51 = vpop.f32.mrb[137].mxu0  ;;  %v7123_v56 = vadd.f32 %v7122_v40, %v16771_v3 }
 0x9a3   : > { %v7125_v49 = vadd.f32 %v7124_v51, %v16738_v62  ;;  %v7126_v17 = vpop.f32.mrb[138].mxu0 }
 0x9a4   : > { %v7128_v42 = vpop.f32.mrb[139].mxu0  ;;  %v7127_v33 = vadd.f32 %v7126_v17, %v16771_v3  ;;  %v7185_v47 = vmax.f32 %v7123_v56, 0.0 }
 0x9a5   : > { %v7201_v53 = vsub.f32 0.0, %v7125_v49  ;;  %v7129_v44 = vadd.f32 %v7128_v42, %v16738_v62 }
 0x9a6   : > { %v7186_v51 = vmax.f32 %v7127_v33, 0.0  ;;  %v7281_v42 = vsub.f32 %v6940_v7, %v7185_v47 }
 0x9a7   : > { %v7221_v24 = vmul.f32 1.442695, %v7201_v53  ;;  %v7202_v36 = vsub.f32 0.0, %v7129_v44 }
 0x9a8   : > { %v7282_v40 = vsub.f32 %v6941_v60, %v7186_v51 }
 0x9a9   : > { %9542 = vpow2.f32 %v7221_v24  ;;  %v7223_v29 = vmul.f32 1.442695, %v7202_v36  ;;  %v7132_v38 = vpop.f32.mrb[140].mxu0 }
 0x9aa   : > { %v7134_v11 = vpop.f32.mrb[141].mxu0  ;;  %v7133_v53 = vadd.f32 %v7132_v38, %v16771_v3 }
 0x9ab   : > { %9544 = vpow2.f32 %v7223_v29  ;;  %v7135_v34 = vadd.f32 %v7134_v11, %v16738_v62  ;;  %v7136_v15 = vpop.f32.mrb[142].mxu0 }
 0x9ac   : > { %v7138_v58 = vpop.f32.mrb[143].mxu0  ;;  %v7137_v24 = vadd.f32 %v7136_v15, %v16771_v3  ;;  %v7187_v29 = vmax.f32 %v7133_v53, 0.0  ;;  %v9524_v53 = vld [vmem:[%s17078_s8 + $0x30] sm:$0xff]  }
 0x9ad   : > { %v7203_v41 = vsub.f32 0.0, %v7135_v34  ;;  %v7139_v6 = vadd.f32 %v7138_v58, %v16738_v62 }
 0x9ae   : > { %v7188_v58 = vmax.f32 %v7137_v24, 0.0  ;;  %v7283_v28 = vsub.f32 %v6942_v55, %v7187_v29  ;;  %v9520_v55 = vld [vmem:[%s17078_s8 + $0x10] sm:$0xff]  }
 0x9af   : > { %v7225_v0 = vmul.f32 1.442695, %v7203_v41  ;;  %v7204_v13 = vsub.f32 0.0, %v7139_v6 }
 0x9b0   : > { %v7284_v39 = vsub.f32 %v6943_v9, %v7188_v58  ;;  %v9519_v9 = vld [vmem:[%s17078_s8 + $0x8] sm:$0xff]  }
 0x9b1   : > { %9546 = vpow2.f32 %v7225_v0  ;;  %v7227_v16 = vmul.f32 1.442695, %v7204_v13  ;;  %9140 = vmatprep.subr.bf16.mxu0 %v9519_v9  ;;  %9171 = vmatprep.subr.bf16.mxu1 %v9519_v9 }
 0x9b2   : > { %9141 = vmatpush3.bf16.msra.mxu0 %v9519_v9  ;;  %9179 = vmatpush3.bf16.msra.mxu1 %v9519_v9 }
 0x9b3   : > { %v9543_v32 = vpop.eup %9542  ;;  %9548 = vpow2.f32 %v7227_v16  ;;  %9142 = vmatprep.subr.bf16.mxu0 %v9520_v55  ;;  %9172 = vmatprep.subr.bf16.mxu1 %v9520_v55 }
 0x9b4   : > { %v7249_v50 = vadd.f32 1.0, %v9543_v32  ;;  %v9521_v32 = vld [vmem:[%s17078_s8 + $0x18] sm:$0xff]  }
 0x9b5   : > { %v9545_v37 = vpop.eup %9544 }
 0x9b6   : > { %9550 = vrcp.f32 %v7249_v50  ;;  %v7250_v22 = vadd.f32 1.0, %v9545_v37  ;;  %9143 = vmatpush3.bf16.msra.mxu0 %v9520_v55  ;;  %9180 = vmatpush3.bf16.msra.mxu1 %v9520_v55 }
 0x9b7   : > { %9144 = vmatprep.subr.bf16.mxu0 %v9521_v32  ;;  %9173 = vmatprep.subr.bf16.mxu1 %v9521_v32 }
 0x9b8   : > { %9552 = vrcp.f32 %v7250_v22 }
 0x9ba   : > { %9145 = vmatpush3.bf16.msra.mxu0 %v9521_v32  ;;  %9181 = vmatpush3.bf16.msra.mxu1 %v9521_v32 }
 0x9bb   : > { %v9547_v19 = vpop.eup %9546 }
 0x9bc   : > { %v7251_v2 = vadd.f32 1.0, %v9547_v19 }
 0x9bd   : > { %v9549_v54 = vpop.eup %9548 }
 0x9be   : > { %9554 = vrcp.f32 %v7251_v2  ;;  %v7252_v49 = vadd.f32 1.0, %v9549_v54  ;;  %v9523_v2 = vld [vmem:[%s17078_s8 + $0x28] sm:$0xff]  }
 0x9c0   : > { %v9551_v44 = vpop.eup %9550  ;;  %9556 = vrcp.f32 %v7252_v49 }
 0x9c1   : > { %v7297_v17 = vmul.f32 %v9551_v44, %v7281_v42 }
 0x9c2   : > { %v9553_v36 = vpop.eup %9552 }
 0x9c3   : > { %v7298_v11 = vmul.f32 %v9553_v36, %v7282_v40  ;;  %v16816_v34 = vadd.f32 %v7297_v17, %v7185_v47  ;;  %v9522_v47 = vld [vmem:[%s17078_s8 + $0x20] sm:$0xff]  }
 0x9c4   : > { %9146 = vmatprep.subr.bf16.mxu0 %v9522_v47  ;;  %9174 = vmatprep.subr.bf16.mxu1 %v9522_v47 }
 0x9c5   : > { %v16818_v41 = vadd.f32 %v7298_v11, %v7186_v51  ;;  %9147 = vmatpush3.bf16.msra.mxu0 %v9522_v47  ;;  %9182 = vmatpush3.bf16.msra.mxu1 %v9522_v47  ;;  %v9525_v11 = vld [vmem:[%s17078_s8 + $0x38] sm:$0xff]  }
 0x9c6   : > { %9148 = vmatprep.subr.bf16.mxu0 %v9523_v2  ;;  %9175 = vmatprep.subr.bf16.mxu1 %v9523_v2 }
 0x9c7   : > { %v7344_v7 = vpack.c.bf16 %v16818_v41, %v16816_v34 }
 0x9c8   : > { %v9555_v38 = vpop.eup %9554 }
 0x9c9   : > { %7494 = vmatmul.mubr.bf16.gmra.mrb[136].mxu1 %v7344_v7  ;;  %v7299_v60 = vmul.f32 %v9555_v38, %v7283_v28  ;;  %9149 = vmatpush3.bf16.msra.mxu0 %v9523_v2 }
 0x9ca   : > { %v9557_v15 = vpop.eup %9556  ;;  %7503 = vmatprep.mubr.bf16.mxu1 %v18547_v59  ;;  %9183 = vmatpush3.bf16.msra.mxu1 %v9523_v2 }
 0x9cb   : > { %v7300_v6 = vmul.f32 %v9557_v15, %v7284_v39  ;;  %v16827_v0 = vadd.f32 %v7299_v60, %v7187_v29  ;;  %9150 = vmatprep.subr.bf16.mxu0 %v9524_v53  ;;  %9176 = vmatprep.subr.bf16.mxu1 %v9524_v53 }
 0x9cd   : > { %v16829_v13 = vadd.f32 %v7300_v6, %v7188_v58  ;;  %9151 = vmatpush3.bf16.msra.mxu0 %v9524_v53 }
 0x9ce   : > { %9184 = vmatpush3.bf16.msra.mxu1 %v9524_v53  ;;  %9152 = vmatprep.subr.bf16.mxu0 %v9525_v11 }
 0x9cf   : > { %v7345_v63 = vpack.c.bf16 %v16829_v13, %v16827_v0  ;;  %9177 = vmatprep.subr.bf16.mxu1 %v9525_v11 }
 0x9d1   : > { %7504 = vmatmul.mubr.bf16.gmra.mrb[140].mxu1 %v7345_v63  ;;  %9153 = vmatpush3.bf16.msra.mxu0 %v9525_v11 }
 0x9d2   : > { %7513 = vmatprep.mubr.bf16.mxu1 %v18547_v59  ;;  %9185 = vmatpush3.bf16.msra.mxu1 %v9525_v11 }
 0x9ec   : > { %v7142_v16 = vpop.f32.mrb[144].mxu0 }
 0x9ed   : > { %v7144_v50 = vpop.f32.mrb[145].mxu0  ;;  %v7143_v6 = vadd.f32 %v7142_v16, %v16771_v3 }
 0x9ee   : > { %v7145_v37 = vadd.f32 %v7144_v50, %v16738_v62  ;;  %v7146_v22 = vpop.f32.mrb[146].mxu0 }
 0x9ef   : > { %v7148_v56 = vpop.f32.mrb[147].mxu0  ;;  %v7147_v63 = vadd.f32 %v7146_v22, %v16771_v3  ;;  %v7189_v9 = vmax.f32 %v7143_v6, 0.0 }
 0x9f0   : > { %v7205_v33 = vsub.f32 0.0, %v7145_v37  ;;  %v7149_v19 = vadd.f32 %v7148_v56, %v16738_v62 }
 0x9f1   : > { %v7190_v50 = vmax.f32 %v7147_v63, 0.0  ;;  %v7285_v56 = vsub.f32 %v6944_v1, %v7189_v9 }
 0x9f2   : > { %v7229_v54 = vmul.f32 1.442695, %v7205_v33  ;;  %v7206_v51 = vsub.f32 0.0, %v7149_v19 }
 0x9f3   : > { %v7286_v16 = vsub.f32 %v6945_v31, %v7190_v50 }
 0x9f4   : > { %9558 = vpow2.f32 %v7229_v54  ;;  %v7231_v49 = vmul.f32 1.442695, %v7206_v51  ;;  %v7152_v42 = vpop.f32.mrb[148].mxu0 }
 0x9f5   : > { %v7154_v44 = vpop.f32.mrb[149].mxu0  ;;  %v7153_v33 = vadd.f32 %v7152_v42, %v16771_v3 }
 0x9f6   : > { %9560 = vpow2.f32 %v7231_v49  ;;  %v7155_v40 = vadd.f32 %v7154_v44, %v16738_v62  ;;  %v7156_v24 = vpop.f32.mrb[150].mxu0 }
 0x9f7   : > { %v7158_v17 = vpop.f32.mrb[151].mxu0  ;;  %v7157_v47 = vadd.f32 %v7156_v24, %v16771_v3  ;;  %v7191_v54 = vmax.f32 %v7153_v33, 0.0 }
 0x9f8   : > { %v7207_v36 = vsub.f32 0.0, %v7155_v40  ;;  %v7159_v29 = vadd.f32 %v7158_v17, %v16738_v62 }
 0x9f9   : > { %v7192_v53 = vmax.f32 %v7157_v47, 0.0  ;;  %v7287_v46 = vsub.f32 %v6946_v12, %v7191_v54  ;;  %v7341_v47 = vld [vmem:[%s17077_s7] sm:$0x3] }
 0x9fa   : > { %v7233_v58 = vmul.f32 1.442695, %v7207_v36  ;;  %v7208_v28 = vsub.f32 0.0, %v7159_v29 }
 0x9fb   : > { %v7288_v26 = vsub.f32 %v6947_v27, %v7192_v53 }
 0x9fc   : > { %9562 = vpow2.f32 %v7233_v58  ;;  %v7235_v7 = vmul.f32 1.442695, %v7208_v28 }
 0x9fe   : > { %v9559_v38 = vpop.eup %9558  ;;  %9564 = vpow2.f32 %v7235_v7 }
 0x9ff   : > { %v7253_v39 = vadd.f32 1.0, %v9559_v38 }
 0xa00   : > { %v9561_v60 = vpop.eup %9560 }
 0xa01   : > { %9566 = vrcp.f32 %v7253_v39  ;;  %v7254_v15 = vadd.f32 1.0, %v9561_v60 }
 0xa03   : > { %9568 = vrcp.f32 %v7254_v15 }
 0xa06   : > { %v9563_v18 = vpop.eup %9562 }
 0xa07   : > { %v7255_v55 = vadd.f32 1.0, %v9563_v18 }
 0xa08   : > { %v9565_v32 = vpop.eup %9564 }
 0xa09   : > { %9570 = vrcp.f32 %v7255_v55  ;;  %v7256_v37 = vadd.f32 1.0, %v9565_v32 }
 0xa0b   : > { %v9567_v19 = vpop.eup %9566  ;;  %9572 = vrcp.f32 %v7256_v37 }
 0xa0c   : > { %v7301_v22 = vmul.f32 %v9567_v19, %v7285_v56 }
 0xa0d   : > { %v9569_v2 = vpop.eup %9568 }
 0xa0e   : > { %v7302_v51 = vmul.f32 %v9569_v2, %v7286_v16  ;;  %v16870_v49 = vadd.f32 %v7301_v22, %v7189_v9 }
 0xa10   : > { %v16872_v44 = vadd.f32 %v7302_v51, %v7190_v50 }
 0xa12   : > { %v7346_v1 = vpack.c.bf16 %v16872_v44, %v16870_v49 }
 0xa13   : > { %v9571_v42 = vpop.eup %9570 }
 0xa14   : > { %7514 = vmatmul.mubr.bf16.gmra.mrb[144].mxu1 %v7346_v1  ;;  %v7303_v31 = vmul.f32 %v9571_v42, %v7287_v46 }
 0xa15   : > { %v9573_v40 = vpop.eup %9572  ;;  %7523 = vmatprep.mubr.bf16.mxu1 %v18547_v59 }
 0xa16   : > { %v7304_v24 = vmul.f32 %v9573_v40, %v7288_v26  ;;  %v16881_v17 = vadd.f32 %v7303_v31, %v7191_v54 }
 0xa18   : > { %v16883_v36 = vadd.f32 %v7304_v24, %v7192_v53 }
 0xa1a   : > { %v7347_v45 = vpack.c.bf16 %v16883_v36, %v16881_v17 }
 0xa1c   : > { %7524 = vmatmul.mubr.bf16.gmra.mrb[148].mxu1 %v7347_v45 }
 0xa1d   : > { %7533 = vmatprep.mubr.bf16.mxu1 %v18547_v59 }
 0xa37   : > { %v7162_v12 = vpop.f32.mrb[152].mxu0 }
 0xa38   : > { %v7164_v29 = vpop.f32.mrb[153].mxu0  ;;  %v7163_v22 = vadd.f32 %v7162_v12, %v16771_v3 }
 0xa39   : > { %v7165_v10 = vadd.f32 %v7164_v29, %v16738_v62  ;;  %v7166_v27 = vpop.f32.mrb[154].mxu0 }
 0xa3a   : > { %v7168_v11 = vpop.f32.mrb[155].mxu0  ;;  %v7167_v2 = vadd.f32 %v7166_v27, %v16771_v3  ;;  %v7193_v51 = vmax.f32 %v7163_v22, 0.0 }
 0xa3b   : > { %v7209_v58 = vsub.f32 0.0, %v7165_v10  ;;  %v7169_v28 = vadd.f32 %v7168_v11, %v16738_v62 }
 0xa3c   : > { %v7194_v46 = vmax.f32 %v7167_v2, 0.0  ;;  %v7289_v29 = vsub.f32 %v6948_v43, %v7193_v51 }
 0xa3d   : > { %v7237_v7 = vmul.f32 1.442695, %v7209_v58  ;;  %v7210_v38 = vsub.f32 0.0, %v7169_v28 }
 0xa3e   : > { %v7290_v11 = vsub.f32 %v6949_v23, %v7194_v46 }
 0xa3f   : > { %9574 = vpow2.f32 %v7237_v7  ;;  %v7239_v39 = vmul.f32 1.442695, %v7210_v38  ;;  %v7172_v60 = vpop.f32.mrb[156].mxu0 }
 0xa40   : > { %v7174_v15 = vpop.f32.mrb[157].mxu0  ;;  %v7173_v24 = vadd.f32 %v7172_v60, %v16771_v3 }
 0xa41   : > { %9576 = vpow2.f32 %v7239_v39  ;;  %v7175_v6 = vadd.f32 %v7174_v15, %v16738_v62  ;;  %v7176_v63 = vpop.f32.mrb[158].mxu0 }
 0xa42   : > { %v7178_v18 = vpop.f32.mrb[159].mxu0  ;;  %v7177_v58 = vadd.f32 %v7176_v63, %v16771_v3  ;;  %v7195_v60 = vmax.f32 %v7173_v24, 0.0 }
 0xa43   : > { %v7211_v9 = vsub.f32 0.0, %v7175_v6  ;;  %v7179_v55 = vadd.f32 %v7178_v18, %v16738_v62  ;;  %v16899_v62 = vrot.slane %v7341_v47, %v6984_v57 }
 0xa44   : > { %v7291_v63 = vsub.f32 %v6950_v30, %v7195_v60 }
 0xa45   : > { %v7241_v32 = vmul.f32 1.442695, %v7211_v9  ;;  %v7212_v50 = vsub.f32 0.0, %v7179_v55  ;;  %v7196_v9 = vmax.f32 %v7177_v58, 0.0 }
 0xa47   : > { %9578 = vpow2.f32 %v7241_v32  ;;  %v7243_v37 = vmul.f32 1.442695, %v7212_v50 }
 0xa49   : > { %v9575_v56 = vpop.eup %9574  ;;  %9580 = vpow2.f32 %v7243_v37 }
 0xa4a   : > { %v7257_v33 = vadd.f32 1.0, %v9575_v56 }
 0xa4b   : > { %v9577_v19 = vpop.eup %9576 }
 0xa4c   : > { %9582 = vrcp.f32 %v7257_v33  ;;  %v7258_v16 = vadd.f32 1.0, %v9577_v19  ;;  %v7292_v33 = vsub.f32 %v6951_v4, %v7196_v9 }
 0xa4e   : > { %9584 = vrcp.f32 %v7258_v16 }
 0xa51   : > { %v9579_v54 = vpop.eup %9578  ;;  %v7475_v53 = vpop.f32.mrb[128].mxu1 }
 0xa52   : > { %v7259_v1 = vadd.f32 1.0, %v9579_v54  ;;  %v7477_v42 = vpop.f32.mrb[129].mxu1 }
 0xa53   : > { %v9581_v26 = vpop.eup %9580  ;;  %v7478_v31 = vadd.f32 %v7477_v42, %v16899_v62  ;;  %v7479_v40 = vpop.f32.mrb[130].mxu1 }
 0xa54   : > { %9586 = vrcp.f32 %v7259_v1  ;;  %v7260_v45 = vadd.f32 1.0, %v9581_v26  ;;  %v7481_v12 = vpop.f32.mrb[131].mxu1 }
 0xa55   : > { %v7570_v57 = vsub.f32 0.0, %v7478_v31  ;;  %v7482_v10 = vadd.f32 %v7481_v12, %v16899_v62 }
 0xa56   : > { %v9583_v27 = vpop.eup %9582  ;;  %9588 = vrcp.f32 %v7260_v45 }
 0xa57   : > { %v7586_v28 = vmul.f32 1.442695, %v7570_v57  ;;  %v7571_v7 = vsub.f32 0.0, %v7482_v10  ;;  %v7305_v38 = vmul.f32 %v9583_v27, %v7289_v29 }
 0xa58   : > { %v9585_v39 = vpop.eup %9584 }
 0xa59   : > { %9590 = vpow2.f32 %v7586_v28  ;;  %v7588_v15 = vmul.f32 1.442695, %v7571_v7  ;;  %v7485_v6 = vpop.f32.mrb[132].mxu1  ;;  %v7306_v61 = vmul.f32 %v9585_v39, %v7290_v11  ;;  %v16909_v43 = vadd.f32 %v7305_v38, %v7193_v51 }
 0xa5a   : > { %v7487_v18 = vpop.f32.mrb[133].mxu1 }
 0xa5b   : > { %9592 = vpow2.f32 %v7588_v15  ;;  %v7488_v48 = vadd.f32 %v7487_v18, %v16899_v62  ;;  %v7489_v23 = vpop.f32.mrb[134].mxu1  ;;  %v16912_v55 = vadd.f32 %v7306_v61, %v7194_v46  ;;  %v16926_v46 = vrot.slane %v7341_v47, %v6980_v21 }
 0xa5c   : > { %v7491_v3 = vpop.f32.mrb[135].mxu1 }
 0xa5d   : > { %v7572_v32 = vsub.f32 0.0, %v7488_v48  ;;  %v7492_v50 = vadd.f32 %v7491_v3, %v16899_v62  ;;  %v7348_v37 = vpack.c.bf16 %v16912_v55, %v16909_v43  ;;  %v7476_v26 = vadd.f32 %v7475_v53, %v16926_v46 }
 0xa5e   : > { %v9587_v56 = vpop.eup %9586  ;;  %v7480_v31 = vadd.f32 %v7479_v40, %v16926_v46  ;;  %v7486_v57 = vadd.f32 %v7485_v6, %v16926_v46  ;;  %v7490_v53 = vadd.f32 %v7489_v23, %v16926_v46 }
 0xa5f   : > { %v7590_v19 = vmul.f32 1.442695, %v7572_v32  ;;  %v7573_v16 = vsub.f32 0.0, %v7492_v50  ;;  %7534 = vmatmul.mubr.bf16.gmra.mrb[152].mxu1 %v7348_v37  ;;  %v7307_v22 = vmul.f32 %v9587_v56, %v7291_v63  ;;  %v7554_v5 = vmax.f32 %v7476_v26, 0.0 }
 0xa60   : > { %v9589_v2 = vpop.eup %9588  ;;  %7543 = vmatprep.mubr.bf16.mxu1 %v18547_v59  ;;  %v7555_v45 = vmax.f32 %v7480_v31, 0.0  ;;  %v7556_v40 = vmax.f32 %v7486_v57, 0.0  ;;  %v7557_v38 = vmax.f32 %v7490_v53, 0.0 }
 0xa61   : > { %9594 = vpow2.f32 %v7590_v19  ;;  %v7592_v20 = vmul.f32 1.442695, %v7573_v16  ;;  %v7308_v30 = vmul.f32 %v9589_v2, %v7292_v33  ;;  %v16922_v54 = vadd.f32 %v7307_v22, %v7195_v60 }
 0xa62   : > { %v7650_v29 = vsub.f32 %v16786_v52, %v7554_v5  ;;  %v7651_v27 = vsub.f32 %v16788_v14, %v7555_v45  ;;  %v7652_v60 = vsub.f32 %v16797_v25, %v7556_v40  ;;  %v7653_v52 = vsub.f32 %v16799_v8, %v7557_v38 }
 0xa63   : > { %v9591_v51 = vpop.eup %9590  ;;  %9596 = vpow2.f32 %v7592_v20  ;;  %v16928_v35 = vadd.f32 %v7308_v30, %v7196_v9 }
 0xa64   : > { %v7618_v4 = vadd.f32 1.0, %v9591_v51 }
 0xa65   : > { %v9593_v1 = vpop.eup %9592  ;;  %v7349_v42 = vpack.c.bf16 %v16928_v35, %v16922_v54 }
 0xa66   : > { %9598 = vrcp.f32 %v7618_v4  ;;  %v7619_v59 = vadd.f32 1.0, %v9593_v1 }
 0xa67   : > { %7544 = vmatmul.mubr.bf16.gmra.mrb[156].mxu1 %v7349_v42 }
 0xa68   : > { %9600 = vrcp.f32 %v7619_v59 }
 0xa6b   : > { %v9595_v24 = vpop.eup %9594 }
 0xa6c   : > { %v7620_v21 = vadd.f32 1.0, %v9595_v24 }
 0xa6d   : > { %v9597_v47 = vpop.eup %9596 }
 0xa6e   : > { %9602 = vrcp.f32 %v7620_v21  ;;  %v7621_v12 = vadd.f32 1.0, %v9597_v47 }
 0xa70   : > { %v9599_v10 = vpop.eup %9598  ;;  %9604 = vrcp.f32 %v7621_v12 }
 0xa71   : > { %v7666_v11 = vmul.f32 %v9599_v10, %v7650_v29 }
 0xa72   : > { %v9601_v58 = vpop.eup %9600 }
 0xa73   : > { %v7667_v28 = vmul.f32 %v9601_v58, %v7651_v27  ;;  %v7682_v7 = vadd.f32 %v7666_v11, %v7554_v5 }
 0xa75   : > { %v7683_v39 = vadd.f32 %v7667_v28, %v7555_v45 }
 0xa77   : > { %v7698_v15 = vpack.c.bf16 %v7683_v39, %v7682_v7 }
 0xa78   : > { %v9603_v61 = vpop.eup %9602 }
 0xa79   : > { %9154 = vmatprep.mubr.bf16.mxu0 %v7698_v15  ;;  %v7668_v6 = vmul.f32 %v9603_v61, %v7652_v60 }
 0xa7a   : > { %v9605_v18 = vpop.eup %9604 }
 0xa7b   : > { %v7669_v9 = vmul.f32 %v9605_v18, %v7653_v52  ;;  %v7684_v14 = vadd.f32 %v7668_v6, %v7556_v40 }
 0xa7d   : > { %v7685_v48 = vadd.f32 %v7669_v9, %v7557_v38 }
 0xa7f   : > { %v7699_v23 = vpack.c.bf16 %v7685_v48, %v7684_v14 }
 0xa81   : > { %9155 = vmatmul.mubr.bf16.vlgmr.msra.gmra.mrb[160].mxu0 %v7699_v23 }
 0xa9c   : > { %v7495_v3 = vpop.f32.mrb[136].mxu1 }
 0xa9d   : > { %v7497_v63 = vpop.f32.mrb[137].mxu1  ;;  %v7496_v21 = vadd.f32 %v7495_v3, %v16926_v46 }
 0xa9e   : > { %v7498_v32 = vadd.f32 %v7497_v63, %v16899_v62  ;;  %v7499_v50 = vpop.f32.mrb[138].mxu1 }
 0xa9f   : > { %v7501_v37 = vpop.f32.mrb[139].mxu1  ;;  %v7500_v47 = vadd.f32 %v7499_v50, %v16926_v46  ;;  %v7558_v12 = vmax.f32 %v7496_v21, 0.0 }
 0xaa0   : > { %v7574_v56 = vsub.f32 0.0, %v7498_v32  ;;  %v7502_v25 = vadd.f32 %v7501_v37, %v16899_v62 }
 0xaa1   : > { %v7559_v10 = vmax.f32 %v7500_v47, 0.0  ;;  %v7654_v53 = vsub.f32 %v16816_v34, %v7558_v12 }
 0xaa2   : > { %v7594_v33 = vmul.f32 1.442695, %v7574_v56  ;;  %v7575_v19 = vsub.f32 0.0, %v7502_v25 }
 0xaa3   : > { %v7655_v40 = vsub.f32 %v16818_v41, %v7559_v10 }
 0xaa4   : > { %9606 = vpow2.f32 %v7594_v33  ;;  %v7596_v8 = vmul.f32 1.442695, %v7575_v19  ;;  %v7505_v16 = vpop.f32.mrb[140].mxu1 }
 0xaa5   : > { %v7507_v22 = vpop.f32.mrb[141].mxu1  ;;  %v7506_v11 = vadd.f32 %v7505_v16, %v16926_v46 }
 0xaa6   : > { %9608 = vpow2.f32 %v7596_v8  ;;  %v7508_v2 = vadd.f32 %v7507_v22, %v16899_v62  ;;  %v7509_v20 = vpop.f32.mrb[142].mxu1 }
 0xaa7   : > { %v7511_v30 = vpop.f32.mrb[143].mxu1  ;;  %v7510_v28 = vadd.f32 %v7509_v20, %v16926_v46  ;;  %v7560_v39 = vmax.f32 %v7506_v11, 0.0 }
 0xaa8   : > { %v7576_v51 = vsub.f32 0.0, %v7508_v2  ;;  %v7512_v4 = vadd.f32 %v7511_v30, %v16899_v62 }
 0xaa9   : > { %v7561_v61 = vmax.f32 %v7510_v28, 0.0  ;;  %v7656_v6 = vsub.f32 %v16827_v0, %v7560_v39 }
 0xaaa   : > { %v7598_v1 = vmul.f32 1.442695, %v7576_v51  ;;  %v7577_v42 = vsub.f32 0.0, %v7512_v4 }
 0xaab   : > { %v7657_v34 = vsub.f32 %v16829_v13, %v7561_v61 }
 0xaac   : > { %9610 = vpow2.f32 %v7598_v1  ;;  %v7600_v59 = vmul.f32 1.442695, %v7577_v42 }
 0xaae   : > { %v9607_v26 = vpop.eup %9606  ;;  %9612 = vpow2.f32 %v7600_v59 }
 0xaaf   : > { %v7622_v31 = vadd.f32 1.0, %v9607_v26 }
 0xab0   : > { %v9609_v24 = vpop.eup %9608 }
 0xab1   : > { %9614 = vrcp.f32 %v7622_v31  ;;  %v7623_v5 = vadd.f32 1.0, %v9609_v24 }
 0xab3   : > { %9616 = vrcp.f32 %v7623_v5 }
 0xab6   : > { %v9611_v45 = vpop.eup %9610 }
 0xab7   : > { %v7624_v29 = vadd.f32 1.0, %v9611_v45 }
 0xab8   : > { %v9613_v57 = vpop.eup %9612 }
 0xab9   : > { %9618 = vrcp.f32 %v7624_v29  ;;  %v7625_v27 = vadd.f32 1.0, %v9613_v57 }
 0xabb   : > { %v9615_v58 = vpop.eup %9614  ;;  %9620 = vrcp.f32 %v7625_v27 }
 0xabc   : > { %v7670_v7 = vmul.f32 %v9615_v58, %v7654_v53 }
 0xabd   : > { %v9617_v38 = vpop.eup %9616 }
 0xabe   : > { %v7671_v60 = vmul.f32 %v9617_v38, %v7655_v40  ;;  %v7686_v15 = vadd.f32 %v7670_v7, %v7558_v12 }
 0xac0   : > { %v7687_v52 = vadd.f32 %v7671_v60, %v7559_v10 }
 0xac2   : > { %v7700_v18 = vpack.c.bf16 %v7687_v52, %v7686_v15 }
 0xac3   : > { %v9619_v9 = vpop.eup %9618 }
 0xac4   : > { %9158 = vmatprep.mubr.bf16.mxu0 %v7700_v18  ;;  %v7672_v14 = vmul.f32 %v9619_v9, %v7656_v6 }
 0xac5   : > { %v9621_v48 = vpop.eup %9620 }
 0xac6   : > { %v7673_v23 = vmul.f32 %v9621_v48, %v7657_v34  ;;  %v7688_v41 = vadd.f32 %v7672_v14, %v7560_v39 }
 0xac8   : > { %v7689_v3 = vadd.f32 %v7673_v23, %v7561_v61 }
 0xaca   : > { %v7701_v63 = vpack.c.bf16 %v7689_v3, %v7688_v41 }
 0xacc   : > { %9159 = vmatmul.mubr.bf16.gmra.mrb[164].mxu0 %v7701_v63 }
 0xae7   : > { %v7515_v32 = vpop.f32.mrb[144].mxu1 }
 0xae8   : > { %v7517_v50 = vpop.f32.mrb[145].mxu1  ;;  %v7516_v21 = vadd.f32 %v7515_v32, %v16926_v46 }
 0xae9   : > { %v7518_v37 = vadd.f32 %v7517_v50, %v16899_v62  ;;  %v7519_v56 = vpop.f32.mrb[146].mxu1 }
 0xaea   : > { %v7521_v25 = vpop.f32.mrb[147].mxu1  ;;  %v7520_v47 = vadd.f32 %v7519_v56, %v16926_v46  ;;  %v7562_v12 = vmax.f32 %v7516_v21, 0.0 }
 0xaeb   : > { %v7578_v33 = vsub.f32 0.0, %v7518_v37  ;;  %v7522_v0 = vadd.f32 %v7521_v25, %v16899_v62 }
 0xaec   : > { %v7563_v10 = vmax.f32 %v7520_v47, 0.0  ;;  %v7658_v53 = vsub.f32 %v16870_v49, %v7562_v12 }
 0xaed   : > { %v7602_v19 = vmul.f32 1.442695, %v7578_v33  ;;  %v7579_v8 = vsub.f32 0.0, %v7522_v0 }
 0xaee   : > { %v7659_v40 = vsub.f32 %v16872_v44, %v7563_v10 }
 0xaef   : > { %9622 = vpow2.f32 %v7602_v19  ;;  %v7604_v13 = vmul.f32 1.442695, %v7579_v8  ;;  %v7525_v16 = vpop.f32.mrb[148].mxu1 }
 0xaf0   : > { %v7527_v22 = vpop.f32.mrb[149].mxu1  ;;  %v7526_v11 = vadd.f32 %v7525_v16, %v16926_v46 }
 0xaf1   : > { %9624 = vpow2.f32 %v7604_v13  ;;  %v7528_v2 = vadd.f32 %v7527_v22, %v16899_v62  ;;  %v7529_v20 = vpop.f32.mrb[150].mxu1 }
 0xaf2   : > { %v7531_v30 = vpop.f32.mrb[151].mxu1  ;;  %v7530_v28 = vadd.f32 %v7529_v20, %v16926_v46  ;;  %v7564_v39 = vmax.f32 %v7526_v11, 0.0 }
 0xaf3   : > { %v7580_v51 = vsub.f32 0.0, %v7528_v2  ;;  %v7532_v4 = vadd.f32 %v7531_v30, %v16899_v62 }
 0xaf4   : > { %v7565_v61 = vmax.f32 %v7530_v28, 0.0  ;;  %v7660_v6 = vsub.f32 %v16881_v17, %v7564_v39 }
 0xaf5   : > { %v7606_v1 = vmul.f32 1.442695, %v7580_v51  ;;  %v7581_v42 = vsub.f32 0.0, %v7532_v4 }
 0xaf6   : > { %v7661_v49 = vsub.f32 %v16883_v36, %v7565_v61 }
 0xaf7   : > { %9626 = vpow2.f32 %v7606_v1  ;;  %v7608_v59 = vmul.f32 1.442695, %v7581_v42 }
 0xaf9   : > { %v9623_v26 = vpop.eup %9622  ;;  %9628 = vpow2.f32 %v7608_v59 }
 0xafa   : > { %v7626_v31 = vadd.f32 1.0, %v9623_v26 }
 0xafb   : > { %v9625_v24 = vpop.eup %9624 }
 0xafc   : > { %9630 = vrcp.f32 %v7626_v31  ;;  %v7627_v5 = vadd.f32 1.0, %v9625_v24 }
 0xafe   : > { %9632 = vrcp.f32 %v7627_v5 }
 0xb01   : > { %v9627_v45 = vpop.eup %9626 }
 0xb02   : > { %v7628_v29 = vadd.f32 1.0, %v9627_v45 }
 0xb03   : > { %v9629_v57 = vpop.eup %9628 }
 0xb04   : > { %9634 = vrcp.f32 %v7628_v29  ;;  %v7629_v27 = vadd.f32 1.0, %v9629_v57 }
 0xb06   : > { %v9631_v58 = vpop.eup %9630  ;;  %9636 = vrcp.f32 %v7629_v27 }
 0xb07   : > { %v7674_v7 = vmul.f32 %v9631_v58, %v7658_v53  ;;  %v16980_v53 = vld [vmem:[%s17079_s9] ss:$0 sm:$0xff] }
 0xb08   : > { %v9633_v38 = vpop.eup %9632 }
 0xb09   : > { %v7675_v60 = vmul.f32 %v9633_v38, %v7659_v40  ;;  %v7690_v15 = vadd.f32 %v7674_v7, %v7562_v12 }
 0xb0b   : > { %v7691_v52 = vadd.f32 %v7675_v60, %v7563_v10 }
 0xb0d   : > { %v7702_v18 = vpack.c.bf16 %v7691_v52, %v7690_v15 }
 0xb0e   : > { %v9635_v9 = vpop.eup %9634 }
 0xb0f   : > { %9162 = vmatprep.mubr.bf16.mxu1 %v7702_v18  ;;  %v7676_v34 = vmul.f32 %v9635_v9, %v7660_v6 }
 0xb10   : > { %v9637_v14 = vpop.eup %9636 }
 0xb11   : > { %v7677_v48 = vmul.f32 %v9637_v14, %v7661_v49  ;;  %v7692_v44 = vadd.f32 %v7676_v34, %v7564_v39 }
 0xb13   : > { %v7693_v23 = vadd.f32 %v7677_v48, %v7565_v61 }
 0xb15   : > { %v7703_v41 = vpack.c.bf16 %v7693_v23, %v7692_v44 }
 0xb17   : > { %9163 = vmatmul.mubr.bf16.vlgmr.msra.gmra.mrb[160].mxu1 %v7703_v41 }
 0xb32   : > { %v7535_v3 = vpop.f32.mrb[152].mxu1 }
 0xb33   : > { %v7537_v63 = vpop.f32.mrb[153].mxu1  ;;  %v7536_v26 = vadd.f32 %v7535_v3, %v16926_v46 }
 0xb34   : > { %v7538_v32 = vadd.f32 %v7537_v63, %v16899_v62  ;;  %v7539_v50 = vpop.f32.mrb[154].mxu1 }
 0xb35   : > { %v7541_v37 = vpop.f32.mrb[155].mxu1  ;;  %v7540_v31 = vadd.f32 %v7539_v50, %v16926_v46  ;;  %v7566_v5 = vmax.f32 %v7536_v26, 0.0 }
 0xb36   : > { %v7582_v56 = vsub.f32 0.0, %v7538_v32  ;;  %v7542_v17 = vadd.f32 %v7541_v37, %v16899_v62 }
 0xb37   : > { %v7567_v47 = vmax.f32 %v7540_v31, 0.0  ;;  %v7662_v12 = vsub.f32 %v16909_v43, %v7566_v5 }
 0xb38   : > { %v7610_v25 = vmul.f32 1.442695, %v7582_v56  ;;  %v7583_v33 = vsub.f32 0.0, %v7542_v17 }
 0xb39   : > { %v7663_v10 = vsub.f32 %v16912_v55, %v7567_v47 }
 0xb3a   : > { %9638 = vpow2.f32 %v7610_v25  ;;  %v7612_v36 = vmul.f32 1.442695, %v7583_v33  ;;  %v7545_v0 = vpop.f32.mrb[156].mxu1 }
 0xb3b   : > { %v7547_v19 = vpop.f32.mrb[157].mxu1  ;;  %v7546_v29 = vadd.f32 %v7545_v0, %v16926_v46 }
 0xb3c   : > { %9640 = vpow2.f32 %v7612_v36  ;;  %v7548_v8 = vadd.f32 %v7547_v19, %v16899_v62  ;;  %v7549_v13 = vpop.f32.mrb[158].mxu1 }
 0xb3d   : > { %v7551_v16 = vpop.f32.mrb[159].mxu1  ;;  %v7550_v27 = vadd.f32 %v7549_v13, %v16926_v46  ;;  %v7568_v40 = vmax.f32 %v7546_v29, 0.0 }
 0xb3e   : > { %v7584_v22 = vsub.f32 0.0, %v7548_v8  ;;  %v7552_v2 = vadd.f32 %v7551_v16, %v16899_v62 }
 0xb3f   : > { %v7569_v60 = vmax.f32 %v7550_v27, 0.0  ;;  %v7664_v6 = vsub.f32 %v16922_v54, %v7568_v40 }
 0xb40   : > { %v7614_v20 = vmul.f32 1.442695, %v7584_v22  ;;  %v7585_v30 = vsub.f32 0.0, %v7552_v2 }
 0xb41   : > { %v7665_v34 = vsub.f32 %v16928_v35, %v7569_v60 }
 0xb42   : > { %9642 = vpow2.f32 %v7614_v20  ;;  %v7616_v51 = vmul.f32 1.442695, %v7585_v30 }
 0xb44   : > { %v9639_v4 = vpop.eup %9638  ;;  %9644 = vpow2.f32 %v7616_v51 }
 0xb45   : > { %v7630_v1 = vadd.f32 1.0, %v9639_v4 }
 0xb46   : > { %v9641_v42 = vpop.eup %9640 }
 0xb47   : > { %9646 = vrcp.f32 %v7630_v1  ;;  %v7631_v59 = vadd.f32 1.0, %v9641_v42 }
 0xb49   : > { %9648 = vrcp.f32 %v7631_v59 }
 0xb4c   : > { %v9643_v24 = vpop.eup %9642 }
 0xb4d   : > { %v7632_v62 = vadd.f32 1.0, %v9643_v24 }
 0xb4e   : > { %v9645_v21 = vpop.eup %9644 }
 0xb4f   : > { %9650 = vrcp.f32 %v7632_v62  ;;  %v7633_v45 = vadd.f32 1.0, %v9645_v21 }
 0xb51   : > { %v9647_v57 = vpop.eup %9646  ;;  %9652 = vrcp.f32 %v7633_v45 }
 0xb52   : > { %v7678_v11 = vmul.f32 %v9647_v57, %v7662_v12 }
 0xb53   : > { %v9649_v58 = vpop.eup %9648 }
 0xb54   : > { %v9156_v28 = vpop.f32.mrb[160].mxu0  ;;  %v7679_v43 = vmul.f32 %v9649_v58, %v7663_v10  ;;  %v7694_v7 = vadd.f32 %v7678_v11, %v7566_v5 }
 0xb55   : > { %v7820_v38 = vadd.f32 %v9156_v28, %v16980_v53  ;;  %v7811_v39 = vpop.f32.mrb[161].mxu0 }
 0xb56   : > { %v7812_v15 = vadd.f32 %v16980_v53, %v7811_v39  ;;  %v9157_v55 = vpop.f32.mrb[162].mxu0  ;;  %v7695_v61 = vadd.f32 %v7679_v43, %v7567_v47 }
 0xb57   : > { %7876 = vst [vmem:[%s16984_s19 + $0x10] sm:$0xff] %v7820_v38  ;;  %v7823_v46 = vadd.f32 %v9157_v55, %v16980_v53  ;;  %v7814_v52 = vpop.f32.mrb[163].mxu0 }
 0xb58   : > { %7874 = vst [vmem:[%s16984_s19] sm:$0xff] %v7812_v15  ;;  %v7815_v18 = vadd.f32 %v16980_v53, %v7814_v52  ;;  %v7704_v9 = vpack.c.bf16 %v7695_v61, %v7694_v7 }
 0xb59   : > { %v9651_v49 = vpop.eup %9650  ;;  %7877 = vst [vmem:[%s16984_s19 + $0x18] sm:$0xff] %v7823_v46 }
 0xb5a   : > { %7875 = vst [vmem:[%s16984_s19 + $0x8] sm:$0xff] %v7815_v18  ;;  %9166 = vmatprep.mubr.bf16.mxu1 %v7704_v9  ;;  %v7680_v14 = vmul.f32 %v9651_v49, %v7664_v6 }
 0xb5b   : > { %v9653_v48 = vpop.eup %9652 }
 0xb5c   : > { %v7681_v44 = vmul.f32 %v9653_v48, %v7665_v34  ;;  %v7696_v23 = vadd.f32 %v7680_v14, %v7568_v40 }
 0xb5e   : > { %v7697_v41 = vadd.f32 %v7681_v44, %v7569_v60 }
 0xb60   : > { %v7705_v54 = vpack.c.bf16 %v7697_v41, %v7696_v23 }
 0xb62   : > { %9167 = vmatmul.mubr.bf16.gmra.mrb[164].mxu1 %v7705_v54 }
 0xb9f   : > { %v9160_v3 = vpop.f32.mrb[164].mxu0 }
 0xba0   : > { %v7836_v63 = vadd.f32 %v9160_v3, %v16980_v53  ;;  %v7827_v32 = vpop.f32.mrb[165].mxu0 }
 0xba1   : > { %v7828_v50 = vadd.f32 %v16980_v53, %v7827_v32  ;;  %v9161_v35 = vpop.f32.mrb[166].mxu0 }
 0xba2   : > { %7880 = vst [vmem:[%s16984_s19 + $0x30] sm:$0xff] %v7836_v63  ;;  %v7839_v37 = vadd.f32 %v9161_v35, %v16980_v53  ;;  %v7830_v56 = vpop.f32.mrb[167].mxu0 }
 0xba3   : > { %7878 = vst [vmem:[%s16984_s19 + $0x20] sm:$0xff] %v7828_v50  ;;  %v7831_v17 = vadd.f32 %v16980_v53, %v7830_v56 }
 0xba4   : > { %7881 = vst [vmem:[%s16984_s19 + $0x38] sm:$0xff] %v7839_v37 }
 0xba5   : > { %7879 = vst [vmem:[%s16984_s19 + $0x28] sm:$0xff] %v7831_v17 }
 0xbea   : > { %v9164_v25 = vpop.f32.mrb[160].mxu1 }
 0xbeb   : > { %v7852_v33 = vadd.f32 %v9164_v25, %v16980_v53  ;;  %v7843_v36 = vpop.f32.mrb[161].mxu1 }
 0xbec   : > { %v7844_v0 = vadd.f32 %v16980_v53, %v7843_v36  ;;  %v9165_v19 = vpop.f32.mrb[162].mxu1 }
 0xbed   : > { %7884 = vst [vmem:[%s16984_s19 + $0x50] sm:$0xff] %v7852_v33  ;;  %v7855_v8 = vadd.f32 %v9165_v19, %v16980_v53  ;;  %v7846_v13 = vpop.f32.mrb[163].mxu1 }
 0xbee   : > { %7882 = vst [vmem:[%s16984_s19 + $0x40] sm:$0xff] %v7844_v0  ;;  %v7847_v16 = vadd.f32 %v16980_v53, %v7846_v13 }
 0xbef   : > { %7885 = vst [vmem:[%s16984_s19 + $0x58] sm:$0xff] %v7855_v8 }
 0xbf0   : > { %7883 = vst [vmem:[%s16984_s19 + $0x48] sm:$0xff] %v7847_v16 }
 0xc35   : > { %v9168_v22 = vpop.f32.mrb[164].mxu1 }
 0xc36   : > { %v7868_v2 = vadd.f32 %v9168_v22, %v16980_v53  ;;  %v7859_v20 = vpop.f32.mrb[165].mxu1 }
 0xc37   : > { %v7860_v30 = vadd.f32 %v16980_v53, %v7859_v20  ;;  %v9169_v51 = vpop.f32.mrb[166].mxu1 }
 0xc38   : > { %7888 = vst [vmem:[%s16984_s19 + $0x70] sm:$0xff] %v7868_v2  ;;  %v7871_v4 = vadd.f32 %v9169_v51, %v16980_v53  ;;  %v7862_v1 = vpop.f32.mrb[167].mxu1 }
 0xc39   : > { %7886 = vst [vmem:[%s16984_s19 + $0x60] sm:$0xff] %v7860_v30  ;;  %v7863_v42 = vadd.f32 %v16980_v53, %v7862_v1 }
 0xc3a   : > { %7889 = vst [vmem:[%s16984_s19 + $0x78] sm:$0xff] %v7871_v4 }
 0xc3b   : > { %7887 = vst [vmem:[%s16984_s19 + $0x68] sm:$0xff] %v7863_v42 }
 0xc3c   : > { %9875 = shalt.err (!%p9872_p11)
}
 0xc3d   : > { %s9876_s11 = scalar_lea.hbm %s17019_s12, 2048  ;;  %s9880_s27 = scalar_lea.hbm %s17080_s10, 4096 }
 0xc3e   : > { %p9877_p13 = scmp.ne.s32.totalorder %s17019_s12, %s9876_s11  ;;  %p9881_p6 = scmp.lt.u32.totalorder %s17019_s12, %s17080_s10 }
 0xc3f   : > { %p9882_p5 = scmp.lt.u32.totalorder %s9880_s27, %s9876_s11  ;;  %p9884_p9 = scmp.lt.u32.totalorder %s9876_s11, %s17019_s12 }
 0xc40   : > { %p9878_p1 = pnand %p9877_p13, %p18554_p10 }
 0xc41   : > { %p9883_p12 = por %p9882_p5, %p9881_p6 }
 0xc42   : > { %p9879_p0 = pneg %p9878_p1 }
 0xc43   : > { %p9885_p2 = por %p9884_p9, %p9883_p12 }
 0xc45   : > { %p9886_p3 = pnand %p9885_p2, %p9879_p0 }
 0xc47   : > { %9889 = shalt.err (!%p9886_p3)
}
 0xc48   : > { %s9961_s19 = smov 128   ;;  %s9962_s24 = smov 8  }
 0xc49   : > { %9198 = dma.vmem_to_hbm [thread:$0]  (%p18554_p10), %s17021_s2, 2048, %s17019_s12, %s17029_s17, %s9961_s19, %s9961_s19, %s9962_s24  }
 0xc4a PF: > { %s18555_s30 = sld [smem:[#allocation15_spill]]  ;;  %p9220_p4 = scmp.ge.s32.totalorder %s9932_s16, 2 }
 0xc4b   : > { %s7919_s25 = sand.u32 1, %s9920_s13  }
 0xc4c   : > { %s7920_s28 = scalar_lea.sflag [#allocation4], %s7919_s25 }
 0xc50   : > { %p18556_p7 = scmp.ne.s32.totalorder %s18555_s30, 0 }
 0xc52   : > { %p9211_p8 = pnand %p9220_p4, %p18556_p7 }
 0xc54   : > { %9915 = dma.done.wait (!%p9211_p8), %s7920_s28, 2048  }
 0xc55   : > { %9917 = vsyncadd (!%p9211_p8), %s7920_s28, 4294965248  ;;  %s18557_s16 = sld [smem:[#allocation13_spill]]  ;;  %s18558_s26 = sld [smem:[#allocation12_spill]] }
 0xc56   : > { %s18559_s15 = sld [smem:[#allocation14_spill]]  ;;  %s18560_s13 = smov %s9924_s14 }
 0xc5b   : > { %p22_p11 = scmp.ge.s32.totalorder %s18557_s16, 4   ;;  %s18561_s14 = smov %s18558_s26 }
 0xc5d   :  { %24 = sbr.rel (!%p22_p11) target bundleno = 7 (0x7), region = 108 }
 0xc64   :  { %7925 = vsyncpa [#allocation3], 1 }
 0xc65   :  { %7927 = vsyncpa [#allocation3 + $0x1], 1 }
 0xc66   :  { %7928 = vsyncpa [#allocation6], 1 }
 0xc67   :  { %7929 = vsyncpa [#allocation4], 1 }
 0xc68   :  { %7931 = vsyncpa [#allocation4 + $0x1], 1 }

</bundles_post_ra>
